<compile_context>
chip_gen: v5e
topology: v5e:2x2
jax: 0.10.0
libtpu: 0.0.40
codegen_flags: <defaults>
</compile_context>

<pallas_src>
import functools

import jax
import jax.numpy as jnp
from jax.experimental import pallas as pl
from jax.experimental.pallas import tpu as pltpu

B = 2      # batch
N = 16     # number of points
EPS = 1e-5


def _feat_trans_kernel(x_ref,
                       w1_ref, a1_ref,
                       w2_ref, a2_ref,
                       w3_ref, a3_ref,
                       wf1_ref, a4_ref,
                       wf2_ref, a5_ref,
                       ww_ref, bw_ref,
                       out_ref,
                       pooled_ref,
                       *, b, n):
    """Single invocation: x_ref is (B*N, 64) f32; weights are bf16; affines f32."""

    def fused_layer(h, w_ref, a_ref):
        # bf16 x bf16 matmul on the MXU with f32 accumulation, then the folded
        # per-channel (bias+BN) scale/shift + ReLU on the VPU.
        y = jnp.dot(h.astype(jnp.bfloat16), w_ref[...],
                    preferred_element_type=jnp.float32)
        y = y * a_ref[0:1, :] + a_ref[1:2, :]
        return jnp.maximum(y, 0.0)

    # ---- point-feature (1x1 conv) stack, all B*N points batched -------------
    h = x_ref[...]                              # (B*N, 64)
    h = fused_layer(h, w1_ref, a1_ref)          # (B*N, 64)
    h = fused_layer(h, w2_ref, a2_ref)          # (B*N, 128)
    h = fused_layer(h, w3_ref, a3_ref)          # (B*N, 1024)

    # ---- per-batch global max pool over the N point rows (static tiny loop) -
    for bi in range(b):
        pooled_ref[bi:bi + 1, :] = jnp.max(h[bi * n:(bi + 1) * n, :],
                                           axis=0, keepdims=True)
    pooled = pooled_ref[...]                    # (B, 1024)

    # ---- pooled FC stack, all B rows at once ---------------------------------
    f = fused_layer(pooled, wf1_ref, a4_ref)    # (B, 512)
    f = fused_layer(f, wf2_ref, a5_ref)         # (B, 256)
    o = jnp.dot(f.astype(jnp.bfloat16), ww_ref[...],
                preferred_element_type=jnp.float32) + bw_ref[...]   # (B, 4096)
    out_ref[...] = o.astype(out_ref.dtype)


def feat_trans_pallas(x_bnc, params):
    """x_bnc: (B, N, 64) float32.  Returns (B, 64, 64) float32."""
    (w1, a1, w2, a2, w3, a3, wf1, a4, wf2, a5, ww, bw) = params
    b, n, c = x_bnc.shape
    x_flat = x_bnc.reshape(b * n, c)

    args = (x_flat, w1, a1, w2, a2, w3, a3, wf1, a4, wf2, a5, ww, bw)

    # Advisory cost estimate: ~16 MFLOPs of matmul fed by ~3.8 MB of traffic.
    flops = 2 * (b * n * (64 * 64 + 64 * 128 + 128 * 1024)
                 + b * (1024 * 512 + 512 * 256 + 256 * 64 * 64))
    bytes_accessed = (sum(int(a.size) * a.dtype.itemsize for a in args)
                      + b * 64 * 64 * 4)

    vmem_spec = pl.BlockSpec(memory_space=pltpu.MemorySpace.VMEM)

    out = pl.pallas_call(
        functools.partial(_feat_trans_kernel, b=b, n=n),
        out_shape=jax.ShapeDtypeStruct((b, 64 * 64), jnp.float32),
        in_specs=[vmem_spec] * len(args),
        out_specs=vmem_spec,
        scratch_shapes=[pltpu.VMEM((b, 1024), jnp.float32)],
        compiler_params=pltpu.CompilerParams(
            vmem_limit_bytes=32 * 1024 * 1024,
        ),
        cost_estimate=pl.CostEstimate(
            flops=flops, transcendentals=0, bytes_accessed=bytes_accessed),
    )(*args)

    return out.reshape(b, 64, 64)


def make_params(key):
    """Deterministic synthetic parameters matching the PyTorch module shapes."""
    keys = jax.random.split(key, 32)
    ki = iter(range(32))

    def linear(cin, cout, scale=0.05):
        w = scale * jax.random.normal(keys[next(ki)], (cout, cin), jnp.float32)
        bias = scale * jax.random.normal(keys[next(ki)], (cout,), jnp.float32)
        return w, bias

    def bn(cch):
        gamma = 1.0 + 0.1 * jax.random.normal(keys[next(ki)], (cch,), jnp.float32)
        beta = 0.1 * jax.random.normal(keys[next(ki)], (cch,), jnp.float32)
        mean = 0.1 * jax.random.normal(keys[next(ki)], (cch,), jnp.float32)
        var = 1.0 + 0.1 * jnp.abs(jax.random.normal(keys[next(ki)], (cch,), jnp.float32))
        return gamma, beta, mean, var

    def fold(w, bias, gamma, beta, mean, var):
        # y = ((x @ w.T + b) - mean) * gamma / sqrt(var+eps) + beta
        #   = x @ w.T * scale + shift
        scale = gamma / jnp.sqrt(var + EPS)
        shift = (bias - mean) * scale + beta
        wt = jnp.transpose(w)                      # (cin, cout)
        aff = jnp.stack([scale, shift], axis=0)    # (2, cout) f32
        return wt, aff

    # conv1d(64->64), conv1d(64->128), conv1d(128->1024), kernel size 1 == linear
    w1, a1 = fold(*linear(64, 64), *bn(64))
    w2, a2 = fold(*linear(64, 128), *bn(128))
    w3, a3 = fold(*linear(128, 1024), *bn(1024))
    # fc1(1024->512), fc2(512->256)
    wf1, a4 = fold(*linear(1024, 512), *bn(512))
    wf2, a5 = fold(*linear(512, 256), *bn(256))
    # final "weights" layer: zero weight, identity bias (exactly as in __init__)
    ww = jnp.zeros((256, 64 * 64), jnp.float32)          # already (cin, cout)
    bw = jnp.eye(64, dtype=jnp.float32).reshape(1, 64 * 64)

    # Cast weight matrices to bf16 (kernel is HBM-weight-bandwidth-bound);
    # keep the folded affine scale/shift and the final bias in f32.
    bf16 = lambda w: w.astype(jnp.bfloat16)
    return (bf16(w1), a1, bf16(w2), a2, bf16(w3), a3,
            bf16(wf1), a4, bf16(wf2), a5, bf16(ww), bw)


def feat_trans_reference(x_bnc, params):
    """Pure-JAX reference with identical (bf16-weight, f32-accumulate) math."""
    (w1, a1, w2, a2, w3, a3, wf1, a4, wf2, a5, ww, bw) = params
    b, n, c = x_bnc.shape

    def layer(h, w, a):
        y = jnp.dot(h.astype(jnp.bfloat16), w, preferred_element_type=jnp.float32)
        return jnp.maximum(y * a[0:1, :] + a[1:2, :], 0.0)

    h = layer(x_bnc.reshape(b * n, c), w1, a1)
    h = layer(h, w2, a2)
    h = layer(h, w3, a3)
    pooled = jnp.max(h.reshape(b, n, -1), axis=1)           # (B, 1024)
    f = layer(pooled, wf1, a4)
    f = layer(f, wf2, a5)
    o = jnp.dot(f.astype(jnp.bfloat16), ww,
                preferred_element_type=jnp.float32) + bw
    return o.reshape(b, 64, 64)


if __name__ == "__main__":
    key = jax.random.PRNGKey(0)
    kx, kp = jax.random.split(key)

    # PyTorch input would be (B, 64, N); kernel layout is (B, N, 64).
    x_torch_layout = jax.random.normal(kx, (B, 64, N), jnp.float32)
    x_bnc = jnp.transpose(x_torch_layout, (0, 2, 1))

    params = make_params(kp)

    out = feat_trans_pallas(x_bnc, params)
    out = jax.block_until_ready(out)

    ref = feat_trans_reference(x_bnc, params)
    assert out.shape == (B, 64, 64)
    # bf16 weights -> relaxed tolerance vs the (same-math) reference.
    assert jnp.allclose(out, ref, atol=1e-2, rtol=1e-2), "mismatch vs reference"

    print("KERNEL_OK")
</pallas_src>

<mosaic_0001>
module attributes {stable_mosaic.version = 11 : i64} {
  func.func @_feat_trans_kernel(%arg0: memref<32x64xf32, #tpu.memory_space<vmem>>, %arg1: memref<64x64xbf16, #tpu.memory_space<vmem>>, %arg2: memref<2x64xf32, #tpu.memory_space<vmem>>, %arg3: memref<64x128xbf16, #tpu.memory_space<vmem>>, %arg4: memref<2x128xf32, #tpu.memory_space<vmem>>, %arg5: memref<128x1024xbf16, #tpu.memory_space<vmem>>, %arg6: memref<2x1024xf32, #tpu.memory_space<vmem>>, %arg7: memref<1024x512xbf16, #tpu.memory_space<vmem>>, %arg8: memref<2x512xf32, #tpu.memory_space<vmem>>, %arg9: memref<512x256xbf16, #tpu.memory_space<vmem>>, %arg10: memref<2x256xf32, #tpu.memory_space<vmem>>, %arg11: memref<256x4096xbf16, #tpu.memory_space<vmem>>, %arg12: memref<1x4096xf32, #tpu.memory_space<vmem>>, %arg13: memref<2x4096xf32, #tpu.memory_space<vmem>>, %arg14: memref<2x1024xf32, #tpu.memory_space<vmem>>) attributes {dimension_semantics = [], scalar_prefetch = 0 : i64, scratch_operands = 1 : i64, tpu.core_type = #tpu.core_type<tc>} {
    %c0 = arith.constant 0 : index
    %c0_0 = arith.constant 0 : index
    %0 = vector.load %arg0[%c0, %c0_0] : memref<32x64xf32, #tpu.memory_space<vmem>>, vector<32x64xf32>
    %1 = arith.truncf %0 : vector<32x64xf32> to vector<32x64xbf16>
    %c0_1 = arith.constant 0 : index
    %c0_2 = arith.constant 0 : index
    %2 = vector.load %arg1[%c0_1, %c0_2] : memref<64x64xbf16, #tpu.memory_space<vmem>>, vector<64x64xbf16>
    %cst = arith.constant dense<0.000000e+00> : vector<32x64xf32>
    %3 = tpu.matmul %1, %2, %cst {dimension_numbers = #tpu.dot_dimension_numbers<[1], [0], [0], [1], [0, 0, 1, 1], [], []>} : vector<32x64xbf16>, vector<64x64xbf16>, vector<32x64xf32> -> vector<32x64xf32>
    %c0_3 = arith.constant 0 : index
    %c0_4 = arith.constant 0 : index
    %4 = vector.load %arg2[%c0_3, %c0_4] : memref<2x64xf32, #tpu.memory_space<vmem>>, vector<1x64xf32>
    %5 = vector.broadcast %4 : vector<1x64xf32> to vector<32x64xf32>
    %6 = arith.mulf %3, %5 : vector<32x64xf32>
    %c1 = arith.constant 1 : index
    %c0_5 = arith.constant 0 : index
    %7 = vector.load %arg2[%c1, %c0_5] : memref<2x64xf32, #tpu.memory_space<vmem>>, vector<1x64xf32>
    %8 = vector.broadcast %7 : vector<1x64xf32> to vector<32x64xf32>
    %9 = arith.addf %6, %8 : vector<32x64xf32>
    %cst_6 = arith.constant 0.000000e+00 : f32
    %10 = vector.broadcast %cst_6 : f32 to vector<32x64xf32>
    %11 = arith.maximumf %9, %10 : vector<32x64xf32>
    %12 = arith.truncf %11 : vector<32x64xf32> to vector<32x64xbf16>
    %c0_7 = arith.constant 0 : index
    %c0_8 = arith.constant 0 : index
    %13 = vector.load %arg3[%c0_7, %c0_8] : memref<64x128xbf16, #tpu.memory_space<vmem>>, vector<64x128xbf16>
    %cst_9 = arith.constant dense<0.000000e+00> : vector<32x128xf32>
    %14 = tpu.matmul %12, %13, %cst_9 {dimension_numbers = #tpu.dot_dimension_numbers<[1], [0], [0], [1], [0, 0, 1, 1], [], []>} : vector<32x64xbf16>, vector<64x128xbf16>, vector<32x128xf32> -> vector<32x128xf32>
    %c0_10 = arith.constant 0 : index
    %c0_11 = arith.constant 0 : index
    %15 = vector.load %arg4[%c0_10, %c0_11] : memref<2x128xf32, #tpu.memory_space<vmem>>, vector<1x128xf32>
    %16 = vector.broadcast %15 : vector<1x128xf32> to vector<32x128xf32>
    %17 = arith.mulf %14, %16 : vector<32x128xf32>
    %c1_12 = arith.constant 1 : index
    %c0_13 = arith.constant 0 : index
    %18 = vector.load %arg4[%c1_12, %c0_13] : memref<2x128xf32, #tpu.memory_space<vmem>>, vector<1x128xf32>
    %19 = vector.broadcast %18 : vector<1x128xf32> to vector<32x128xf32>
    %20 = arith.addf %17, %19 : vector<32x128xf32>
    %cst_14 = arith.constant 0.000000e+00 : f32
    %21 = vector.broadcast %cst_14 : f32 to vector<32x128xf32>
    %22 = arith.maximumf %20, %21 : vector<32x128xf32>
    %23 = arith.truncf %22 : vector<32x128xf32> to vector<32x128xbf16>
    %c0_15 = arith.constant 0 : index
    %c0_16 = arith.constant 0 : index
    %24 = vector.load %arg5[%c0_15, %c0_16] : memref<128x1024xbf16, #tpu.memory_space<vmem>>, vector<128x1024xbf16>
    %cst_17 = arith.constant dense<0.000000e+00> : vector<32x1024xf32>
    %25 = tpu.matmul %23, %24, %cst_17 {dimension_numbers = #tpu.dot_dimension_numbers<[1], [0], [0], [1], [0, 0, 1, 1], [], []>} : vector<32x128xbf16>, vector<128x1024xbf16>, vector<32x1024xf32> -> vector<32x1024xf32>
    %c0_18 = arith.constant 0 : index
    %c0_19 = arith.constant 0 : index
    %26 = vector.load %arg6[%c0_18, %c0_19] : memref<2x1024xf32, #tpu.memory_space<vmem>>, vector<1x1024xf32>
    %27 = vector.broadcast %26 : vector<1x1024xf32> to vector<32x1024xf32>
    %28 = arith.mulf %25, %27 : vector<32x1024xf32>
    %c1_20 = arith.constant 1 : index
    %c0_21 = arith.constant 0 : index
    %29 = vector.load %arg6[%c1_20, %c0_21] : memref<2x1024xf32, #tpu.memory_space<vmem>>, vector<1x1024xf32>
    %30 = vector.broadcast %29 : vector<1x1024xf32> to vector<32x1024xf32>
    %31 = arith.addf %28, %30 : vector<32x1024xf32>
    %cst_22 = arith.constant 0.000000e+00 : f32
    %32 = vector.broadcast %cst_22 : f32 to vector<32x1024xf32>
    %33 = arith.maximumf %31, %32 : vector<32x1024xf32>
    %34 = vector.extract_strided_slice %33 {offsets = [0, 0], sizes = [16, 1024], strides = [1, 1]} : vector<32x1024xf32> to vector<16x1024xf32>
    %cst_23 = arith.constant dense<0xFF800000> : vector<1024xf32>
    %35 = vector.multi_reduction <maximumf>, %34, %cst_23 [0] : vector<16x1024xf32> to vector<1024xf32>
    %36 = vector.shape_cast %35 : vector<1024xf32> to vector<1x1024xf32>
    %c0_24 = arith.constant 0 : index
    %c0_25 = arith.constant 0 : index
    %37 = vector.load %arg14[%c0_24, %c0_25] : memref<2x1024xf32, #tpu.memory_space<vmem>>, vector<1x1024xf32>
    tpu.vector_store %arg14[%c0_24, %c0_25], %36 {strides = array<i32>} : memref<2x1024xf32, #tpu.memory_space<vmem>>, vector<1x1024xf32>,
    %38 = vector.extract_strided_slice %33 {offsets = [16, 0], sizes = [16, 1024], strides = [1, 1]} : vector<32x1024xf32> to vector<16x1024xf32>
    %cst_26 = arith.constant dense<0xFF800000> : vector<1024xf32>
    %39 = vector.multi_reduction <maximumf>, %38, %cst_26 [0] : vector<16x1024xf32> to vector<1024xf32>
    %40 = vector.shape_cast %39 : vector<1024xf32> to vector<1x1024xf32>
    %c1_27 = arith.constant 1 : index
    %c0_28 = arith.constant 0 : index
    %41 = vector.load %arg14[%c1_27, %c0_28] : memref<2x1024xf32, #tpu.memory_space<vmem>>, vector<1x1024xf32>
    tpu.vector_store %arg14[%c1_27, %c0_28], %40 {strides = array<i32>} : memref<2x1024xf32, #tpu.memory_space<vmem>>, vector<1x1024xf32>,
    %c0_29 = arith.constant 0 : index
    %c0_30 = arith.constant 0 : index
    %42 = vector.load %arg14[%c0_29, %c0_30] : memref<2x1024xf32, #tpu.memory_space<vmem>>, vector<2x1024xf32>
    %43 = arith.truncf %42 : vector<2x1024xf32> to vector<2x1024xbf16>
    %c0_31 = arith.constant 0 : index
    %c0_32 = arith.constant 0 : index
    %44 = vector.load %arg7[%c0_31, %c0_32] : memref<1024x512xbf16, #tpu.memory_space<vmem>>, vector<1024x512xbf16>
    %cst_33 = arith.constant dense<0.000000e+00> : vector<2x512xf32>
    %45 = tpu.matmul %43, %44, %cst_33 {dimension_numbers = #tpu.dot_dimension_numbers<[1], [0], [0], [1], [0, 0, 1, 1], [], []>} : vector<2x1024xbf16>, vector<1024x512xbf16>, vector<2x512xf32> -> vector<2x512xf32>
    %c0_34 = arith.constant 0 : index
    %c0_35 = arith.constant 0 : index
    %46 = vector.load %arg8[%c0_34, %c0_35] : memref<2x512xf32, #tpu.memory_space<vmem>>, vector<1x512xf32>
    %47 = vector.broadcast %46 : vector<1x512xf32> to vector<2x512xf32>
    %48 = arith.mulf %45, %47 : vector<2x512xf32>
    %c1_36 = arith.constant 1 : index
    %c0_37 = arith.constant 0 : index
    %49 = vector.load %arg8[%c1_36, %c0_37] : memref<2x512xf32, #tpu.memory_space<vmem>>, vector<1x512xf32>
    %50 = vector.broadcast %49 : vector<1x512xf32> to vector<2x512xf32>
    %51 = arith.addf %48, %50 : vector<2x512xf32>
    %cst_38 = arith.constant 0.000000e+00 : f32
    %52 = vector.broadcast %cst_38 : f32 to vector<2x512xf32>
    %53 = arith.maximumf %51, %52 : vector<2x512xf32>
    %54 = arith.truncf %53 : vector<2x512xf32> to vector<2x512xbf16>
    %c0_39 = arith.constant 0 : index
    %c0_40 = arith.constant 0 : index
    %55 = vector.load %arg9[%c0_39, %c0_40] : memref<512x256xbf16, #tpu.memory_space<vmem>>, vector<512x256xbf16>
    %cst_41 = arith.constant dense<0.000000e+00> : vector<2x256xf32>
    %56 = tpu.matmul %54, %55, %cst_41 {dimension_numbers = #tpu.dot_dimension_numbers<[1], [0], [0], [1], [0, 0, 1, 1], [], []>} : vector<2x512xbf16>, vector<512x256xbf16>, vector<2x256xf32> -> vector<2x256xf32>
    %c0_42 = arith.constant 0 : index
    %c0_43 = arith.constant 0 : index
    %57 = vector.load %arg10[%c0_42, %c0_43] : memref<2x256xf32, #tpu.memory_space<vmem>>, vector<1x256xf32>
    %58 = vector.broadcast %57 : vector<1x256xf32> to vector<2x256xf32>
    %59 = arith.mulf %56, %58 : vector<2x256xf32>
    %c1_44 = arith.constant 1 : index
    %c0_45 = arith.constant 0 : index
    %60 = vector.load %arg10[%c1_44, %c0_45] : memref<2x256xf32, #tpu.memory_space<vmem>>, vector<1x256xf32>
    %61 = vector.broadcast %60 : vector<1x256xf32> to vector<2x256xf32>
    %62 = arith.addf %59, %61 : vector<2x256xf32>
    %cst_46 = arith.constant 0.000000e+00 : f32
    %63 = vector.broadcast %cst_46 : f32 to vector<2x256xf32>
    %64 = arith.maximumf %62, %63 : vector<2x256xf32>
    %65 = arith.truncf %64 : vector<2x256xf32> to vector<2x256xbf16>
    %c0_47 = arith.constant 0 : index
    %c0_48 = arith.constant 0 : index
    %66 = vector.load %arg11[%c0_47, %c0_48] : memref<256x4096xbf16, #tpu.memory_space<vmem>>, vector<256x4096xbf16>
    %cst_49 = arith.constant dense<0.000000e+00> : vector<2x4096xf32>
    %67 = tpu.matmul %65, %66, %cst_49 {dimension_numbers = #tpu.dot_dimension_numbers<[1], [0], [0], [1], [0, 0, 1, 1], [], []>} : vector<2x256xbf16>, vector<256x4096xbf16>, vector<2x4096xf32> -> vector<2x4096xf32>
    %c0_50 = arith.constant 0 : index
    %c0_51 = arith.constant 0 : index
    %68 = vector.load %arg12[%c0_50, %c0_51] : memref<1x4096xf32, #tpu.memory_space<vmem>>, vector<1x4096xf32>
    %69 = vector.broadcast %68 : vector<1x4096xf32> to vector<2x4096xf32>
    %70 = arith.addf %67, %69 : vector<2x4096xf32>
    %c0_52 = arith.constant 0 : index
    %c0_53 = arith.constant 0 : index
    %71 = vector.load %arg13[%c0_52, %c0_53] : memref<2x4096xf32, #tpu.memory_space<vmem>>, vector<2x4096xf32>
    tpu.vector_store %arg13[%c0_52, %c0_53], %70 {strides = array<i32>} : memref<2x4096xf32, #tpu.memory_space<vmem>>, vector<2x4096xf32>,
    return
  }
}

</mosaic_0001>

<bundles_post_ra>
// kernel: tpu_custom_call.1
= control target key start
LH: loop header
LB: loop body
LE: loop exit
PB: predicated region body
PF: predicated region fallthrough
CT: control target
= control target key end

     0   :  { %18 = vsyncpa [#allocation4], 0  ;;  %s13417_s0 = inlined_call_operand.hbm [shape: f32[32,64], index: 0, kind: input, shape index: {}]   ;;  %s13418_s1 = inlined_call_operand.hbm [shape: bf16[64,64], index: 1, kind: input, shape index: {}]   ;;  %s13419_s2 = inlined_call_operand.hbm [shape: f32[2,64], index: 2, kind: input, shape index: {}]   ;;  %s13420_s3 = inlined_call_operand.hbm [shape: bf16[64,128], index: 3, kind: input, shape index: {}]   ;;  %s13421_s4 = inlined_call_operand.hbm [shape: f32[2,128], index: 4, kind: input, shape index: {}]   ;;  %s13422_s5 = inlined_call_operand.hbm [shape: bf16[128,1024], index: 5, kind: input, shape index: {}]   ;;  %s13423_s6 = inlined_call_operand.hbm [shape: f32[2,1024], index: 6, kind: input, shape index: {}]   ;;  %s13424_s7 = inlined_call_operand.hbm [shape: bf16[1024,512], index: 7, kind: input, shape index: {}]   ;;  %s13425_s8 = inlined_call_operand.hbm [shape: f32[2,512], index: 8, kind: input, shape index: {}]   ;;  %s13426_s9 = inlined_call_operand.hbm [shape: bf16[512,256], index: 9, kind: input, shape index: {}]   ;;  %s13427_s10 = inlined_call_operand.hbm [shape: f32[2,256], index: 10, kind: input, shape index: {}]   ;;  %s13428_s11 = inlined_call_operand.hbm [shape: bf16[256,4096], index: 11, kind: input, shape index: {}]   ;;  %s13429_s12 = inlined_call_operand.hbm [shape: f32[1,4096], index: 12, kind: input, shape index: {}]   ;;  %s13430_s13 = inlined_call_operand.hbm [shape: f32[2,4096], index: 13, kind: output, shape index: {}]  }
   0x1   :  { %19 = vsyncpa [#allocation7], 0 }
   0x2   :  { %20 = vsyncpa [#allocation10], 0 }
   0x3   :  { %21 = vsyncpa [#allocation13], 0 }
   0x4   :  { %22 = vsyncpa [#allocation16], 0 }
   0x5   :  { %23 = vsyncpa [#allocation19], 0 }
   0x6   :  { %24 = vsyncpa [#allocation22], 0  ;;  %s43_s27 = sshll.u32 %s13418_s1, 4  ;;  %s44_s27 = int_to_ptr.hbm [resolvable:$true] %s43_s27 }
   0x7   :  { %25 = vsyncpa [#allocation5], 0  ;;  %s12757_s28 = smov [#allocation6]   ;;  %s67_s15 = sshll.u32 %s13420_s3, 4  ;;  %s68_s15 = int_to_ptr.hbm [resolvable:$true] %s67_s15 }
   0x8   :  { %s45_s29 = sshll.u32 %s12757_s28, 4  ;;  %s12758_s16 = smov 64   ;;  %s46_s29 = int_to_ptr.vmem [resolvable:$true] %s45_s29 }
   0x9   :  { %s12759_s17 = smov 4   ;;  %s12760_s18 = smov [#allocation9]  }
   0xa   :  { %51 = dma.hbm_to_vmem [thread:$0]  %s44_s27, 512, %s46_s29, [#allocation7], %s12758_s16, %s12758_s16, %s12759_s17  }
   0xb   :  { %s69_s19 = sshll.u32 %s12760_s18, 4  ;;  %s91_s22 = sshll.u32 %s13422_s5, 4  ;;  %s70_s19 = int_to_ptr.vmem [resolvable:$true] %s69_s19  ;;  %s92_s22 = int_to_ptr.hbm [resolvable:$true] %s91_s22 }
   0xc   :  { %75 = dma.hbm_to_vmem [thread:$0]  %s68_s15, 512, %s70_s19, [#allocation10], %s12758_s16, %s12758_s16, %s12759_s17  }
   0xd   :  { %s12761_s1 = smov [#allocation12]   ;;  %s115_s3 = sshll.u32 %s13424_s7, 4  ;;  %s116_s3 = int_to_ptr.hbm [resolvable:$true] %s115_s3 }
   0xe   :  { %s93_s23 = sshll.u32 %s12761_s1, 4  ;;  %s12762_s26 = smov 512   ;;  %s94_s23 = int_to_ptr.vmem [resolvable:$true] %s93_s23 }
   0xf   :  { %s12763_s28 = smov 32   ;;  %s12764_s27 = smov [#allocation15]  }
  0x10   :  { %99 = dma.hbm_to_vmem [thread:$0]  %s92_s22, 8192, %s94_s23, [#allocation13], %s12762_s26, %s12762_s26, %s12763_s28  }
  0x11   :  { %s117_s29 = sshll.u32 %s12764_s27, 4  ;;  %s12765_s30 = smov 256   ;;  %s118_s29 = int_to_ptr.vmem [resolvable:$true] %s117_s29 }
  0x12   :  { %s12766_s14 = smov 16   ;;  %s139_s15 = sshll.u32 %s13426_s9, 4  ;;  %s140_s15 = int_to_ptr.hbm [resolvable:$true] %s139_s15 }
  0x13   :  { %123 = dma.hbm_to_vmem [thread:$0]  %s116_s3, 32768, %s118_s29, [#allocation16], %s12765_s30, %s12765_s30, %s12766_s14  }
  0x14   :  { %s12767_s16 = smov [#allocation18]   ;;  %s163_s20 = sshll.u32 %s13428_s11, 4  ;;  %s164_s20 = int_to_ptr.hbm [resolvable:$true] %s163_s20 }
  0x15   :  { %s141_s17 = sshll.u32 %s12767_s16, 4  ;;  %s12768_s21 = smov 128   ;;  %s142_s17 = int_to_ptr.vmem [resolvable:$true] %s141_s17 }
  0x16   :  { %s12769_s22 = smov 8   ;;  %s12770_s1 = smov [#allocation21]  }
  0x17   :  { %147 = dma.hbm_to_vmem [thread:$0]  %s140_s15, 8192, %s142_s17, [#allocation19], %s12768_s21, %s12768_s21, %s12769_s22  }
  0x18   :  { %s165_s23 = sshll.u32 %s12770_s1, 4  ;;  %s30_s3 = sshll.u32 %s13417_s0, 4  ;;  %s166_s23 = int_to_ptr.vmem [resolvable:$true] %s165_s23  ;;  %s31_s3 = int_to_ptr.hbm [resolvable:$true] %s30_s3 }
  0x19   :  { %s12771_s9 = smov 2048   ;;  %s12772_s26 = smov [#allocation3]  }
  0x1a   :  { %171 = dma.hbm_to_vmem [thread:$0]  %s164_s20, 65536, %s166_s23, [#allocation22], %s12771_s9, %s12771_s9, %s12768_s21  }
  0x1b   :  { %s32_s28 = sshll.u32 %s12772_s26, 4  ;;  %s57_s11 = sshll.u32 %s13419_s2, 4  ;;  %s33_s28 = int_to_ptr.vmem [resolvable:$true] %s32_s28  ;;  %s58_s11 = int_to_ptr.hbm [resolvable:$true] %s57_s11 }
  0x1c   :  { %38 = dma.hbm_to_vmem [thread:$0]  %s31_s3, 512, %s33_s28, [#allocation4], %s12768_s21, %s12768_s21, %s12769_s22  }
  0x1d   :  { %s81_s5 = sshll.u32 %s13421_s4, 4  ;;  %s12773_s18 = smov [#allocation8]   ;;  %s82_s5 = int_to_ptr.hbm [resolvable:$true] %s81_s5 }
  0x1e   :  { %s59_s15 = sshll.u32 %s12773_s18, 4  ;;  %s12774_s0 = smov [#allocation11]   ;;  %s60_s15 = int_to_ptr.vmem [resolvable:$true] %s59_s15 }
  0x1f   :  { %62 = dma.hbm_to_vmem [thread:$0]  %s58_s11, 32, %s60_s15, [#allocation7]  }
  0x20   :  { %s83_s16 = sshll.u32 %s12774_s0, 4  ;;  %s105_s7 = sshll.u32 %s13423_s6, 4  ;;  %s84_s16 = int_to_ptr.vmem [resolvable:$true] %s83_s16  ;;  %s106_s7 = int_to_ptr.hbm [resolvable:$true] %s105_s7 }
  0x21   :  { %86 = dma.hbm_to_vmem [thread:$0]  %s82_s5, 32, %s84_s16, [#allocation10]  }
  0x22   :  { %s129_s21 = sshll.u32 %s13425_s8, 4  ;;  %s12775_s22 = smov [#allocation14]   ;;  %s130_s21 = int_to_ptr.hbm [resolvable:$true] %s129_s21 }
  0x23   :  { %s107_s4 = sshll.u32 %s12775_s22, 4  ;;  %s12776_s1 = smov [#allocation17]   ;;  %s108_s4 = int_to_ptr.vmem [resolvable:$true] %s107_s4 }
  0x24   :  { %110 = dma.hbm_to_vmem [thread:$0]  %s106_s7, 256, %s108_s4, [#allocation13]  }
  0x25   :  { %s131_s23 = sshll.u32 %s12776_s1, 4  ;;  %s153_s3 = sshll.u32 %s13427_s10, 4  ;;  %s132_s23 = int_to_ptr.vmem [resolvable:$true] %s131_s23  ;;  %s154_s3 = int_to_ptr.hbm [resolvable:$true] %s153_s3 }
  0x26   :  { %134 = dma.hbm_to_vmem [thread:$0]  %s130_s21, 128, %s132_s23, [#allocation16]  }
  0x27   :  { %s177_s26 = sshll.u32 %s13429_s12, 4  ;;  %s12777_s28 = smov [#allocation20]   ;;  %s178_s26 = int_to_ptr.hbm [resolvable:$true] %s177_s26 }
  0x28   :  { %s155_s8 = sshll.u32 %s12777_s28, 4  ;;  %s12778_s27 = smov [#allocation23]   ;;  %s156_s8 = int_to_ptr.vmem [resolvable:$true] %s155_s8 }
  0x29   :  { %158 = dma.hbm_to_vmem [thread:$0]  %s154_s3, 64, %s156_s8, [#allocation19]  }
  0x2a   :  { %s179_s29 = sshll.u32 %s12778_s27, 4  ;;  %s180_s29 = int_to_ptr.vmem [resolvable:$true] %s179_s29 }
  0x2b   :  { %182 = dma.hbm_to_vmem [thread:$0]  %s178_s26, 512, %s180_s29, [#allocation22]  }
  0x2c   :  { %12741 = dma.done.wait [#allocation4], 512  }
  0x2d   :  { %12742 = vsyncadd [#allocation4], 4294966784 }
  0x2e   :  { %12743 = dma.done.wait [#allocation7], 544  }
  0x2f   :  { %12744 = vsyncadd [#allocation7], 4294966752 }
  0x30   :  { %12745 = dma.done.wait [#allocation10], 544  }
  0x31   :  { %12746 = vsyncadd [#allocation10], 4294966752 }
  0x32   :  { %12747 = dma.done.wait [#allocation13], 8448  }
  0x33   :  { %12748 = vsyncadd [#allocation13], 4294958848 }
  0x34   :  { %12749 = dma.done.wait [#allocation16], 32896  }
  0x35   :  { %12750 = vsyncadd [#allocation16], 4294934400 }
  0x36   :  { %12751 = dma.done.wait [#allocation19], 8256  }
  0x37   :  { %12752 = vsyncadd [#allocation19], 4294959040 }
  0x38   :  { %12753 = dma.done.wait [#allocation22], 66048  }
  0x39   :  { %12754 = vsyncadd [#allocation22], 4294901248  ;;  %v11477_v0 = vld [vmem:[#allocation6 + $0x18] sm:$0xff]  ;;  %v11476_v1 = vld [vmem:[#allocation6 + $0x10] sm:$0xff]  ;;  %vm274_vm0 = vcmask 523264   ;;  %vm1135_vm1 = vcmask 1042434  }
  0x3a   :  { %285 = vmatpush.bf16.msra.mxu0 %v11477_v0  ;;  %v11475_v2 = vld [vmem:[#allocation6 + $0x8] sm:$0xff]  ;;  %v11474_v3 = vld [vmem:[#allocation6] sm:$0xff]  ;;  %v238_v7 = vld [vmem:[#allocation3 + $0x10] sm:$0xff]  ;;  %vm1133_vm2 = vcmask 1040384   ;;  %vm1137_vm3 = vcmask 1041408   ;;  %vm1141_vm4 = vcmask 1046534  }
  0x3b   :  { %v236_v4 = vld [vmem:[#allocation3] sm:$0xff]  ;;  %v237_v5 = vld [vmem:[#allocation3 + $0x8] sm:$0xff]  ;;  %v239_v8 = vld [vmem:[#allocation3 + $0x18] sm:$0xff]  ;;  %vm1139_vm5 = vcmask 1044484   ;;  %vm1143_vm6 = vcmask 1045508   ;;  %vm1145_vm7 = vcmask 1043456  }
  0x3c   :  { %v240_v6 = vpack.c.bf16 %v237_v5, %v236_v4  ;;  %v241_v9 = vpack.c.bf16 %v239_v8, %v238_v7  ;;  %v11481_v10 = vld [vmem:[#allocation9 + $0x18] sm:$0xff]  ;;  %v11480_v11 = vld [vmem:[#allocation9 + $0x10] sm:$0xff]  ;;  %v11479_v12 = vld [vmem:[#allocation9 + $0x8] sm:$0xff]  ;;  %s12779_s10 = smov [#allocation24]   ;;  %s7838_s14 = sshll.u32 %s13430_s13, 4  ;;  %s7839_s14 = int_to_ptr.hbm [resolvable:$true] %s7838_s14 }
  0x3d   :  { %360 = vmatpush.bf16.msra.mxu1 %v11481_v10  ;;  %v11478_v13 = vld [vmem:[#allocation9] sm:$0xff]  ;;  %v12891_v15 = vld [vmem:[#allocation8] ss:$0 sm:$0xff]  ;;  %v12893_v19 = vld [vmem:[#allocation8 + $0x1] ss:$0 sm:$0xff]  ;;  %s7836_s12 = sshll.u32 %s12779_s10, 4  ;;  %s7837_s12 = int_to_ptr.vmem [resolvable:$true] %s7836_s12 }
  0x3e   :  { %286 = vmatpush.bf16.msra.mxu0 %v11476_v1  ;;  %v8116_v16 = vld [vmem:[#allocation12 + $0x1c0] sm:$0xf]  ;;  %v11538_v18 = vld [vmem:[#allocation12 + $0x1c4] sm:$0xf]  ;;  %v8124_v22 = vld [vmem:[#allocation12 + $0x1c8] sm:$0xf] }
  0x3f   :  { %v11542_v17 = vld [vmem:[#allocation12 + $0x1dc] sm:$0xf0]  ;;  %v8118_v21 = vld [vmem:[#allocation12 + $0x1e0] sm:$0xf0]  ;;  %v11543_v23 = vld [vmem:[#allocation12 + $0x1e4] sm:$0xf0] }
  0x40   :  { %v8117_v20 = vor.u32 %v11542_v17, %v8116_v16  ;;  %v8121_v24 = vor.u32 %v11538_v18, %v8118_v21  ;;  %v8125_v25 = vor.u32 %v11543_v23, %v8124_v22  ;;  %v11539_v26 = vld [vmem:[#allocation12 + $0x1cc] sm:$0xf]  ;;  %v8084_v28 = vld [vmem:[#allocation12 + $0x180] sm:$0xf]  ;;  %v11530_v32 = vld [vmem:[#allocation12 + $0x184] sm:$0xf] }
  0x41   :  { %361 = vmatpush.bf16.msra.mxu1 %v11480_v11  ;;  %v8126_v27 = vld [vmem:[#allocation12 + $0x1e8] sm:$0xf0]  ;;  %v11534_v31 = vld [vmem:[#allocation12 + $0x19c] sm:$0xf0]  ;;  %v8086_v33 = vld [vmem:[#allocation12 + $0x1a0] sm:$0xf0] }
  0x42   :  { %287 = vmatpush.bf16.msra.mxu0 %v11475_v2  ;;  %777 = vmatpush.bf16.msra.mxu2 %v8117_v20  ;;  %v8129_v30 = vor.u32 %v11539_v26, %v8126_v27  ;;  %v8085_v34 = vor.u32 %v11534_v31, %v8084_v28  ;;  %v8089_v35 = vor.u32 %v11530_v32, %v8086_v33  ;;  %v8092_v36 = vld [vmem:[#allocation12 + $0x188] sm:$0xf]  ;;  %v11531_v39 = vld [vmem:[#allocation12 + $0x18c] sm:$0xf]  ;;  %v8052_v41 = vld [vmem:[#allocation12 + $0x140] sm:$0xf] }
  0x43   :  { %796 = vmatpush.bf16.msra.mxu3 %v8121_v24  ;;  %v11535_v37 = vld [vmem:[#allocation12 + $0x1a4] sm:$0xf0]  ;;  %v8094_v40 = vld [vmem:[#allocation12 + $0x1a8] sm:$0xf0]  ;;  %v11526_v43 = vld [vmem:[#allocation12 + $0x15c] sm:$0xf0] }
  0x44   :  { %v8093_v38 = vor.u32 %v11535_v37, %v8092_v36  ;;  %v8097_v42 = vor.u32 %v11531_v39, %v8094_v40  ;;  %v11522_v44 = vld [vmem:[#allocation12 + $0x144] sm:$0xf]  ;;  %v8053_v48 = vor.u32 %v11526_v43, %v8052_v41  ;;  %v8060_v49 = vld [vmem:[#allocation12 + $0x148] sm:$0xf]  ;;  %v11523_v51 = vld [vmem:[#allocation12 + $0x14c] sm:$0xf] }
  0x45   :  { %362 = vmatpush.bf16.msra.mxu1 %v11479_v12  ;;  %v8054_v45 = vld [vmem:[#allocation12 + $0x160] sm:$0xf0]  ;;  %v11527_v50 = vld [vmem:[#allocation12 + $0x164] sm:$0xf0]  ;;  %v8062_v55 = vld [vmem:[#allocation12 + $0x168] sm:$0xf0] }
  0x46   :  { %288 = vmatpush.bf16.msra.mxu0 %v11474_v3  ;;  %778 = vmatpush.bf16.msra.mxu2 %v8085_v34  ;;  %v8057_v53 = vor.u32 %v11522_v44, %v8054_v45  ;;  %v8061_v54 = vor.u32 %v11527_v50, %v8060_v49  ;;  %v8020_v56 = vld [vmem:[#allocation12 + $0x100] sm:$0xf]  ;;  %v8065_v58 = vor.u32 %v11523_v51, %v8062_v55  ;;  %v11514_v59 = vld [vmem:[#allocation12 + $0x104] sm:$0xf]  ;;  %v8028_v61 = vld [vmem:[#allocation12 + $0x108] sm:$0xf] }
  0x47   :  { %797 = vmatpush.bf16.msra.mxu3 %v8089_v35  ;;  %v11518_v57 = vld [vmem:[#allocation12 + $0x11c] sm:$0xf0]  ;;  %v8022_v60 = vld [vmem:[#allocation12 + $0x120] sm:$0xf0]  ;;  %v11519_v63 = vld [vmem:[#allocation12 + $0x124] sm:$0xf0] }
  0x48   :  { %v11515_v0 = vld [vmem:[#allocation12 + $0x10c] sm:$0xf]  ;;  %v8021_v2 = vor.u32 %v11518_v57, %v8020_v56  ;;  %v8025_v5 = vor.u32 %v11514_v59, %v8022_v60  ;;  %v7988_v20 = vld [vmem:[#allocation12 + $0xc0] sm:$0xf]  ;;  %v11506_v23 = vld [vmem:[#allocation12 + $0xc4] sm:$0xf] }
  0x49   :  { %7870 = vmatmul.msk.bf16.vlgmr.msra.gmra.mxu0 %vm274_vm0, %v240_v6  ;;  %363 = vmatpush.bf16.msra.mxu1 %v11478_v13  ;;  %v8030_v1 = vld [vmem:[#allocation12 + $0x128] sm:$0xf0]  ;;  %v8029_v6 = vor.u32 %v11519_v63, %v8028_v61  ;;  %v11510_v21 = vld [vmem:[#allocation12 + $0xdc] sm:$0xf0]  ;;  %v7990_v24 = vld [vmem:[#allocation12 + $0xe0] sm:$0xf0] }
  0x4a   :  { %815 = vmatpush.bf16.msrb.mxu0 %v8125_v25  ;;  %779 = vmatpush.bf16.msra.mxu2 %v8053_v48  ;;  %v8033_v7 = vor.u32 %v11515_v0, %v8030_v1  ;;  %v7989_v22 = vor.u32 %v11510_v21, %v7988_v20  ;;  %v7996_v25 = vld [vmem:[#allocation12 + $0xc8] sm:$0xf]  ;;  %v7993_v26 = vor.u32 %v11506_v23, %v7990_v24  ;;  %v11507_v28 = vld [vmem:[#allocation12 + $0xcc] sm:$0xf]  ;;  %v11502_v31 = vld [vmem:[#allocation12 + $0x9c] sm:$0xf0] }
  0x4b   :  { %798 = vmatpush.bf16.msra.mxu3 %v8057_v53  ;;  %v11511_v27 = vld [vmem:[#allocation12 + $0xe4] sm:$0xf0]  ;;  %v11498_v32 = vld [vmem:[#allocation12 + $0x84] sm:$0xf]  ;;  %v11499_v39 = vld [vmem:[#allocation12 + $0x8c] sm:$0xf] }
  0x4c   :  { %v7958_v34 = vld [vmem:[#allocation12 + $0xa0] sm:$0xf0]  ;;  %v7964_v35 = vld [vmem:[#allocation12 + $0x88] sm:$0xf]  ;;  %v7966_v40 = vld [vmem:[#allocation12 + $0xa8] sm:$0xf0] }
  0x4d   :  { %834 = vmatpush.bf16.msrb.mxu1 %v8129_v30  ;;  %v7998_v30 = vld [vmem:[#allocation12 + $0xe8] sm:$0xf0]  ;;  %v11503_v36 = vld [vmem:[#allocation12 + $0xa4] sm:$0xf0]  ;;  %v7961_v37 = vor.u32 %v11498_v32, %v7958_v34  ;;  %v7969_v41 = vor.u32 %v11499_v39, %v7966_v40  ;;  %v11494_v43 = vld [vmem:[#allocation12 + $0x5c] sm:$0xf0] }
  0x4e   :  { %816 = vmatpush.bf16.msrb.mxu0 %v8093_v38  ;;  %780 = vmatpush.bf16.msra.mxu2 %v8021_v2  ;;  %v7965_v38 = vor.u32 %v11503_v36, %v7964_v35  ;;  %v11490_v44 = vld [vmem:[#allocation12 + $0x44] sm:$0xf]  ;;  %v11495_v48 = vld [vmem:[#allocation12 + $0x64] sm:$0xf0]  ;;  %v11491_v51 = vld [vmem:[#allocation12 + $0x4c] sm:$0xf] }
  0x4f   :  { %799 = vmatpush.bf16.msra.mxu3 %v8025_v5  ;;  %v11486_v55 = vld [vmem:[#allocation12 + $0x1c] sm:$0xf0]  ;;  %v11482_v56 = vld [vmem:[#allocation12 + $0x4] sm:$0xf]  ;;  %v7900_v59 = vld [vmem:[#allocation12 + $0x8] sm:$0xf] }
  0x50   :  { %v11487_v60 = vld [vmem:[#allocation12 + $0x24] sm:$0xf0]  ;;  %v11483_v63 = vld [vmem:[#allocation12 + $0xc] sm:$0xf]  ;;  %v8132_v2 = vld [vmem:[#allocation12 + $0x1d0] sm:$0xf] }
  0x51   :  { %835 = vmatpush.bf16.msrb.mxu1 %v8097_v42  ;;  %v7924_v42 = vld [vmem:[#allocation12 + $0x40] sm:$0xf]  ;;  %v7902_v0 = vld [vmem:[#allocation12 + $0x28] sm:$0xf0]  ;;  %v8102_v20 = vld [vmem:[#allocation12 + $0x1b0] sm:$0xf0] }
  0x52   :  { %817 = vmatpush.bf16.msrb.mxu0 %v8061_v54  ;;  %781 = vmatpush.bf16.msra.mxu2 %v7989_v22  ;;  %v7925_v45 = vor.u32 %v11494_v43, %v7924_v42  ;;  %v7892_v54 = vld [vmem:[#allocation12] sm:$0xf]  ;;  %v7905_v1 = vor.u32 %v11483_v63, %v7902_v0  ;;  %v8108_v21 = vld [vmem:[#allocation12 + $0x198] sm:$0xf]  ;;  %v11525_v35 = vld [vmem:[#allocation12 + $0x15c] sm:$0xf] }
  0x53   :  { %800 = vmatpush.bf16.msra.mxu3 %v7993_v26  ;;  %v7893_v57 = vor.u32 %v11486_v55, %v7892_v54  ;;  %v11537_v22 = vld [vmem:[#allocation12 + $0x1b4] sm:$0xf0]  ;;  %v8110_v26 = vld [vmem:[#allocation12 + $0x1b8] sm:$0xf0]  ;;  %v11520_v39 = vld [vmem:[#allocation12 + $0x12c] sm:$0xf0] }
  0x54   :  { %v8109_v24 = vor.u32 %v11537_v22, %v8108_v21  ;;  %v11529_v32 = vld [vmem:[#allocation12 + $0x174] sm:$0xf0]  ;;  %v8078_v36 = vld [vmem:[#allocation12 + $0x178] sm:$0xf0]  ;;  %v11516_v40 = vld [vmem:[#allocation12 + $0x114] sm:$0xf] }
  0x55   :  { %836 = vmatpush.bf16.msrb.mxu1 %v8065_v58  ;;  %v7894_v58 = vld [vmem:[#allocation12 + $0x20] sm:$0xf0]  ;;  %v8038_v42 = vld [vmem:[#allocation12 + $0x130] sm:$0xf0]  ;;  %v8044_v43 = vld [vmem:[#allocation12 + $0x118] sm:$0xf] }
  0x56   :  { %818 = vmatpush.bf16.msrb.mxu0 %v8029_v6  ;;  %v7897_v61 = vor.u32 %v11482_v56, %v7894_v58  ;;  %v8134_v6 = vld [vmem:[#allocation12 + $0x1f0] sm:$0xf0]  ;;  %v11513_v58 = vld [vmem:[#allocation12 + $0xf4] sm:$0xf0]  ;;  %v7972_v63 = vld [vmem:[#allocation12 + $0x90] sm:$0xf] }
  0x57   :  { %801 = vmatpush.bf16.msra.mxu3 %v7961_v37  ;;  %v8081_v37 = vor.u32 %v11525_v35, %v8078_v36  ;;  %v11508_v54 = vld [vmem:[#allocation12 + $0xd4] sm:$0xf]  ;;  %v7948_v21 = vld [vmem:[#allocation12 + $0x58] sm:$0xf] }
  0x58   :  { %v8006_v56 = vld [vmem:[#allocation12 + $0xf0] sm:$0xf0]  ;;  %v11497_v22 = vld [vmem:[#allocation12 + $0x74] sm:$0xf0] }
  0x59   :  { %7871 = vmatmul.msk.bf16.gmra.mxu0 %vm274_vm0, %v241_v9  ;;  %837 = vmatpush.bf16.msrb.mxu1 %v8033_v7  ;;  %v8140_v7 = vld [vmem:[#allocation12 + $0x1d8] sm:$0xf] }
  0xc6   :  { %v290_v14 = vpop.f32.mrf.mxu0 }
  0xc7   :  { %v302_v29 = vmul.f32 %v12891_v15, %v290_v14 }
  0xc9   :  { %v308_v46 = vadd.f32 %v12893_v19, %v302_v29  ;;  %v7997_v29 = vor.u32 %v11511_v27, %v7996_v25  ;;  %v11533_v25 = vld [vmem:[#allocation12 + $0x19c] sm:$0xf] }
  0xca   :  { %v8113_v27 = vor.u32 %v11533_v25, %v8110_v26  ;;  %v7949_v26 = vor.u32 %v11497_v22, %v7948_v21 }
  0xcb   :  { %v312_v3 = vmax.f32 %v308_v46, 0.0  ;;  %819 = vmatpush.bf16.msrb.mxu0 %v7997_v29  ;;  %v7926_v46 = vld [vmem:[#allocation12 + $0x60] sm:$0xf0]  ;;  %v11528_v29 = vld [vmem:[#allocation12 + $0x16c] sm:$0xf0] }
  0xcc   :  { %v7929_v49 = vor.u32 %v11490_v44, %v7926_v46  ;;  %v11521_v44 = vld [vmem:[#allocation12 + $0x134] sm:$0xf0] }
  0xcd   :  { %v8045_v46 = vor.u32 %v11521_v44, %v8044_v43 }
  0xce   :  { %v292_v47 = vpop.f32.mrf.mxu0  ;;  %802 = vmatpush.bf16.msra.mxu3 %v7929_v49  ;;  %v12905_v49 = vld [vmem:[#allocation11] ss:$0 sm:$0xff] }
  0xcf   :  { %v303_v52 = vmul.f32 %v12891_v15, %v292_v47  ;;  %820 = vmatpush.bf16.msrb.mxu0 %v7965_v38  ;;  %v7932_v47 = vld [vmem:[#allocation12 + $0x48] sm:$0xf]  ;;  %v8036_v38 = vld [vmem:[#allocation12 + $0x110] sm:$0xf] }
  0xd0   :  { %v7933_v50 = vor.u32 %v11495_v48, %v7932_v47  ;;  %v11517_v47 = vld [vmem:[#allocation12 + $0x11c] sm:$0xf] }
  0xd1   :  { %v309_v62 = vadd.f32 %v12893_v19, %v303_v52  ;;  %v7934_v52 = vld [vmem:[#allocation12 + $0x68] sm:$0xf0]  ;;  %v8046_v48 = vld [vmem:[#allocation12 + $0x138] sm:$0xf0] }
  0xd2   :  { %v7937_v53 = vor.u32 %v11491_v51, %v7934_v52  ;;  %803 = vmatpush.bf16.msra.mxu3 %v7897_v61  ;;  %v8004_v52 = vld [vmem:[#allocation12 + $0xd0] sm:$0xf]  ;;  %v11509_v61 = vld [vmem:[#allocation12 + $0xdc] sm:$0xf] }
  0xd3   :  { %v313_v4 = vmax.f32 %v309_v62, 0.0  ;;  %821 = vmatpush.bf16.msrb.mxu0 %v7933_v50  ;;  %v7901_v62 = vor.u32 %v11487_v60, %v7900_v59  ;;  %v8049_v50 = vor.u32 %v11517_v47, %v8046_v48  ;;  %v8009_v59 = vor.u32 %v11508_v54, %v8006_v56 }
  0xd5   :  { %v316_v8 = vpack.c.bf16 %v313_v4, %v312_v3  ;;  %v11544_v3 = vld [vmem:[#allocation12 + $0x1ec] sm:$0xf0]  ;;  %v11540_v4 = vld [vmem:[#allocation12 + $0x1d4] sm:$0xf] }
  0xd6   :  { %v295_v9 = vpop.f32.mrf.mxu0  ;;  %v8133_v5 = vor.u32 %v11544_v3, %v8132_v2  ;;  %v11500_v2 = vld [vmem:[#allocation12 + $0x94] sm:$0xf] }
  0xd7   :  { %7888 = vmatmul.msk.bf16.vlgmr.msra.gmra.mxu1 %vm274_vm0, %v316_v8  ;;  %v304_v10 = vmul.f32 %v12891_v15, %v295_v9  ;;  %822 = vmatpush.bf16.msrb.mxu0 %v7901_v62  ;;  %v11545_v8 = vld [vmem:[#allocation12 + $0x1f4] sm:$0xf0]  ;;  %v8137_v9 = vor.u32 %v11540_v4, %v8134_v6  ;;  %v8014_v62 = vld [vmem:[#allocation12 + $0xf8] sm:$0xf0]  ;;  %v7974_v3 = vld [vmem:[#allocation12 + $0xb0] sm:$0xf0] }
  0xd8   :  { %v8017_v0 = vor.u32 %v11509_v61, %v8014_v62  ;;  %v7980_v6 = vld [vmem:[#allocation12 + $0x98] sm:$0xf] }
  0xd9   :  { %v310_v12 = vadd.f32 %v12893_v19, %v304_v10  ;;  %v8141_v10 = vor.u32 %v11545_v8, %v8140_v7  ;;  %872 = vmatpush.bf16.msrb.mxu3 %v8137_v9  ;;  %v11505_v7 = vld [vmem:[#allocation12 + $0xb4] sm:$0xf0]  ;;  %v11501_v8 = vld [vmem:[#allocation12 + $0x9c] sm:$0xf] }
  0xdb   :  { %v314_v16 = vmax.f32 %v310_v12, 0.0  ;;  %v8142_v12 = vld [vmem:[#allocation12 + $0x1f8] sm:$0xf0]  ;;  %891 = vmatpush.bf16.msra.mxu0 %v8141_v10 }
  0xdc   :  { %v12404_v10 = vld [vmem:[#allocation11 + $0x1] ss:$0 sm:$0xff] }
  0xde   :  { %v297_v11 = vpop.f32.mrf.mxu0 }
  0xdf   :  { %v305_v13 = vmul.f32 %v12891_v15, %v297_v11  ;;  %v8001_v15 = vor.u32 %v11507_v28, %v7998_v30  ;;  %v11541_v11 = vld [vmem:[#allocation12 + $0x1dc] sm:$0xf]  ;;  %892 = vmatpush.bf16.msra.mxu0 %v8109_v24  ;;  %v8068_v28 = vld [vmem:[#allocation12 + $0x150] sm:$0xf]  ;;  %v11524_v30 = vld [vmem:[#allocation12 + $0x154] sm:$0xf] }
  0xe1   :  { %v311_v14 = vadd.f32 %v12893_v19, %v305_v13  ;;  %v7956_v19 = vld [vmem:[#allocation12 + $0x80] sm:$0xf]  ;;  %838 = vmatpush.bf16.msrb.mxu1 %v8001_v15  ;;  %v8145_v13 = vor.u32 %v11541_v11, %v8142_v12  ;;  %v8069_v15 = vor.u32 %v11528_v29, %v8068_v28  ;;  %v7981_v11 = vor.u32 %v11505_v7, %v7980_v6  ;;  %v7982_v12 = vld [vmem:[#allocation12 + $0xb8] sm:$0xf0]  ;;  %v7908_v28 = vld [vmem:[#allocation12 + $0x10] sm:$0xf] }
  0xe2   :  { %v7957_v33 = vor.u32 %v11502_v31, %v7956_v19  ;;  %v8070_v19 = vld [vmem:[#allocation12 + $0x170] sm:$0xf0]  ;;  %v8076_v31 = vld [vmem:[#allocation12 + $0x158] sm:$0xf]  ;;  %v11488_v29 = vld [vmem:[#allocation12 + $0x2c] sm:$0xf0] }
  0xe3   :  { %v315_v17 = vmax.f32 %v311_v14, 0.0  ;;  %v8100_v14 = vld [vmem:[#allocation12 + $0x190] sm:$0xf]  ;;  %v8077_v34 = vor.u32 %v11529_v32, %v8076_v31  ;;  %v11484_v31 = vld [vmem:[#allocation12 + $0x14] sm:$0xf]  ;;  %v7909_v36 = vor.u32 %v11488_v29, %v7908_v28 }
  0xe4   :  { %782 = vmatpush.bf16.msra.mxu2 %v7957_v33  ;;  %v8073_v33 = vor.u32 %v11524_v30, %v8070_v19  ;;  %v7910_v32 = vld [vmem:[#allocation12 + $0x30] sm:$0xf0]  ;;  %v8260_v28 = vld [vmem:[#allocation15 + $0xe0] sm:$0xf]  ;;  %v11576_v29 = vld [vmem:[#allocation15 + $0xec] sm:$0xf0] }
  0xe5   :  { %v317_v18 = vpack.c.bf16 %v315_v17, %v314_v16  ;;  %839 = vmatpush.bf16.msrb.mxu1 %v7969_v41  ;;  %v11536_v16 = vld [vmem:[#allocation12 + $0x1ac] sm:$0xf0]  ;;  %v11532_v17 = vld [vmem:[#allocation12 + $0x194] sm:$0xf]  ;;  %893 = vmatpush.bf16.msra.mxu0 %v8077_v34  ;;  %v8037_v41 = vor.u32 %v11520_v39, %v8036_v38  ;;  %v11489_v34 = vld [vmem:[#allocation12 + $0x34] sm:$0xf0] }
  0xe6   :  { %v8105_v23 = vor.u32 %v11532_v17, %v8102_v20  ;;  %v11492_v17 = vld [vmem:[#allocation12 + $0x54] sm:$0xf]  ;;  %v11485_v39 = vld [vmem:[#allocation12 + $0x1c] sm:$0xf] }
  0xe7   :  { %7889 = vmatmul.msk.bf16.gmra.mxu1 %vm274_vm0, %v317_v18  ;;  %v8101_v18 = vor.u32 %v11536_v16, %v8100_v14  ;;  %v7985_v14 = vor.u32 %v11501_v8, %v7982_v12  ;;  %v11496_v16 = vld [vmem:[#allocation12 + $0x6c] sm:$0xf0] }
  0xe8   :  { %783 = vmatpush.bf16.msra.mxu2 %v7925_v45  ;;  %873 = vmatpush.bf16.msrb.mxu3 %v8105_v23  ;;  %v8041_v45 = vor.u32 %v11516_v40, %v8038_v42  ;;  %v11493_v23 = vld [vmem:[#allocation12 + $0x5c] sm:$0xf] }
  0xe9   :  { %840 = vmatpush.bf16.msrb.mxu1 %v7937_v53  ;;  %894 = vmatpush.bf16.msra.mxu0 %v8045_v46  ;;  %v11512_v53 = vld [vmem:[#allocation12 + $0xec] sm:$0xf0]  ;;  %v7918_v40 = vld [vmem:[#allocation12 + $0x38] sm:$0xf0] }
  0xea   :  { %v8005_v55 = vor.u32 %v11512_v53, %v8004_v52  ;;  %v7921_v44 = vor.u32 %v11485_v39, %v7918_v40 }
  0xec   :  { %784 = vmatpush.bf16.msra.mxu2 %v7893_v57  ;;  %874 = vmatpush.bf16.msrb.mxu3 %v8073_v33  ;;  %v8012_v57 = vld [vmem:[#allocation12 + $0xd8] sm:$0xf] }
  0xed   :  { %841 = vmatpush.bf16.msrb.mxu1 %v7905_v1  ;;  %v8013_v60 = vor.u32 %v11513_v58, %v8012_v57  ;;  %v11504_v1 = vld [vmem:[#allocation12 + $0xac] sm:$0xf0]  ;;  %v7916_v33 = vld [vmem:[#allocation12 + $0x18] sm:$0xf] }
  0xee   :  { %v7973_v4 = vor.u32 %v11504_v1, %v7972_v63  ;;  %v7917_v38 = vor.u32 %v11489_v34, %v7916_v33  ;;  %v8516_v33 = vld [vmem:[#allocation15 + $0x2e0] sm:$0xf]  ;;  %v11640_v34 = vld [vmem:[#allocation15 + $0x2ec] sm:$0xf0] }
  0xef   :  { %895 = vmatpush.bf16.msra.mxu0 %v8013_v60  ;;  %v8517_v40 = vor.u32 %v11640_v34, %v8516_v33 }
  0xf0   :  { %853 = vmatpush.bf16.msrb.mxu2 %v8133_v5  ;;  %875 = vmatpush.bf16.msrb.mxu3 %v8041_v45  ;;  %v7977_v5 = vor.u32 %v11500_v2, %v7974_v3 }
  0xf1   :  { %910 = vmatpush.bf16.msra.mxu1 %v8145_v13  ;;  %v7940_v13 = vld [vmem:[#allocation12 + $0x50] sm:$0xf] }
  0xf2   :  { %v7941_v20 = vor.u32 %v11496_v16, %v7940_v13 }
  0xf3   :  { %896 = vmatpush.bf16.msra.mxu0 %v7981_v11 }
  0xf4   :  { %854 = vmatpush.bf16.msrb.mxu2 %v8101_v18  ;;  %876 = vmatpush.bf16.msrb.mxu3 %v8009_v59  ;;  %v7942_v18 = vld [vmem:[#allocation12 + $0x70] sm:$0xf0]  ;;  %v12919_v59 = vld [vmem:[#allocation14 + $0x1] ss:$2 sm:$0xff] }
  0xf5   :  { %911 = vmatpush.bf16.msra.mxu1 %v8113_v27  ;;  %v7945_v25 = vor.u32 %v11492_v17, %v7942_v18  ;;  %v7950_v27 = vld [vmem:[#allocation12 + $0x78] sm:$0xf0]  ;;  %v12923_v61 = vperm.slane %v12919_v59, 2  ;;  %v12927_v63 = vperm.slane %v12919_v59, 3  ;;  %v12938_v6 = vperm.slane %v12919_v59, 0 }
  0xf6   :  { %v7953_v19 = vor.u32 %v11493_v23, %v7950_v27  ;;  %v12941_v7 = vperm.slane %v12919_v59, 1 }
  0xf7   :  { %897 = vmatpush.bf16.msra.mxu0 %v7949_v26 }
  0xf8   :  { %855 = vmatpush.bf16.msrb.mxu2 %v8069_v15  ;;  %877 = vmatpush.bf16.msrb.mxu3 %v7977_v5 }
  0xf9   :  { %912 = vmatpush.bf16.msra.mxu1 %v8081_v37  ;;  %v7913_v37 = vor.u32 %v11484_v31, %v7910_v32  ;;  %v8261_v31 = vor.u32 %v11576_v29, %v8260_v28  ;;  %v11608_v32 = vld [vmem:[#allocation15 + $0x1ec] sm:$0xf0] }
  0xfb   :  { %898 = vmatpush.bf16.msra.mxu0 %v7917_v38 }
  0xfc   :  { %856 = vmatpush.bf16.msrb.mxu2 %v8037_v41  ;;  %878 = vmatpush.bf16.msrb.mxu3 %v7945_v25 }
  0xfd   :  { %913 = vmatpush.bf16.msra.mxu1 %v8049_v50 }
 0x100   :  { %857 = vmatpush.bf16.msrb.mxu2 %v8005_v55  ;;  %879 = vmatpush.bf16.msrb.mxu3 %v7913_v37  ;;  %v12911_v55 = vld [vmem:[#allocation14] ss:$2 sm:$0xff] }
 0x101   :  { %914 = vmatpush.bf16.msra.mxu1 %v8017_v0  ;;  %v12917_v58 = vperm.slane %v12911_v55, 3  ;;  %v12930_v1 = vperm.slane %v12911_v55, 0  ;;  %v12933_v3 = vperm.slane %v12911_v55, 1 }
 0x104   :  { %858 = vmatpush.bf16.msrb.mxu2 %v7973_v4 }
 0x105   :  { %915 = vmatpush.bf16.msra.mxu1 %v7985_v14 }
 0x108   :  { %859 = vmatpush.bf16.msrb.mxu2 %v7941_v20 }
 0x109   :  { %916 = vmatpush.bf16.msra.mxu1 %v7953_v19 }
 0x10c   :  { %860 = vmatpush.bf16.msrb.mxu2 %v7909_v36 }
 0x10d   :  { %917 = vmatpush.bf16.msra.mxu1 %v7921_v44 }
 0x154   :  { %v365_v51 = vpop.f32.mrf.mxu1 }
 0x155   :  { %v377_v9 = vmul.f32 %v12905_v49, %v365_v51 }
 0x157   :  { %v383_v30 = vadd.f32 %v12404_v10, %v377_v9 }
 0x159   :  { %v387_v41 = vmax.f32 %v383_v30, 0.0  ;;  %v8388_v30 = vld [vmem:[#allocation15 + $0x1e0] sm:$0xf] }
 0x15a   :  { %v8389_v39 = vor.u32 %v11608_v32, %v8388_v30  ;;  %v8228_v32 = vld [vmem:[#allocation15 + $0xa0] sm:$0xf] }
 0x15c   :  { %v367_v24 = vpop.f32.mrf.mxu1 }
 0x15d   :  { %v378_v15 = vmul.f32 %v12905_v49, %v367_v24 }
 0x15f   :  { %v384_v35 = vadd.f32 %v12404_v10, %v378_v15 }
 0x161   :  { %v388_v42 = vmax.f32 %v384_v35, 0.0 }
 0x163   :  { %v391_v43 = vpack.c.bf16 %v388_v42, %v387_v41  ;;  %v8644_v41 = vld [vmem:[#allocation15 + $0x3e0] sm:$0xf]  ;;  %v11672_v42 = vld [vmem:[#allocation15 + $0x3ec] sm:$0xf0] }
 0x164   :  { %v370_v45 = vpop.f32.mrf.mxu1 }
 0x165   :  { %785 = vmatmul.bf16.vlgmr.msra.gmra.mxu2 %v391_v43  ;;  %804 = vmatmul.bf16.vlgmr.msra.gmra.mxu3 %v391_v43  ;;  %v379_v46 = vmul.f32 %v12905_v49, %v370_v45 }
 0x166   :  { %823 = vmatmul.bf16.vlgmr.msrb.gmra.mxu0 %v391_v43  ;;  %842 = vmatmul.bf16.vlgmr.msrb.gmra.mxu1 %v391_v43 }
 0x167   :  { %v385_v48 = vadd.f32 %v12404_v10, %v379_v46  ;;  %2797 = vmatpush.bf16.msra.mxu2 %v8261_v31  ;;  %2810 = vmatpush.bf16.msra.mxu3 %v8389_v39 }
 0x168   :  { %2823 = vmatpush.bf16.msrb.mxu0 %v8517_v40 }
 0x169   :  { %v389_v52 = vmax.f32 %v385_v48, 0.0 }
 0x16c   :  { %v372_v47 = vpop.f32.mrf.mxu1 }
 0x16d   :  { %v380_v50 = vmul.f32 %v12905_v49, %v372_v47  ;;  %v12914_v49 = vperm.slane %v12911_v55, 2 }
 0x16f   :  { %v386_v51 = vadd.f32 %v12404_v10, %v380_v50 }
 0x171   :  { %v390_v53 = vmax.f32 %v386_v51, 0.0  ;;  %v8645_v51 = vor.u32 %v11672_v42, %v8644_v41  ;;  %v12973_v42 = vperm.slane %v12919_v59, 7 }
 0x173   :  { %v392_v54 = vpack.c.bf16 %v390_v53, %v389_v52  ;;  %v8244_v52 = vld [vmem:[#allocation15 + $0xc0] sm:$0xf]  ;;  %v11572_v53 = vld [vmem:[#allocation15 + $0xcc] sm:$0xf0]  ;;  %2836 = vmatpush.bf16.msrb.mxu1 %v8645_v51 }
 0x175   :  { %790 = vmatmul.bf16.gmra.mxu2 %v392_v54  ;;  %809 = vmatmul.bf16.gmra.mxu3 %v392_v54 }
 0x176   :  { %828 = vmatmul.bf16.gmra.mxu0 %v392_v54  ;;  %847 = vmatmul.bf16.gmra.mxu1 %v392_v54 }
 0x185   :  { %861 = vmatmul.bf16.vlgmr.msrb.gmra.mxu2 %v391_v43  ;;  %880 = vmatmul.bf16.vlgmr.msrb.gmra.mxu3 %v391_v43 }
 0x186   :  { %899 = vmatmul.bf16.vlgmr.msra.gmra.mxu0 %v391_v43  ;;  %918 = vmatmul.bf16.vlgmr.msra.gmra.mxu1 %v391_v43 }
 0x195   :  { %866 = vmatmul.bf16.gmra.mxu2 %v392_v54  ;;  %885 = vmatmul.bf16.gmra.mxu3 %v392_v54 }
 0x196   :  { %904 = vmatmul.bf16.gmra.mxu0 %v392_v54  ;;  %923 = vmatmul.bf16.gmra.mxu1 %v392_v54 }
 0x1e3   :  { %v824_v56 = vpop.f32.mrf.mxu0  ;;  %v843_v57 = vpop.f32.mrf.mxu1 }
 0x1e4   :  { %v949_v60 = vmul.f32 %v12914_v49, %v824_v56  ;;  %v950_v62 = vmul.f32 %v12917_v58, %v843_v57 }
 0x1e6   :  { %v1000_v4 = vadd.f32 %v12923_v61, %v949_v60  ;;  %v1001_v5 = vadd.f32 %v12927_v63, %v950_v62  ;;  %v8372_v60 = vld [vmem:[#allocation15 + $0x1c0] sm:$0xf]  ;;  %v11604_v62 = vld [vmem:[#allocation15 + $0x1cc] sm:$0xf0] }
 0x1e8   :  { %v786_v0 = vpop.f32.mrf.mxu2  ;;  %v805_v2 = vpop.f32.mrf.mxu3  ;;  %v1032_v17 = vmax.f32 %v1000_v4, 0.0  ;;  %v1033_v18 = vmax.f32 %v1001_v5, 0.0  ;;  %v8245_v5 = vor.u32 %v11572_v53, %v8244_v52 }
 0x1e9   :  { %v947_v10 = vmul.f32 %v12930_v1, %v786_v0  ;;  %v948_v11 = vmul.f32 %v12933_v3, %v805_v2  ;;  %v8500_v0 = vld [vmem:[#allocation15 + $0x2c0] sm:$0xf] }
 0x1ea   :  { %2798 = vmatpush.bf16.msra.mxu2 %v8245_v5  ;;  %v11632_v5 = vld [vmem:[#allocation15 + $0x2ac] sm:$0xf0] }
 0x1eb   :  { %v826_v8 = vpop.f32.mrf.mxu0  ;;  %v845_v9 = vpop.f32.mrf.mxu1  ;;  %v998_v20 = vadd.f32 %v12938_v6, %v947_v10  ;;  %v999_v21 = vadd.f32 %v12941_v7, %v948_v11  ;;  %v8628_v10 = vld [vmem:[#allocation15 + $0x3c0] sm:$0xf]  ;;  %v11668_v11 = vld [vmem:[#allocation15 + $0x3cc] sm:$0xf0] }
 0x1ec   :  { %v957_v12 = vmul.f32 %v12914_v49, %v826_v8  ;;  %v958_v13 = vmul.f32 %v12917_v58, %v845_v9  ;;  %v8373_v8 = vor.u32 %v11604_v62, %v8372_v60  ;;  %v11636_v9 = vld [vmem:[#allocation15 + $0x2cc] sm:$0xf0] }
 0x1ed   :  { %v1030_v43 = vmax.f32 %v998_v20, 0.0  ;;  %v1031_v44 = vmax.f32 %v999_v21, 0.0 }
 0x1ee   :  { %v1008_v14 = vadd.f32 %v12923_v61, %v957_v12  ;;  %v1009_v16 = vadd.f32 %v12927_v63, %v958_v13  ;;  %2811 = vmatpush.bf16.msra.mxu3 %v8373_v8 }
 0x1f0   :  { %v1040_v22 = vmax.f32 %v1008_v14, 0.0  ;;  %v1041_v23 = vmax.f32 %v1009_v16, 0.0  ;;  %v788_v24 = vpop.f32.mrf.mxu2  ;;  %v807_v25 = vpop.f32.mrf.mxu3 }
 0x1f1   :  { %v955_v26 = vmul.f32 %v12930_v1, %v788_v24  ;;  %v956_v27 = vmul.f32 %v12933_v3, %v807_v25 }
 0x1f2   :  { %v1076_v15 = vmax.f32 %v1032_v17, %v1040_v22  ;;  %v1083_v19 = vmax.f32 %v1033_v18, %v1041_v23  ;;  %v12958_v17 = vperm.slane %v12911_v55, 6  ;;  %v12961_v18 = vperm.slane %v12911_v55, 7 }
 0x1f3   :  { %v1006_v35 = vadd.f32 %v12938_v6, %v955_v26  ;;  %v1007_v36 = vadd.f32 %v12941_v7, %v956_v27  ;;  %v829_v37 = vpop.f32.mrf.mxu0  ;;  %v848_v38 = vpop.f32.mrf.mxu1  ;;  %v12965_v23 = vperm.slane %v12919_v59, 6  ;;  %v8501_v26 = vor.u32 %v11636_v9, %v8500_v0 }
 0x1f4   :  { %v1077_v45 = vrot.slane %v1076_v15, 4  ;;  %v1084_v46 = vrot.slane %v1083_v19, 4  ;;  %v965_v50 = vmul.f32 %v12914_v49, %v829_v37  ;;  %v966_v57 = vmul.f32 %v12917_v58, %v848_v38  ;;  %v8356_v37 = vld [vmem:[#allocation15 + $0x1a0] sm:$0xf]  ;;  %v11600_v38 = vld [vmem:[#allocation15 + $0x1ac] sm:$0xf0] }
 0x1f5   :  { %v1038_v47 = vmax.f32 %v1006_v35, 0.0  ;;  %v1039_v48 = vmax.f32 %v1007_v36, 0.0  ;;  %v8629_v27 = vor.u32 %v11668_v11, %v8628_v10  ;;  %2824 = vmatpush.bf16.msrb.mxu0 %v8501_v26  ;;  %v11568_v36 = vld [vmem:[#allocation15 + $0xac] sm:$0xf0] }
 0x1f6   :  { %v1078_v54 = vmax.f32 %v1076_v15, %v1077_v45  ;;  %v1085_v56 = vmax.f32 %v1083_v19, %v1084_v46  ;;  %v1016_v22 = vadd.f32 %v12923_v61, %v965_v50  ;;  %v1017_v24 = vadd.f32 %v12927_v63, %v966_v57 }
 0x1f7   :  { %v1062_v2 = vmax.f32 %v1030_v43, %v1038_v47  ;;  %v1069_v4 = vmax.f32 %v1031_v44, %v1039_v48  ;;  %2837 = vmatpush.bf16.msrb.mxu1 %v8629_v27  ;;  %v8229_v47 = vor.u32 %v11568_v36, %v8228_v32  ;;  %v8357_v48 = vor.u32 %v11600_v38, %v8356_v37 }
 0x1f8   :  { %v1079_v12 = vrot.slane %v1078_v54, 2  ;;  %v1086_v13 = vrot.slane %v1085_v56, 2  ;;  %v791_v14 = vpop.f32.mrf.mxu2  ;;  %v810_v16 = vpop.f32.mrf.mxu3  ;;  %v1048_v41 = vmax.f32 %v1016_v22, 0.0  ;;  %v1049_v43 = vmax.f32 %v1017_v24, 0.0 }
 0x1f9   :  { %v1063_v20 = vrot.slane %v1062_v2, 4  ;;  %v1070_v21 = vrot.slane %v1069_v4, 4  ;;  %v963_v25 = vmul.f32 %v12930_v1, %v791_v14  ;;  %v964_v15 = vmul.f32 %v12933_v3, %v810_v16  ;;  %2799 = vmatpush.bf16.msra.mxu2 %v8229_v47  ;;  %2812 = vmatpush.bf16.msra.mxu3 %v8357_v48 }
 0x1fa   :  { %v1080_v28 = vmax.f32 %v1078_v54, %v1079_v12  ;;  %v1087_v33 = vmax.f32 %v1085_v56, %v1086_v13  ;;  %v12989_v38 = vperm.slane %v12911_v55, 5 }
 0x1fb   :  { %v1064_v29 = vmax.f32 %v1062_v2, %v1063_v20  ;;  %v1071_v30 = vmax.f32 %v1069_v4, %v1070_v21  ;;  %v831_v19 = vpop.f32.mrf.mxu0  ;;  %v850_v31 = vpop.f32.mrf.mxu1  ;;  %v1014_v44 = vadd.f32 %v12938_v6, %v963_v25  ;;  %v1015_v51 = vadd.f32 %v12941_v7, %v964_v15  ;;  %v8484_v4 = vld [vmem:[#allocation15 + $0x2a0] sm:$0xf] }
 0x1fc   :  { %v973_v34 = vmul.f32 %v12914_v49, %v831_v19  ;;  %v974_v35 = vmul.f32 %v12917_v58, %v850_v31  ;;  %v1081_v46 = vrot.slane %v1080_v28, 1  ;;  %v1088_v50 = vrot.slane %v1087_v33, 1 }
 0x1fd   :  { %v1065_v39 = vrot.slane %v1064_v29, 2  ;;  %v1072_v40 = vrot.slane %v1071_v30, 2  ;;  %v8485_v24 = vor.u32 %v11632_v5, %v8484_v4 }
 0x1fe   :  { %v1024_v45 = vadd.f32 %v12923_v61, %v973_v34  ;;  %v1025_v49 = vadd.f32 %v12927_v63, %v974_v35  ;;  %v1046_v63 = vmax.f32 %v1014_v44, 0.0  ;;  %v1082_v8 = vmax.f32 %v1080_v28, %v1081_v46 }
 0x1ff   :  { %v1073_v58 = vmax.f32 %v1071_v30, %v1072_v40  ;;  %v1066_v57 = vmax.f32 %v1064_v29, %v1065_v39  ;;  %v1089_v14 = vmax.f32 %v1087_v33, %v1088_v50  ;;  %v12985_v28 = vperm.slane %v12911_v55, 4  ;;  %2825 = vmatpush.bf16.msrb.mxu0 %v8485_v24 }
 0x200   :  { %v1056_v52 = vmax.f32 %v1024_v45, 0.0  ;;  %v1057_v53 = vmax.f32 %v1025_v49, 0.0  ;;  %v793_v54 = vpop.f32.mrf.mxu2  ;;  %v812_v56 = vpop.f32.mrf.mxu3  ;;  %v12998_v49 = vperm.slane %v12919_v59, 5 }
 0x201   :  { %v1074_v60 = vrot.slane %v1073_v58, 1  ;;  %v971_v62 = vmul.f32 %v12930_v1, %v793_v54  ;;  %v972_v61 = vmul.f32 %v12933_v3, %v812_v56  ;;  %v1047_v1 = vmax.f32 %v1015_v51, 0.0  ;;  %v8612_v51 = vld [vmem:[#allocation15 + $0x3a0] sm:$0xf] }
 0x202   :  { %v1163_v0 = vmax.f32 %v1048_v41, %v1056_v52  ;;  %v1170_v2 = vmax.f32 %v1049_v43, %v1057_v53  ;;  %v1067_v20 = vrot.slane %v1066_v57, 1  ;;  %v1128_v15 = vrot.slane %v1089_v14, 5  ;;  %v11664_v52 = vld [vmem:[#allocation15 + $0x3ac] sm:$0xf0] }
 0x203   :  { %v1075_v9 = vmax.f32 %v1073_v58, %v1074_v60  ;;  %v1022_v10 = vadd.f32 %v12938_v6, %v971_v62  ;;  %v1023_v11 = vadd.f32 %v12941_v7, %v972_v61  ;;  %v900_v12 = vpop.f32.mrf.mxu0  ;;  %v919_v13 = vpop.f32.mrf.mxu1  ;;  %v1127_v6 = vrot.slane %v1082_v8, 6  ;;  %v11564_v60 = vld [vmem:[#allocation15 + $0x8c] sm:$0xf0] }
 0x204   :  { %v1164_v16 = vrot.slane %v1163_v0, 4  ;;  %v1171_v3 = vrot.slane %v1170_v2, 4  ;;  %v953_v27 = vmul.f32 %v12958_v17, %v900_v12  ;;  %v954_v32 = vmul.f32 %v12961_v18, %v919_v13 }
 0x205   :  { %v1054_v21 = vmax.f32 %v1022_v10, 0.0  ;;  %v1055_v22 = vmax.f32 %v1023_v11, 0.0  ;;  %v1126_v29 = vrot.slane %v1075_v9, 7  ;;  %v1068_v35 = vmax.f32 %v1066_v57, %v1067_v20  ;;  %v8340_v9 = vld [vmem:[#allocation15 + $0x180] sm:$0xf] }
 0x206   :  { %v1165_v25 = vmax.f32 %v1163_v0, %v1164_v16  ;;  %v1172_v26 = vmax.f32 %v1170_v2, %v1171_v3  ;;  %v1004_v39 = vadd.f32 %v12965_v23, %v953_v27  ;;  %v12994_v41 = vperm.slane %v12919_v59, 4  ;;  %v8212_v59 = vld [vmem:[#allocation15 + $0x80] sm:$0xf]  ;;  %v11596_v10 = vld [vmem:[#allocation15 + $0x18c] sm:$0xf0] }
 0x207   :  { %v1149_v7 = vmax.f32 %v1046_v63, %v1054_v21  ;;  %v1156_v30 = vmax.f32 %v1047_v1, %v1055_v22  ;;  %v1134_v43 = vsel %vm1133_vm2, %v1068_v35, %v1126_v29  ;;  %v1136_v55 = vsel %vm1135_vm1, %v1127_v6, %v1128_v15  ;;  %v8468_v6 = vld [vmem:[#allocation15 + $0x280] sm:$0xf]  ;;  %v11628_v29 = vld [vmem:[#allocation15 + $0x28c] sm:$0xf0] }
 0x208   :  { %v1166_v19 = vrot.slane %v1165_v25, 2  ;;  %v1173_v31 = vrot.slane %v1172_v26, 2  ;;  %v862_v33 = vpop.f32.mrf.mxu2  ;;  %v881_v34 = vpop.f32.mrf.mxu3  ;;  %v1005_v48 = vadd.f32 %v12973_v42, %v954_v32  ;;  %v13008_v62 = vsel %vm1137_vm3, %v1134_v43, %v1136_v55 }
 0x209   :  { %v1150_v36 = vrot.slane %v1149_v7, 4  ;;  %v1157_v37 = vrot.slane %v1156_v30, 4  ;;  %v951_v40 = vmul.f32 %v12985_v28, %v862_v33  ;;  %v952_v56 = vmul.f32 %v12989_v38, %v881_v34 }
 0x20a   :  { %v1167_v44 = vmax.f32 %v1165_v25, %v1166_v19  ;;  %v13001_v47 = vmax.f32 %v1172_v26, %v1173_v31  ;;  %v1036_v61 = vmax.f32 %v1004_v39, 0.0  ;;  %v8613_v8 = vor.u32 %v11664_v52, %v8612_v51  ;;  %v11660_v39 = vld [vmem:[#allocation15 + $0x38c] sm:$0xf0] }
 0x20b   :  { %v1158_v45 = vmax.f32 %v1156_v30, %v1157_v37  ;;  %v902_v46 = vpop.f32.mrf.mxu0  ;;  %v921_v58 = vpop.f32.mrf.mxu1  ;;  %v1151_v53 = vmax.f32 %v1149_v7, %v1150_v36  ;;  %v1002_v63 = vadd.f32 %v12994_v41, %v951_v40  ;;  %v1037_v12 = vmax.f32 %v1005_v48, 0.0  ;;  %v8596_v37 = vld [vmem:[#allocation15 + $0x380] sm:$0xf] }
 0x20c   :  { %v961_v50 = vmul.f32 %v12958_v17, %v902_v46  ;;  %v962_v57 = vmul.f32 %v12961_v18, %v921_v58  ;;  %v1168_v2 = vrot.slane %v1167_v44, 1  ;;  %v1175_v11 = vrot.slane %v13001_v47, 1  ;;  %2838 = vmatpush.bf16.msrb.mxu1 %v8613_v8  ;;  %v11592_v8 = vld [vmem:[#allocation15 + $0x16c] sm:$0xf0] }
 0x20d   :  { %v1159_v54 = vrot.slane %v1158_v45, 2  ;;  %v8213_v16 = vor.u32 %v11564_v60, %v8212_v59  ;;  %v1152_v3 = vrot.slane %v1151_v53, 2  ;;  %v1003_v20 = vadd.f32 %v12998_v49, %v952_v56  ;;  %v8196_v56 = vld [vmem:[#allocation15 + $0x60] sm:$0xf] }
 0x20e   :  { %v1012_v0 = vadd.f32 %v12965_v23, %v961_v50  ;;  %v1013_v5 = vadd.f32 %v12973_v42, %v962_v57  ;;  %v1034_v24 = vmax.f32 %v1002_v63, 0.0  ;;  %v8341_v27 = vor.u32 %v11596_v10, %v8340_v9  ;;  %v11560_v57 = vld [vmem:[#allocation15 + $0x6c] sm:$0xf0] }
 0x20f   :  { %v1160_v4 = vmax.f32 %v1158_v45, %v1159_v54  ;;  %2800 = vmatpush.bf16.msra.mxu2 %v8213_v16  ;;  %v13017_v7 = vmax.f32 %v1167_v44, %v1168_v2  ;;  %v1035_v40 = vmax.f32 %v1003_v20, 0.0  ;;  %v8469_v45 = vor.u32 %v11628_v29, %v8468_v6 }
 0x210   :  { %v1044_v13 = vmax.f32 %v1012_v0, 0.0  ;;  %v864_v14 = vpop.f32.mrf.mxu2  ;;  %v883_v1 = vpop.f32.mrf.mxu3  ;;  %v1045_v21 = vmax.f32 %v1013_v5, 0.0  ;;  %2813 = vmatpush.bf16.msra.mxu3 %v8341_v27  ;;  %v13029_v50 = vmax.f32 %v1151_v53, %v1152_v3  ;;  %v8597_v54 = vor.u32 %v11660_v39, %v8596_v37  ;;  %v8324_v5 = vld [vmem:[#allocation15 + $0x160] sm:$0xf] }
 0x211   :  { %v959_v22 = vmul.f32 %v12985_v28, %v864_v14  ;;  %v960_v26 = vmul.f32 %v12989_v38, %v883_v1  ;;  %v1161_v30 = vrot.slane %v1160_v4, 1  ;;  %2826 = vmatpush.bf16.msrb.mxu0 %v8469_v45  ;;  %v8197_v1 = vor.u32 %v11560_v57, %v8196_v56 }
 0x212   :  { %v1104_v25 = vmax.f32 %v1036_v61, %v1044_v13  ;;  %v1111_v15 = vmax.f32 %v1037_v12, %v1045_v21  ;;  %2839 = vmatpush.bf16.msrb.mxu1 %v8597_v54 }
 0x213   :  { %v1010_v19 = vadd.f32 %v12994_v41, %v959_v22  ;;  %v905_v31 = vpop.f32.mrf.mxu0  ;;  %v924_v32 = vpop.f32.mrf.mxu1  ;;  %v1011_v34 = vadd.f32 %v12998_v49, %v960_v26  ;;  %v13031_v59 = vmax.f32 %v1160_v4, %v1161_v30  ;;  %2801 = vmatpush.bf16.msra.mxu2 %v8197_v1  ;;  %v11624_v30 = vld [vmem:[#allocation15 + $0x26c] sm:$0xf0] }
 0x214   :  { %v1105_v33 = vrot.slane %v1104_v25, 4  ;;  %v969_v35 = vmul.f32 %v12958_v17, %v905_v31  ;;  %v970_v36 = vmul.f32 %v12961_v18, %v924_v32  ;;  %v1112_v43 = vrot.slane %v1111_v15, 4  ;;  %v11552_v1 = vld [vmem:[#allocation15 + $0x2c] sm:$0xf0] }
 0x215   :  { %v1042_v44 = vmax.f32 %v1010_v19, 0.0  ;;  %v1043_v58 = vmax.f32 %v1011_v34, 0.0  ;;  %v11656_v34 = vld [vmem:[#allocation15 + $0x36c] sm:$0xf0] }
 0x216   :  { %v1106_v46 = vmax.f32 %v1104_v25, %v1105_v33  ;;  %v13024_v55 = vadd.f32 %v12965_v23, %v969_v35  ;;  %v13027_v48 = vadd.f32 %v12973_v42, %v970_v36  ;;  %v1113_v51 = vmax.f32 %v1111_v15, %v1112_v43  ;;  %v8452_v25 = vld [vmem:[#allocation15 + $0x260] sm:$0xf] }
 0x217   :  { %v1090_v52 = vmax.f32 %v1034_v24, %v1042_v44  ;;  %v1097_v61 = vmax.f32 %v1035_v40, %v1043_v58  ;;  %v8325_v24 = vor.u32 %v11592_v8, %v8324_v5  ;;  %v8580_v15 = vld [vmem:[#allocation15 + $0x360] sm:$0xf]  ;;  %v8453_v45 = vor.u32 %v11624_v30, %v8452_v25  ;;  %v11648_v30 = vld [vmem:[#allocation15 + $0x32c] sm:$0xf0] }
 0x218   :  { %v1107_v60 = vrot.slane %v1106_v46, 2  ;;  %v1052_v63 = vmax.f32 %v13024_v55, 0.0  ;;  %v867_v0 = vpop.f32.mrf.mxu2  ;;  %v886_v2 = vpop.f32.mrf.mxu3  ;;  %v1114_v9 = vrot.slane %v1113_v51, 2  ;;  %v1053_v10 = vmax.f32 %v13027_v48, 0.0  ;;  %v8308_v58 = vld [vmem:[#allocation15 + $0x140] sm:$0xf] }
 0x219   :  { %v1091_v53 = vrot.slane %v1090_v52, 4  ;;  %v967_v12 = vmul.f32 %v12985_v28, %v867_v0  ;;  %v1098_v14 = vrot.slane %v1097_v61, 4  ;;  %v968_v4 = vmul.f32 %v12989_v38, %v886_v2  ;;  %2814 = vmatpush.bf16.msra.mxu3 %v8325_v24  ;;  %v11620_v0 = vld [vmem:[#allocation15 + $0x24c] sm:$0xf0]  ;;  %2827 = vmatpush.bf16.msrb.mxu0 %v8453_v45  ;;  %v8420_v25 = vld [vmem:[#allocation15 + $0x220] sm:$0xf] }
 0x21a   :  { %v1108_v13 = vmax.f32 %v1106_v46, %v1107_v60  ;;  %v1115_v16 = vmax.f32 %v1113_v51, %v1114_v9  ;;  %v11556_v46 = vld [vmem:[#allocation15 + $0x4c] sm:$0xf0]  ;;  %v8581_v60 = vor.u32 %v11656_v34, %v8580_v15  ;;  %v8564_v9 = vld [vmem:[#allocation15 + $0x340] sm:$0xf] }
 0x21b   :  { %v1092_v3 = vmax.f32 %v1090_v52, %v1091_v53  ;;  %v13038_v20 = vadd.f32 %v12994_v41, %v967_v12  ;;  %v907_v21 = vpop.f32.mrf.mxu0  ;;  %v926_v22 = vpop.f32.mrf.mxu1  ;;  %v1099_v27 = vmax.f32 %v1097_v61, %v1098_v14  ;;  %v13041_v6 = vadd.f32 %v12998_v49, %v968_v4  ;;  %v11588_v51 = vld [vmem:[#allocation15 + $0x14c] sm:$0xf0]  ;;  %v8436_v61 = vld [vmem:[#allocation15 + $0x240] sm:$0xf] }
 0x21c   :  { %v1109_v26 = vrot.slane %v1108_v13, 1  ;;  %v977_v29 = vmul.f32 %v12958_v17, %v907_v21  ;;  %v1116_v19 = vrot.slane %v1115_v16, 1  ;;  %v978_v33 = vmul.f32 %v12961_v18, %v926_v22  ;;  %v8180_v17 = vld [vmem:[#allocation15 + $0x40] sm:$0xf]  ;;  %2840 = vmatpush.bf16.msrb.mxu1 %v8581_v60  ;;  %v11584_v24 = vld [vmem:[#allocation15 + $0x12c] sm:$0xf0] }
 0x21d   :  { %v1093_v31 = vrot.slane %v1092_v3, 2  ;;  %v1050_v32 = vmax.f32 %v13038_v20, 0.0  ;;  %v1100_v36 = vrot.slane %v1099_v27, 2  ;;  %v1051_v37 = vmax.f32 %v13041_v6, 0.0  ;;  %v8164_v4 = vld [vmem:[#allocation15 + $0x20] sm:$0xf] }
 0x21e   :  { %v1110_v35 = vmax.f32 %v1108_v13, %v1109_v26  ;;  %v1028_v39 = vadd.f32 %v12965_v23, %v977_v29  ;;  %v1117_v40 = vmax.f32 %v1115_v16, %v1116_v19  ;;  %v1029_v44 = vadd.f32 %v12973_v42, %v978_v33  ;;  %v11652_v42 = vld [vmem:[#allocation15 + $0x34c] sm:$0xf0]  ;;  %v8292_v16 = vld [vmem:[#allocation15 + $0x120] sm:$0xf] }
 0x21f   :  { %v1094_v43 = vmax.f32 %v1092_v3, %v1093_v31  ;;  %v1101_v52 = vmax.f32 %v1099_v27, %v1100_v36  ;;  %v8181_v14 = vor.u32 %v11556_v46, %v8180_v17  ;;  %v11616_v26 = vld [vmem:[#allocation15 + $0x22c] sm:$0xf0]  ;;  %v8309_v27 = vor.u32 %v11588_v51, %v8308_v58  ;;  %v8548_v29 = vld [vmem:[#allocation15 + $0x320] sm:$0xf] }
 0x220   :  { %v1131_v18 = vrot.slane %v1110_v35, 2  ;;  %v1060_v54 = vmax.f32 %v1028_v39, 0.0  ;;  %v869_v56 = vpop.f32.mrf.mxu2  ;;  %v888_v57 = vpop.f32.mrf.mxu3  ;;  %v1132_v2 = vrot.slane %v1117_v40, 1  ;;  %v1061_v5 = vmax.f32 %v1029_v44, 0.0  ;;  %v8148_v34 = vld [vmem:[#allocation15] sm:$0xf] }
 0x221   :  { %v1095_v23 = vrot.slane %v1094_v43, 1  ;;  %v975_v8 = vmul.f32 %v12985_v28, %v869_v56  ;;  %v1102_v53 = vrot.slane %v1101_v52, 1  ;;  %v976_v13 = vmul.f32 %v12989_v38, %v888_v57  ;;  %2802 = vmatpush.bf16.msra.mxu2 %v8181_v14  ;;  %v11548_v48 = vld [vmem:[#allocation15 + $0xc] sm:$0xf0]  ;;  %2815 = vmatpush.bf16.msra.mxu3 %v8309_v27  ;;  %v8276_v39 = vld [vmem:[#allocation15 + $0x100] sm:$0xf] }
 0x222   :  { %v1191_v12 = vmax.f32 %v1052_v63, %v1060_v54  ;;  %v1142_v3 = vsel %vm1141_vm4, %v1131_v18, %v1132_v2  ;;  %v1198_v28 = vmax.f32 %v1053_v10, %v1061_v5  ;;  %v8437_v33 = vor.u32 %v11620_v0, %v8436_v61  ;;  %v11580_v17 = vld [vmem:[#allocation15 + $0x10c] sm:$0xf0]  ;;  %v8404_v45 = vld [vmem:[#allocation15 + $0x200] sm:$0xf] }
 0x223   :  { %v1096_v21 = vmax.f32 %v1094_v43, %v1095_v23  ;;  %v1026_v22 = vadd.f32 %v12994_v41, %v975_v8  ;;  %v1103_v55 = vmax.f32 %v1101_v52, %v1102_v53  ;;  %v1027_v38 = vadd.f32 %v12998_v49, %v976_v13  ;;  %v11612_v46 = vld [vmem:[#allocation15 + $0x20c] sm:$0xf0]  ;;  %v8532_v58 = vld [vmem:[#allocation15 + $0x300] sm:$0xf] }
 0x224   :  { %v1192_v63 = vrot.slane %v1191_v12, 4  ;;  %v1199_v19 = vrot.slane %v1198_v28, 4  ;;  %v8565_v36 = vor.u32 %v11652_v42, %v8564_v9  ;;  %2828 = vmatpush.bf16.msrb.mxu0 %v8437_v33  ;;  %v8165_v43 = vor.u32 %v11552_v1, %v8164_v4  ;;  %v11644_v51 = vld [vmem:[#allocation15 + $0x30c] sm:$0xf0]  ;;  %v8772_v57 = vld [vmem:[#allocation15 + $0x4e0] sm:$0xf] }
 0x225   :  { %v1129_v15 = vrot.slane %v1096_v21, 4  ;;  %v1058_v31 = vmax.f32 %v1026_v22, 0.0  ;;  %v1130_v10 = vrot.slane %v1103_v55, 3  ;;  %v1059_v41 = vmax.f32 %v1027_v38, 0.0  ;;  %v11704_v60 = vld [vmem:[#allocation15 + $0x4ec] sm:$0xf0] }
 0x226   :  { %v1193_v35 = vmax.f32 %v1191_v12, %v1192_v63  ;;  %v1200_v40 = vmax.f32 %v1198_v28, %v1199_v19  ;;  %v8293_v44 = vor.u32 %v11584_v24, %v8292_v16  ;;  %2841 = vmatpush.bf16.msrb.mxu1 %v8565_v36  ;;  %v8421_v56 = vor.u32 %v11616_v26, %v8420_v25  ;;  %v8900_v61 = vld [vmem:[#allocation15 + $0x5e0] sm:$0xf]  ;;  %v11736_v20 = vld [vmem:[#allocation15 + $0x5ec] sm:$0xf0] }
 0x227   :  { %v1177_v49 = vmax.f32 %v1050_v32, %v1058_v31  ;;  %v1140_v18 = vsel %vm1139_vm5, %v1129_v15, %v1130_v10  ;;  %v1184_v54 = vmax.f32 %v1051_v37, %v1059_v41  ;;  %2803 = vmatpush.bf16.msra.mxu2 %v8165_v43  ;;  %v8549_v23 = vor.u32 %v11648_v30, %v8548_v29  ;;  %v9028_v5 = vld [vmem:[#allocation15 + $0x6e0] sm:$0xf]  ;;  %v11768_v8 = vld [vmem:[#allocation15 + $0x6ec] sm:$0xf0] }
 0x228   :  { %v1194_v52 = vrot.slane %v1193_v35, 2  ;;  %v1144_v32 = vsel %vm1143_vm6, %v1140_v18, %v1142_v3  ;;  %v1201_v0 = vrot.slane %v1200_v40, 2  ;;  %2816 = vmatpush.bf16.msra.mxu3 %v8293_v44  ;;  %v8149_v37 = vor.u32 %v11548_v48, %v8148_v34  ;;  %v9156_v53 = vld [vmem:[#allocation15 + $0x7e0] sm:$0xf]  ;;  %v11800_v12 = vld [vmem:[#allocation15 + $0x7ec] sm:$0xf0]  ;;  %2829 = vmatpush.bf16.msrb.mxu0 %v8421_v56 }
 0x229   :  { %v1178_v2 = vrot.slane %v1177_v49, 4  ;;  %v1146_v9 = vsel %vm1145_vm7, %v13008_v62, %v1144_v32  ;;  %v1185_v6 = vrot.slane %v1184_v54, 4  ;;  %v8277_v4 = vor.u32 %v11580_v17, %v8276_v39  ;;  %v8756_v1 = vld [vmem:[#allocation15 + $0x4c0] sm:$0xf]  ;;  %v11700_v16 = vld [vmem:[#allocation15 + $0x4cc] sm:$0xf0] }
 0x22a   :  { %v1195_v42 = vmax.f32 %v1193_v35, %v1194_v52  ;;  %1148 = vst [vmem:[#allocation2] ss:$2 sm:$0xff] %v1146_v9  ;;  %v1202_v13 = vmax.f32 %v1200_v40, %v1201_v0  ;;  %2842 = vmatpush.bf16.msrb.mxu1 %v8549_v23  ;;  %v8405_v28 = vor.u32 %v11612_v46, %v8404_v45  ;;  %v8884_v24 = vld [vmem:[#allocation15 + $0x5c0] sm:$0xf]  ;;  %v11732_v62 = vld [vmem:[#allocation15 + $0x5cc] sm:$0xf0] }
 0x22b   :  { %v1179_v14 = vmax.f32 %v1177_v49, %v1178_v2  ;;  %v1186_v21 = vmax.f32 %v1184_v54, %v1185_v6  ;;  %v8533_v22 = vor.u32 %v11644_v51, %v8532_v58  ;;  %2804 = vmatpush.bf16.msra.mxu2 %v8149_v37  ;;  %v8773_v55 = vor.u32 %v11704_v60, %v8772_v57  ;;  %v9012_v38 = vld [vmem:[#allocation15 + $0x6c0] sm:$0xf]  ;;  %v11764_v27 = vld [vmem:[#allocation15 + $0x6cc] sm:$0xf0] }
 0x22c   :  { %v1196_v3 = vrot.slane %v1195_v42, 1  ;;  %v1203_v25 = vrot.slane %v1202_v13, 1  ;;  %v8901_v63 = vor.u32 %v11736_v20, %v8900_v61  ;;  %v1176_v29 = vmax.f32 %v13001_v47, %v1175_v11  ;;  %2817 = vmatpush.bf16.msra.mxu3 %v8277_v4  ;;  %v9140_v31 = vld [vmem:[#allocation15 + $0x7c0] sm:$0xf]  ;;  %v11796_v33 = vld [vmem:[#allocation15 + $0x7cc] sm:$0xf0]  ;;  %2830 = vmatpush.bf16.msrb.mxu0 %v8405_v28 }
 0x22d   :  { %v1180_v26 = vrot.slane %v1179_v14, 2  ;;  %v1187_v30 = vrot.slane %v1186_v21, 2  ;;  %v9029_v15 = vor.u32 %v11768_v8, %v9028_v5  ;;  %v9157_v19 = vor.u32 %v11800_v12, %v9156_v53  ;;  %v8740_v41 = vld [vmem:[#allocation15 + $0x4a0] sm:$0xf]  ;;  %v11696_v47 = vld [vmem:[#allocation15 + $0x4ac] sm:$0xf0] }
 0x22e   :  { %v1154_v34 = vrot.slane %v13029_v50, 1  ;;  %v1197_v48 = vmax.f32 %v1195_v42, %v1196_v3  ;;  %v8757_v35 = vor.u32 %v11700_v16, %v8756_v1  ;;  %v1204_v36 = vmax.f32 %v1202_v13, %v1203_v25  ;;  %2843 = vmatpush.bf16.msrb.mxu1 %v8533_v22  ;;  %v8868_v11 = vld [vmem:[#allocation15 + $0x5a0] sm:$0xf]  ;;  %v11728_v40 = vld [vmem:[#allocation15 + $0x5ac] sm:$0xf0] }
 0x22f   :  { %v1181_v10 = vmax.f32 %v1179_v14, %v1180_v26  ;;  %2849 = vmatpush.bf16.msrb.mxu2 %v8773_v55  ;;  %v1188_v39 = vmax.f32 %v1186_v21, %v1187_v30  ;;  %v8885_v17 = vor.u32 %v11732_v62, %v8884_v24  ;;  %v1213_v49 = vrot.slane %v13031_v59, 7  ;;  %v8996_v46 = vld [vmem:[#allocation15 + $0x6a0] sm:$0xf]  ;;  %v11760_v58 = vld [vmem:[#allocation15 + $0x6ac] sm:$0xf0] }
 0x230   :  { %2862 = vmatpush.bf16.msrb.mxu3 %v8901_v63  ;;  %2875 = vmatpush.bf16.msra.mxu0 %v9029_v15  ;;  %v9013_v44 = vor.u32 %v11764_v27, %v9012_v38  ;;  %v9141_v45 = vor.u32 %v11796_v33, %v9140_v31  ;;  %v1214_v51 = vrot.slane %v13017_v7, 6  ;;  %v9124_v52 = vld [vmem:[#allocation15 + $0x7a0] sm:$0xf]  ;;  %v11792_v54 = vld [vmem:[#allocation15 + $0x7ac] sm:$0xf0]  ;;  %v1215_v56 = vrot.slane %v1176_v29, 5 }
 0x231   :  { %v1182_v43 = vrot.slane %v1181_v10, 1  ;;  %v1189_v18 = vrot.slane %v1188_v39, 1  ;;  %v1155_v57 = vmax.f32 %v13029_v50, %v1154_v34  ;;  %v8741_v61 = vor.u32 %v11696_v47, %v8740_v41  ;;  %v8724_v20 = vld [vmem:[#allocation15 + $0x480] sm:$0xf]  ;;  %v11692_v59 = vld [vmem:[#allocation15 + $0x48c] sm:$0xf0] }
 0x232   :  { %2888 = vmatpush.bf16.msra.mxu1 %v9157_v19  ;;  %v1218_v32 = vrot.slane %v1197_v48, 2  ;;  %v1219_v0 = vrot.slane %v1204_v36, 1  ;;  %v8869_v23 = vor.u32 %v11728_v40, %v8868_v11  ;;  %v8852_v5 = vld [vmem:[#allocation15 + $0x580] sm:$0xf]  ;;  %v11724_v8 = vld [vmem:[#allocation15 + $0x58c] sm:$0xf0]  ;;  %v8997_v42 = vor.u32 %v11760_v58, %v8996_v46 }
 0x233   :  { %v1183_v60 = vmax.f32 %v1181_v10, %v1182_v43  ;;  %2850 = vmatpush.bf16.msrb.mxu2 %v8757_v35  ;;  %v1190_v2 = vmax.f32 %v1188_v39, %v1189_v18  ;;  %v1220_v7 = vsel %vm1133_vm2, %v1155_v57, %v1213_v49  ;;  %v9125_v6 = vor.u32 %v11792_v54, %v9124_v52  ;;  %v8980_v50 = vld [vmem:[#allocation15 + $0x680] sm:$0xf]  ;;  %v11756_v37 = vld [vmem:[#allocation15 + $0x68c] sm:$0xf0] }
 0x234   :  { %2863 = vmatpush.bf16.msrb.mxu3 %v8885_v17  ;;  %2876 = vmatpush.bf16.msra.mxu0 %v9013_v44  ;;  %v9108_v12 = vld [vmem:[#allocation15 + $0x780] sm:$0xf]  ;;  %v11788_v13 = vld [vmem:[#allocation15 + $0x78c] sm:$0xf0]  ;;  %v1221_v14 = vsel %vm1135_vm1, %v1214_v51, %v1215_v56  ;;  %v8725_v4 = vor.u32 %v11692_v59, %v8724_v20  ;;  %v1224_v16 = vsel %vm1141_vm4, %v1218_v32, %v1219_v0 }
 0x235   :  { %v1216_v9 = vrot.slane %v1183_v60, 4  ;;  %v1217_v53 = vrot.slane %v1190_v2, 3  ;;  %v1222_v1 = vsel %vm1137_vm3, %v1220_v7, %v1221_v14  ;;  %v8853_v21 = vor.u32 %v11724_v8, %v8852_v5  ;;  %v8708_v28 = vld [vmem:[#allocation15 + $0x460] sm:$0xf]  ;;  %v11688_v22 = vld [vmem:[#allocation15 + $0x46c] sm:$0xf0] }
 0x236   :  { %2889 = vmatpush.bf16.msra.mxu1 %v9141_v45  ;;  %v8981_v62 = vor.u32 %v11756_v37, %v8980_v50  ;;  %v9109_v25 = vor.u32 %v11788_v13, %v9108_v12  ;;  %v8836_v26 = vld [vmem:[#allocation15 + $0x560] sm:$0xf]  ;;  %v11720_v55 = vld [vmem:[#allocation15 + $0x56c] sm:$0xf0]  ;;  %v8709_v15 = vor.u32 %v11688_v22, %v8708_v28  ;;  %v11606_v37 = vld [vmem:[#allocation15 + $0x1e4] sm:$0xf] }
 0x237   :  { %2851 = vmatpush.bf16.msrb.mxu2 %v8741_v61  ;;  %v1223_v3 = vsel %vm1139_vm5, %v1216_v9, %v1217_v53  ;;  %v8964_v63 = vld [vmem:[#allocation15 + $0x660] sm:$0xf]  ;;  %v11752_v27 = vld [vmem:[#allocation15 + $0x66c] sm:$0xf0]  ;;  %v8837_v19 = vor.u32 %v11720_v55, %v8836_v26  ;;  %v8390_v53 = vld [vmem:[#allocation15 + $0x1f0] sm:$0xf0] }
 0x238   :  { %2864 = vmatpush.bf16.msrb.mxu3 %v8869_v23  ;;  %v1225_v24 = vsel %vm1143_vm6, %v1223_v3, %v1224_v16  ;;  %2877 = vmatpush.bf16.msra.mxu0 %v8997_v42  ;;  %v9092_v29 = vld [vmem:[#allocation15 + $0x760] sm:$0xf]  ;;  %v11784_v30 = vld [vmem:[#allocation15 + $0x76c] sm:$0xf0]  ;;  %v8965_v34 = vor.u32 %v11752_v27, %v8964_v63  ;;  %v11574_v42 = vld [vmem:[#allocation15 + $0xe4] sm:$0xf]  ;;  %v8393_v63 = vor.u32 %v11606_v37, %v8390_v53 }
 0x239   :  { %v1226_v38 = vsel %vm1145_vm7, %v1222_v1, %v1225_v24  ;;  %v8692_v31 = vld [vmem:[#allocation15 + $0x440] sm:$0xf]  ;;  %v11684_v33 = vld [vmem:[#allocation15 + $0x44c] sm:$0xf0]  ;;  %v9093_v48 = vor.u32 %v11784_v30, %v9092_v29  ;;  %v11638_v12 = vld [vmem:[#allocation15 + $0x2e4] sm:$0xf] }
 0x23a   :  { %2890 = vmatpush.bf16.msra.mxu1 %v9125_v6  ;;  %1229 = vst [vmem:[#allocation2 + $0x1] ss:$2 sm:$0xff] %v1226_v38  ;;  %v8820_v10 = vld [vmem:[#allocation15 + $0x540] sm:$0xf]  ;;  %v11716_v35 = vld [vmem:[#allocation15 + $0x54c] sm:$0xf0]  ;;  %v8693_v47 = vor.u32 %v11684_v33, %v8692_v31 }
 0x23b   :  { %2852 = vmatpush.bf16.msrb.mxu2 %v8725_v4  ;;  %v8948_v41 = vld [vmem:[#allocation15 + $0x640] sm:$0xf]  ;;  %v11748_v36 = vld [vmem:[#allocation15 + $0x64c] sm:$0xf0]  ;;  %v8821_v40 = vor.u32 %v11716_v35, %v8820_v10  ;;  %v8262_v6 = vld [vmem:[#allocation15 + $0xf0] sm:$0xf0] }
 0x23c   :  { %2865 = vmatpush.bf16.msrb.mxu3 %v8853_v21  ;;  %2878 = vmatpush.bf16.msra.mxu0 %v8981_v62  ;;  %v9076_v39 = vld [vmem:[#allocation15 + $0x740] sm:$0xf]  ;;  %v11780_v17 = vld [vmem:[#allocation15 + $0x74c] sm:$0xf0]  ;;  %v8949_v45 = vor.u32 %v11748_v36, %v8948_v41  ;;  %v8518_v4 = vld [vmem:[#allocation15 + $0x2f0] sm:$0xf0]  ;;  %v8265_v55 = vor.u32 %v11574_v42, %v8262_v6 }
 0x23d   :  { %v8676_v11 = vld [vmem:[#allocation15 + $0x420] sm:$0xf]  ;;  %v11680_v49 = vld [vmem:[#allocation15 + $0x42c] sm:$0xf0]  ;;  %v9077_v46 = vor.u32 %v11780_v17, %v9076_v39  ;;  %v11670_v1 = vld [vmem:[#allocation15 + $0x3e4] sm:$0xf]  ;;  %v8521_v29 = vor.u32 %v11638_v12, %v8518_v4 }
 0x23e   :  { %2891 = vmatpush.bf16.msra.mxu1 %v9109_v25  ;;  %v8804_v43 = vld [vmem:[#allocation15 + $0x520] sm:$0xf]  ;;  %v11712_v44 = vld [vmem:[#allocation15 + $0x52c] sm:$0xf0]  ;;  %v8677_v57 = vor.u32 %v11680_v49, %v8676_v11  ;;  %v8646_v16 = vld [vmem:[#allocation15 + $0x3f0] sm:$0xf0] }
 0x23f   :  { %2853 = vmatpush.bf16.msrb.mxu2 %v8709_v15  ;;  %v8932_v58 = vld [vmem:[#allocation15 + $0x620] sm:$0xf]  ;;  %v11744_v51 = vld [vmem:[#allocation15 + $0x62c] sm:$0xf0]  ;;  %v8805_v60 = vor.u32 %v11712_v44, %v8804_v43  ;;  %v11570_v38 = vld [vmem:[#allocation15 + $0xc4] sm:$0xf]  ;;  %v8649_v30 = vor.u32 %v11670_v1, %v8646_v16 }
 0x240   :  { %2866 = vmatpush.bf16.msrb.mxu3 %v8837_v19  ;;  %2879 = vmatpush.bf16.msra.mxu0 %v8965_v34  ;;  %v9060_v18 = vld [vmem:[#allocation15 + $0x720] sm:$0xf]  ;;  %v11776_v52 = vld [vmem:[#allocation15 + $0x72c] sm:$0xf0]  ;;  %v8933_v59 = vor.u32 %v11744_v51, %v8932_v58  ;;  %v8246_v27 = vld [vmem:[#allocation15 + $0xd0] sm:$0xf0] }
 0x241   :  { %v1230_v54 = vld [vmem:[#allocation2] sm:$0xff]  ;;  %v1231_v56 = vld [vmem:[#allocation2 + $0x8] sm:$0xff]  ;;  %v11676_v20 = vld [vmem:[#allocation15 + $0x40c] sm:$0xf0]  ;;  %v9061_v32 = vor.u32 %v11776_v52, %v9060_v18  ;;  %v8249_v10 = vor.u32 %v11570_v38, %v8246_v27 }
 0x242   :  { %2892 = vmatpush.bf16.msra.mxu1 %v9093_v48  ;;  %1234 = vst [vmem:[#allocation1] ss:$4 sm:$0xff] %v1230_v54  ;;  %v8660_v61 = vld [vmem:[#allocation15 + $0x400] sm:$0xf]  ;;  %v11708_v2 = vld [vmem:[#allocation15 + $0x50c] sm:$0xf0] }
 0x243   :  { %2854 = vmatpush.bf16.msrb.mxu2 %v8693_v47  ;;  %1236 = vst [vmem:[#allocation1 + $0x20] ss:$4 sm:$0xff] %v1231_v56  ;;  %v8788_v0 = vld [vmem:[#allocation15 + $0x500] sm:$0xf]  ;;  %v11740_v5 = vld [vmem:[#allocation15 + $0x60c] sm:$0xf0]  ;;  %v8661_v9 = vor.u32 %v11676_v20, %v8660_v61 }
 0x244   :  { %2867 = vmatpush.bf16.msrb.mxu3 %v8821_v40  ;;  %2880 = vmatpush.bf16.msra.mxu0 %v8949_v45  ;;  %v8916_v23 = vld [vmem:[#allocation15 + $0x600] sm:$0xf]  ;;  %v11772_v7 = vld [vmem:[#allocation15 + $0x70c] sm:$0xf0]  ;;  %v8789_v50 = vor.u32 %v11708_v2, %v8788_v0  ;;  %v11602_v15 = vld [vmem:[#allocation15 + $0x1c4] sm:$0xf] }
 0x245   :  { %v9044_v8 = vld [vmem:[#allocation15 + $0x700] sm:$0xf]  ;;  %v8917_v13 = vor.u32 %v11740_v5, %v8916_v23  ;;  %v8374_v19 = vld [vmem:[#allocation15 + $0x1d0] sm:$0xf0]  ;;  %v11634_v31 = vld [vmem:[#allocation15 + $0x2c4] sm:$0xf] }
 0x246   :  { %2893 = vmatpush.bf16.msra.mxu1 %v9077_v46  ;;  %v9045_v14 = vor.u32 %v11772_v7, %v9044_v8  ;;  %v8502_v33 = vld [vmem:[#allocation15 + $0x2d0] sm:$0xf0]  ;;  %v11666_v34 = vld [vmem:[#allocation15 + $0x3c4] sm:$0xf]  ;;  %v8377_v35 = vor.u32 %v11602_v15, %v8374_v19 }
 0x247   :  { %2855 = vmatpush.bf16.msrb.mxu2 %v8677_v57  ;;  %v8630_v48 = vld [vmem:[#allocation15 + $0x3d0] sm:$0xf0]  ;;  %v11566_v41 = vld [vmem:[#allocation15 + $0xa4] sm:$0xf]  ;;  %v8505_v39 = vor.u32 %v11634_v31, %v8502_v33 }
 0x248   :  { %2868 = vmatpush.bf16.msrb.mxu3 %v8805_v60  ;;  %2881 = vmatpush.bf16.msra.mxu0 %v8933_v59  ;;  %v8230_v36 = vld [vmem:[#allocation15 + $0xb0] sm:$0xf0]  ;;  %v8633_v17 = vor.u32 %v11666_v34, %v8630_v48  ;;  %v11598_v47 = vld [vmem:[#allocation15 + $0x1a4] sm:$0xf] }
 0x249   :  { %v1237_v3 = vld.sshfl [vmem:[#allocation1] sm:$0xff pattern:$0x73625140]  ;;  %v1238_v21 = vld.sshfl [vmem:[#allocation1 + $0x8] sm:$0xff pattern:$0x73625140]  ;;  %v8233_v46 = vor.u32 %v11566_v41, %v8230_v36 }
 0x24a   :  { %2894 = vmatpush.bf16.msra.mxu1 %v9061_v32  ;;  %v13080_v28 = vpack.c.bf16 %v1237_v3, %v1237_v3  ;;  %v13082_v22 = vpack.c.bf16 %v1238_v21, %v1238_v21  ;;  %v1239_v24 = vld.sshfl [vmem:[#allocation1 + $0x10] sm:$0xff pattern:$0x73625140]  ;;  %v1240_v62 = vld.sshfl [vmem:[#allocation1 + $0x18] sm:$0xff pattern:$0x73625140] }
 0x24b   :  { %2856 = vmatpush.bf16.msrb.mxu2 %v8661_v9  ;;  %v13084_v25 = vpack.c.bf16 %v1239_v24, %v1239_v24  ;;  %v13086_v26 = vpack.c.bf16 %v1240_v62, %v1240_v62  ;;  %v8358_v11 = vld [vmem:[#allocation15 + $0x1b0] sm:$0xf0]  ;;  %v11630_v40 = vld [vmem:[#allocation15 + $0x2a4] sm:$0xf] }
 0x24c   :  { %2869 = vmatpush.bf16.msrb.mxu3 %v8789_v50  ;;  %2882 = vmatpush.bf16.msra.mxu0 %v8917_v13  ;;  %v8486_v49 = vld [vmem:[#allocation15 + $0x2b0] sm:$0xf0]  ;;  %v11662_v43 = vld [vmem:[#allocation15 + $0x3a4] sm:$0xf]  ;;  %v8361_v58 = vor.u32 %v11598_v47, %v8358_v11 }
 0x24d   :  { %2805 = vmatmul.bf16.vlgmr.msra.gmra.mxu2 %v13080_v28  ;;  %2818 = vmatmul.bf16.vlgmr.msra.gmra.mxu3 %v13082_v22  ;;  %v8614_v44 = vld [vmem:[#allocation15 + $0x3b0] sm:$0xf0]  ;;  %v11562_v45 = vld [vmem:[#allocation15 + $0x84] sm:$0xf]  ;;  %v8489_v54 = vor.u32 %v11630_v40, %v8486_v49 }
 0x24e   :  { %2895 = vmatpush.bf16.msra.mxu1 %v9045_v14  ;;  %2831 = vmatmul.bf16.vlgmr.msrb.gmra.mxu0 %v13084_v25  ;;  %v8214_v51 = vld [vmem:[#allocation15 + $0x90] sm:$0xf0]  ;;  %v11594_v18 = vld [vmem:[#allocation15 + $0x184] sm:$0xf]  ;;  %v8617_v56 = vor.u32 %v11662_v43, %v8614_v44 }
 0x24f   :  { %2844 = vmatmul.bf16.vlgmr.msrb.gmra.mxu1 %v13086_v26  ;;  %2901 = vmatpush.bf16.msra.mxu2 %v8265_v55  ;;  %v8342_v52 = vld [vmem:[#allocation15 + $0x190] sm:$0xf0]  ;;  %v11626_v57 = vld [vmem:[#allocation15 + $0x284] sm:$0xf]  ;;  %v8217_v5 = vor.u32 %v11562_v45, %v8214_v51 }
 0x250   :  { %2914 = vmatpush.bf16.msra.mxu3 %v8393_v63  ;;  %2927 = vmatpush.bf16.msrb.mxu0 %v8521_v29  ;;  %v8470_v60 = vld [vmem:[#allocation15 + $0x290] sm:$0xf0]  ;;  %v11658_v61 = vld [vmem:[#allocation15 + $0x384] sm:$0xf]  ;;  %v8345_v8 = vor.u32 %v11594_v18, %v8342_v52 }
 0x251   :  { %v8598_v20 = vld [vmem:[#allocation15 + $0x390] sm:$0xf0]  ;;  %v11558_v59 = vld [vmem:[#allocation15 + $0x64] sm:$0xf]  ;;  %v8473_v6 = vor.u32 %v11626_v57, %v8470_v60 }
 0x252   :  { %2940 = vmatpush.bf16.msrb.mxu1 %v8649_v30  ;;  %v8198_v32 = vld [vmem:[#allocation15 + $0x70] sm:$0xf0]  ;;  %v11590_v0 = vld [vmem:[#allocation15 + $0x164] sm:$0xf]  ;;  %v8601_v50 = vor.u32 %v11658_v61, %v8598_v20 }
 0x253   :  { %2902 = vmatpush.bf16.msra.mxu2 %v8249_v10  ;;  %v8326_v2 = vld [vmem:[#allocation15 + $0x170] sm:$0xf0]  ;;  %v11622_v23 = vld [vmem:[#allocation15 + $0x264] sm:$0xf]  ;;  %v8201_v14 = vor.u32 %v11558_v59, %v8198_v32 }
 0x254   :  { %2915 = vmatpush.bf16.msra.mxu3 %v8377_v35  ;;  %2928 = vmatpush.bf16.msrb.mxu0 %v8505_v39  ;;  %v8454_v7 = vld [vmem:[#allocation15 + $0x270] sm:$0xf0]  ;;  %v11654_v9 = vld [vmem:[#allocation15 + $0x364] sm:$0xf]  ;;  %v8329_v4 = vor.u32 %v11590_v0, %v8326_v2 }
 0x255   :  { %v8582_v42 = vld [vmem:[#allocation15 + $0x370] sm:$0xf0]  ;;  %v1242_v53 = vld.sshfl [vmem:[#allocation1 + $0x28] sm:$0xff pattern:$0x73625140]  ;;  %v8457_v3 = vor.u32 %v11622_v23, %v8454_v7 }
 0x256   :  { %2941 = vmatpush.bf16.msrb.mxu1 %v8633_v17  ;;  %v1241_v37 = vld.sshfl [vmem:[#allocation1 + $0x20] sm:$0xff pattern:$0x73625140]  ;;  %v1243_v12 = vld.sshfl [vmem:[#allocation1 + $0x30] sm:$0xff pattern:$0x73625140]  ;;  %v13094_v16 = vpack.c.bf16 %v1242_v53, %v1242_v53  ;;  %v8585_v63 = vor.u32 %v11654_v9, %v8582_v42 }
 0x257   :  { %2903 = vmatpush.bf16.msra.mxu2 %v8233_v46  ;;  %v1244_v13 = vld.sshfl [vmem:[#allocation1 + $0x38] sm:$0xff pattern:$0x73625140]  ;;  %v13092_v1 = vpack.c.bf16 %v1241_v37, %v1241_v37  ;;  %v11554_v21 = vld [vmem:[#allocation15 + $0x44] sm:$0xf]  ;;  %v13096_v62 = vpack.c.bf16 %v1243_v12, %v1243_v12 }
 0x258   :  { %2916 = vmatpush.bf16.msra.mxu3 %v8361_v58  ;;  %2929 = vmatpush.bf16.msrb.mxu0 %v8489_v54  ;;  %v8182_v24 = vld [vmem:[#allocation15 + $0x50] sm:$0xf0]  ;;  %v13098_v55 = vpack.c.bf16 %v1244_v13, %v1244_v13  ;;  %v11586_v38 = vld [vmem:[#allocation15 + $0x144] sm:$0xf] }
 0x259   :  { %v8310_v27 = vld [vmem:[#allocation15 + $0x150] sm:$0xf0]  ;;  %v11618_v29 = vld [vmem:[#allocation15 + $0x244] sm:$0xf]  ;;  %v8185_v31 = vor.u32 %v11554_v21, %v8182_v24 }
 0x25a   :  { %2942 = vmatpush.bf16.msrb.mxu1 %v8617_v56  ;;  %v8438_v30 = vld [vmem:[#allocation15 + $0x250] sm:$0xf0]  ;;  %v11650_v15 = vld [vmem:[#allocation15 + $0x344] sm:$0xf]  ;;  %v8313_v33 = vor.u32 %v11586_v38, %v8310_v27 }
 0x25b   :  { %2904 = vmatpush.bf16.msra.mxu2 %v8217_v5  ;;  %v8566_v19 = vld [vmem:[#allocation15 + $0x350] sm:$0xf0]  ;;  %v11550_v34 = vld [vmem:[#allocation15 + $0x24] sm:$0xf]  ;;  %v8441_v10 = vor.u32 %v11618_v29, %v8438_v30 }
 0x25c   :  { %2917 = vmatpush.bf16.msra.mxu3 %v8345_v8  ;;  %2930 = vmatpush.bf16.msrb.mxu0 %v8473_v6  ;;  %v8166_v48 = vld [vmem:[#allocation15 + $0x30] sm:$0xf0]  ;;  %v8569_v35 = vor.u32 %v11650_v15, %v8566_v19  ;;  %v11582_v41 = vld [vmem:[#allocation15 + $0x124] sm:$0xf] }
 0x25d   :  { %2857 = vmatmul.bf16.vlgmr.msrb.gmra.mxu2 %v13092_v1  ;;  %2870 = vmatmul.bf16.vlgmr.msrb.gmra.mxu3 %v13094_v16  ;;  %v8294_v36 = vld [vmem:[#allocation15 + $0x130] sm:$0xf0]  ;;  %v11614_v39 = vld [vmem:[#allocation15 + $0x224] sm:$0xf]  ;;  %v8169_v49 = vor.u32 %v11550_v34, %v8166_v48 }
 0x25e   :  { %2943 = vmatpush.bf16.msrb.mxu1 %v8601_v50  ;;  %2883 = vmatmul.bf16.vlgmr.msra.gmra.mxu0 %v13096_v62  ;;  %v8422_v17 = vld [vmem:[#allocation15 + $0x230] sm:$0xf0]  ;;  %v11646_v47 = vld [vmem:[#allocation15 + $0x324] sm:$0xf]  ;;  %v8297_v43 = vor.u32 %v11582_v41, %v8294_v36 }
 0x25f   :  { %2896 = vmatmul.bf16.vlgmr.msra.gmra.mxu1 %v13098_v55  ;;  %2905 = vmatpush.bf16.msra.mxu2 %v8201_v14  ;;  %v8550_v11 = vld [vmem:[#allocation15 + $0x330] sm:$0xf0]  ;;  %v11546_v40 = vld [vmem:[#allocation15 + $0x4] sm:$0xf]  ;;  %v8425_v58 = vor.u32 %v11614_v39, %v8422_v17 }
 0x260   :  { %2918 = vmatpush.bf16.msra.mxu3 %v8329_v4  ;;  %2931 = vmatpush.bf16.msrb.mxu0 %v8457_v3  ;;  %v8150_v44 = vld [vmem:[#allocation15 + $0x10] sm:$0xf0]  ;;  %v11578_v45 = vld [vmem:[#allocation15 + $0x104] sm:$0xf]  ;;  %v8553_v51 = vor.u32 %v11646_v47, %v8550_v11 }
 0x261   :  { %v8278_v46 = vld [vmem:[#allocation15 + $0x110] sm:$0xf0]  ;;  %v11610_v18 = vld [vmem:[#allocation15 + $0x204] sm:$0xf]  ;;  %v8153_v32 = vor.u32 %v11546_v40, %v8150_v44 }
 0x262   :  { %2944 = vmatpush.bf16.msrb.mxu1 %v8585_v63  ;;  %v8406_v52 = vld [vmem:[#allocation15 + $0x210] sm:$0xf0]  ;;  %v11642_v54 = vld [vmem:[#allocation15 + $0x304] sm:$0xf]  ;;  %v8281_v0 = vor.u32 %v11578_v45, %v8278_v46 }
 0x263   :  { %2906 = vmatpush.bf16.msra.mxu2 %v8185_v31  ;;  %v8534_v56 = vld [vmem:[#allocation15 + $0x310] sm:$0xf0]  ;;  %v11702_v57 = vld [vmem:[#allocation15 + $0x4e4] sm:$0xf]  ;;  %v8409_v8 = vor.u32 %v11610_v18, %v8406_v52 }
 0x264   :  { %2919 = vmatpush.bf16.msra.mxu3 %v8313_v33  ;;  %2932 = vmatpush.bf16.msrb.mxu0 %v8441_v10  ;;  %v8774_v60 = vld [vmem:[#allocation15 + $0x4f0] sm:$0xf0]  ;;  %v11734_v61 = vld [vmem:[#allocation15 + $0x5e4] sm:$0xf]  ;;  %v8537_v7 = vor.u32 %v11642_v54, %v8534_v56 }
 0x265   :  { %v8902_v20 = vld [vmem:[#allocation15 + $0x5f0] sm:$0xf0]  ;;  %v11766_v59 = vld [vmem:[#allocation15 + $0x6e4] sm:$0xf]  ;;  %v8777_v9 = vor.u32 %v11702_v57, %v8774_v60 }
 0x266   :  { %2945 = vmatpush.bf16.msrb.mxu1 %v8569_v35  ;;  %v9030_v2 = vld [vmem:[#allocation15 + $0x6f0] sm:$0xf0]  ;;  %v11798_v23 = vld [vmem:[#allocation15 + $0x7e4] sm:$0xf]  ;;  %v8905_v42 = vor.u32 %v11734_v61, %v8902_v20 }
 0x267   :  { %2907 = vmatpush.bf16.msra.mxu2 %v8169_v49  ;;  %v9158_v5 = vld [vmem:[#allocation15 + $0x7f0] sm:$0xf0]  ;;  %v11698_v6 = vld [vmem:[#allocation15 + $0x4c4] sm:$0xf]  ;;  %v9033_v37 = vor.u32 %v11766_v59, %v9030_v2 }
 0x268   :  { %2920 = vmatpush.bf16.msra.mxu3 %v8297_v43  ;;  %2933 = vmatpush.bf16.msrb.mxu0 %v8425_v58  ;;  %v8758_v50 = vld [vmem:[#allocation15 + $0x4d0] sm:$0xf0]  ;;  %v9161_v53 = vor.u32 %v11798_v23, %v9158_v5  ;;  %v11730_v12 = vld [vmem:[#allocation15 + $0x5c4] sm:$0xf] }
 0x269   :  { %v8886_v13 = vld [vmem:[#allocation15 + $0x5d0] sm:$0xf0]  ;;  %v11762_v14 = vld [vmem:[#allocation15 + $0x6c4] sm:$0xf]  ;;  %v8761_v24 = vor.u32 %v11698_v6, %v8758_v50 }
 0x26a   :  { %2946 = vmatpush.bf16.msrb.mxu1 %v8553_v51  ;;  %v9014_v4 = vld [vmem:[#allocation15 + $0x6d0] sm:$0xf0]  ;;  %v11794_v3 = vld [vmem:[#allocation15 + $0x7c4] sm:$0xf]  ;;  %v8889_v63 = vor.u32 %v11730_v12, %v8886_v13 }
 0x26b   :  { %2908 = vmatpush.bf16.msra.mxu2 %v8153_v32  ;;  %v9142_v21 = vld [vmem:[#allocation15 + $0x7d0] sm:$0xf0]  ;;  %v11694_v38 = vld [vmem:[#allocation15 + $0x4a4] sm:$0xf]  ;;  %v9017_v29 = vor.u32 %v11762_v14, %v9014_v4 }
 0x26c   :  { %2921 = vmatpush.bf16.msra.mxu3 %v8281_v0  ;;  %2934 = vmatpush.bf16.msrb.mxu0 %v8409_v8  ;;  %v8742_v27 = vld [vmem:[#allocation15 + $0x4b0] sm:$0xf0]  ;;  %v9145_v30 = vor.u32 %v11794_v3, %v9142_v21  ;;  %v11726_v15 = vld [vmem:[#allocation15 + $0x5a4] sm:$0xf] }
 0x26d   :  { %v8870_v19 = vld [vmem:[#allocation15 + $0x5b0] sm:$0xf0]  ;;  %v11758_v31 = vld [vmem:[#allocation15 + $0x6a4] sm:$0xf]  ;;  %v8745_v10 = vor.u32 %v11694_v38, %v8742_v27 }
 0x26e   :  { %2947 = vmatpush.bf16.msrb.mxu1 %v8537_v7  ;;  %2909 = vmatmul.bf16.vlgmr.msra.gmra.mxu2 %v13080_v28  ;;  %v8998_v33 = vld [vmem:[#allocation15 + $0x6b0] sm:$0xf0]  ;;  %v11790_v34 = vld [vmem:[#allocation15 + $0x7a4] sm:$0xf]  ;;  %v8873_v35 = vor.u32 %v11726_v15, %v8870_v19 }
 0x26f   :  { %2953 = vmatpush.bf16.msrb.mxu2 %v8777_v9  ;;  %2922 = vmatmul.bf16.vlgmr.msra.gmra.mxu3 %v13082_v22  ;;  %v9126_v48 = vld [vmem:[#allocation15 + $0x7b0] sm:$0xf0]  ;;  %v11690_v41 = vld [vmem:[#allocation15 + $0x484] sm:$0xf]  ;;  %v9001_v39 = vor.u32 %v11758_v31, %v8998_v33 }
 0x270   :  { %2966 = vmatpush.bf16.msrb.mxu3 %v8905_v42  ;;  %2979 = vmatpush.bf16.msra.mxu0 %v9033_v37  ;;  %v8726_v36 = vld [vmem:[#allocation15 + $0x490] sm:$0xf0]  ;;  %v9129_v17 = vor.u32 %v11790_v34, %v9126_v48  ;;  %v11722_v47 = vld [vmem:[#allocation15 + $0x584] sm:$0xf] }
 0x271   :  { %2935 = vmatmul.bf16.vlgmr.msrb.gmra.mxu0 %v13084_v25  ;;  %2948 = vmatmul.bf16.vlgmr.msrb.gmra.mxu1 %v13086_v26  ;;  %v8854_v11 = vld [vmem:[#allocation15 + $0x590] sm:$0xf0]  ;;  %v11754_v40 = vld [vmem:[#allocation15 + $0x684] sm:$0xf]  ;;  %v8729_v45 = vor.u32 %v11690_v41, %v8726_v36 }
 0x272   :  { %2992 = vmatpush.bf16.msra.mxu1 %v9161_v53  ;;  %v8982_v49 = vld [vmem:[#allocation15 + $0x690] sm:$0xf0]  ;;  %v11786_v43 = vld [vmem:[#allocation15 + $0x784] sm:$0xf]  ;;  %v8857_v46 = vor.u32 %v11722_v47, %v8854_v11  ;;  %v8396_v47 = vld [vmem:[#allocation15 + $0x1e8] sm:$0xf] }
 0x273   :  { %2954 = vmatpush.bf16.msrb.mxu2 %v8761_v24  ;;  %v9110_v44 = vld [vmem:[#allocation15 + $0x790] sm:$0xf0]  ;;  %v11686_v58 = vld [vmem:[#allocation15 + $0x464] sm:$0xf]  ;;  %v8985_v18 = vor.u32 %v11754_v40, %v8982_v49  ;;  %v11609_v11 = vld [vmem:[#allocation15 + $0x1f4] sm:$0xf0] }
 0x274   :  { %2967 = vmatpush.bf16.msrb.mxu3 %v8889_v63  ;;  %2980 = vmatpush.bf16.msra.mxu0 %v9017_v29  ;;  %v8710_v51 = vld [vmem:[#allocation15 + $0x470] sm:$0xf0]  ;;  %v9113_v52 = vor.u32 %v11786_v43, %v9110_v44  ;;  %v11718_v54 = vld [vmem:[#allocation15 + $0x564] sm:$0xf]  ;;  %v8524_v40 = vld [vmem:[#allocation15 + $0x2e8] sm:$0xf] }
 0x275   :  { %v8838_v56 = vld [vmem:[#allocation15 + $0x570] sm:$0xf0]  ;;  %v11750_v57 = vld [vmem:[#allocation15 + $0x664] sm:$0xf]  ;;  %v8713_v59 = vor.u32 %v11686_v58, %v8710_v51  ;;  %v11641_v44 = vld [vmem:[#allocation15 + $0x2f4] sm:$0xf0] }
 0x276   :  { %2993 = vmatpush.bf16.msra.mxu1 %v9145_v30  ;;  %v8966_v60 = vld [vmem:[#allocation15 + $0x670] sm:$0xf0]  ;;  %v11782_v61 = vld [vmem:[#allocation15 + $0x764] sm:$0xf]  ;;  %v8841_v32 = vor.u32 %v11718_v54, %v8838_v56  ;;  %v8252_v54 = vld [vmem:[#allocation15 + $0xc8] sm:$0xf] }
 0x277   :  { %2955 = vmatpush.bf16.msrb.mxu2 %v8745_v10  ;;  %v9094_v20 = vld [vmem:[#allocation15 + $0x770] sm:$0xf0]  ;;  %v11682_v0 = vld [vmem:[#allocation15 + $0x444] sm:$0xf]  ;;  %v8969_v23 = vor.u32 %v11750_v57, %v8966_v60  ;;  %v11573_v56 = vld [vmem:[#allocation15 + $0xd4] sm:$0xf0]  ;;  %v8525_v57 = vor.u32 %v11641_v44, %v8524_v40 }
 0x278   :  { %2968 = vmatpush.bf16.msrb.mxu3 %v8873_v35  ;;  %2981 = vmatpush.bf16.msra.mxu0 %v9001_v39  ;;  %v8694_v2 = vld [vmem:[#allocation15 + $0x450] sm:$0xf0]  ;;  %v9097_v5 = vor.u32 %v11782_v61, %v9094_v20  ;;  %v11714_v8 = vld [vmem:[#allocation15 + $0x544] sm:$0xf]  ;;  %v8268_v39 = vld [vmem:[#allocation15 + $0xe8] sm:$0xf] }
 0x279   :  { %v8822_v7 = vld [vmem:[#allocation15 + $0x550] sm:$0xf0]  ;;  %v11746_v9 = vld [vmem:[#allocation15 + $0x644] sm:$0xf]  ;;  %v8697_v37 = vor.u32 %v11682_v0, %v8694_v2  ;;  %v8380_v61 = vld [vmem:[#allocation15 + $0x1c8] sm:$0xf] }
 0x27a   :  { %2994 = vmatpush.bf16.msra.mxu1 %v9129_v17  ;;  %v8950_v42 = vld [vmem:[#allocation15 + $0x650] sm:$0xf0]  ;;  %v11778_v6 = vld [vmem:[#allocation15 + $0x744] sm:$0xf]  ;;  %v8825_v53 = vor.u32 %v11714_v8, %v8822_v7  ;;  %v11577_v17 = vld [vmem:[#allocation15 + $0xf4] sm:$0xf0] }
 0x27b   :  { %2956 = vmatpush.bf16.msrb.mxu2 %v8729_v45  ;;  %v9078_v50 = vld [vmem:[#allocation15 + $0x750] sm:$0xf0]  ;;  %v11678_v12 = vld [vmem:[#allocation15 + $0x424] sm:$0xf]  ;;  %v8953_v14 = vor.u32 %v11746_v9, %v8950_v42  ;;  %v8652_v45 = vld [vmem:[#allocation15 + $0x3e8] sm:$0xf] }
 0x27c   :  { %2969 = vmatpush.bf16.msrb.mxu3 %v8857_v46  ;;  %2982 = vmatpush.bf16.msra.mxu0 %v8985_v18  ;;  %v8678_v13 = vld [vmem:[#allocation15 + $0x430] sm:$0xf0]  ;;  %v9081_v4 = vor.u32 %v11778_v6, %v9078_v50  ;;  %v11710_v3 = vld [vmem:[#allocation15 + $0x524] sm:$0xf]  ;;  %v11673_v46 = vld [vmem:[#allocation15 + $0x3f4] sm:$0xf0]  ;;  %v8269_v18 = vor.u32 %v11577_v17, %v8268_v39 }
 0x27d   :  { %v8806_v21 = vld [vmem:[#allocation15 + $0x530] sm:$0xf0]  ;;  %v11742_v24 = vld [vmem:[#allocation15 + $0x624] sm:$0xf]  ;;  %v8681_v30 = vor.u32 %v11678_v12, %v8678_v13  ;;  %v8653_v60 = vor.u32 %v11673_v46, %v8652_v45  ;;  %v11605_v20 = vld [vmem:[#allocation15 + $0x1d4] sm:$0xf0] }
 0x27e   :  { %2995 = vmatpush.bf16.msra.mxu1 %v9113_v52  ;;  %v8934_v63 = vld [vmem:[#allocation15 + $0x630] sm:$0xf0]  ;;  %v11774_v38 = vld [vmem:[#allocation15 + $0x724] sm:$0xf]  ;;  %v8809_v15 = vor.u32 %v11710_v3, %v8806_v21  ;;  %v8397_v52 = vor.u32 %v11609_v11, %v8396_v47  ;;  %v8636_v0 = vld [vmem:[#allocation15 + $0x3c8] sm:$0xf] }
 0x27f   :  { %2957 = vmatpush.bf16.msrb.mxu2 %v8713_v59  ;;  %v9062_v27 = vld [vmem:[#allocation15 + $0x730] sm:$0xf0]  ;;  %v11674_v29 = vld [vmem:[#allocation15 + $0x404] sm:$0xf]  ;;  %v8937_v34 = vor.u32 %v11742_v24, %v8934_v63  ;;  %v8508_v59 = vld [vmem:[#allocation15 + $0x2c8] sm:$0xf] }
 0x280   :  { %2970 = vmatpush.bf16.msrb.mxu3 %v8841_v32  ;;  %2983 = vmatpush.bf16.msra.mxu0 %v8969_v23  ;;  %v8662_v19 = vld [vmem:[#allocation15 + $0x410] sm:$0xf0]  ;;  %v11706_v31 = vld [vmem:[#allocation15 + $0x504] sm:$0xf]  ;;  %v9065_v48 = vor.u32 %v11774_v38, %v9062_v27  ;;  %v11637_v32 = vld [vmem:[#allocation15 + $0x2d4] sm:$0xf0]  ;;  %v8253_v23 = vor.u32 %v11573_v56, %v8252_v54 }
 0x281   :  { %v8790_v33 = vld [vmem:[#allocation15 + $0x510] sm:$0xf0]  ;;  %v11738_v10 = vld [vmem:[#allocation15 + $0x604] sm:$0xf]  ;;  %v8665_v49 = vor.u32 %v11674_v29, %v8662_v19  ;;  %v11669_v2 = vld [vmem:[#allocation15 + $0x3d4] sm:$0xf0]  ;;  %v8509_v9 = vor.u32 %v11637_v32, %v8508_v59 }
 0x282   :  { %2996 = vmatpush.bf16.msra.mxu1 %v9097_v5  ;;  %v8918_v35 = vld [vmem:[#allocation15 + $0x610] sm:$0xf0]  ;;  %v11770_v41 = vld [vmem:[#allocation15 + $0x704] sm:$0xf]  ;;  %v8793_v43 = vor.u32 %v11706_v31, %v8790_v33  ;;  %v8381_v5 = vor.u32 %v11605_v20, %v8380_v61  ;;  %v8236_v8 = vld [vmem:[#allocation15 + $0xa8] sm:$0xf]  ;;  %v8637_v42 = vor.u32 %v11669_v2, %v8636_v0 }
 0x283   :  { %2958 = vmatpush.bf16.msrb.mxu2 %v8697_v37  ;;  %v9046_v36 = vld [vmem:[#allocation15 + $0x710] sm:$0xf0]  ;;  %v8921_v58 = vor.u32 %v11738_v10, %v8918_v35  ;;  %v11569_v7 = vld [vmem:[#allocation15 + $0xb4] sm:$0xf0]  ;;  %v8364_v6 = vld [vmem:[#allocation15 + $0x1a8] sm:$0xf] }
 0x284   :  { %2971 = vmatpush.bf16.msrb.mxu3 %v8825_v53  ;;  %2984 = vmatpush.bf16.msra.mxu0 %v8953_v14  ;;  %v9049_v51 = vor.u32 %v11770_v41, %v9046_v36  ;;  %v11601_v50 = vld [vmem:[#allocation15 + $0x1b4] sm:$0xf0]  ;;  %v8492_v37 = vld [vmem:[#allocation15 + $0x2a8] sm:$0xf]  ;;  %v8237_v14 = vor.u32 %v11569_v7, %v8236_v8 }
 0x285   :  { %v11633_v53 = vld [vmem:[#allocation15 + $0x2b4] sm:$0xf0]  ;;  %v8620_v12 = vld [vmem:[#allocation15 + $0x3a8] sm:$0xf] }
 0x286   :  { %2997 = vmatpush.bf16.msra.mxu1 %v9081_v4  ;;  %v11665_v13 = vld [vmem:[#allocation15 + $0x3b4] sm:$0xf0]  ;;  %v8365_v4 = vor.u32 %v11601_v50, %v8364_v6  ;;  %v8220_v3 = vld [vmem:[#allocation15 + $0x88] sm:$0xf]  ;;  %v8493_v24 = vor.u32 %v11633_v53, %v8492_v37 }
 0x287   :  { %2959 = vmatpush.bf16.msrb.mxu2 %v8681_v30  ;;  %v11565_v21 = vld [vmem:[#allocation15 + $0x94] sm:$0xf0]  ;;  %v8621_v63 = vor.u32 %v11665_v13, %v8620_v12  ;;  %v8348_v38 = vld [vmem:[#allocation15 + $0x188] sm:$0xf] }
 0x288   :  { %2972 = vmatpush.bf16.msrb.mxu3 %v8809_v15  ;;  %2985 = vmatpush.bf16.msra.mxu0 %v8937_v34  ;;  %v11597_v27 = vld [vmem:[#allocation15 + $0x194] sm:$0xf0]  ;;  %v8476_v29 = vld [vmem:[#allocation15 + $0x288] sm:$0xf]  ;;  %v8221_v31 = vor.u32 %v11565_v21, %v8220_v3 }
 0x289   :  { %v11629_v30 = vld [vmem:[#allocation15 + $0x294] sm:$0xf0]  ;;  %v8604_v15 = vld [vmem:[#allocation15 + $0x388] sm:$0xf]  ;;  %v8349_v33 = vor.u32 %v11597_v27, %v8348_v38 }
 0x28a   :  { %2998 = vmatpush.bf16.msra.mxu1 %v9065_v48  ;;  %v11661_v19 = vld [vmem:[#allocation15 + $0x394] sm:$0xf0]  ;;  %v8204_v34 = vld [vmem:[#allocation15 + $0x68] sm:$0xf]  ;;  %v8477_v10 = vor.u32 %v11629_v30, %v8476_v29 }
 0x28b   :  { %2960 = vmatpush.bf16.msrb.mxu2 %v8665_v49  ;;  %v11561_v48 = vld [vmem:[#allocation15 + $0x74] sm:$0xf0]  ;;  %v8605_v35 = vor.u32 %v11661_v19, %v8604_v15  ;;  %v8332_v41 = vld [vmem:[#allocation15 + $0x168] sm:$0xf] }
 0x28c   :  { %2973 = vmatpush.bf16.msrb.mxu3 %v8793_v43  ;;  %2986 = vmatpush.bf16.msra.mxu0 %v8921_v58  ;;  %v11593_v36 = vld [vmem:[#allocation15 + $0x174] sm:$0xf0]  ;;  %v8460_v39 = vld [vmem:[#allocation15 + $0x268] sm:$0xf]  ;;  %v8205_v40 = vor.u32 %v11561_v48, %v8204_v34 }
 0x28d   :  { %v11625_v17 = vld [vmem:[#allocation15 + $0x274] sm:$0xf0]  ;;  %v8588_v47 = vld [vmem:[#allocation15 + $0x368] sm:$0xf]  ;;  %v8333_v49 = vor.u32 %v11593_v36, %v8332_v41 }
 0x28e   :  { %2999 = vmatpush.bf16.msra.mxu1 %v9049_v51  ;;  %2961 = vmatmul.bf16.vlgmr.msrb.gmra.mxu2 %v13092_v1  ;;  %v11657_v11 = vld [vmem:[#allocation15 + $0x374] sm:$0xf0]  ;;  %v8188_v43 = vld [vmem:[#allocation15 + $0x48] sm:$0xf]  ;;  %v8461_v45 = vor.u32 %v11625_v17, %v8460_v39 }
 0x28f   :  { %3005 = vmatpush.bf16.msra.mxu2 %v8269_v18  ;;  %2974 = vmatmul.bf16.vlgmr.msrb.gmra.mxu3 %v13094_v16  ;;  %v11557_v44 = vld [vmem:[#allocation15 + $0x54] sm:$0xf0]  ;;  %v8589_v46 = vor.u32 %v11657_v11, %v8588_v47  ;;  %v8316_v58 = vld [vmem:[#allocation15 + $0x148] sm:$0xf] }
 0x290   :  { %3018 = vmatpush.bf16.msra.mxu3 %v8397_v52  ;;  %3031 = vmatpush.bf16.msrb.mxu0 %v8525_v57  ;;  %v11589_v51 = vld [vmem:[#allocation15 + $0x154] sm:$0xf0]  ;;  %v8444_v18 = vld [vmem:[#allocation15 + $0x248] sm:$0xf]  ;;  %v8189_v57 = vor.u32 %v11557_v44, %v8188_v43 }
 0x291   :  { %2987 = vmatmul.bf16.vlgmr.msra.gmra.mxu0 %v13096_v62  ;;  %3000 = vmatmul.bf16.vlgmr.msra.gmra.mxu1 %v13098_v55  ;;  %v11621_v52 = vld [vmem:[#allocation15 + $0x254] sm:$0xf0]  ;;  %v8572_v54 = vld [vmem:[#allocation15 + $0x348] sm:$0xf] }
 0x292   :  { %3044 = vmatpush.bf16.msrb.mxu1 %v8653_v60  ;;  %v11653_v56 = vld [vmem:[#allocation15 + $0x354] sm:$0xf0]  ;;  %v8317_v60 = vor.u32 %v11589_v51, %v8316_v58  ;;  %v8172_v61 = vld [vmem:[#allocation15 + $0x28] sm:$0xf]  ;;  %v8445_v59 = vor.u32 %v11621_v52, %v8444_v18 }
 0x293   :  { %3006 = vmatpush.bf16.msra.mxu2 %v8253_v23  ;;  %v11553_v20 = vld [vmem:[#allocation15 + $0x34] sm:$0xf0]  ;;  %v8573_v32 = vor.u32 %v11653_v56, %v8572_v54  ;;  %v8300_v0 = vld [vmem:[#allocation15 + $0x128] sm:$0xf] }
 0x294   :  { %3019 = vmatpush.bf16.msra.mxu3 %v8381_v5  ;;  %3032 = vmatpush.bf16.msrb.mxu0 %v8509_v9  ;;  %v11585_v2 = vld [vmem:[#allocation15 + $0x134] sm:$0xf0]  ;;  %v8428_v23 = vld [vmem:[#allocation15 + $0x228] sm:$0xf] }
 0x295   :  { %v11617_v5 = vld [vmem:[#allocation15 + $0x234] sm:$0xf0]  ;;  %v8556_v8 = vld [vmem:[#allocation15 + $0x328] sm:$0xf]  ;;  %v8301_v6 = vor.u32 %v11585_v2, %v8300_v0 }
 0x296   :  { %3045 = vmatpush.bf16.msrb.mxu1 %v8637_v42  ;;  %v11649_v7 = vld [vmem:[#allocation15 + $0x334] sm:$0xf0]  ;;  %v8156_v9 = vld [vmem:[#allocation15 + $0x8] sm:$0xf]  ;;  %v8173_v42 = vor.u32 %v11553_v20, %v8172_v61  ;;  %v8429_v12 = vor.u32 %v11617_v5, %v8428_v23 }
 0x297   :  { %3007 = vmatpush.bf16.msra.mxu2 %v8237_v14  ;;  %v11549_v50 = vld [vmem:[#allocation15 + $0x14] sm:$0xf0]  ;;  %v8284_v37 = vld [vmem:[#allocation15 + $0x108] sm:$0xf]  ;;  %v8557_v13 = vor.u32 %v11649_v7, %v8556_v8 }
 0x298   :  { %3020 = vmatpush.bf16.msra.mxu3 %v8365_v4  ;;  %3033 = vmatpush.bf16.msrb.mxu0 %v8493_v24  ;;  %v11581_v53 = vld [vmem:[#allocation15 + $0x114] sm:$0xf0]  ;;  %v8412_v14 = vld [vmem:[#allocation15 + $0x208] sm:$0xf]  ;;  %v8157_v30 = vor.u32 %v11549_v50, %v8156_v9 }
 0x299   :  { %v11613_v4 = vld [vmem:[#allocation15 + $0x214] sm:$0xf0]  ;;  %v8540_v3 = vld [vmem:[#allocation15 + $0x308] sm:$0xf]  ;;  %v8285_v15 = vor.u32 %v11581_v53, %v8284_v37 }
 0x29a   :  { %3046 = vmatpush.bf16.msrb.mxu1 %v8621_v63  ;;  %v11645_v21 = vld [vmem:[#allocation15 + $0x314] sm:$0xf0]  ;;  %v8780_v24 = vld [vmem:[#allocation15 + $0x4e8] sm:$0xf]  ;;  %v8413_v34 = vor.u32 %v11613_v4, %v8412_v14 }
 0x29b   :  { %3008 = vmatpush.bf16.msra.mxu2 %v8221_v31  ;;  %v11705_v63 = vld [vmem:[#allocation15 + $0x4f4] sm:$0xf0]  ;;  %v8908_v38 = vld [vmem:[#allocation15 + $0x5e8] sm:$0xf]  ;;  %v8541_v48 = vor.u32 %v11645_v21, %v8540_v3 }
 0x29c   :  { %3021 = vmatpush.bf16.msra.mxu3 %v8349_v33  ;;  %3034 = vmatpush.bf16.msrb.mxu0 %v8477_v10  ;;  %v11737_v27 = vld [vmem:[#allocation15 + $0x5f4] sm:$0xf0]  ;;  %v9036_v29 = vld [vmem:[#allocation15 + $0x6e8] sm:$0xf]  ;;  %v8781_v10 = vor.u32 %v11705_v63, %v8780_v24 }
 0x29d   :  { %v11769_v19 = vld [vmem:[#allocation15 + $0x6f4] sm:$0xf0]  ;;  %v9164_v31 = vld [vmem:[#allocation15 + $0x7e8] sm:$0xf] }
 0x29e   :  { %3047 = vmatpush.bf16.msrb.mxu1 %v8605_v35  ;;  %v11801_v33 = vld [vmem:[#allocation15 + $0x7f4] sm:$0xf0]  ;;  %v8909_v35 = vor.u32 %v11737_v27, %v8908_v38  ;;  %v8764_v41 = vld [vmem:[#allocation15 + $0x4c8] sm:$0xf]  ;;  %v9037_v39 = vor.u32 %v11769_v19, %v9036_v29 }
 0x29f   :  { %3009 = vmatpush.bf16.msra.mxu2 %v8205_v40  ;;  %v11701_v36 = vld [vmem:[#allocation15 + $0x4d4] sm:$0xf0]  ;;  %v9165_v17 = vor.u32 %v11801_v33, %v9164_v31  ;;  %v8892_v47 = vld [vmem:[#allocation15 + $0x5c8] sm:$0xf] }
 0x2a0   :  { %3022 = vmatpush.bf16.msra.mxu3 %v8333_v49  ;;  %3035 = vmatpush.bf16.msrb.mxu0 %v8461_v45  ;;  %v11733_v11 = vld [vmem:[#allocation15 + $0x5d4] sm:$0xf0]  ;;  %v9020_v40 = vld [vmem:[#allocation15 + $0x6c8] sm:$0xf]  ;;  %v8765_v45 = vor.u32 %v11701_v36, %v8764_v41 }
 0x2a1   :  { %v11765_v49 = vld [vmem:[#allocation15 + $0x6d4] sm:$0xf0]  ;;  %v9148_v43 = vld [vmem:[#allocation15 + $0x7c8] sm:$0xf] }
 0x2a2   :  { %3048 = vmatpush.bf16.msrb.mxu1 %v8589_v46  ;;  %v11797_v44 = vld [vmem:[#allocation15 + $0x7d4] sm:$0xf0]  ;;  %v8893_v46 = vor.u32 %v11733_v11, %v8892_v47  ;;  %v8748_v58 = vld [vmem:[#allocation15 + $0x4a8] sm:$0xf]  ;;  %v9021_v18 = vor.u32 %v11765_v49, %v9020_v40 }
 0x2a3   :  { %3010 = vmatpush.bf16.msra.mxu2 %v8189_v57  ;;  %v11697_v51 = vld [vmem:[#allocation15 + $0x4b4] sm:$0xf0]  ;;  %v9149_v52 = vor.u32 %v11797_v44, %v9148_v43  ;;  %v8876_v54 = vld [vmem:[#allocation15 + $0x5a8] sm:$0xf] }
 0x2a4   :  { %3023 = vmatpush.bf16.msra.mxu3 %v8317_v60  ;;  %3036 = vmatpush.bf16.msrb.mxu0 %v8445_v59  ;;  %v11729_v56 = vld [vmem:[#allocation15 + $0x5b4] sm:$0xf0]  ;;  %v9004_v57 = vld [vmem:[#allocation15 + $0x6a8] sm:$0xf]  ;;  %v8749_v59 = vor.u32 %v11697_v51, %v8748_v58 }
 0x2a5   :  { %v11761_v60 = vld [vmem:[#allocation15 + $0x6b4] sm:$0xf0]  ;;  %v9132_v61 = vld [vmem:[#allocation15 + $0x7a8] sm:$0xf] }
 0x2a6   :  { %3049 = vmatpush.bf16.msrb.mxu1 %v8573_v32  ;;  %v11793_v20 = vld [vmem:[#allocation15 + $0x7b4] sm:$0xf0]  ;;  %v8877_v32 = vor.u32 %v11729_v56, %v8876_v54  ;;  %v8732_v0 = vld [vmem:[#allocation15 + $0x488] sm:$0xf]  ;;  %v9005_v23 = vor.u32 %v11761_v60, %v9004_v57 }
 0x2a7   :  { %3011 = vmatpush.bf16.msra.mxu2 %v8173_v42  ;;  %v11693_v2 = vld [vmem:[#allocation15 + $0x494] sm:$0xf0]  ;;  %v9133_v5 = vor.u32 %v11793_v20, %v9132_v61  ;;  %v8860_v8 = vld [vmem:[#allocation15 + $0x588] sm:$0xf] }
 0x2a8   :  { %3024 = vmatpush.bf16.msra.mxu3 %v8301_v6  ;;  %3037 = vmatpush.bf16.msrb.mxu0 %v8429_v12  ;;  %v11725_v7 = vld [vmem:[#allocation15 + $0x594] sm:$0xf0]  ;;  %v8988_v9 = vld [vmem:[#allocation15 + $0x688] sm:$0xf]  ;;  %v8733_v37 = vor.u32 %v11693_v2, %v8732_v0 }
 0x2a9   :  { %v11757_v42 = vld [vmem:[#allocation15 + $0x694] sm:$0xf0]  ;;  %v9116_v6 = vld [vmem:[#allocation15 + $0x788] sm:$0xf]  ;;  %v8861_v53 = vor.u32 %v11725_v7, %v8860_v8  ;;  %v11607_v8 = vld [vmem:[#allocation15 + $0x1ec] sm:$0xf] }
 0x2aa   :  { %3050 = vmatpush.bf16.msrb.mxu1 %v8557_v13  ;;  %v11789_v50 = vld [vmem:[#allocation15 + $0x794] sm:$0xf0]  ;;  %v8716_v12 = vld [vmem:[#allocation15 + $0x468] sm:$0xf]  ;;  %v8989_v14 = vor.u32 %v11757_v42, %v8988_v9  ;;  %v8398_v7 = vld [vmem:[#allocation15 + $0x1f8] sm:$0xf0] }
 0x2ab   :  { %3012 = vmatpush.bf16.msra.mxu2 %v8157_v30  ;;  %v11689_v13 = vld [vmem:[#allocation15 + $0x474] sm:$0xf0]  ;;  %v9117_v4 = vor.u32 %v11789_v50, %v9116_v6  ;;  %v8844_v3 = vld [vmem:[#allocation15 + $0x568] sm:$0xf]  ;;  %v11639_v9 = vld [vmem:[#allocation15 + $0x2ec] sm:$0xf] }
 0x2ac   :  { %3025 = vmatpush.bf16.msra.mxu3 %v8285_v15  ;;  %3038 = vmatpush.bf16.msrb.mxu0 %v8413_v34  ;;  %v11721_v21 = vld [vmem:[#allocation15 + $0x574] sm:$0xf0]  ;;  %v8972_v24 = vld [vmem:[#allocation15 + $0x668] sm:$0xf]  ;;  %v8717_v29 = vor.u32 %v11689_v13, %v8716_v12  ;;  %v8526_v50 = vld [vmem:[#allocation15 + $0x2f8] sm:$0xf0] }
 0x2ad   :  { %v11753_v63 = vld [vmem:[#allocation15 + $0x674] sm:$0xf0]  ;;  %v9100_v38 = vld [vmem:[#allocation15 + $0x768] sm:$0xf]  ;;  %v8845_v30 = vor.u32 %v11721_v21, %v8844_v3  ;;  %v11571_v3 = vld [vmem:[#allocation15 + $0xcc] sm:$0xf] }
 0x2ae   :  { %3051 = vmatpush.bf16.msrb.mxu1 %v8541_v48  ;;  %3013 = vmatmul.bf16.vlgmr.msra.gmra.mxu2 %v13080_v28  ;;  %v11785_v27 = vld [vmem:[#allocation15 + $0x774] sm:$0xf0]  ;;  %v8700_v15 = vld [vmem:[#allocation15 + $0x448] sm:$0xf]  ;;  %v8973_v31 = vor.u32 %v11753_v63, %v8972_v24  ;;  %v8254_v21 = vld [vmem:[#allocation15 + $0xd8] sm:$0xf0]  ;;  %v8529_v24 = vor.u32 %v11639_v9, %v8526_v50 }
 0x2af   :  { %3057 = vmatpush.bf16.msrb.mxu2 %v8781_v10  ;;  %3026 = vmatmul.bf16.vlgmr.msra.gmra.mxu3 %v13082_v22  ;;  %v11685_v19 = vld [vmem:[#allocation15 + $0x454] sm:$0xf0]  ;;  %v9101_v33 = vor.u32 %v11785_v27, %v9100_v38  ;;  %v8828_v34 = vld [vmem:[#allocation15 + $0x548] sm:$0xf]  ;;  %v11603_v38 = vld [vmem:[#allocation15 + $0x1cc] sm:$0xf] }
 0x2b0   :  { %3070 = vmatpush.bf16.msrb.mxu3 %v8909_v35  ;;  %3083 = vmatpush.bf16.msra.mxu0 %v9037_v39  ;;  %v11717_v48 = vld [vmem:[#allocation15 + $0x554] sm:$0xf0]  ;;  %v8956_v10 = vld [vmem:[#allocation15 + $0x648] sm:$0xf]  ;;  %v8701_v39 = vor.u32 %v11685_v19, %v8700_v15  ;;  %v8382_v27 = vld [vmem:[#allocation15 + $0x1d8] sm:$0xf0] }
 0x2b1   :  { %3039 = vmatmul.bf16.vlgmr.msrb.gmra.mxu0 %v13084_v25  ;;  %3052 = vmatmul.bf16.vlgmr.msrb.gmra.mxu1 %v13086_v26  ;;  %v11749_v35 = vld [vmem:[#allocation15 + $0x654] sm:$0xf0]  ;;  %v9084_v41 = vld [vmem:[#allocation15 + $0x748] sm:$0xf]  ;;  %v11667_v15 = vld [vmem:[#allocation15 + $0x3cc] sm:$0xf] }
 0x2b2   :  { %3096 = vmatpush.bf16.msra.mxu1 %v9165_v17  ;;  %v11781_v36 = vld [vmem:[#allocation15 + $0x754] sm:$0xf0]  ;;  %v8829_v17 = vor.u32 %v11717_v48, %v8828_v34  ;;  %v8684_v47 = vld [vmem:[#allocation15 + $0x428] sm:$0xf]  ;;  %v8957_v40 = vor.u32 %v11749_v35, %v8956_v10  ;;  %v8638_v19 = vld [vmem:[#allocation15 + $0x3d8] sm:$0xf0] }
 0x2b3   :  { %3058 = vmatpush.bf16.msrb.mxu2 %v8765_v45  ;;  %v11681_v11 = vld [vmem:[#allocation15 + $0x434] sm:$0xf0]  ;;  %v9085_v49 = vor.u32 %v11781_v36, %v9084_v41  ;;  %v8812_v43 = vld [vmem:[#allocation15 + $0x528] sm:$0xf]  ;;  %v11567_v34 = vld [vmem:[#allocation15 + $0xac] sm:$0xf]  ;;  %v8641_v35 = vor.u32 %v11667_v15, %v8638_v19 }
 0x2b4   :  { %3071 = vmatpush.bf16.msrb.mxu3 %v8893_v46  ;;  %3084 = vmatpush.bf16.msra.mxu0 %v9021_v18  ;;  %v11713_v44 = vld [vmem:[#allocation15 + $0x534] sm:$0xf0]  ;;  %v8940_v45 = vld [vmem:[#allocation15 + $0x628] sm:$0xf]  ;;  %v8238_v48 = vld [vmem:[#allocation15 + $0xb8] sm:$0xf0] }
 0x2b5   :  { %v11745_v46 = vld [vmem:[#allocation15 + $0x634] sm:$0xf0]  ;;  %v9068_v58 = vld [vmem:[#allocation15 + $0x728] sm:$0xf]  ;;  %v8813_v54 = vor.u32 %v11713_v44, %v8812_v43  ;;  %v11599_v41 = vld [vmem:[#allocation15 + $0x1ac] sm:$0xf] }
 0x2b6   :  { %3097 = vmatpush.bf16.msra.mxu1 %v9149_v52  ;;  %v11777_v51 = vld [vmem:[#allocation15 + $0x734] sm:$0xf0]  ;;  %v8668_v18 = vld [vmem:[#allocation15 + $0x408] sm:$0xf]  ;;  %v8685_v52 = vor.u32 %v11681_v11, %v8684_v47  ;;  %v8941_v61 = vor.u32 %v11745_v46, %v8940_v45  ;;  %v8366_v36 = vld [vmem:[#allocation15 + $0x1b8] sm:$0xf0] }
 0x2b7   :  { %3059 = vmatpush.bf16.msrb.mxu2 %v8749_v59  ;;  %v11677_v56 = vld [vmem:[#allocation15 + $0x414] sm:$0xf0]  ;;  %v8796_v57 = vld [vmem:[#allocation15 + $0x508] sm:$0xf]  ;;  %v9069_v20 = vor.u32 %v11777_v51, %v9068_v58  ;;  %v11663_v47 = vld [vmem:[#allocation15 + $0x3ac] sm:$0xf] }
 0x2b8   :  { %3072 = vmatpush.bf16.msrb.mxu3 %v8877_v32  ;;  %3085 = vmatpush.bf16.msra.mxu0 %v9005_v23  ;;  %v11709_v60 = vld [vmem:[#allocation15 + $0x514] sm:$0xf0]  ;;  %v8924_v59 = vld [vmem:[#allocation15 + $0x608] sm:$0xf]  ;;  %v11575_v23 = vld [vmem:[#allocation15 + $0xec] sm:$0xf]  ;;  %v8669_v42 = vor.u32 %v11677_v56, %v8668_v18 }
 0x2b9   :  { %v11741_v32 = vld [vmem:[#allocation15 + $0x614] sm:$0xf0]  ;;  %v9052_v0 = vld [vmem:[#allocation15 + $0x708] sm:$0xf]  ;;  %v8797_v6 = vor.u32 %v11709_v60, %v8796_v57  ;;  %v8622_v11 = vld [vmem:[#allocation15 + $0x3b8] sm:$0xf0] }
 0x2ba   :  { %3098 = vmatpush.bf16.msra.mxu1 %v9133_v5  ;;  %v11773_v2 = vld [vmem:[#allocation15 + $0x714] sm:$0xf0]  ;;  %v8270_v5 = vld [vmem:[#allocation15 + $0xf8] sm:$0xf0]  ;;  %v8925_v12 = vor.u32 %v11741_v32, %v8924_v59  ;;  %v11563_v45 = vld [vmem:[#allocation15 + $0x8c] sm:$0xf]  ;;  %v8625_v51 = vor.u32 %v11663_v47, %v8622_v11 }
 0x2bb   :  { %3060 = vmatpush.bf16.msrb.mxu2 %v8733_v37  ;;  %v11671_v37 = vld [vmem:[#allocation15 + $0x3ec] sm:$0xf]  ;;  %v9053_v13 = vor.u32 %v11773_v2, %v9052_v0  ;;  %v8222_v46 = vld [vmem:[#allocation15 + $0x98] sm:$0xf0] }
 0x2bc   :  { %3073 = vmatpush.bf16.msrb.mxu3 %v8861_v53  ;;  %3086 = vmatpush.bf16.msra.mxu0 %v8989_v14  ;;  %v8654_v53 = vld [vmem:[#allocation15 + $0x3f8] sm:$0xf0]  ;;  %v8273_v14 = vor.u32 %v11575_v23, %v8270_v5  ;;  %v11595_v18 = vld [vmem:[#allocation15 + $0x18c] sm:$0xf] }
 0x2bd   :  { %v8657_v63 = vor.u32 %v11671_v37, %v8654_v53  ;;  %v8478_v56 = vld [vmem:[#allocation15 + $0x298] sm:$0xf0]  ;;  %v11659_v57 = vld [vmem:[#allocation15 + $0x38c] sm:$0xf] }
 0x2be   :  { %3099 = vmatpush.bf16.msra.mxu1 %v9117_v4  ;;  %v8401_v4 = vor.u32 %v11607_v8, %v8398_v7  ;;  %v8606_v60 = vld [vmem:[#allocation15 + $0x398] sm:$0xf0]  ;;  %v11559_v59 = vld [vmem:[#allocation15 + $0x6c] sm:$0xf] }
 0x2bf   :  { %3061 = vmatpush.bf16.msrb.mxu2 %v8717_v29  ;;  %v11635_v29 = vld [vmem:[#allocation15 + $0x2cc] sm:$0xf]  ;;  %v8206_v32 = vld [vmem:[#allocation15 + $0x78] sm:$0xf0]  ;;  %v8609_v2 = vor.u32 %v11659_v57, %v8606_v60 }
 0x2c0   :  { %3074 = vmatpush.bf16.msrb.mxu3 %v8845_v30  ;;  %3087 = vmatpush.bf16.msra.mxu0 %v8973_v31  ;;  %v8510_v30 = vld [vmem:[#allocation15 + $0x2d8] sm:$0xf0]  ;;  %v8257_v31 = vor.u32 %v11571_v3, %v8254_v21  ;;  %v11591_v8 = vld [vmem:[#allocation15 + $0x16c] sm:$0xf] }
 0x2c1   :  { %v8513_v10 = vor.u32 %v11635_v29, %v8510_v30  ;;  %v8334_v7 = vld [vmem:[#allocation15 + $0x178] sm:$0xf0]  ;;  %v11623_v9 = vld [vmem:[#allocation15 + $0x26c] sm:$0xf] }
 0x2c2   :  { %3100 = vmatpush.bf16.msra.mxu1 %v9101_v33  ;;  %v8385_v33 = vor.u32 %v11603_v38, %v8382_v27  ;;  %v11655_v50 = vld [vmem:[#allocation15 + $0x36c] sm:$0xf]  ;;  %v8590_v37 = vld [vmem:[#allocation15 + $0x378] sm:$0xf0] }
 0x2c3   :  { %3062 = vmatpush.bf16.msrb.mxu2 %v8701_v39  ;;  %v11631_v39 = vld [vmem:[#allocation15 + $0x2ac] sm:$0xf]  ;;  %v8190_v21 = vld [vmem:[#allocation15 + $0x58] sm:$0xf0] }
 0x2c4   :  { %3075 = vmatpush.bf16.msrb.mxu3 %v8829_v17  ;;  %3088 = vmatpush.bf16.msra.mxu0 %v8957_v40  ;;  %v8494_v17 = vld [vmem:[#allocation15 + $0x2b8] sm:$0xf0]  ;;  %v8241_v40 = vor.u32 %v11567_v34, %v8238_v48  ;;  %v11555_v3 = vld [vmem:[#allocation15 + $0x4c] sm:$0xf] }
 0x2c5   :  { %v8497_v58 = vor.u32 %v11631_v39, %v8494_v17  ;;  %v11587_v38 = vld [vmem:[#allocation15 + $0x14c] sm:$0xf]  ;;  %v8318_v27 = vld [vmem:[#allocation15 + $0x158] sm:$0xf0] }
 0x2c6   :  { %3101 = vmatpush.bf16.msra.mxu1 %v9085_v49  ;;  %v8369_v49 = vor.u32 %v11599_v41, %v8366_v36  ;;  %v11619_v29 = vld [vmem:[#allocation15 + $0x24c] sm:$0xf]  ;;  %v8446_v30 = vld [vmem:[#allocation15 + $0x258] sm:$0xf0]  ;;  %v8321_v34 = vor.u32 %v11587_v38, %v8318_v27 }
 0x2c7   :  { %3063 = vmatpush.bf16.msrb.mxu2 %v8685_v52  ;;  %v8350_v52 = vld [vmem:[#allocation15 + $0x198] sm:$0xf0]  ;;  %v11651_v15 = vld [vmem:[#allocation15 + $0x34c] sm:$0xf] }
 0x2c8   :  { %3076 = vmatpush.bf16.msrb.mxu3 %v8813_v54  ;;  %3089 = vmatpush.bf16.msra.mxu0 %v8941_v61  ;;  %v11627_v54 = vld [vmem:[#allocation15 + $0x28c] sm:$0xf]  ;;  %v8225_v61 = vor.u32 %v11563_v45, %v8222_v46  ;;  %v8574_v19 = vld [vmem:[#allocation15 + $0x358] sm:$0xf0] }
 0x2c9   :  { %v8481_v0 = vor.u32 %v11627_v54, %v8478_v56  ;;  %v11551_v48 = vld [vmem:[#allocation15 + $0x2c] sm:$0xf]  ;;  %v8577_v41 = vor.u32 %v11651_v15, %v8574_v19  ;;  %v8302_v47 = vld [vmem:[#allocation15 + $0x138] sm:$0xf0] }
 0x2ca   :  { %3102 = vmatpush.bf16.msra.mxu1 %v9069_v20  ;;  %v8353_v20 = vor.u32 %v11595_v18, %v8350_v52  ;;  %v11583_v17 = vld [vmem:[#allocation15 + $0x12c] sm:$0xf]  ;;  %v8158_v18 = vld [vmem:[#allocation15 + $0x18] sm:$0xf0] }
 0x2cb   :  { %3064 = vmatpush.bf16.msrb.mxu2 %v8669_v42  ;;  %v2832_v43 = vpop.f32.mrf.mxu0  ;;  %v11615_v11 = vld [vmem:[#allocation15 + $0x22c] sm:$0xf]  ;;  %v8305_v46 = vor.u32 %v11583_v17, %v8302_v47  ;;  %v8286_v54 = vld [vmem:[#allocation15 + $0x118] sm:$0xf0] }
 0x2cc   :  { %3077 = vmatpush.bf16.msrb.mxu3 %v8797_v6  ;;  %3090 = vmatpush.bf16.msra.mxu0 %v8925_v12  ;;  %v2845_v44 = vpop.f32.mrf.mxu1  ;;  %v8462_v6 = vld [vmem:[#allocation15 + $0x278] sm:$0xf0]  ;;  %v8209_v12 = vor.u32 %v11559_v59, %v8206_v32  ;;  %v11579_v52 = vld [vmem:[#allocation15 + $0x10c] sm:$0xf] }
 0x2cd   :  { %v11611_v60 = vld [vmem:[#allocation15 + $0x20c] sm:$0xf]  ;;  %v8542_v59 = vld [vmem:[#allocation15 + $0x318] sm:$0xf0] }
 0x2ce   :  { %3103 = vmatpush.bf16.msra.mxu1 %v9053_v13  ;;  %3065 = vmatmul.bf16.vlgmr.msrb.gmra.mxu2 %v13092_v1  ;;  %v8337_v13 = vor.u32 %v11591_v8, %v8334_v7  ;;  %v11703_v32 = vld [vmem:[#allocation15 + $0x4ec] sm:$0xf]  ;;  %v8289_v7 = vor.u32 %v11579_v52, %v8286_v54  ;;  %v8894_v38 = vld [vmem:[#allocation15 + $0x5d8] sm:$0xf0] }
 0x2cf   :  { %3109 = vmatpush.bf16.msra.mxu2 %v8273_v14  ;;  %3078 = vmatmul.bf16.vlgmr.msrb.gmra.mxu3 %v13094_v16  ;;  %v11763_v27 = vld [vmem:[#allocation15 + $0x6cc] sm:$0xf]  ;;  %v9022_v15 = vld [vmem:[#allocation15 + $0x6d8] sm:$0xf0] }
 0x2d0   :  { %3122 = vmatpush.bf16.msra.mxu3 %v8401_v4  ;;  %3135 = vmatpush.bf16.msrb.mxu0 %v8529_v24  ;;  %v2806_v23 = vpop.f32.mrf.mxu2  ;;  %v2819_v5 = vpop.f32.mrf.mxu3  ;;  %v8465_v24 = vor.u32 %v11623_v9, %v8462_v6  ;;  %v9038_v9 = vld [vmem:[#allocation15 + $0x6f8] sm:$0xf0]  ;;  %v11795_v19 = vld [vmem:[#allocation15 + $0x7cc] sm:$0xf] }
 0x2d1   :  { %3091 = vmatmul.bf16.vlgmr.msra.gmra.mxu0 %v13096_v62  ;;  %3104 = vmatmul.bf16.vlgmr.msra.gmra.mxu1 %v13098_v55  ;;  %v2820_v42 = vadd.f32 %v2819_v5, %v2806_v23  ;;  %v8910_v23 = vld [vmem:[#allocation15 + $0x5f8] sm:$0xf0]  ;;  %v11767_v5 = vld [vmem:[#allocation15 + $0x6ec] sm:$0xf] }
 0x2d2   :  { %3148 = vmatpush.bf16.msrb.mxu1 %v8657_v63  ;;  %v8593_v63 = vor.u32 %v11655_v50, %v8590_v37  ;;  %v9166_v6 = vld [vmem:[#allocation15 + $0x7f8] sm:$0xf0]  ;;  %v11759_v47 = vld [vmem:[#allocation15 + $0x6ac] sm:$0xf] }
 0x2d3   :  { %3110 = vmatpush.bf16.msra.mxu2 %v8257_v31  ;;  %v2833_v53 = vadd.f32 %v2832_v43, %v2820_v42  ;;  %v2834_v14 = vpop.f32.mrf.mxu0  ;;  %v8558_v43 = vld [vmem:[#allocation15 + $0x338] sm:$0xf0]  ;;  %v11799_v42 = vld [vmem:[#allocation15 + $0x7ec] sm:$0xf] }
 0x2d4   :  { %3123 = vmatpush.bf16.msra.mxu3 %v8385_v33  ;;  %3136 = vmatpush.bf16.msrb.mxu0 %v8513_v10  ;;  %v2847_v4 = vpop.f32.mrf.mxu1  ;;  %v8193_v33 = vor.u32 %v11555_v3, %v8190_v21  ;;  %v8174_v10 = vld [vmem:[#allocation15 + $0x38] sm:$0xf0]  ;;  %v9041_v21 = vor.u32 %v11767_v5, %v9038_v9  ;;  %v11751_v9 = vld [vmem:[#allocation15 + $0x66c] sm:$0xf] }
 0x2d5   :  { %v13120_v31 = vadd.f32 %v2845_v44, %v2833_v53  ;;  %v11547_v44 = vld [vmem:[#allocation15 + $0xc] sm:$0xf]  ;;  %v8177_v45 = vor.u32 %v11551_v48, %v8174_v10  ;;  %v8766_v3 = vld [vmem:[#allocation15 + $0x4d8] sm:$0xf0] }
 0x2d6   :  { %3149 = vmatpush.bf16.msrb.mxu1 %v8641_v35  ;;  %v8449_v35 = vor.u32 %v11619_v29, %v8446_v30  ;;  %v8161_v8 = vor.u32 %v11547_v44, %v8158_v18  ;;  %v11699_v4 = vld [vmem:[#allocation15 + $0x4cc] sm:$0xf]  ;;  %v8878_v17 = vld [vmem:[#allocation15 + $0x5b8] sm:$0xf0] }
 0x2d7   :  { %3111 = vmatpush.bf16.msra.mxu2 %v8241_v40  ;;  %v8430_v40 = vld [vmem:[#allocation15 + $0x238] sm:$0xf0]  ;;  %v11695_v10 = vld [vmem:[#allocation15 + $0x4ac] sm:$0xf] }
 0x2d8   :  { %3124 = vmatpush.bf16.msra.mxu3 %v8369_v49  ;;  %3137 = vmatpush.bf16.msrb.mxu0 %v8497_v58  ;;  %v2808_v36 = vpop.f32.mrf.mxu2  ;;  %v2821_v39 = vpop.f32.mrf.mxu3  ;;  %v11647_v49 = vld [vmem:[#allocation15 + $0x32c] sm:$0xf]  ;;  %v8433_v56 = vor.u32 %v11615_v11, %v8430_v40  ;;  %v9006_v11 = vld [vmem:[#allocation15 + $0x6b8] sm:$0xf0] }
 0x2d9   :  { %v8561_v57 = vor.u32 %v11647_v49, %v8558_v43  ;;  %v11727_v39 = vld [vmem:[#allocation15 + $0x5ac] sm:$0xf]  ;;  %v9134_v49 = vld [vmem:[#allocation15 + $0x7b8] sm:$0xf0] }
 0x2da   :  { %3150 = vmatpush.bf16.msrb.mxu1 %v8625_v51  ;;  %v11791_v40 = vld [vmem:[#allocation15 + $0x7ac] sm:$0xf]  ;;  %v8734_v52 = vld [vmem:[#allocation15 + $0x498] sm:$0xf0] }
 0x2db   :  { %3112 = vmatpush.bf16.msra.mxu2 %v8225_v61  ;;  %v13122_v58 = vpop.f32.mrf.mxu0  ;;  %v8414_v61 = vld [vmem:[#allocation15 + $0x218] sm:$0xf0]  ;;  %v11691_v18 = vld [vmem:[#allocation15 + $0x48c] sm:$0xf]  ;;  %v9137_v54 = vor.u32 %v11791_v40, %v9134_v49 }
 0x2dc   :  { %3125 = vmatpush.bf16.msra.mxu3 %v8353_v20  ;;  %3138 = vmatpush.bf16.msrb.mxu0 %v8481_v0  ;;  %v13124_v51 = vpop.f32.mrf.mxu1  ;;  %v11643_v20 = vld [vmem:[#allocation15 + $0x30c] sm:$0xf]  ;;  %v8782_v0 = vld [vmem:[#allocation15 + $0x4f8] sm:$0xf0]  ;;  %v8417_v50 = vor.u32 %v11611_v60, %v8414_v61 }
 0x2dd   :  { %v8545_v37 = vor.u32 %v11643_v20, %v8542_v59  ;;  %v8990_v60 = vld [vmem:[#allocation15 + $0x698] sm:$0xf0]  ;;  %v11787_v61 = vld [vmem:[#allocation15 + $0x78c] sm:$0xf]  ;;  %v8737_v59 = vor.u32 %v11691_v18, %v8734_v52 }
 0x2de   :  { %3151 = vmatpush.bf16.msrb.mxu1 %v8609_v2  ;;  %v11735_v2 = vld [vmem:[#allocation15 + $0x5ec] sm:$0xf]  ;;  %v8942_v40 = vld [vmem:[#allocation15 + $0x638] sm:$0xf0] }
 0x2df   :  { %3113 = vmatpush.bf16.msra.mxu2 %v8209_v12  ;;  %v8913_v14 = vor.u32 %v11735_v2, %v8910_v23  ;;  %v8718_v2 = vld [vmem:[#allocation15 + $0x478] sm:$0xf0]  ;;  %v11775_v49 = vld [vmem:[#allocation15 + $0x72c] sm:$0xf] }
 0x2e0   :  { %3126 = vmatpush.bf16.msra.mxu3 %v8337_v13  ;;  %3139 = vmatpush.bf16.msrb.mxu0 %v8465_v24  ;;  %v13126_v53 = vpop.f32.mrf.mxu2  ;;  %v13128_v12 = vpop.f32.mrf.mxu3  ;;  %v8785_v13 = vor.u32 %v11703_v32, %v8782_v0  ;;  %v9169_v24 = vor.u32 %v11799_v42, %v9166_v6  ;;  %v11687_v0 = vld [vmem:[#allocation15 + $0x46c] sm:$0xf]  ;;  %v8974_v42 = vld [vmem:[#allocation15 + $0x678] sm:$0xf0] }
 0x2e1   :  { %v11783_v6 = vld [vmem:[#allocation15 + $0x76c] sm:$0xf]  ;;  %v8670_v18 = vld [vmem:[#allocation15 + $0x418] sm:$0xf0] }
 0x2e2   :  { %3152 = vmatpush.bf16.msrb.mxu1 %v8593_v63  ;;  %v11731_v63 = vld [vmem:[#allocation15 + $0x5cc] sm:$0xf] }
 0x2e3   :  { %3114 = vmatpush.bf16.msra.mxu2 %v8193_v33  ;;  %v2886_v29 = vpop.f32.mrf.mxu0  ;;  %v9150_v33 = vld [vmem:[#allocation15 + $0x7d8] sm:$0xf0]  ;;  %v8897_v48 = vor.u32 %v11731_v63, %v8894_v38  ;;  %v11715_v38 = vld [vmem:[#allocation15 + $0x54c] sm:$0xf] }
 0x2e4   :  { %3127 = vmatpush.bf16.msra.mxu3 %v8321_v34  ;;  %3140 = vmatpush.bf16.msrb.mxu0 %v8449_v35  ;;  %v2899_v30 = vpop.f32.mrf.mxu1  ;;  %v8769_v34 = vor.u32 %v11699_v4, %v8766_v3  ;;  %v8750_v35 = vld [vmem:[#allocation15 + $0x4b8] sm:$0xf0]  ;;  %v9153_v36 = vor.u32 %v11795_v19, %v9150_v33  ;;  %v8977_v3 = vor.u32 %v11751_v9, %v8974_v42  ;;  %v11747_v29 = vld [vmem:[#allocation15 + $0x64c] sm:$0xf] }
 0x2e5   :  { %v8702_v4 = vld [vmem:[#allocation15 + $0x458] sm:$0xf0]  ;;  %v11707_v52 = vld [vmem:[#allocation15 + $0x50c] sm:$0xf] }
 0x2e6   :  { %3153 = vmatpush.bf16.msrb.mxu1 %v8577_v41  ;;  %v9025_v41 = vor.u32 %v11763_v27, %v9022_v15  ;;  %v8830_v27 = vld [vmem:[#allocation15 + $0x558] sm:$0xf0]  ;;  %v11779_v15 = vld [vmem:[#allocation15 + $0x74c] sm:$0xf] }
 0x2e7   :  { %3115 = vmatpush.bf16.msra.mxu2 %v8177_v45  ;;  %v8753_v45 = vor.u32 %v11695_v10, %v8750_v35  ;;  %v8958_v30 = vld [vmem:[#allocation15 + $0x658] sm:$0xf0]  ;;  %v8833_v10 = vor.u32 %v11715_v38, %v8830_v27  ;;  %v11679_v35 = vld [vmem:[#allocation15 + $0x42c] sm:$0xf]  ;;  %v9212_v38 = vld [vmem:[#allocation18 + $0x50] sm:$0xf] }
 0x2e8   :  { %3128 = vmatpush.bf16.msra.mxu3 %v8305_v46  ;;  %3141 = vmatpush.bf16.msrb.mxu0 %v8433_v56  ;;  %v2860_v43 = vpop.f32.mrf.mxu2  ;;  %v2873_v44 = vpop.f32.mrf.mxu3  ;;  %v8881_v46 = vor.u32 %v11727_v39, %v8878_v17  ;;  %v8862_v56 = vld [vmem:[#allocation15 + $0x598] sm:$0xf0]  ;;  %v11711_v17 = vld [vmem:[#allocation15 + $0x52c] sm:$0xf]  ;;  %v11813_v27 = vld [vmem:[#allocation18 + $0x54] sm:$0xf0] }
 0x2e9   :  { %v9086_v19 = vld [vmem:[#allocation15 + $0x758] sm:$0xf0] }
 0x2ea   :  { %3154 = vmatpush.bf16.msrb.mxu1 %v8561_v57  ;;  %v11755_v57 = vld [vmem:[#allocation15 + $0x68c] sm:$0xf]  ;;  %v9089_v39 = vor.u32 %v11779_v15, %v9086_v19  ;;  %v9070_v43 = vld [vmem:[#allocation15 + $0x738] sm:$0xf0]  ;;  %v9213_v15 = vor.u32 %v11813_v27, %v9212_v38 }
 0x2eb   :  { %3116 = vmatpush.bf16.msra.mxu2 %v8161_v8  ;;  %v8993_v23 = vor.u32 %v11755_v57, %v8990_v60  ;;  %v11719_v8 = vld [vmem:[#allocation15 + $0x56c] sm:$0xf]  ;;  %v8798_v57 = vld [vmem:[#allocation15 + $0x518] sm:$0xf0] }
 0x2ec   :  { %3129 = vmatpush.bf16.msra.mxu3 %v8289_v7  ;;  %3142 = vmatpush.bf16.msrb.mxu0 %v8417_v50  ;;  %v8846_v7 = vld [vmem:[#allocation15 + $0x578] sm:$0xf0]  ;;  %v11739_v60 = vld [vmem:[#allocation15 + $0x60c] sm:$0xf] }
 0x2ed   :  { %v9102_v50 = vld [vmem:[#allocation15 + $0x778] sm:$0xf0] }
 0x2ee   :  { %3155 = vmatpush.bf16.msrb.mxu1 %v8545_v37  ;;  %3117 = vmatmul.bf16.vlgmr.msra.gmra.mxu2 %v13080_v28  ;;  %v9009_v28 = vor.u32 %v11759_v47, %v9006_v11  ;;  %v13136_v20 = vpop.f32.mrf.mxu1  ;;  %v8721_v37 = vor.u32 %v11687_v0, %v8718_v2  ;;  %v8814_v47 = vld [vmem:[#allocation15 + $0x538] sm:$0xf0]  ;;  %v11743_v11 = vld [vmem:[#allocation15 + $0x62c] sm:$0xf]  ;;  %v11817_v0 = vld [vmem:[#allocation18 + $0x74] sm:$0xf0] }
 0x2ef   :  { %3161 = vmatpush.bf16.msrb.mxu2 %v8785_v13  ;;  %3130 = vmatmul.bf16.vlgmr.msra.gmra.mxu3 %v13082_v22  ;;  %v11723_v22 = vld [vmem:[#allocation15 + $0x58c] sm:$0xf]  ;;  %v8849_v13 = vor.u32 %v11719_v8, %v8846_v7  ;;  %v9292_v2 = vld [vmem:[#allocation18 + $0xf0] sm:$0xf]  ;;  %v8801_v8 = vor.u32 %v11707_v52, %v8798_v57 }
 0x2f0   :  { %3174 = vmatpush.bf16.msrb.mxu3 %v8913_v14  ;;  %3187 = vmatpush.bf16.msra.mxu0 %v9041_v21  ;;  %v8865_v32 = vor.u32 %v11723_v22, %v8862_v56  ;;  %v11683_v14 = vld [vmem:[#allocation15 + $0x44c] sm:$0xf]  ;;  %v9105_v21 = vor.u32 %v11783_v6, %v9102_v50  ;;  %v9220_v50 = vld [vmem:[#allocation18 + $0x60] sm:$0xf]  ;;  %v9356_v52 = vld [vmem:[#allocation18 + $0x170] sm:$0xf] }
 0x2f1   :  { %3143 = vmatmul.bf16.vlgmr.msrb.gmra.mxu0 %v13084_v25  ;;  %3156 = vmatmul.bf16.vlgmr.msrb.gmra.mxu1 %v13086_v26  ;;  %v9118_v25 = vld [vmem:[#allocation15 + $0x798] sm:$0xf0]  ;;  %v13134_v26 = vpop.f32.mrf.mxu0 }
 0x2f2   :  { %3200 = vmatpush.bf16.msra.mxu1 %v9169_v24  ;;  %v9121_v5 = vor.u32 %v11787_v61, %v9118_v25  ;;  %v13138_v24 = vpop.f32.mrf.mxu2  ;;  %v13140_v63 = vpop.f32.mrf.mxu3  ;;  %v8926_v61 = vld [vmem:[#allocation15 + $0x618] sm:$0xf0]  ;;  %v11771_v25 = vld [vmem:[#allocation15 + $0x70c] sm:$0xf] }
 0x2f3   :  { %3162 = vmatpush.bf16.msrb.mxu2 %v8769_v34  ;;  %v8929_v7 = vor.u32 %v11739_v60, %v8926_v61 }
 0x2f4   :  { %3175 = vmatpush.bf16.msrb.mxu3 %v8897_v48  ;;  %3188 = vmatpush.bf16.msra.mxu0 %v9025_v41  ;;  %v8705_v48 = vor.u32 %v11683_v14, %v8702_v4  ;;  %v8686_v41 = vld [vmem:[#allocation15 + $0x438] sm:$0xf0]  ;;  %v11831_v14 = vld [vmem:[#allocation18 + $0xe4] sm:$0xf0]  ;;  %v2859_v4 = vadd.f32 %v13126_v53, %v13120_v31  ;;  %v2924_v53 = vadd.f32 %v13140_v63, %v13138_v24  ;;  %v9196_v63 = vld [vmem:[#allocation18 + $0x30] sm:$0xf] }
 0x2f5   :  { %v8689_v44 = vor.u32 %v11679_v35, %v8686_v41  ;;  %v11809_v41 = vld [vmem:[#allocation18 + $0x34] sm:$0xf0] }
 0x2f6   :  { %3201 = vmatpush.bf16.msra.mxu1 %v9153_v36  ;;  %v2951_v34 = vpop.f32.mrf.mxu1  ;;  %v8961_v36 = vor.u32 %v11747_v29, %v8958_v30  ;;  %v9276_v29 = vld [vmem:[#allocation18 + $0xd0] sm:$0xf]  ;;  %v11829_v30 = vld [vmem:[#allocation18 + $0xd4] sm:$0xf0]  ;;  %v2872_v31 = vadd.f32 %v13128_v12, %v2859_v4  ;;  %v11803_v4 = vld [vmem:[#allocation18 + $0x4] sm:$0xf0] }
 0x2f7   :  { %3163 = vmatpush.bf16.msrb.mxu2 %v8753_v45  ;;  %v8817_v45 = vor.u32 %v11711_v17, %v8814_v47  ;;  %v9277_v19 = vor.u32 %v11829_v30, %v9276_v29  ;;  %v9268_v34 = vld [vmem:[#allocation18 + $0xc0] sm:$0xf]  ;;  %v11816_v29 = vld [vmem:[#allocation18 + $0x74] sm:$0xf]  ;;  %v9340_v30 = vld [vmem:[#allocation18 + $0x150] sm:$0xf] }
 0x2f8   :  { %3176 = vmatpush.bf16.msrb.mxu3 %v8881_v46  ;;  %3189 = vmatpush.bf16.msra.mxu0 %v9009_v28  ;;  %v11675_v46 = vld [vmem:[#allocation15 + $0x40c] sm:$0xf]  ;;  %v8945_v28 = vor.u32 %v11743_v11, %v8942_v40  ;;  %v13157_v11 = vld [vmem:[#allocation17 + $0x1] ss:$2 sm:$0xf] }
 0x2f9   :  { %v2938_v33 = vpop.f32.mrf.mxu0 }
 0x2fa   :  { %3202 = vmatpush.bf16.msra.mxu1 %v9137_v54  ;;  %v9073_v54 = vor.u32 %v11775_v49, %v9070_v43  ;;  %v2912_v22 = vpop.f32.mrf.mxu2  ;;  %v2925_v56 = vpop.f32.mrf.mxu3  ;;  %v9204_v33 = vld [vmem:[#allocation18 + $0x40] sm:$0xf]  ;;  %v11807_v43 = vld [vmem:[#allocation18 + $0x24] sm:$0xf0] }
 0x2fb   :  { %3164 = vmatpush.bf16.msrb.mxu2 %v8737_v59  ;;  %v9054_v59 = vld [vmem:[#allocation15 + $0x718] sm:$0xf0]  ;;  %v9188_v49 = vld [vmem:[#allocation18 + $0x20] sm:$0xf]  ;;  %v3230_v56 = vperm.slane %v13157_v11, 0 }
 0x2fc   :  { %3177 = vmatpush.bf16.msrb.mxu3 %v8865_v32  ;;  %3190 = vmatpush.bf16.msra.mxu0 %v8993_v23  ;;  %v9228_v32 = vld [vmem:[#allocation18 + $0x70] sm:$0xf]  ;;  %v11833_v23 = vld [vmem:[#allocation18 + $0xf4] sm:$0xf0]  ;;  %v9057_v9 = vor.u32 %v11771_v25, %v9054_v59  ;;  %v9189_v25 = vor.u32 %v11807_v43, %v9188_v49 }
 0x2fd   :  { %v9229_v42 = vor.u32 %v11817_v0, %v9228_v32  ;;  %v9293_v6 = vor.u32 %v11833_v23, %v9292_v2  ;;  %v9180_v59 = vld [vmem:[#allocation18 + $0x10] sm:$0xf]  ;;  %v11805_v32 = vld [vmem:[#allocation18 + $0x14] sm:$0xf0]  ;;  %v9348_v23 = vld [vmem:[#allocation18 + $0x160] sm:$0xf] }
 0x2fe   :  { %3203 = vmatpush.bf16.msra.mxu1 %v9121_v5  ;;  %v8673_v5 = vor.u32 %v11675_v46, %v8670_v18  ;;  %v11823_v18 = vld [vmem:[#allocation18 + $0xa4] sm:$0xf0]  ;;  %v9244_v0 = vld [vmem:[#allocation18 + $0x90] sm:$0xf]  ;;  %v11821_v2 = vld [vmem:[#allocation18 + $0x94] sm:$0xf0] }
 0x2ff   :  { %3165 = vmatpush.bf16.msrb.mxu2 %v8721_v37  ;;  %v11815_v37 = vld [vmem:[#allocation18 + $0x64] sm:$0xf0] }
 0x300   :  { %3178 = vmatpush.bf16.msrb.mxu3 %v8849_v13  ;;  %3191 = vmatpush.bf16.msra.mxu0 %v8977_v3  ;;  %v9284_v13 = vld [vmem:[#allocation18 + $0xe0] sm:$0xf]  ;;  %v9221_v3 = vor.u32 %v11815_v37, %v9220_v50 }
 0x301   :  { %v9172_v50 = vld [vmem:[#allocation18] sm:$0xf] }
 0x302   :  { %3204 = vmatpush.bf16.msra.mxu1 %v9105_v21  ;;  %v9285_v21 = vor.u32 %v11831_v14, %v9284_v13  ;;  %v9181_v13 = vor.u32 %v11805_v32, %v9180_v59  ;;  %v9245_v14 = vor.u32 %v11821_v2, %v9244_v0  ;;  %v9308_v59 = vld [vmem:[#allocation18 + $0x110] sm:$0xf]  ;;  %v11837_v32 = vld [vmem:[#allocation18 + $0x114] sm:$0xf0] }
 0x303   :  { %3166 = vmatpush.bf16.msrb.mxu2 %v8705_v48  ;;  %v2885_v48 = vadd.f32 %v13122_v58, %v2872_v31  ;;  %v9197_v58 = vor.u32 %v11809_v41, %v9196_v63  ;;  %v11845_v31 = vld [vmem:[#allocation18 + $0x154] sm:$0xf0]  ;;  %v9332_v63 = vld [vmem:[#allocation18 + $0x140] sm:$0xf]  ;;  %v11843_v41 = vld [vmem:[#allocation18 + $0x144] sm:$0xf0] }
 0x304   :  { %3179 = vmatpush.bf16.msrb.mxu3 %v8833_v10  ;;  %3192 = vmatpush.bf16.msra.mxu0 %v8961_v36  ;;  %v13152_v10 = vld [vmem:[#allocation17] ss:$2 sm:$0xf]  ;;  %v9260_v36 = vld [vmem:[#allocation18 + $0xb0] sm:$0xf] }
 0x305   :  { %v2898_v17 = vadd.f32 %v13124_v51, %v2885_v48  ;;  %v3215_v47 = vperm.slane %v13152_v10, 0  ;;  %v9173_v48 = vor.u32 %v11803_v4, %v9172_v50  ;;  %v11806_v50 = vld [vmem:[#allocation18 + $0x24] sm:$0xf] }
 0x306   :  { %3205 = vmatpush.bf16.msra.mxu1 %v9089_v39  ;;  %v11825_v39 = vld [vmem:[#allocation18 + $0xb4] sm:$0xf0]  ;;  %v11822_v4 = vld [vmem:[#allocation18 + $0xa4] sm:$0xf] }
 0x307   :  { %3167 = vmatpush.bf16.msrb.mxu2 %v8689_v44  ;;  %v9252_v44 = vld [vmem:[#allocation18 + $0xa0] sm:$0xf]  ;;  %v3223_v22 = vmul.f32 %v3215_v47, %v2898_v17  ;;  %v9286_v17 = vld [vmem:[#allocation18 + $0xe8] sm:$0xf0]  ;;  %v9333_v47 = vor.u32 %v11843_v41, %v9332_v63 }
 0x308   :  { %3180 = vmatpush.bf16.msrb.mxu3 %v8817_v45  ;;  %3193 = vmatpush.bf16.msra.mxu0 %v8945_v28  ;;  %v11849_v28 = vld [vmem:[#allocation18 + $0x174] sm:$0xf0] }
 0x309   :  { %v9357_v51 = vor.u32 %v11849_v28, %v9356_v52  ;;  %v9278_v52 = vld [vmem:[#allocation18 + $0xd8] sm:$0xf0] }
 0x30a   :  { %3206 = vmatpush.bf16.msra.mxu1 %v9073_v54 }
 0x30b   :  { %3168 = vmatpush.bf16.msrb.mxu2 %v8673_v5  ;;  %v11847_v5 = vld [vmem:[#allocation18 + $0x164] sm:$0xf0] }
 0x30c   :  { %3181 = vmatpush.bf16.msrb.mxu3 %v8801_v8  ;;  %3194 = vmatpush.bf16.msra.mxu0 %v8929_v7  ;;  %v3216_v7 = vperm.slane %v13152_v10, 1 }
 0x30e   :  { %3207 = vmatpush.bf16.msra.mxu1 %v9057_v9  ;;  %3169 = vmatmul.bf16.vlgmr.msrb.gmra.mxu2 %v13092_v1  ;;  %v11811_v1 = vld [vmem:[#allocation18 + $0x44] sm:$0xf0]  ;;  %v3001_v12 = vpop.f32.mrf.mxu1  ;;  %v9349_v9 = vor.u32 %v11847_v5, %v9348_v23  ;;  %v11808_v23 = vld [vmem:[#allocation18 + $0x34] sm:$0xf] }
 0x30f   :  { %3634 = vmatpush.bf16.msra.mxu2 %v9229_v42  ;;  %3182 = vmatmul.bf16.vlgmr.msrb.gmra.mxu3 %v13094_v16  ;;  %v11827_v16 = vld [vmem:[#allocation18 + $0xc4] sm:$0xf0]  ;;  %v9205_v35 = vor.u32 %v11811_v1, %v9204_v33  ;;  %v3238_v42 = vadd.f32 %v3230_v56, %v3223_v22  ;;  %v9294_v33 = vld [vmem:[#allocation18 + $0xf8] sm:$0xf0]  ;;  %v9341_v1 = vor.u32 %v11845_v31, %v9340_v30 }
 0x310   :  { %3647 = vmatpush.bf16.msra.mxu3 %v9293_v6  ;;  %3195 = vmatmul.bf16.vlgmr.msra.gmra.mxu0 %v13096_v62  ;;  %v2937_v62 = vadd.f32 %v13134_v26, %v2924_v53  ;;  %v9269_v24 = vor.u32 %v11827_v16, %v9268_v34  ;;  %v9261_v26 = vor.u32 %v11825_v39, %v9260_v36  ;;  %v3231_v6 = vperm.slane %v13157_v11, 1  ;;  %v11830_v39 = vld [vmem:[#allocation18 + $0xe4] sm:$0xf]  ;;  %v9358_v30 = vld [vmem:[#allocation18 + $0x178] sm:$0xf0] }
 0x311   :  { %3208 = vmatmul.bf16.vlgmr.msra.gmra.mxu1 %v13098_v55  ;;  %v2988_v55 = vpop.f32.mrf.mxu0  ;;  %v2962_v45 = vpop.f32.mrf.mxu2  ;;  %3660 = vmatpush.bf16.msrb.mxu0 %v9357_v51  ;;  %v3242_v34 = vmax.f32 %v3238_v42, 0.0  ;;  %v11839_v51 = vld [vmem:[#allocation18 + $0x124] sm:$0xf0]  ;;  %v9262_v42 = vld [vmem:[#allocation18 + $0xb8] sm:$0xf0] }
 0x312   :  { %v2950_v40 = vadd.f32 %v13136_v20, %v2937_v62  ;;  %v2975_v46 = vpop.f32.mrf.mxu3  ;;  %v9253_v20 = vor.u32 %v11823_v18, %v9252_v44  ;;  %v9289_v44 = vor.u32 %v11830_v39, %v9286_v17  ;;  %v11828_v18 = vld [vmem:[#allocation18 + $0xd4] sm:$0xf]  ;;  %v9174_v39 = vld [vmem:[#allocation18 + $0x8] sm:$0xf0]  ;;  %v11818_v17 = vld [vmem:[#allocation18 + $0x84] sm:$0xf] }
 0x313   :  { %3635 = vmatpush.bf16.msra.mxu2 %v9221_v3  ;;  %v9236_v3 = vld [vmem:[#allocation18 + $0x80] sm:$0xf]  ;;  %v13165_v49 = vpack.c.bf16 %v3242_v34, %v3242_v34  ;;  %v9281_v56 = vor.u32 %v11828_v18, %v9278_v52  ;;  %v9182_v34 = vld [vmem:[#allocation18 + $0x18] sm:$0xf0]  ;;  %v11842_v52 = vld [vmem:[#allocation18 + $0x144] sm:$0xf] }
 0x314   :  { %3648 = vmatpush.bf16.msra.mxu3 %v9285_v21  ;;  %v2963_v54 = vadd.f32 %v2962_v45, %v2950_v40  ;;  %v11819_v21 = vld [vmem:[#allocation18 + $0x84] sm:$0xf0]  ;;  %v11841_v40 = vld [vmem:[#allocation18 + $0x134] sm:$0xf0]  ;;  %v11812_v45 = vld [vmem:[#allocation18 + $0x54] sm:$0xf] }
 0x315   :  { %3661 = vmatpush.bf16.msrb.mxu0 %v9349_v9  ;;  %v9237_v62 = vor.u32 %v11819_v21, %v9236_v3  ;;  %v11824_v9 = vld [vmem:[#allocation18 + $0xb4] sm:$0xf]  ;;  %v9300_v3 = vld [vmem:[#allocation18 + $0x100] sm:$0xf]  ;;  %v11835_v21 = vld [vmem:[#allocation18 + $0x104] sm:$0xf0] }
 0x316   :  { %v2976_v57 = vadd.f32 %v2975_v46, %v2963_v54  ;;  %v3003_v61 = vpop.f32.mrf.mxu1  ;;  %v9214_v46 = vld [vmem:[#allocation18 + $0x58] sm:$0xf0]  ;;  %v9316_v54 = vld [vmem:[#allocation18 + $0x120] sm:$0xf] }
 0x317   :  { %3636 = vmatpush.bf16.msra.mxu2 %v9213_v15  ;;  %v9230_v15 = vld [vmem:[#allocation18 + $0x78] sm:$0xf0]  ;;  %v9217_v22 = vor.u32 %v11812_v45, %v9214_v46  ;;  %v11826_v61 = vld [vmem:[#allocation18 + $0xc4] sm:$0xf] }
 0x318   :  { %3649 = vmatpush.bf16.msra.mxu3 %v9277_v19  ;;  %v2989_v8 = vadd.f32 %v2988_v55, %v2976_v57  ;;  %v11832_v19 = vld [vmem:[#allocation18 + $0xf4] sm:$0xf]  ;;  %v11814_v55 = vld [vmem:[#allocation18 + $0x64] sm:$0xf] }
 0x319   :  { %v2990_v60 = vpop.f32.mrf.mxu0  ;;  %v2964_v38 = vpop.f32.mrf.mxu2  ;;  %3662 = vmatpush.bf16.msrb.mxu0 %v9341_v1  ;;  %v11810_v57 = vld [vmem:[#allocation18 + $0x44] sm:$0xf]  ;;  %v11804_v1 = vld [vmem:[#allocation18 + $0x14] sm:$0xf] }
 0x31a   :  { %v3002_v37 = vadd.f32 %v3001_v12, %v2989_v8  ;;  %v2977_v27 = vpop.f32.mrf.mxu3  ;;  %v9233_v12 = vor.u32 %v11816_v29, %v9230_v15  ;;  %v9206_v60 = vld [vmem:[#allocation18 + $0x48] sm:$0xf0]  ;;  %v11848_v29 = vld [vmem:[#allocation18 + $0x174] sm:$0xf]  ;;  %v9185_v63 = vor.u32 %v11804_v1, %v9182_v34  ;;  %v11859_v1 = vld [vmem:[#allocation18 + $0x1c4] sm:$0xf0] }
 0x31b   :  { %3637 = vmatpush.bf16.msra.mxu2 %v9205_v35  ;;  %v9297_v35 = vor.u32 %v11832_v19, %v9294_v33  ;;  %v9209_v0 = vor.u32 %v11810_v57, %v9206_v60  ;;  %v9254_v38 = vld [vmem:[#allocation18 + $0xa8] sm:$0xf0]  ;;  %v9301_v27 = vor.u32 %v11835_v21, %v9300_v3  ;;  %v9361_v15 = vor.u32 %v11848_v29, %v9358_v30  ;;  %v11838_v57 = vld [vmem:[#allocation18 + $0x124] sm:$0xf]  ;;  %v11863_v3 = vld [vmem:[#allocation18 + $0x1e4] sm:$0xf0] }
 0x31c   :  { %3650 = vmatpush.bf16.msra.mxu3 %v9269_v24  ;;  %v3224_v53 = vmul.f32 %v3216_v7, %v3002_v37  ;;  %v9222_v24 = vld [vmem:[#allocation18 + $0x68] sm:$0xf0]  ;;  %v9198_v7 = vld [vmem:[#allocation18 + $0x38] sm:$0xf0]  ;;  %v9257_v33 = vor.u32 %v11822_v4, %v9254_v38  ;;  %v9412_v4 = vld [vmem:[#allocation18 + $0x1e0] sm:$0xf] }
 0x31d   :  { %v9225_v43 = vor.u32 %v11814_v55, %v9222_v24  ;;  %3663 = vmatpush.bf16.msrb.mxu0 %v9333_v47  ;;  %v9190_v37 = vld [vmem:[#allocation18 + $0x28] sm:$0xf0]  ;;  %v9246_v55 = vld [vmem:[#allocation18 + $0x98] sm:$0xf0]  ;;  %v9413_v21 = vor.u32 %v11863_v3, %v9412_v4  ;;  %v3217_v30 = vperm.slane %v13152_v10, 2 }
 0x31e   :  { %v3239_v16 = vadd.f32 %v3231_v6, %v3224_v53  ;;  %v9309_v6 = vor.u32 %v11837_v32, %v9308_v59  ;;  %v9193_v19 = vor.u32 %v11806_v50, %v9190_v37  ;;  %v9238_v47 = vld [vmem:[#allocation18 + $0x88] sm:$0xf0]  ;;  %v9310_v59 = vld [vmem:[#allocation18 + $0x118] sm:$0xf0] }
 0x31f   :  { %3638 = vmatpush.bf16.msra.mxu2 %v9197_v58  ;;  %v9241_v18 = vor.u32 %v11818_v17, %v9238_v47  ;;  %v9318_v60 = vld [vmem:[#allocation18 + $0x128] sm:$0xf0]  ;;  %v9372_v47 = vld [vmem:[#allocation18 + $0x190] sm:$0xf] }
 0x320   :  { %3651 = vmatpush.bf16.msra.mxu3 %v9261_v26  ;;  %v3243_v36 = vmax.f32 %v3239_v16, 0.0  ;;  %v9324_v26 = vld [vmem:[#allocation18 + $0x130] sm:$0xf]  ;;  %v11820_v16 = vld [vmem:[#allocation18 + $0x94] sm:$0xf] }
 0x321   :  { %v9325_v28 = vor.u32 %v11841_v40, %v9324_v26  ;;  %v9249_v41 = vor.u32 %v11820_v16, %v9246_v55  ;;  %v11844_v26 = vld [vmem:[#allocation18 + $0x154] sm:$0xf]  ;;  %v9342_v40 = vld [vmem:[#allocation18 + $0x158] sm:$0xf0]  ;;  %v9388_v55 = vld [vmem:[#allocation18 + $0x1b0] sm:$0xf] }
 0x322   :  { %v13163_v58 = vpack.c.bf16 %v3243_v36, %v3243_v36  ;;  %v11802_v36 = vld [vmem:[#allocation18 + $0x4] sm:$0xf]  ;;  %v9345_v45 = vor.u32 %v11844_v26, %v9342_v40  ;;  %v11853_v26 = vld [vmem:[#allocation18 + $0x194] sm:$0xf0] }
 0x323   :  { %3639 = vmatpush.bf16.msra.mxu2 %v9189_v25  ;;  %v9270_v25 = vld [vmem:[#allocation18 + $0xc8] sm:$0xf0]  ;;  %3664 = vmatpush.bf16.msrb.mxu0 %v9325_v28  ;;  %v9177_v46 = vor.u32 %v11802_v36, %v9174_v39  ;;  %v11855_v36 = vld [vmem:[#allocation18 + $0x1a4] sm:$0xf0]  ;;  %v9373_v40 = vor.u32 %v11853_v26, %v9372_v47 }
 0x324   :  { %3652 = vmatpush.bf16.msra.mxu3 %v9253_v20  ;;  %v9317_v20 = vor.u32 %v11839_v51, %v9316_v54  ;;  %v9273_v2 = vor.u32 %v11826_v61, %v9270_v25  ;;  %v9334_v28 = vld [vmem:[#allocation18 + $0x148] sm:$0xf0]  ;;  %v11840_v51 = vld [vmem:[#allocation18 + $0x134] sm:$0xf]  ;;  %v9321_v61 = vor.u32 %v11838_v57, %v9318_v60 }
 0x325   :  { %v9337_v54 = vor.u32 %v11842_v52, %v9334_v28  ;;  %v11864_v52 = vld [vmem:[#allocation18 + $0x1f4] sm:$0xf]  ;;  %v9422_v28 = vld [vmem:[#allocation18 + $0x1f8] sm:$0xf0]  ;;  %v9414_v57 = vld [vmem:[#allocation18 + $0x1e8] sm:$0xf0] }
 0x327   :  { %3640 = vmatpush.bf16.msra.mxu2 %v9181_v13  ;;  %3665 = vmatpush.bf16.msrb.mxu0 %v9317_v20  ;;  %v9201_v13 = vor.u32 %v11808_v23, %v9198_v7  ;;  %v11836_v20 = vld [vmem:[#allocation18 + $0x114] sm:$0xf]  ;;  %v11834_v7 = vld [vmem:[#allocation18 + $0x104] sm:$0xf] }
 0x328   :  { %3653 = vmatpush.bf16.msra.mxu3 %v9245_v14  ;;  %v9265_v14 = vor.u32 %v11824_v9, %v9262_v42  ;;  %v9313_v32 = vor.u32 %v11836_v20, %v9310_v59  ;;  %v9302_v9 = vld [vmem:[#allocation18 + $0x108] sm:$0xf0]  ;;  %v11860_v20 = vld [vmem:[#allocation18 + $0x1d4] sm:$0xf]  ;;  %v9406_v59 = vld [vmem:[#allocation18 + $0x1d8] sm:$0xf0] }
 0x329   :  { %v9305_v42 = vor.u32 %v11834_v7, %v9302_v9  ;;  %v9398_v7 = vld [vmem:[#allocation18 + $0x1c8] sm:$0xf0] }
 0x32b   :  { %3641 = vmatpush.bf16.msra.mxu2 %v9173_v48  ;;  %3666 = vmatpush.bf16.msrb.mxu0 %v9309_v6  ;;  %v11865_v6 = vld [vmem:[#allocation18 + $0x1f4] sm:$0xf0] }
 0x32c   :  { %3654 = vmatpush.bf16.msra.mxu3 %v9237_v62 }
 0x32e   :  { %3642 = vmatmul.bf16.vlgmr.msra.gmra.mxu2 %v13165_v49  ;;  %v13169_v5 = vpop.f32.mrf.mxu0  ;;  %v13171_v8 = vpop.f32.mrf.mxu1 }
 0x32f   :  { %3686 = vmatpush.bf16.msrb.mxu2 %v9233_v12  ;;  %3655 = vmatmul.bf16.vlgmr.msra.gmra.mxu3 %v13163_v58  ;;  %v11846_v12 = vld [vmem:[#allocation18 + $0x164] sm:$0xf] }
 0x330   :  { %3699 = vmatpush.bf16.msrb.mxu3 %v9297_v35  ;;  %3667 = vmatpush.bf16.msrb.mxu0 %v9301_v27  ;;  %v9350_v35 = vld [vmem:[#allocation18 + $0x168] sm:$0xf0] }
 0x331   :  { %v3014_v31 = vpop.f32.mrf.mxu2  ;;  %v9353_v24 = vor.u32 %v11846_v12, %v9350_v35  ;;  %v11857_v12 = vld [vmem:[#allocation18 + $0x1b4] sm:$0xf0] }
 0x332   :  { %v3027_v53 = vpop.f32.mrf.mxu3 }
 0x333   :  { %3687 = vmatpush.bf16.msrb.mxu2 %v9225_v43  ;;  %v3028_v25 = vadd.f32 %v3027_v53, %v3014_v31  ;;  %v9404_v31 = vld [vmem:[#allocation18 + $0x1d0] sm:$0xf]  ;;  %v11861_v53 = vld [vmem:[#allocation18 + $0x1d4] sm:$0xf0] }
 0x334   :  { %3700 = vmatpush.bf16.msrb.mxu3 %v9289_v44  ;;  %3712 = vmatpush.bf16.msra.mxu0 %v9361_v15  ;;  %v9396_v15 = vld [vmem:[#allocation18 + $0x1c0] sm:$0xf] }
 0x336   :  { %v3042_v48 = vpop.f32.mrf.mxu0  ;;  %v3055_v62 = vpop.f32.mrf.mxu1 }
 0x337   :  { %3688 = vmatpush.bf16.msrb.mxu2 %v9217_v22  ;;  %v9326_v22 = vld [vmem:[#allocation18 + $0x138] sm:$0xf0]  ;;  %v9397_v62 = vor.u32 %v11859_v1, %v9396_v15 }
 0x338   :  { %3701 = vmatpush.bf16.msrb.mxu3 %v9281_v56  ;;  %3713 = vmatpush.bf16.msra.mxu0 %v9353_v24  ;;  %v9329_v56 = vor.u32 %v11840_v51, %v9326_v22 }
 0x339   :  { %v3016_v43 = vpop.f32.mrf.mxu2 }
 0x33a   :  { %v3029_v44 = vpop.f32.mrf.mxu3 }
 0x33b   :  { %3689 = vmatpush.bf16.msrb.mxu2 %v9209_v0  ;;  %v3041_v0 = vadd.f32 %v13169_v5, %v3028_v25 }
 0x33c   :  { %3702 = vmatpush.bf16.msrb.mxu3 %v9273_v2  ;;  %3714 = vmatpush.bf16.msra.mxu0 %v9345_v45  ;;  %v9364_v45 = vld [vmem:[#allocation18 + $0x180] sm:$0xf] }
 0x33f   :  { %3690 = vmatpush.bf16.msrb.mxu2 %v9201_v13 }
 0x340   :  { %3703 = vmatpush.bf16.msrb.mxu3 %v9265_v14  ;;  %3715 = vmatpush.bf16.msra.mxu0 %v9337_v54  ;;  %v9425_v54 = vor.u32 %v11864_v52, %v9422_v28  ;;  %v10196_v52 = vld [vmem:[#allocation21 + $0x600] sm:$0xf] }
 0x341   :  { %v12074_v28 = vld [vmem:[#allocation21 + $0x67c] sm:$0xf0] }
 0x343   :  { %3691 = vmatpush.bf16.msrb.mxu2 %v9193_v19  ;;  %v3232_v19 = vperm.slane %v13157_v11, 2 }
 0x344   :  { %3704 = vmatpush.bf16.msrb.mxu3 %v9257_v33  ;;  %3716 = vmatpush.bf16.msra.mxu0 %v9329_v56  ;;  %v9405_v33 = vor.u32 %v11861_v53, %v9404_v31  ;;  %v11862_v56 = vld [vmem:[#allocation18 + $0x1e4] sm:$0xf] }
 0x345   :  { %v9417_v60 = vor.u32 %v11862_v56, %v9414_v57  ;;  %v10197_v56 = vor.u32 %v12074_v28, %v10196_v52  ;;  %v11866_v52 = vld [vmem:[#allocation21 + $0x4] sm:$0xf] }
 0x346   :  { %v9430_v28 = vld [vmem:[#allocation21 + $0x80] sm:$0xf0] }
 0x347   :  { %3692 = vmatpush.bf16.msrb.mxu2 %v9185_v63  ;;  %v9389_v63 = vor.u32 %v11857_v12, %v9388_v55 }
 0x348   :  { %3705 = vmatpush.bf16.msrb.mxu3 %v9249_v41  ;;  %3717 = vmatpush.bf16.msra.mxu0 %v9321_v61  ;;  %v9380_v41 = vld [vmem:[#allocation18 + $0x1a0] sm:$0xf] }
 0x349   :  { %v9381_v17 = vor.u32 %v11855_v36, %v9380_v41 }
 0x34b   :  { %3693 = vmatpush.bf16.msrb.mxu2 %v9177_v46  ;;  %v11851_v46 = vld [vmem:[#allocation18 + $0x184] sm:$0xf0] }
 0x34c   :  { %3706 = vmatpush.bf16.msrb.mxu3 %v9241_v18  ;;  %3718 = vmatpush.bf16.msra.mxu0 %v9313_v32  ;;  %v9365_v18 = vor.u32 %v11851_v46, %v9364_v45  ;;  %v9409_v32 = vor.u32 %v11860_v20, %v9406_v59  ;;  %v12090_v45 = vld [vmem:[#allocation21 + $0x704] sm:$0xf]  ;;  %v12042_v20 = vld [vmem:[#allocation21 + $0x57c] sm:$0xf0] }
 0x34d   :  { %v12026_v59 = vld [vmem:[#allocation21 + $0x504] sm:$0xf] }
 0x34e   :  { %3694 = vmatmul.bf16.vlgmr.msrb.gmra.mxu2 %v13165_v49  ;;  %v3092_v2 = vpop.f32.mrf.mxu0  ;;  %v3105_v23 = vpop.f32.mrf.mxu1  ;;  %v9420_v49 = vld [vmem:[#allocation18 + $0x1f0] sm:$0xf] }
 0x34f   :  { %3707 = vmatmul.bf16.vlgmr.msrb.gmra.mxu3 %v13163_v58  ;;  %v3054_v58 = vadd.f32 %v13171_v8, %v3041_v0  ;;  %v9421_v50 = vor.u32 %v11865_v6, %v9420_v49  ;;  %v9390_v49 = vld [vmem:[#allocation18 + $0x1b8] sm:$0xf0] }
 0x350   :  { %3719 = vmatpush.bf16.msra.mxu0 %v9305_v42  ;;  %v11856_v42 = vld [vmem:[#allocation18 + $0x1b4] sm:$0xf] }
 0x351   :  { %v3066_v37 = vpop.f32.mrf.mxu2  ;;  %3673 = vmatpush.bf16.msrb.mxu1 %v9421_v50  ;;  %v9393_v6 = vor.u32 %v11856_v42, %v9390_v49  ;;  %v9382_v50 = vld [vmem:[#allocation18 + $0x1a8] sm:$0xf0]  ;;  %v9942_v42 = vld [vmem:[#allocation21 + $0x480] sm:$0xf0] }
 0x352   :  { %v3079_v13 = vpop.f32.mrf.mxu3  ;;  %v3067_v14 = vadd.f32 %v3066_v37, %v3054_v58  ;;  %v11854_v58 = vld [vmem:[#allocation18 + $0x1a4] sm:$0xf] }
 0x353   :  { %v9385_v37 = vor.u32 %v11854_v58, %v9382_v50  ;;  %v9812_v58 = vld [vmem:[#allocation21 + $0x300] sm:$0xf] }
 0x354   :  { %v3080_v5 = vadd.f32 %v3079_v13, %v3067_v14  ;;  %v11852_v13 = vld [vmem:[#allocation18 + $0x194] sm:$0xf]  ;;  %v9374_v14 = vld [vmem:[#allocation18 + $0x198] sm:$0xf0]  ;;  %v11978_v50 = vld [vmem:[#allocation21 + $0x37c] sm:$0xf0] }
 0x355   :  { %3674 = vmatpush.bf16.msrb.mxu1 %v9413_v21  ;;  %v9377_v3 = vor.u32 %v11852_v13, %v9374_v14  ;;  %v9813_v13 = vor.u32 %v11978_v50, %v9812_v58  ;;  %v12362_v14 = vld [vmem:[#allocation21 + $0xf7c] sm:$0xf0]  ;;  %v10206_v58 = vld [vmem:[#allocation21 + $0x688] sm:$0xf0] }
 0x356   :  { %v3094_v38 = vpop.f32.mrf.mxu0  ;;  %v3107_v27 = vpop.f32.mrf.mxu1  ;;  %v3093_v29 = vadd.f32 %v3092_v2, %v3080_v5 }
 0x357   :  { %v11850_v27 = vld [vmem:[#allocation18 + $0x184] sm:$0xf] }
 0x358   :  { %v3106_v8 = vadd.f32 %v3105_v23, %v3093_v29  ;;  %v11858_v23 = vld [vmem:[#allocation18 + $0x1c4] sm:$0xf]  ;;  %v9366_v29 = vld [vmem:[#allocation18 + $0x188] sm:$0xf0] }
 0x359   :  { %v3068_v34 = vpop.f32.mrf.mxu2  ;;  %3675 = vmatpush.bf16.msrb.mxu1 %v9405_v33  ;;  %v9401_v9 = vor.u32 %v11858_v23, %v9398_v7  ;;  %v12010_v23 = vld [vmem:[#allocation21 + $0x47c] sm:$0xf0] }
 0x35a   :  { %v3081_v16 = vpop.f32.mrf.mxu3  ;;  %v3225_v48 = vmul.f32 %v3217_v30, %v3106_v8  ;;  %v9369_v30 = vor.u32 %v11850_v27, %v9366_v29  ;;  %v11350_v27 = vld [vmem:[#allocation21 + $0xf80] sm:$0xf0]  ;;  %v9684_v29 = vld [vmem:[#allocation21 + $0x200] sm:$0xf] }
 0x35b   :  { %v3218_v16 = vperm.slane %v13152_v10, 3  ;;  %v10324_v10 = vld [vmem:[#allocation21 + $0x700] sm:$0xf] }
 0x35c   :  { %v3240_v35 = vadd.f32 %v3232_v19, %v3225_v48 }
 0x35d   :  { %3676 = vmatpush.bf16.msrb.mxu1 %v9397_v62  ;;  %v3233_v62 = vperm.slane %v13157_v11, 3 }
 0x35e   :  { %v3244_v24 = vmax.f32 %v3240_v35, 0.0 }
 0x360   :  { %v3248_v39 = vpack.c.bf16 %v3244_v24, %v3244_v24 }
 0x361   :  { %3677 = vmatpush.bf16.msrb.mxu1 %v9389_v63 }
 0x362   :  { %3668 = vmatmul.bf16.vlgmr.msrb.gmra.mxu0 %v3248_v39 }
 0x365   :  { %3678 = vmatpush.bf16.msrb.mxu1 %v9381_v17 }
 0x369   :  { %3679 = vmatpush.bf16.msrb.mxu1 %v9373_v40 }
 0x36d   :  { %3680 = vmatpush.bf16.msrb.mxu1 %v9365_v18  ;;  %v10326_v18 = vld [vmem:[#allocation21 + $0x780] sm:$0xf0] }
 0x36e   :  { %v3144_v43 = vpop.f32.mrf.mxu0  ;;  %v3157_v44 = vpop.f32.mrf.mxu1 }
 0x371   :  { %v3118_v51 = vpop.f32.mrf.mxu2  ;;  %3725 = vmatpush.bf16.msra.mxu1 %v9425_v54  ;;  %v10329_v54 = vor.u32 %v12090_v45, %v10326_v18  ;;  %v12266_v18 = vld [vmem:[#allocation21 + $0xc7c] sm:$0xf0] }
 0x372   :  { %v3131_v22 = vpop.f32.mrf.mxu3  ;;  %3720 = vmatmul.bf16.vlgmr.msra.gmra.mxu0 %v3248_v39 }
 0x373   :  { %v3132_v4 = vadd.f32 %v3131_v22, %v3118_v51  ;;  %v12058_v51 = vld [vmem:[#allocation21 + $0x604] sm:$0xf]  ;;  %6929 = vmatpush.bf16.msrb.mxu0 %v10329_v54 }
 0x374   :  { %v10198_v22 = vld [vmem:[#allocation21 + $0x680] sm:$0xf0] }
 0x375   :  { %3726 = vmatpush.bf16.msra.mxu1 %v9417_v60  ;;  %v3145_v21 = vadd.f32 %v3144_v43, %v3132_v4  ;;  %v10201_v57 = vor.u32 %v12058_v51, %v10198_v22  ;;  %v11962_v4 = vld [vmem:[#allocation21 + $0x304] sm:$0xf]  ;;  %v10332_v22 = vld [vmem:[#allocation21 + $0x708] sm:$0xf] }
 0x376   :  { %v3146_v61 = vpop.f32.mrf.mxu0  ;;  %v3159_v25 = vpop.f32.mrf.mxu1  ;;  %v12250_v54 = vld [vmem:[#allocation21 + $0xc04] sm:$0xf] }
 0x377   :  { %v3158_v31 = vadd.f32 %v3157_v44, %v3145_v21  ;;  %v12106_v44 = vld [vmem:[#allocation21 + $0x77c] sm:$0xf0]  ;;  %6930 = vmatpush.bf16.msrb.mxu0 %v10201_v57  ;;  %v10966_v51 = vld [vmem:[#allocation21 + $0xc80] sm:$0xf0]  ;;  %v12091_v57 = vld [vmem:[#allocation21 + $0x70c] sm:$0xf] }
 0x378   :  { %v10325_v46 = vor.u32 %v12106_v44, %v10324_v10  ;;  %v10068_v25 = vld [vmem:[#allocation21 + $0x500] sm:$0xf] }
 0x379   :  { %v3120_v0 = vpop.f32.mrf.mxu2  ;;  %3727 = vmatpush.bf16.msra.mxu1 %v9409_v32  ;;  %v10069_v32 = vor.u32 %v12042_v20, %v10068_v25  ;;  %v11882_v10 = vld [vmem:[#allocation21 + $0x7c] sm:$0xf0]  ;;  %v9433_v20 = vor.u32 %v11866_v52, %v9430_v28  ;;  %v9822_v52 = vld [vmem:[#allocation21 + $0x388] sm:$0xf0] }
 0x37a   :  { %v3133_v2 = vpop.f32.mrf.mxu3  ;;  %6903 = vmatpush.bf16.msra.mxu2 %v10325_v46  ;;  %v10070_v0 = vld [vmem:[#allocation21 + $0x580] sm:$0xf0]  ;;  %v10964_v44 = vld [vmem:[#allocation21 + $0xc00] sm:$0xf] }
 0x37b   :  { %v9940_v2 = vld [vmem:[#allocation21 + $0x400] sm:$0xf]  ;;  %v10073_v7 = vor.u32 %v12026_v59, %v10070_v0  ;;  %v10965_v25 = vor.u32 %v12266_v18, %v10964_v44  ;;  %v10969_v59 = vor.u32 %v12250_v54, %v10966_v51  ;;  %v11356_v44 = vld [vmem:[#allocation21 + $0xf08] sm:$0xf]  ;;  %v11963_v18 = vld [vmem:[#allocation21 + $0x30c] sm:$0xf] }
 0x37c   :  { %v9941_v49 = vor.u32 %v12010_v23, %v9940_v2  ;;  %v12234_v0 = vld [vmem:[#allocation21 + $0xb7c] sm:$0xf0]  ;;  %v12347_v54 = vld [vmem:[#allocation21 + $0xf0c] sm:$0xf] }
 0x37d   :  { %3728 = vmatpush.bf16.msra.mxu1 %v9401_v9  ;;  %v11994_v9 = vld [vmem:[#allocation21 + $0x404] sm:$0xf]  ;;  %6931 = vmatpush.bf16.msrb.mxu0 %v10073_v7  ;;  %v11358_v51 = vld [vmem:[#allocation21 + $0xf88] sm:$0xf0] }
 0x37e   :  { %6904 = vmatpush.bf16.msra.mxu2 %v10197_v56  ;;  %v12107_v56 = vld [vmem:[#allocation21 + $0x784] sm:$0xf0]  ;;  %v12218_v7 = vld [vmem:[#allocation21 + $0xb04] sm:$0xf] }
 0x37f   :  { %v10333_v2 = vor.u32 %v12107_v56, %v10332_v22 }
 0x381   :  { %3729 = vmatpush.bf16.msra.mxu1 %v9393_v6  ;;  %v9945_v6 = vor.u32 %v11994_v9, %v9942_v42  ;;  %v10838_v9 = vld [vmem:[#allocation21 + $0xb80] sm:$0xf0]  ;;  %v10204_v42 = vld [vmem:[#allocation21 + $0x608] sm:$0xf] }
 0x382   :  { %6905 = vmatpush.bf16.msra.mxu2 %v10069_v32  ;;  %v10836_v32 = vld [vmem:[#allocation21 + $0xb00] sm:$0xf] }
 0x383   :  { %6932 = vmatpush.bf16.msrb.mxu0 %v9945_v6  ;;  %v12059_v6 = vld [vmem:[#allocation21 + $0x60c] sm:$0xf] }
 0x385   :  { %3730 = vmatpush.bf16.msra.mxu1 %v9385_v37  ;;  %v11348_v37 = vld [vmem:[#allocation21 + $0xf00] sm:$0xf] }
 0x386   :  { %6906 = vmatpush.bf16.msra.mxu2 %v9941_v49  ;;  %v11349_v21 = vor.u32 %v12362_v14, %v11348_v37  ;;  %v12075_v49 = vld [vmem:[#allocation21 + $0x684] sm:$0xf0]  ;;  %v10837_v37 = vor.u32 %v12234_v0, %v10836_v32  ;;  %v10708_v14 = vld [vmem:[#allocation21 + $0xa00] sm:$0xf] }
 0x387   :  { %v11228_v32 = vld [vmem:[#allocation21 + $0xe08] sm:$0xf] }
 0x388   :  { %6916 = vmatpush.bf16.msra.mxu3 %v11349_v21  ;;  %v10209_v21 = vor.u32 %v12059_v6, %v10206_v58  ;;  %v11230_v6 = vld [vmem:[#allocation21 + $0xe88] sm:$0xf0]  ;;  %v9564_v58 = vld [vmem:[#allocation21 + $0x108] sm:$0xf] }
 0x389   :  { %3731 = vmatpush.bf16.msra.mxu1 %v9377_v3  ;;  %v9814_v3 = vld [vmem:[#allocation21 + $0x380] sm:$0xf0] }
 0x38a   :  { %6907 = vmatpush.bf16.msra.mxu2 %v9813_v13  ;;  %v10841_v13 = vor.u32 %v12218_v7, %v10838_v9  ;;  %v11931_v7 = vld [vmem:[#allocation21 + $0x20c] sm:$0xf] }
 0x38b   :  { %v9694_v9 = vld [vmem:[#allocation21 + $0x288] sm:$0xf0] }
 0x38d   :  { %v3196_v5 = vpop.f32.mrf.mxu0  ;;  %3732 = vmatpush.bf16.msra.mxu1 %v9369_v30 }
 0x38e   :  { %v3209_v38 = vpop.f32.mrf.mxu1 }
 0x391   :  { %v3170_v53 = vpop.f32.mrf.mxu2 }
 0x392   :  { %v3183_v15 = vpop.f32.mrf.mxu3  ;;  %v3171_v8 = vadd.f32 %v3170_v53, %v3158_v31  ;;  %v11946_v31 = vld [vmem:[#allocation21 + $0x27c] sm:$0xf0] }
 0x393   :  { %v11220_v53 = vld [vmem:[#allocation21 + $0xe00] sm:$0xf] }
 0x394   :  { %v3184_v19 = vadd.f32 %v3183_v15, %v3171_v8  ;;  %v12330_v15 = vld [vmem:[#allocation21 + $0xe7c] sm:$0xf0]  ;;  %v9685_v8 = vor.u32 %v11946_v31, %v9684_v29  ;;  %v12043_v29 = vld [vmem:[#allocation21 + $0x584] sm:$0xf0]  ;;  %v10078_v31 = vld [vmem:[#allocation21 + $0x588] sm:$0xf0] }
 0x395   :  { %v3198_v33 = vpop.f32.mrf.mxu0 }
 0x396   :  { %v3211_v1 = vpop.f32.mrf.mxu1  ;;  %v3197_v34 = vadd.f32 %v3196_v5, %v3184_v19  ;;  %v9817_v5 = vor.u32 %v11962_v4, %v9814_v3  ;;  %v11221_v19 = vor.u32 %v12330_v15, %v11220_v53  ;;  %v11930_v33 = vld [vmem:[#allocation21 + $0x204] sm:$0xf]  ;;  %6908 = vmatpush.bf16.msra.mxu2 %v9685_v8  ;;  %v12202_v4 = vld [vmem:[#allocation21 + $0xa7c] sm:$0xf0]  ;;  %v10205_v3 = vor.u32 %v12075_v49, %v10204_v42  ;;  %v12315_v49 = vld [vmem:[#allocation21 + $0xe0c] sm:$0xf] }
 0x397   :  { %v9686_v1 = vld [vmem:[#allocation21 + $0x280] sm:$0xf0]  ;;  %v10709_v53 = vor.u32 %v12202_v4, %v10708_v14  ;;  %v10580_v8 = vld [vmem:[#allocation21 + $0x900] sm:$0xf]  ;;  %v9697_v42 = vor.u32 %v11931_v7, %v9694_v9  ;;  %v12299_v14 = vld [vmem:[#allocation21 + $0xd84] sm:$0xf0] }
 0x398   :  { %v3210_v48 = vadd.f32 %v3209_v38, %v3197_v34  ;;  %v12346_v38 = vld [vmem:[#allocation21 + $0xf04] sm:$0xf]  ;;  %6933 = vmatpush.bf16.msrb.mxu0 %v9817_v5  ;;  %6917 = vmatpush.bf16.msra.mxu3 %v11221_v19  ;;  %v12170_v19 = vld [vmem:[#allocation21 + $0x97c] sm:$0xf0] }
 0x399   :  { %v3172_v55 = vpop.f32.mrf.mxu2  ;;  %v11353_v30 = vor.u32 %v12346_v38, %v11350_v27  ;;  %v12314_v34 = vld [vmem:[#allocation21 + $0xe04] sm:$0xf]  ;;  %v10076_v27 = vld [vmem:[#allocation21 + $0x508] sm:$0xf] }
 0x39a   :  { %v3185_v12 = vpop.f32.mrf.mxu3  ;;  %v3226_v35 = vmul.f32 %v3218_v16, %v3210_v48  ;;  %v9689_v16 = vor.u32 %v11930_v33, %v9686_v1  ;;  %v11222_v48 = vld [vmem:[#allocation21 + $0xe80] sm:$0xf0]  ;;  %v11914_v55 = vld [vmem:[#allocation21 + $0x17c] sm:$0xf0]  ;;  %v10077_v33 = vor.u32 %v12043_v29, %v10076_v27  ;;  %v11102_v29 = vld [vmem:[#allocation21 + $0xd88] sm:$0xf0] }
 0x39b   :  { %v11225_v12 = vor.u32 %v12314_v34, %v11222_v48  ;;  %v12186_v5 = vld [vmem:[#allocation21 + $0xa04] sm:$0xf]  ;;  %v9948_v48 = vld [vmem:[#allocation21 + $0x408] sm:$0xf] }
 0x39c   :  { %v3241_v24 = vadd.f32 %v3233_v62, %v3226_v35  ;;  %v9556_v62 = vld [vmem:[#allocation21 + $0x100] sm:$0xf]  ;;  %6934 = vmatpush.bf16.msrb.mxu0 %v9689_v16  ;;  %v10710_v38 = vld [vmem:[#allocation21 + $0xa80] sm:$0xf0] }
 0x39d   :  { %v11092_v35 = vld [vmem:[#allocation21 + $0xd00] sm:$0xf]  ;;  %v10713_v15 = vor.u32 %v12186_v5, %v10710_v38  ;;  %v12154_v34 = vld [vmem:[#allocation21 + $0x904] sm:$0xf]  ;;  %v9566_v5 = vld [vmem:[#allocation21 + $0x188] sm:$0xf0] }
 0x39e   :  { %v3245_v63 = vmax.f32 %v3241_v24, 0.0  ;;  %v12298_v24 = vld [vmem:[#allocation21 + $0xd7c] sm:$0xf0]  ;;  %v10582_v16 = vld [vmem:[#allocation21 + $0x980] sm:$0xf0] }
 0x39f   :  { %v12283_v38 = vld [vmem:[#allocation21 + $0xd0c] sm:$0xf] }
 0x3a0   :  { %v3249_v41 = vpack.c.bf16 %v3245_v63, %v3245_v63  ;;  %v11898_v63 = vld [vmem:[#allocation21 + $0x104] sm:$0xf] }
 0x3a2   :  { %3681 = vmatmul.bf16.vlgmr.msrb.gmra.mxu1 %v3249_v41 }
 0x3a3   :  { %6942 = vmatpush.bf16.msrb.mxu1 %v11353_v30  ;;  %v12027_v30 = vld [vmem:[#allocation21 + $0x50c] sm:$0xf] }
 0x3a4   :  { %v10081_v1 = vor.u32 %v12027_v30, %v10078_v31  ;;  %v11105_v30 = vor.u32 %v12283_v38, %v11102_v29  ;;  %v9436_v31 = vld [vmem:[#allocation21 + $0x8] sm:$0xf]  ;;  %v10084_v29 = vld [vmem:[#allocation21 + $0x510] sm:$0xf] }
 0x3a7   :  { %6943 = vmatpush.bf16.msrb.mxu1 %v11225_v12  ;;  %v9950_v12 = vld [vmem:[#allocation21 + $0x488] sm:$0xf0] }
 0x3b1   :  { %v3643_v36 = vpop.f32.mrf.mxu2 }
 0x3b2   :  { %v3656_v39 = vpop.f32.mrf.mxu3  ;;  %3733 = vmatmul.bf16.vlgmr.msra.gmra.mxu1 %v3249_v41  ;;  %v9558_v41 = vld [vmem:[#allocation21 + $0x180] sm:$0xf0] }
 0x3b3   :  { %v13181_v17 = vadd.f32 %v3656_v39, %v3643_v36  ;;  %v12282_v36 = vld [vmem:[#allocation21 + $0xd04] sm:$0xf]  ;;  %v9561_v45 = vor.u32 %v11898_v63, %v9558_v41  ;;  %v10452_v63 = vld [vmem:[#allocation21 + $0x800] sm:$0xf]  ;;  %v10585_v41 = vor.u32 %v12154_v34, %v10582_v16 }
 0x3b4   :  { %v11094_v39 = vld [vmem:[#allocation21 + $0xd80] sm:$0xf0] }
 0x3b5   :  { %v11097_v46 = vor.u32 %v12282_v36, %v11094_v39  ;;  %6935 = vmatpush.bf16.msrb.mxu0 %v9561_v45  ;;  %v12138_v36 = vld [vmem:[#allocation21 + $0x87c] sm:$0xf0]  ;;  %v12122_v39 = vld [vmem:[#allocation21 + $0x804] sm:$0xf]  ;;  %v12363_v45 = vld [vmem:[#allocation21 + $0xf84] sm:$0xf0] }
 0x3b6   :  { %v10453_v28 = vor.u32 %v12138_v36, %v10452_v63  ;;  %v11357_v56 = vor.u32 %v12363_v45, %v11356_v44  ;;  %v12219_v63 = vld [vmem:[#allocation21 + $0xb0c] sm:$0xf] }
 0x3b7   :  { %6944 = vmatpush.bf16.msrb.mxu1 %v11097_v46  ;;  %v11979_v46 = vld [vmem:[#allocation21 + $0x384] sm:$0xf0]  ;;  %v10846_v36 = vld [vmem:[#allocation21 + $0xb88] sm:$0xf0] }
 0x3b8   :  { %v10718_v44 = vld [vmem:[#allocation21 + $0xa88] sm:$0xf0] }
 0x3b9   :  { %v3645_v47 = vpop.f32.mrf.mxu2  ;;  %6936 = vmatpush.bf16.msrb.mxu0 %v9433_v20  ;;  %v9692_v20 = vld [vmem:[#allocation21 + $0x208] sm:$0xf] }
 0x3ba   :  { %v3658_v26 = vpop.f32.mrf.mxu3 }
 0x3bb   :  { %v9557_v26 = vor.u32 %v11914_v55, %v9556_v62  ;;  %6945 = vmatpush.bf16.msrb.mxu1 %v10969_v59  ;;  %v12011_v62 = vld [vmem:[#allocation21 + $0x484] sm:$0xf0]  ;;  %v11995_v55 = vld [vmem:[#allocation21 + $0x40c] sm:$0xf] }
 0x3bc   :  { %v11947_v59 = vld [vmem:[#allocation21 + $0x284] sm:$0xf0] }
 0x3bd   :  { %6909 = vmatpush.bf16.msra.mxu2 %v9557_v26  ;;  %v10454_v26 = vld [vmem:[#allocation21 + $0x880] sm:$0xf0]  ;;  %v9693_v0 = vor.u32 %v11947_v59, %v9692_v20  ;;  %v3738_v20 = vld [vmem:[#allocation20] ss:$2 sm:$0x3] }
 0x3be   :  { %v10457_v22 = vor.u32 %v12122_v39, %v10454_v26  ;;  %v10849_v39 = vor.u32 %v12219_v63, %v10846_v36  ;;  %v10716_v26 = vld [vmem:[#allocation21 + $0xa08] sm:$0xf]  ;;  %v3747_v59 = vld [vmem:[#allocation20 + $0x1] ss:$2 sm:$0x3] }
 0x3bf   :  { %6946 = vmatpush.bf16.msrb.mxu1 %v10841_v13  ;;  %v11100_v13 = vld [vmem:[#allocation21 + $0xd08] sm:$0xf]  ;;  %v3749_v7 = vperm.slane %v3747_v59, 0 }
 0x3c3   :  { %6947 = vmatpush.bf16.msrb.mxu1 %v10713_v15  ;;  %v10972_v15 = vld [vmem:[#allocation21 + $0xc08] sm:$0xf] }
 0x3c7   :  { %6948 = vmatpush.bf16.msrb.mxu1 %v10585_v41 }
 0x3cb   :  { %6949 = vmatpush.bf16.msrb.mxu1 %v10457_v22  ;;  %v10460_v22 = vld [vmem:[#allocation21 + $0x808] sm:$0xf] }
 0x3d1   :  { %v3695_v40 = vpop.f32.mrf.mxu2 }
 0x3d2   :  { %v3708_v43 = vpop.f32.mrf.mxu3 }
 0x3d3   :  { %v13183_v11 = vadd.f32 %v3708_v43, %v3695_v40  ;;  %v11093_v40 = vor.u32 %v12298_v24, %v11092_v35  ;;  %v9428_v43 = vld [vmem:[#allocation21] sm:$0xf]  ;;  %v10581_v24 = vor.u32 %v12170_v19, %v10580_v8  ;;  %v12267_v19 = vld [vmem:[#allocation21 + $0xc84] sm:$0xf0] }
 0x3d4   :  { %v10973_v34 = vor.u32 %v12267_v19, %v10972_v15 }
 0x3d5   :  { %6918 = vmatpush.bf16.msra.mxu3 %v11093_v40  ;;  %v9949_v40 = vor.u32 %v12011_v62, %v9948_v48  ;;  %v12251_v48 = vld [vmem:[#allocation21 + $0xc0c] sm:$0xf] }
 0x3d6   :  { %v10974_v62 = vld [vmem:[#allocation21 + $0xc88] sm:$0xf0] }
 0x3d9   :  { %v3697_v60 = vpop.f32.mrf.mxu2  ;;  %6919 = vmatpush.bf16.msra.mxu3 %v10965_v25 }
 0x3da   :  { %v3710_v61 = vpop.f32.mrf.mxu3  ;;  %v10334_v60 = vld [vmem:[#allocation21 + $0x788] sm:$0xf0] }
 0x3db   :  { %v9429_v61 = vor.u32 %v11882_v10, %v9428_v43  ;;  %v10337_v23 = vor.u32 %v12091_v57, %v10334_v60  ;;  %v9953_v43 = vor.u32 %v11995_v55, %v9950_v12  ;;  %v9820_v10 = vld [vmem:[#allocation21 + $0x308] sm:$0xf]  ;;  %v9825_v60 = vor.u32 %v11963_v18, %v9822_v52  ;;  %v12155_v52 = vld [vmem:[#allocation21 + $0x90c] sm:$0xf] }
 0x3dc   :  { %v9821_v57 = vor.u32 %v11979_v46, %v9820_v10  ;;  %v10977_v55 = vor.u32 %v12251_v48, %v10974_v62  ;;  %v10844_v12 = vld [vmem:[#allocation21 + $0xb08] sm:$0xf]  ;;  %v12012_v62 = vld [vmem:[#allocation21 + $0x48c] sm:$0xf0] }
 0x3dd   :  { %6910 = vmatpush.bf16.msra.mxu2 %v9429_v61  ;;  %6981 = vmatpush.bf16.msra.mxu0 %v10337_v23  ;;  %v11361_v61 = vor.u32 %v12347_v54, %v11358_v51  ;;  %v10588_v46 = vld [vmem:[#allocation21 + $0x908] sm:$0xf]  ;;  %v10590_v54 = vld [vmem:[#allocation21 + $0x988] sm:$0xf0] }
 0x3de   :  { %6920 = vmatpush.bf16.msra.mxu3 %v10837_v37  ;;  %v11915_v37 = vld [vmem:[#allocation21 + $0x184] sm:$0xf0]  ;;  %v10593_v51 = vor.u32 %v12155_v52, %v10590_v54  ;;  %v9700_v54 = vld [vmem:[#allocation21 + $0x210] sm:$0xf] }
 0x3df   :  { %v13185_v47 = vpop.f32.mrf.mxu0  ;;  %6994 = vmatpush.bf16.msra.mxu1 %v11361_v61  ;;  %v9565_v4 = vor.u32 %v11915_v37, %v9564_v58  ;;  %v12171_v18 = vld [vmem:[#allocation21 + $0x984] sm:$0xf0]  ;;  %v10462_v61 = vld [vmem:[#allocation21 + $0x888] sm:$0xf0]  ;;  %v12092_v58 = vld [vmem:[#allocation21 + $0x714] sm:$0xf] }
 0x3e1   :  { %6955 = vmatpush.bf16.msrb.mxu2 %v10333_v2  ;;  %6982 = vmatpush.bf16.msra.mxu0 %v10209_v21  ;;  %v12331_v2 = vld [vmem:[#allocation21 + $0xe84] sm:$0xf0]  ;;  %v11899_v21 = vld [vmem:[#allocation21 + $0x10c] sm:$0xf] }
 0x3e2   :  { %6921 = vmatpush.bf16.msra.mxu3 %v10709_v53  ;;  %v11229_v23 = vor.u32 %v12331_v2, %v11228_v32  ;;  %v9569_v27 = vor.u32 %v11899_v21, %v9566_v5  ;;  %v11883_v53 = vld [vmem:[#allocation21 + $0x84] sm:$0xf0]  ;;  %v3670_v32 = vadd.f32 %v13185_v47, %v13181_v17  ;;  %v12076_v5 = vld [vmem:[#allocation21 + $0x68c] sm:$0xf0]  ;;  %v12060_v17 = vld [vmem:[#allocation21 + $0x614] sm:$0xf] }
 0x3e3   :  { %v9437_v8 = vor.u32 %v11883_v53, %v9436_v31  ;;  %v10214_v47 = vld [vmem:[#allocation21 + $0x690] sm:$0xf0] }
 0x3e4   :  { %v12028_v31 = vld [vmem:[#allocation21 + $0x514] sm:$0xf] }
 0x3e5   :  { %6956 = vmatpush.bf16.msrb.mxu2 %v10205_v3  ;;  %6983 = vmatpush.bf16.msra.mxu0 %v10081_v1  ;;  %v11101_v3 = vor.u32 %v12299_v14, %v11100_v13  ;;  %v9438_v1 = vld [vmem:[#allocation21 + $0x88] sm:$0xf0]  ;;  %v10086_v53 = vld [vmem:[#allocation21 + $0x590] sm:$0xf0] }
 0x3e6   :  { %6922 = vmatpush.bf16.msra.mxu3 %v10581_v24  ;;  %v12235_v24 = vld [vmem:[#allocation21 + $0xb84] sm:$0xf0] }
 0x3e7   :  { %v3671_v50 = vpop.f32.mrf.mxu0  ;;  %v10845_v41 = vor.u32 %v12235_v24, %v10844_v12  ;;  %v9958_v12 = vld [vmem:[#allocation21 + $0x490] sm:$0xf0] }
 0x3e8   :  { %v11233_v50 = vor.u32 %v12315_v49, %v11230_v6  ;;  %v12108_v6 = vld [vmem:[#allocation21 + $0x78c] sm:$0xf0] }
 0x3e9   :  { %6957 = vmatpush.bf16.msrb.mxu2 %v10077_v33  ;;  %6984 = vmatpush.bf16.msra.mxu0 %v9953_v43  ;;  %v11867_v33 = vld [vmem:[#allocation21 + $0xc] sm:$0xf] }
 0x3ea   :  { %6923 = vmatpush.bf16.msra.mxu3 %v10453_v28  ;;  %6995 = vmatpush.bf16.msra.mxu1 %v11233_v50  ;;  %v9441_v16 = vor.u32 %v11867_v33, %v9438_v1  ;;  %v12187_v43 = vld [vmem:[#allocation21 + $0xa0c] sm:$0xf]  ;;  %v10589_v28 = vor.u32 %v12171_v18, %v10588_v46  ;;  %v10342_v50 = vld [vmem:[#allocation21 + $0x790] sm:$0xf0]  ;;  %v3750_v33 = vperm.slane %v3747_v59, 1 }
 0x3eb   :  { %v10721_v45 = vor.u32 %v12187_v43, %v10718_v44  ;;  %v9830_v43 = vld [vmem:[#allocation21 + $0x390] sm:$0xf0] }
 0x3ec   :  { %v12348_v44 = vld [vmem:[#allocation21 + $0xf14] sm:$0xf] }
 0x3ed   :  { %6958 = vmatpush.bf16.msrb.mxu2 %v9949_v40  ;;  %6985 = vmatpush.bf16.msra.mxu0 %v9825_v60  ;;  %v12203_v40 = vld [vmem:[#allocation21 + $0xa84] sm:$0xf0]  ;;  %v11238_v59 = vld [vmem:[#allocation21 + $0xe90] sm:$0xf0] }
 0x3ee   :  { %6968 = vmatpush.bf16.msrb.mxu3 %v11357_v56  ;;  %6996 = vmatpush.bf16.msra.mxu1 %v11105_v30  ;;  %v10717_v10 = vor.u32 %v12203_v40, %v10716_v26  ;;  %v12139_v56 = vld [vmem:[#allocation21 + $0x884] sm:$0xf0]  ;;  %v12044_v30 = vld [vmem:[#allocation21 + $0x58c] sm:$0xf0]  ;;  %v11964_v40 = vld [vmem:[#allocation21 + $0x314] sm:$0xf] }
 0x3ef   :  { %v13187_v35 = vpop.f32.mrf.mxu0  ;;  %v10461_v60 = vor.u32 %v12139_v56, %v10460_v22  ;;  %v10085_v1 = vor.u32 %v12044_v30, %v10084_v29  ;;  %v12364_v26 = vld [vmem:[#allocation21 + $0xf8c] sm:$0xf0]  ;;  %v9833_v22 = vor.u32 %v11964_v40, %v9830_v43  ;;  %v9446_v29 = vld [vmem:[#allocation21 + $0x90] sm:$0xf0] }
 0x3f0   :  { %v3722_v15 = vadd.f32 %v13187_v35, %v13183_v11  ;;  %v11980_v11 = vld [vmem:[#allocation21 + $0x38c] sm:$0xf0]  ;;  %v12252_v30 = vld [vmem:[#allocation21 + $0xc14] sm:$0xf] }
 0x3f1   :  { %6959 = vmatpush.bf16.msrb.mxu2 %v9821_v57  ;;  %6986 = vmatpush.bf16.msra.mxu0 %v9697_v42  ;;  %v12123_v57 = vld [vmem:[#allocation21 + $0x80c] sm:$0xf]  ;;  %v10340_v42 = vld [vmem:[#allocation21 + $0x710] sm:$0xf] }
 0x3f2   :  { %6969 = vmatpush.bf16.msrb.mxu3 %v11229_v23  ;;  %6997 = vmatpush.bf16.msra.mxu1 %v10977_v55  ;;  %v10341_v14 = vor.u32 %v12108_v6, %v10340_v42  ;;  %v11996_v55 = vld [vmem:[#allocation21 + $0x414] sm:$0xf]  ;;  %v11364_v35 = vld [vmem:[#allocation21 + $0xf10] sm:$0xf] }
 0x3f3   :  { %v11108_v42 = vld [vmem:[#allocation21 + $0xd10] sm:$0xf]  ;;  %v11900_v6 = vld [vmem:[#allocation21 + $0x114] sm:$0xf] }
 0x3f4   :  { %v10724_v40 = vld [vmem:[#allocation21 + $0xa10] sm:$0xf] }
 0x3f5   :  { %6960 = vmatpush.bf16.msrb.mxu2 %v9693_v0  ;;  %6987 = vmatpush.bf16.msra.mxu0 %v9569_v27  ;;  %v3740_v0 = vperm.slane %v3738_v20, 0  ;;  %v10217_v27 = vor.u32 %v12060_v17, %v10214_v47  ;;  %v12204_v43 = vld [vmem:[#allocation21 + $0xa8c] sm:$0xf0] }
 0x3f6   :  { %6970 = vmatpush.bf16.msrb.mxu3 %v11101_v3  ;;  %6998 = vmatpush.bf16.msra.mxu1 %v10849_v39  ;;  %v10212_v3 = vld [vmem:[#allocation21 + $0x610] sm:$0xf] }
 0x3f7   :  { %v3723_v25 = vpop.f32.mrf.mxu0  ;;  %v10213_v38 = vor.u32 %v12076_v5, %v10212_v3  ;;  %v9828_v39 = vld [vmem:[#allocation21 + $0x310] sm:$0xf] }
 0x3f8   :  { %v10465_v25 = vor.u32 %v12123_v57, %v10462_v61  ;;  %v9829_v52 = vor.u32 %v11980_v11, %v9828_v39  ;;  %v11236_v57 = vld [vmem:[#allocation21 + $0xe10] sm:$0xf]  ;;  %v11932_v61 = vld [vmem:[#allocation21 + $0x214] sm:$0xf]  ;;  %v12061_v39 = vld [vmem:[#allocation21 + $0x61c] sm:$0xf] }
 0x3f9   :  { %6961 = vmatpush.bf16.msrb.mxu2 %v9565_v4  ;;  %6988 = vmatpush.bf16.msra.mxu0 %v9441_v16  ;;  %v10345_v4 = vor.u32 %v12092_v58, %v10342_v50  ;;  %v9956_v16 = vld [vmem:[#allocation21 + $0x410] sm:$0xf]  ;;  %v9574_v58 = vld [vmem:[#allocation21 + $0x190] sm:$0xf0]  ;;  %v10222_v11 = vld [vmem:[#allocation21 + $0x698] sm:$0xf0] }
 0x3fa   :  { %6971 = vmatpush.bf16.msrb.mxu3 %v10973_v34  ;;  %6999 = vmatpush.bf16.msra.mxu1 %v10721_v45  ;;  %v10089_v34 = vor.u32 %v12028_v31, %v10086_v53  ;;  %v9957_v63 = vor.u32 %v12012_v62, %v9956_v16  ;;  %v11366_v45 = vld [vmem:[#allocation21 + $0xf90] sm:$0xf0]  ;;  %v11884_v3 = vld [vmem:[#allocation21 + $0x8c] sm:$0xf0]  ;;  %v9577_v17 = vor.u32 %v11900_v6, %v9574_v58  ;;  %v10348_v53 = vld [vmem:[#allocation21 + $0x718] sm:$0xf] }
 0x3fb   :  { %v11369_v56 = vor.u32 %v12348_v44, %v11366_v45  ;;  %v12284_v50 = vld [vmem:[#allocation21 + $0xd14] sm:$0xf]  ;;  %v10980_v5 = vld [vmem:[#allocation21 + $0xc10] sm:$0xf]  ;;  %v10225_v44 = vor.u32 %v12061_v39, %v10222_v11  ;;  %v11917_v11 = vld [vmem:[#allocation21 + $0x194] sm:$0xf0] }
 0x3fc   :  { %v10982_v31 = vld [vmem:[#allocation21 + $0xc90] sm:$0xf0]  ;;  %v12236_v62 = vld [vmem:[#allocation21 + $0xb8c] sm:$0xf0] }
 0x3fd   :  { %6962 = vmatpush.bf16.msrb.mxu2 %v9437_v8  ;;  %v3741_v8 = vperm.slane %v3738_v20, 1  ;;  %v12316_v20 = vld [vmem:[#allocation21 + $0xe14] sm:$0xf]  ;;  %v10985_v16 = vor.u32 %v12252_v30, %v10982_v31 }
 0x3fe   :  { %6972 = vmatpush.bf16.msrb.mxu3 %v10845_v41  ;;  %7000 = vmatpush.bf16.msra.mxu1 %v10593_v51  ;;  %v9961_v41 = vor.u32 %v11996_v55, %v9958_v12  ;;  %v11948_v51 = vld [vmem:[#allocation21 + $0x28c] sm:$0xf0]  ;;  %v12188_v45 = vld [vmem:[#allocation21 + $0xa14] sm:$0xf] }
 0x3ff   :  { %v12124_v6 = vld [vmem:[#allocation21 + $0x814] sm:$0xf] }
 0x400   :  { %v10470_v58 = vld [vmem:[#allocation21 + $0x890] sm:$0xf0] }
 0x402   :  { %6973 = vmatpush.bf16.msrb.mxu3 %v10717_v10  ;;  %7001 = vmatpush.bf16.msra.mxu1 %v10465_v25  ;;  %v9702_v25 = vld [vmem:[#allocation21 + $0x290] sm:$0xf0] }
 0x406   :  { %6974 = vmatpush.bf16.msrb.mxu3 %v10589_v28  ;;  %v11365_v28 = vor.u32 %v12364_v26, %v11364_v35 }
 0x40a   :  { %6975 = vmatpush.bf16.msrb.mxu3 %v10461_v60  ;;  %v12332_v60 = vld [vmem:[#allocation21 + $0xe8c] sm:$0xf0] }
 0x41f   :  { %v3682_v2 = vpop.f32.mrf.mxu1 }
 0x420   :  { %v3683_v23 = vadd.f32 %v3682_v2, %v3670_v32  ;;  %v9701_v32 = vor.u32 %v11948_v51, %v9700_v54  ;;  %v9572_v2 = vld [vmem:[#allocation21 + $0x110] sm:$0xf]  ;;  %v12029_v54 = vld [vmem:[#allocation21 + $0x51c] sm:$0xf] }
 0x421   :  { %v10094_v51 = vld [vmem:[#allocation21 + $0x598] sm:$0xf0] }
 0x422   :  { %v3744_v9 = vmul.f32 %v3740_v0, %v3683_v23  ;;  %v11237_v0 = vor.u32 %v12332_v60, %v11236_v57  ;;  %v11916_v23 = vld [vmem:[#allocation21 + $0x18c] sm:$0xf0] }
 0x423   :  { %v10596_v57 = vld [vmem:[#allocation21 + $0x910] sm:$0xf] }
 0x424   :  { %v3753_v49 = vadd.f32 %v3749_v7, %v3744_v9  ;;  %v9705_v7 = vor.u32 %v11932_v61, %v9702_v25  ;;  %v11241_v9 = vor.u32 %v12316_v20, %v11238_v59  ;;  %v12172_v60 = vld [vmem:[#allocation21 + $0x98c] sm:$0xf0]  ;;  %v10097_v25 = vor.u32 %v12029_v54, %v10094_v51  ;;  %v12156_v20 = vld [vmem:[#allocation21 + $0x914] sm:$0xf]  ;;  %v12269_v54 = vld [vmem:[#allocation21 + $0xc94] sm:$0xf0] }
 0x425   :  { %v10598_v59 = vld [vmem:[#allocation21 + $0x990] sm:$0xf0] }
 0x426   :  { %v3755_v37 = vmax.f32 %v3753_v49, 0.0  ;;  %v12300_v49 = vld [vmem:[#allocation21 + $0xd8c] sm:$0xf0] }
 0x427   :  { %v3684_v13 = vpop.f32.mrf.mxu1 }
 0x428   :  { %v13191_v21 = vpack.c.bf16 %v3755_v37, %v3755_v37  ;;  %v11110_v37 = vld [vmem:[#allocation21 + $0xd90] sm:$0xf0]  ;;  %v9573_v13 = vor.u32 %v11916_v23, %v9572_v2  ;;  %v11997_v2 = vld [vmem:[#allocation21 + $0x41c] sm:$0xf] }
 0x429   :  { %v11113_v47 = vor.u32 %v12284_v50, %v11110_v37  ;;  %v9966_v23 = vld [vmem:[#allocation21 + $0x498] sm:$0xf0] }
 0x42a   :  { %6911 = vmatmul.bf16.vlgmr.msra.gmra.mxu2 %v13191_v21  ;;  %6937 = vmatmul.bf16.vlgmr.msrb.gmra.mxu0 %v13191_v21  ;;  %v9969_v37 = vor.u32 %v11997_v2, %v9966_v23 }
 0x42b   :  { %7007 = vmatpush.bf16.msra.mxu2 %v10341_v14  ;;  %7033 = vmatpush.bf16.msrb.mxu0 %v10345_v4  ;;  %v11109_v14 = vor.u32 %v12300_v49, %v11108_v42  ;;  %v9444_v4 = vld [vmem:[#allocation21 + $0x10] sm:$0xf]  ;;  %v10601_v42 = vor.u32 %v12156_v20, %v10598_v59  ;;  %v12094_v59 = vld [vmem:[#allocation21 + $0x724] sm:$0xf] }
 0x42c   :  { %v12140_v49 = vld [vmem:[#allocation21 + $0x88c] sm:$0xf0] }
 0x42f   :  { %7008 = vmatpush.bf16.msra.mxu2 %v10213_v38  ;;  %7034 = vmatpush.bf16.msrb.mxu0 %v10217_v27  ;;  %v3734_v19 = vpop.f32.mrf.mxu1  ;;  %v12268_v38 = vld [vmem:[#allocation21 + $0xc8c] sm:$0xf0]  ;;  %v11868_v27 = vld [vmem:[#allocation21 + $0x14] sm:$0xf] }
 0x430   :  { %v3735_v48 = vadd.f32 %v3734_v19, %v3722_v15  ;;  %v12109_v15 = vld [vmem:[#allocation21 + $0x794] sm:$0xf0]  ;;  %v10350_v19 = vld [vmem:[#allocation21 + $0x798] sm:$0xf0] }
 0x431   :  { %v10349_v55 = vor.u32 %v12109_v15, %v10348_v53  ;;  %v9708_v15 = vld [vmem:[#allocation21 + $0x218] sm:$0xf] }
 0x432   :  { %v3745_v24 = vmul.f32 %v3741_v8, %v3735_v48  ;;  %v12093_v8 = vld [vmem:[#allocation21 + $0x71c] sm:$0xf]  ;;  %v10852_v48 = vld [vmem:[#allocation21 + $0xb10] sm:$0xf] }
 0x433   :  { %7009 = vmatpush.bf16.msra.mxu2 %v10085_v1  ;;  %7035 = vmatpush.bf16.msrb.mxu0 %v10089_v34  ;;  %v10981_v1 = vor.u32 %v12268_v38, %v10980_v5  ;;  %v9449_v34 = vor.u32 %v11868_v27, %v9446_v29  ;;  %v10353_v12 = vor.u32 %v12093_v8, %v10350_v19  ;;  %v11965_v5 = vld [vmem:[#allocation21 + $0x31c] sm:$0xf]  ;;  %v11244_v8 = vld [vmem:[#allocation21 + $0xe18] sm:$0xf] }
 0x434   :  { %v3754_v36 = vadd.f32 %v3750_v33, %v3745_v24  ;;  %v9445_v33 = vor.u32 %v11884_v3, %v9444_v4  ;;  %v12220_v24 = vld [vmem:[#allocation21 + $0xb14] sm:$0xf]  ;;  %v10853_v35 = vor.u32 %v12236_v62, %v10852_v48  ;;  %v12365_v4 = vld [vmem:[#allocation21 + $0xf94] sm:$0xf0]  ;;  %v12349_v38 = vld [vmem:[#allocation21 + $0xf1c] sm:$0xf]  ;;  %v10473_v29 = vor.u32 %v12124_v6, %v10470_v58 }
 0x435   :  { %v11981_v3 = vld [vmem:[#allocation21 + $0x394] sm:$0xf0]  ;;  %v11374_v27 = vld [vmem:[#allocation21 + $0xf98] sm:$0xf0] }
 0x436   :  { %v3756_v10 = vmax.f32 %v3754_v36, 0.0  ;;  %v12077_v36 = vld [vmem:[#allocation21 + $0x694] sm:$0xf0]  ;;  %v12317_v48 = vld [vmem:[#allocation21 + $0xe1c] sm:$0xf] }
 0x437   :  { %7010 = vmatpush.bf16.msra.mxu2 %v9957_v63  ;;  %7036 = vmatpush.bf16.msrb.mxu0 %v9961_v41  ;;  %v3736_v46 = vpop.f32.mrf.mxu1  ;;  %v10854_v63 = vld [vmem:[#allocation21 + $0xb90] sm:$0xf0]  ;;  %v10220_v41 = vld [vmem:[#allocation21 + $0x618] sm:$0xf]  ;;  %v11246_v62 = vld [vmem:[#allocation21 + $0xe98] sm:$0xf0] }
 0x438   :  { %v13197_v18 = vpack.c.bf16 %v3756_v10, %v3756_v10  ;;  %v10857_v26 = vor.u32 %v12220_v24, %v10854_v63  ;;  %v10221_v10 = vor.u32 %v12077_v36, %v10220_v41  ;;  %v10726_v46 = vld [vmem:[#allocation21 + $0xa90] sm:$0xf0]  ;;  %v12333_v19 = vld [vmem:[#allocation21 + $0xe94] sm:$0xf0]  ;;  %v11249_v39 = vor.u32 %v12317_v48, %v11246_v62  ;;  %v10862_v58 = vld [vmem:[#allocation21 + $0xb98] sm:$0xf0] }
 0x439   :  { %v9580_v63 = vld [vmem:[#allocation21 + $0x118] sm:$0xf]  ;;  %v10606_v62 = vld [vmem:[#allocation21 + $0x998] sm:$0xf0] }
 0x43a   :  { %6924 = vmatmul.bf16.vlgmr.msra.gmra.mxu3 %v13197_v18  ;;  %6950 = vmatmul.bf16.vlgmr.msrb.gmra.mxu1 %v13197_v18  ;;  %v11116_v41 = vld [vmem:[#allocation21 + $0xd18] sm:$0xf] }
 0x43b   :  { %6963 = vmatmul.bf16.vlgmr.msrb.gmra.mxu2 %v13191_v21  ;;  %6989 = vmatmul.bf16.vlgmr.msra.gmra.mxu0 %v13191_v21  ;;  %v12301_v36 = vld [vmem:[#allocation21 + $0xd94] sm:$0xf0] }
 0x43c   :  { %7011 = vmatpush.bf16.msra.mxu2 %v9829_v52  ;;  %7020 = vmatpush.bf16.msra.mxu3 %v11365_v28  ;;  %v10092_v52 = vld [vmem:[#allocation21 + $0x518] sm:$0xf] }
 0x43d   :  { %7037 = vmatpush.bf16.msrb.mxu0 %v9833_v22  ;;  %7046 = vmatpush.bf16.msrb.mxu1 %v11369_v56  ;;  %v12045_v28 = vld [vmem:[#allocation21 + $0x594] sm:$0xf0]  ;;  %v10725_v22 = vor.u32 %v12204_v43, %v10724_v40  ;;  %v10729_v56 = vor.u32 %v12188_v45, %v10726_v46  ;;  %v12285_v40 = vld [vmem:[#allocation21 + $0xd1c] sm:$0xf]  ;;  %v9581_v45 = vor.u32 %v11917_v11, %v9580_v63  ;;  %v9974_v63 = vld [vmem:[#allocation21 + $0x4a0] sm:$0xf0] }
 0x43e   :  { %v10093_v61 = vor.u32 %v12045_v28, %v10092_v52  ;;  %v11118_v43 = vld [vmem:[#allocation21 + $0xd98] sm:$0xf0]  ;;  %v11885_v52 = vld [vmem:[#allocation21 + $0x94] sm:$0xf0] }
 0x43f   :  { %v10988_v28 = vld [vmem:[#allocation21 + $0xc18] sm:$0xf]  ;;  %v11121_v51 = vor.u32 %v12285_v40, %v11118_v43  ;;  %v10478_v40 = vld [vmem:[#allocation21 + $0x898] sm:$0xf0] }
 0x440   :  { %7012 = vmatpush.bf16.msra.mxu2 %v9701_v32  ;;  %7021 = vmatpush.bf16.msra.mxu3 %v11237_v0  ;;  %v9964_v32 = vld [vmem:[#allocation21 + $0x418] sm:$0xf]  ;;  %v10989_v20 = vor.u32 %v12269_v54, %v10988_v28  ;;  %v9846_v28 = vld [vmem:[#allocation21 + $0x3a0] sm:$0xf0] }
 0x441   :  { %7038 = vmatpush.bf16.msrb.mxu0 %v9705_v7  ;;  %7047 = vmatpush.bf16.msrb.mxu1 %v11241_v9  ;;  %v12013_v0 = vld [vmem:[#allocation21 + $0x494] sm:$0xf0]  ;;  %v10597_v7 = vor.u32 %v12172_v60, %v10596_v57  ;;  %v10468_v9 = vld [vmem:[#allocation21 + $0x810] sm:$0xf]  ;;  %v12253_v57 = vld [vmem:[#allocation21 + $0xc1c] sm:$0xf] }
 0x442   :  { %v9965_v50 = vor.u32 %v12013_v0, %v9964_v32  ;;  %v10990_v60 = vld [vmem:[#allocation21 + $0xc98] sm:$0xf0]  ;;  %v10358_v32 = vld [vmem:[#allocation21 + $0x7a0] sm:$0xf0] }
 0x443   :  { %v10993_v23 = vor.u32 %v12253_v57, %v10990_v60  ;;  %v10361_v6 = vor.u32 %v12094_v59, %v10358_v32  ;;  %v11252_v59 = vld [vmem:[#allocation21 + $0xe20] sm:$0xf] }
 0x444   :  { %7013 = vmatpush.bf16.msra.mxu2 %v9573_v13  ;;  %7022 = vmatpush.bf16.msra.mxu3 %v11109_v14  ;;  %v9836_v13 = vld [vmem:[#allocation21 + $0x318] sm:$0xf] }
 0x445   :  { %7039 = vmatpush.bf16.msrb.mxu0 %v9577_v17  ;;  %7048 = vmatpush.bf16.msrb.mxu1 %v11113_v47  ;;  %v11372_v14 = vld [vmem:[#allocation21 + $0xf18] sm:$0xf]  ;;  %v9838_v17 = vld [vmem:[#allocation21 + $0x398] sm:$0xf0]  ;;  %v10469_v47 = vor.u32 %v12140_v49, %v10468_v9  ;;  %v9837_v31 = vor.u32 %v11981_v3, %v9836_v13  ;;  %v12062_v13 = vld [vmem:[#allocation21 + $0x624] sm:$0xf] }
 0x446   :  { %v11373_v30 = vor.u32 %v12365_v4, %v11372_v14  ;;  %v9841_v53 = vor.u32 %v11965_v5, %v9838_v17  ;;  %v10860_v9 = vld [vmem:[#allocation21 + $0xb18] sm:$0xf]  ;;  %v12221_v49 = vld [vmem:[#allocation21 + $0xb1c] sm:$0xf]  ;;  %v10230_v14 = vld [vmem:[#allocation21 + $0x6a0] sm:$0xf0] }
 0x447   :  { %v10865_v3 = vor.u32 %v12221_v49, %v10862_v58  ;;  %v10732_v17 = vld [vmem:[#allocation21 + $0xa18] sm:$0xf]  ;;  %v9588_v58 = vld [vmem:[#allocation21 + $0x120] sm:$0xf] }
 0x448   :  { %7014 = vmatpush.bf16.msra.mxu2 %v9445_v33  ;;  %7023 = vmatpush.bf16.msra.mxu3 %v10981_v1  ;;  %v11377_v33 = vor.u32 %v12349_v38, %v11374_v27  ;;  %v11949_v1 = vld [vmem:[#allocation21 + $0x294] sm:$0xf0]  ;;  %v12189_v38 = vld [vmem:[#allocation21 + $0xa1c] sm:$0xf]  ;;  %v10233_v27 = vor.u32 %v12062_v13, %v10230_v14  ;;  %v12302_v14 = vld [vmem:[#allocation21 + $0xd9c] sm:$0xf0] }
 0x449   :  { %7040 = vmatpush.bf16.msrb.mxu0 %v9449_v34  ;;  %7049 = vmatpush.bf16.msrb.mxu1 %v10985_v16  ;;  %v11933_v34 = vld [vmem:[#allocation21 + $0x21c] sm:$0xf] }
 0x44a   :  { %6976 = vmatmul.bf16.vlgmr.msrb.gmra.mxu3 %v13197_v18  ;;  %7002 = vmatmul.bf16.vlgmr.msra.gmra.mxu1 %v13197_v18  ;;  %v9710_v16 = vld [vmem:[#allocation21 + $0x298] sm:$0xf0] }
 0x44b   :  { %7015 = vmatmul.bf16.vlgmr.msra.gmra.mxu2 %v13191_v21  ;;  %v9713_v24 = vor.u32 %v11933_v34, %v9710_v16  ;;  %v12173_v34 = vld [vmem:[#allocation21 + $0x994] sm:$0xf0]  ;;  %v12157_v16 = vld [vmem:[#allocation21 + $0x91c] sm:$0xf] }
 0x44c   :  { %7059 = vmatpush.bf16.msrb.mxu2 %v10349_v55  ;;  %7024 = vmatpush.bf16.msra.mxu3 %v10853_v35  ;;  %v11245_v55 = vor.u32 %v12333_v19, %v11244_v8  ;;  %v11901_v35 = vld [vmem:[#allocation21 + $0x11c] sm:$0xf] }
 0x44d   :  { %7085 = vmatpush.bf16.msra.mxu0 %v10353_v12  ;;  %7050 = vmatpush.bf16.msrb.mxu1 %v10857_v26  ;;  %v9709_v12 = vor.u32 %v11949_v1, %v9708_v15  ;;  %v9582_v26 = vld [vmem:[#allocation21 + $0x198] sm:$0xf0]  ;;  %v10102_v15 = vld [vmem:[#allocation21 + $0x5a0] sm:$0xf0]  ;;  %v10604_v1 = vld [vmem:[#allocation21 + $0x918] sm:$0xf] }
 0x44e   :  { %7041 = vmatmul.bf16.vlgmr.msrb.gmra.mxu0 %v13191_v21  ;;  %v9585_v46 = vor.u32 %v11901_v35, %v9582_v26  ;;  %v12141_v35 = vld [vmem:[#allocation21 + $0x894] sm:$0xf0]  ;;  %v12125_v26 = vld [vmem:[#allocation21 + $0x81c] sm:$0xf] }
 0x450   :  { %7060 = vmatpush.bf16.msrb.mxu2 %v10221_v10  ;;  %7025 = vmatpush.bf16.msra.mxu3 %v10725_v22  ;;  %v11117_v10 = vor.u32 %v12301_v36, %v11116_v41  ;;  %v11869_v22 = vld [vmem:[#allocation21 + $0x1c] sm:$0xf]  ;;  %v10605_v41 = vor.u32 %v12173_v34, %v10604_v1  ;;  %v10476_v36 = vld [vmem:[#allocation21 + $0x818] sm:$0xf]  ;;  %v10998_v1 = vld [vmem:[#allocation21 + $0xca0] sm:$0xf0] }
 0x451   :  { %7086 = vmatpush.bf16.msra.mxu0 %v10225_v44  ;;  %7051 = vmatpush.bf16.msrb.mxu1 %v10729_v56  ;;  %v9452_v44 = vld [vmem:[#allocation21 + $0x18] sm:$0xf]  ;;  %v9454_v56 = vld [vmem:[#allocation21 + $0x98] sm:$0xf0]  ;;  %v10477_v54 = vor.u32 %v12141_v35, %v10476_v36  ;;  %v10364_v34 = vld [vmem:[#allocation21 + $0x728] sm:$0xf] }
 0x452   :  { %v9453_v0 = vor.u32 %v11885_v52, %v9452_v44  ;;  %v9457_v2 = vor.u32 %v11869_v22, %v9454_v56  ;;  %v11982_v44 = vld [vmem:[#allocation21 + $0x39c] sm:$0xf0]  ;;  %v11966_v52 = vld [vmem:[#allocation21 + $0x324] sm:$0xf]  ;;  %v10481_v56 = vor.u32 %v12125_v26, %v10478_v40  ;;  %v10236_v40 = vld [vmem:[#allocation21 + $0x628] sm:$0xf] }
 0x453   :  { %v11382_v22 = vld [vmem:[#allocation21 + $0xfa0] sm:$0xf0]  ;;  %v10868_v36 = vld [vmem:[#allocation21 + $0xb20] sm:$0xf] }
 0x454   :  { %7061 = vmatpush.bf16.msrb.mxu2 %v10093_v61  ;;  %7026 = vmatpush.bf16.msra.mxu3 %v10597_v7  ;;  %v10356_v61 = vld [vmem:[#allocation21 + $0x720] sm:$0xf]  ;;  %v10870_v26 = vld [vmem:[#allocation21 + $0xba0] sm:$0xf0] }
 0x455   :  { %7087 = vmatpush.bf16.msra.mxu0 %v10097_v25  ;;  %7052 = vmatpush.bf16.msrb.mxu1 %v10601_v42  ;;  %v12110_v25 = vld [vmem:[#allocation21 + $0x79c] sm:$0xf0]  ;;  %v12237_v42 = vld [vmem:[#allocation21 + $0xb94] sm:$0xf0] }
 0x456   :  { %v10357_v7 = vor.u32 %v12110_v25, %v10356_v61  ;;  %v10861_v4 = vor.u32 %v12237_v42, %v10860_v9  ;;  %v9849_v61 = vor.u32 %v11966_v52, %v9846_v28  ;;  %v9716_v25 = vld [vmem:[#allocation21 + $0x220] sm:$0xf]  ;;  %v11254_v9 = vld [vmem:[#allocation21 + $0xea0] sm:$0xf0] }
 0x457   :  { %v10740_v28 = vld [vmem:[#allocation21 + $0xa20] sm:$0xf] }
 0x458   :  { %7062 = vmatpush.bf16.msrb.mxu2 %v9965_v50  ;;  %7027 = vmatpush.bf16.msra.mxu3 %v10469_v47  ;;  %v10228_v50 = vld [vmem:[#allocation21 + $0x620] sm:$0xf]  ;;  %v12205_v47 = vld [vmem:[#allocation21 + $0xa94] sm:$0xf0] }
 0x459   :  { %7088 = vmatpush.bf16.msra.mxu0 %v9969_v37  ;;  %7053 = vmatpush.bf16.msrb.mxu1 %v10473_v29  ;;  %v12078_v37 = vld [vmem:[#allocation21 + $0x69c] sm:$0xf0]  ;;  %v10734_v29 = vld [vmem:[#allocation21 + $0xa98] sm:$0xf0]  ;;  %v10733_v8 = vor.u32 %v12205_v47, %v10732_v17  ;;  %v11126_v17 = vld [vmem:[#allocation21 + $0xda0] sm:$0xf0] }
 0x45a   :  { %v10229_v5 = vor.u32 %v12078_v37, %v10228_v50  ;;  %v10737_v19 = vor.u32 %v12189_v38, %v10734_v29  ;;  %v11918_v50 = vld [vmem:[#allocation21 + $0x19c] sm:$0xf0] }
 0x45b   :  { %7028 = vmatmul.bf16.vlgmr.msra.gmra.mxu3 %v13197_v18  ;;  %v11124_v37 = vld [vmem:[#allocation21 + $0xd20] sm:$0xf]  ;;  %v9589_v47 = vor.u32 %v11918_v50, %v9588_v58  ;;  %v9982_v58 = vld [vmem:[#allocation21 + $0x4a8] sm:$0xf0] }
 0x45c   :  { %7072 = vmatpush.bf16.msrb.mxu3 %v11373_v30  ;;  %7063 = vmatpush.bf16.msrb.mxu2 %v9837_v31  ;;  %v10100_v30 = vld [vmem:[#allocation21 + $0x520] sm:$0xf] }
 0x45d   :  { %7089 = vmatpush.bf16.msra.mxu0 %v9841_v53  ;;  %7098 = vmatpush.bf16.msra.mxu1 %v11377_v33  ;;  %v12046_v31 = vld [vmem:[#allocation21 + $0x59c] sm:$0xf0]  ;;  %v12030_v53 = vld [vmem:[#allocation21 + $0x524] sm:$0xf] }
 0x45e   :  { %7054 = vmatmul.bf16.vlgmr.msrb.gmra.mxu1 %v13197_v18  ;;  %v10101_v33 = vor.u32 %v12046_v31, %v10100_v30  ;;  %v10105_v48 = vor.u32 %v12030_v53, %v10102_v15  ;;  %v9460_v38 = vld [vmem:[#allocation21 + $0x20] sm:$0xf] }
 0x45f   :  { %v11886_v30 = vld [vmem:[#allocation21 + $0x9c] sm:$0xf0] }
 0x460   :  { %7073 = vmatpush.bf16.msrb.mxu3 %v11245_v55  ;;  %7064 = vmatpush.bf16.msrb.mxu2 %v9709_v12  ;;  %v9972_v55 = vld [vmem:[#allocation21 + $0x420] sm:$0xf] }
 0x461   :  { %7090 = vmatpush.bf16.msra.mxu0 %v9713_v24  ;;  %7099 = vmatpush.bf16.msra.mxu1 %v11249_v39  ;;  %v12014_v12 = vld [vmem:[#allocation21 + $0x49c] sm:$0xf0]  ;;  %v11998_v24 = vld [vmem:[#allocation21 + $0x424] sm:$0xf]  ;;  %v10609_v39 = vor.u32 %v12157_v16, %v10606_v62  ;;  %v12111_v16 = vld [vmem:[#allocation21 + $0x7a4] sm:$0xf0] }
 0x462   :  { %v9973_v11 = vor.u32 %v12014_v12, %v9972_v55  ;;  %v9977_v43 = vor.u32 %v11998_v24, %v9974_v63  ;;  %v10996_v31 = vld [vmem:[#allocation21 + $0xc20] sm:$0xf]  ;;  %v12095_v62 = vld [vmem:[#allocation21 + $0x72c] sm:$0xf] }
 0x463   :  { %v12270_v53 = vld [vmem:[#allocation21 + $0xc9c] sm:$0xf0]  ;;  %v10366_v55 = vld [vmem:[#allocation21 + $0x7a8] sm:$0xf0] }
 0x464   :  { %7074 = vmatpush.bf16.msrb.mxu3 %v11117_v10  ;;  %7065 = vmatpush.bf16.msrb.mxu2 %v9581_v45  ;;  %v9844_v10 = vld [vmem:[#allocation21 + $0x320] sm:$0xf]  ;;  %v10997_v12 = vor.u32 %v12270_v53, %v10996_v31  ;;  %v10369_v35 = vor.u32 %v12095_v62, %v10366_v55  ;;  %v9854_v31 = vld [vmem:[#allocation21 + $0x3a8] sm:$0xf0]  ;;  %v11260_v62 = vld [vmem:[#allocation21 + $0xe28] sm:$0xf] }
 0x465   :  { %7091 = vmatpush.bf16.msra.mxu0 %v9585_v46  ;;  %7100 = vmatpush.bf16.msra.mxu1 %v11121_v51  ;;  %v11380_v45 = vld [vmem:[#allocation21 + $0xf20] sm:$0xf]  ;;  %v12350_v51 = vld [vmem:[#allocation21 + $0xf24] sm:$0xf]  ;;  %v9845_v57 = vor.u32 %v11982_v44, %v9844_v10  ;;  %v12063_v10 = vld [vmem:[#allocation21 + $0x62c] sm:$0xf] }
 0x466   :  { %v12366_v46 = vld [vmem:[#allocation21 + $0xf9c] sm:$0xf0]  ;;  %v11385_v32 = vor.u32 %v12350_v51, %v11382_v22  ;;  %v10238_v44 = vld [vmem:[#allocation21 + $0x6a8] sm:$0xf0]  ;;  %v12190_v51 = vld [vmem:[#allocation21 + $0xa24] sm:$0xf] }
 0x467   :  { %v11381_v60 = vor.u32 %v12366_v46, %v11380_v45  ;;  %v10241_v22 = vor.u32 %v12063_v10, %v10238_v44  ;;  %v12303_v44 = vld [vmem:[#allocation21 + $0xda4] sm:$0xf0] }
 0x468   :  { %7075 = vmatpush.bf16.msrb.mxu3 %v10989_v20  ;;  %7066 = vmatpush.bf16.msrb.mxu2 %v9453_v0  ;;  %v11950_v20 = vld [vmem:[#allocation21 + $0x29c] sm:$0xf0] }
 0x469   :  { %7092 = vmatpush.bf16.msra.mxu0 %v9457_v2  ;;  %7101 = vmatpush.bf16.msra.mxu1 %v10993_v23  ;;  %v12334_v0 = vld [vmem:[#allocation21 + $0xe9c] sm:$0xf0]  ;;  %v11934_v2 = vld [vmem:[#allocation21 + $0x224] sm:$0xf]  ;;  %v9717_v42 = vor.u32 %v11950_v20, %v9716_v25  ;;  %v10110_v25 = vld [vmem:[#allocation21 + $0x5a8] sm:$0xf0] }
 0x46a   :  { %v9718_v23 = vld [vmem:[#allocation21 + $0x2a0] sm:$0xf0]  ;;  %v11253_v49 = vor.u32 %v12334_v0, %v11252_v59  ;;  %v10612_v0 = vld [vmem:[#allocation21 + $0x920] sm:$0xf] }
 0x46b   :  { %7067 = vmatmul.bf16.vlgmr.msrb.gmra.mxu2 %v13191_v21 }
 0x46c   :  { %7111 = vmatpush.bf16.msra.mxu2 %v10357_v7  ;;  %7093 = vmatmul.bf16.vlgmr.msra.gmra.mxu0 %v13191_v21  ;;  %v12318_v7 = vld [vmem:[#allocation21 + $0xe24] sm:$0xf] }
 0x46d   :  { %7137 = vmatpush.bf16.msrb.mxu0 %v10361_v6  ;;  %7076 = vmatpush.bf16.msrb.mxu3 %v10861_v4  ;;  %v9721_v6 = vor.u32 %v11934_v2, %v9718_v23  ;;  %v11257_v13 = vor.u32 %v12318_v7, %v11254_v9  ;;  %v11902_v4 = vld [vmem:[#allocation21 + $0x124] sm:$0xf]  ;;  %v12174_v2 = vld [vmem:[#allocation21 + $0x99c] sm:$0xf0] }
 0x46e   :  { %7102 = vmatpush.bf16.msra.mxu1 %v10865_v3  ;;  %v9590_v3 = vld [vmem:[#allocation21 + $0x1a0] sm:$0xf0]  ;;  %v10613_v50 = vor.u32 %v12174_v2, %v10612_v0  ;;  %v11006_v0 = vld [vmem:[#allocation21 + $0xca8] sm:$0xf0]  ;;  %v10372_v2 = vld [vmem:[#allocation21 + $0x730] sm:$0xf] }
 0x46f   :  { %v9593_v29 = vor.u32 %v11902_v4, %v9590_v3  ;;  %v12158_v23 = vld [vmem:[#allocation21 + $0x924] sm:$0xf]  ;;  %v12142_v4 = vld [vmem:[#allocation21 + $0x89c] sm:$0xf0] }
 0x470   :  { %7112 = vmatpush.bf16.msra.mxu2 %v10229_v5  ;;  %v12286_v5 = vld [vmem:[#allocation21 + $0xd24] sm:$0xf] }
 0x471   :  { %7138 = vmatpush.bf16.msrb.mxu0 %v10233_v27  ;;  %7077 = vmatpush.bf16.msrb.mxu3 %v10733_v8  ;;  %v11125_v27 = vor.u32 %v12302_v14, %v11124_v37  ;;  %v11129_v15 = vor.u32 %v12286_v5, %v11126_v17  ;;  %v11870_v8 = vld [vmem:[#allocation21 + $0x24] sm:$0xf]  ;;  %v10484_v37 = vld [vmem:[#allocation21 + $0x820] sm:$0xf] }
 0x472   :  { %7103 = vmatpush.bf16.msra.mxu1 %v10737_v19  ;;  %v9462_v19 = vld [vmem:[#allocation21 + $0xa0] sm:$0xf0]  ;;  %v10485_v53 = vor.u32 %v12142_v4, %v10484_v37  ;;  %v10876_v37 = vld [vmem:[#allocation21 + $0xb28] sm:$0xf] }
 0x473   :  { %v9465_v24 = vor.u32 %v11870_v8, %v9462_v19  ;;  %v10614_v9 = vld [vmem:[#allocation21 + $0x9a0] sm:$0xf0]  ;;  %v11390_v8 = vld [vmem:[#allocation21 + $0xfa8] sm:$0xf0] }
 0x474   :  { %7113 = vmatpush.bf16.msra.mxu2 %v10101_v33  ;;  %v12254_v33 = vld [vmem:[#allocation21 + $0xc24] sm:$0xf] }
 0x475   :  { %7139 = vmatpush.bf16.msrb.mxu0 %v10105_v48  ;;  %7078 = vmatpush.bf16.msrb.mxu3 %v10605_v41  ;;  %v9461_v48 = vor.u32 %v11886_v30, %v9460_v38  ;;  %v11001_v63 = vor.u32 %v12254_v33, %v10998_v1  ;;  %v10365_v41 = vor.u32 %v12111_v16, %v10364_v34  ;;  %v12126_v3 = vld [vmem:[#allocation21 + $0x824] sm:$0xf]  ;;  %v11983_v38 = vld [vmem:[#allocation21 + $0x3a4] sm:$0xf0]  ;;  %v11967_v30 = vld [vmem:[#allocation21 + $0x32c] sm:$0xf] }
 0x476   :  { %7104 = vmatpush.bf16.msra.mxu1 %v10609_v39  ;;  %v12238_v39 = vld [vmem:[#allocation21 + $0xb9c] sm:$0xf0]  ;;  %v10486_v5 = vld [vmem:[#allocation21 + $0x8a0] sm:$0xf0]  ;;  %v9857_v34 = vor.u32 %v11967_v30, %v9854_v31  ;;  %v9724_v16 = vld [vmem:[#allocation21 + $0x228] sm:$0xf] }
 0x477   :  { %v10869_v45 = vor.u32 %v12238_v39, %v10868_v36  ;;  %v10489_v19 = vor.u32 %v12126_v3, %v10486_v5  ;;  %v11262_v36 = vld [vmem:[#allocation21 + $0xea8] sm:$0xf0]  ;;  %v10244_v5 = vld [vmem:[#allocation21 + $0x630] sm:$0xf]  ;;  %v10748_v31 = vld [vmem:[#allocation21 + $0xa28] sm:$0xf] }
 0x478   :  { %7114 = vmatpush.bf16.msra.mxu2 %v9973_v11  ;;  %v12222_v11 = vld [vmem:[#allocation21 + $0xb24] sm:$0xf]  ;;  %v10878_v3 = vld [vmem:[#allocation21 + $0xba8] sm:$0xf0] }
 0x479   :  { %7140 = vmatpush.bf16.msrb.mxu0 %v9977_v43  ;;  %7079 = vmatpush.bf16.msrb.mxu3 %v10477_v54  ;;  %v12079_v43 = vld [vmem:[#allocation21 + $0x6a4] sm:$0xf0]  ;;  %v10873_v46 = vor.u32 %v12222_v11, %v10870_v26  ;;  %v12206_v54 = vld [vmem:[#allocation21 + $0xa9c] sm:$0xf0] }
 0x47a   :  { %7105 = vmatpush.bf16.msra.mxu1 %v10481_v56  ;;  %v10237_v52 = vor.u32 %v12079_v43, %v10236_v40  ;;  %v10742_v56 = vld [vmem:[#allocation21 + $0xaa0] sm:$0xf0]  ;;  %v10741_v20 = vor.u32 %v12206_v54, %v10740_v28  ;;  %v9596_v26 = vld [vmem:[#allocation21 + $0x128] sm:$0xf]  ;;  %v11134_v28 = vld [vmem:[#allocation21 + $0xda8] sm:$0xf0] }
 0x47b   :  { %v10745_v59 = vor.u32 %v12190_v51, %v10742_v56  ;;  %v11919_v40 = vld [vmem:[#allocation21 + $0x1a4] sm:$0xf0] }
 0x47c   :  { %7115 = vmatpush.bf16.msra.mxu2 %v9845_v57  ;;  %7080 = vmatmul.bf16.vlgmr.msrb.gmra.mxu3 %v13197_v18  ;;  %v10108_v57 = vld [vmem:[#allocation21 + $0x528] sm:$0xf]  ;;  %v9597_v54 = vor.u32 %v11919_v40, %v9596_v26  ;;  %v12000_v26 = vld [vmem:[#allocation21 + $0x434] sm:$0xf] }
 0x47d   :  { %7124 = vmatpush.bf16.msra.mxu3 %v11381_v60  ;;  %7141 = vmatpush.bf16.msrb.mxu0 %v9849_v61  ;;  %v12047_v60 = vld [vmem:[#allocation21 + $0x5a4] sm:$0xf0]  ;;  %v12031_v61 = vld [vmem:[#allocation21 + $0x52c] sm:$0xf]  ;;  %v9990_v40 = vld [vmem:[#allocation21 + $0x4b0] sm:$0xf0] }
 0x47e   :  { %7150 = vmatpush.bf16.msrb.mxu1 %v11385_v32  ;;  %v10109_v32 = vor.u32 %v12047_v60, %v10108_v57  ;;  %v10113_v7 = vor.u32 %v12031_v61, %v10110_v25  ;;  %v11132_v43 = vld [vmem:[#allocation21 + $0xd28] sm:$0xf] }
 0x47f   :  { %7106 = vmatmul.bf16.vlgmr.msra.gmra.mxu1 %v13197_v18  ;;  %v9468_v51 = vld [vmem:[#allocation21 + $0x28] sm:$0xf] }
 0x480   :  { %7116 = vmatpush.bf16.msra.mxu2 %v9717_v42  ;;  %v9980_v42 = vld [vmem:[#allocation21 + $0x428] sm:$0xf] }
 0x481   :  { %7125 = vmatpush.bf16.msra.mxu3 %v11253_v49  ;;  %7142 = vmatpush.bf16.msrb.mxu0 %v9721_v6  ;;  %v12015_v49 = vld [vmem:[#allocation21 + $0x4a4] sm:$0xf0]  ;;  %v11999_v6 = vld [vmem:[#allocation21 + $0x42c] sm:$0xf] }
 0x482   :  { %7151 = vmatpush.bf16.msrb.mxu1 %v11257_v13  ;;  %v10617_v13 = vor.u32 %v12158_v23, %v10614_v9  ;;  %v9981_v14 = vor.u32 %v12015_v49, %v9980_v42  ;;  %v9985_v17 = vor.u32 %v11999_v6, %v9982_v58  ;;  %v11887_v57 = vld [vmem:[#allocation21 + $0xa4] sm:$0xf0]  ;;  %v12112_v23 = vld [vmem:[#allocation21 + $0x7ac] sm:$0xf0]  ;;  %v12096_v9 = vld [vmem:[#allocation21 + $0x734] sm:$0xf] }
 0x483   :  { %v11004_v60 = vld [vmem:[#allocation21 + $0xc28] sm:$0xf]  ;;  %v10374_v42 = vld [vmem:[#allocation21 + $0x7b0] sm:$0xf0] }
 0x484   :  { %7117 = vmatpush.bf16.msra.mxu2 %v9589_v47  ;;  %v9852_v47 = vld [vmem:[#allocation21 + $0x328] sm:$0xf]  ;;  %v10377_v4 = vor.u32 %v12096_v9, %v10374_v42  ;;  %v9732_v42 = vld [vmem:[#allocation21 + $0x230] sm:$0xf] }
 0x485   :  { %7126 = vmatpush.bf16.msra.mxu3 %v11125_v27  ;;  %7143 = vmatpush.bf16.msrb.mxu0 %v9593_v29  ;;  %v11388_v27 = vld [vmem:[#allocation21 + $0xf28] sm:$0xf]  ;;  %v9853_v33 = vor.u32 %v11983_v38, %v9852_v47  ;;  %v12064_v47 = vld [vmem:[#allocation21 + $0x634] sm:$0xf] }
 0x486   :  { %7152 = vmatpush.bf16.msrb.mxu1 %v11129_v15  ;;  %v12367_v29 = vld [vmem:[#allocation21 + $0xfa4] sm:$0xf0]  ;;  %v12351_v15 = vld [vmem:[#allocation21 + $0xf2c] sm:$0xf]  ;;  %v10246_v38 = vld [vmem:[#allocation21 + $0x6b0] sm:$0xf0] }
 0x487   :  { %v11389_v1 = vor.u32 %v12367_v29, %v11388_v27  ;;  %v11393_v55 = vor.u32 %v12351_v15, %v11390_v8  ;;  %v12271_v61 = vld [vmem:[#allocation21 + $0xca4] sm:$0xf0]  ;;  %v12191_v15 = vld [vmem:[#allocation21 + $0xa2c] sm:$0xf]  ;;  %v10249_v8 = vor.u32 %v12064_v47, %v10246_v38  ;;  %v9604_v47 = vld [vmem:[#allocation21 + $0x130] sm:$0xf] }
 0x488   :  { %7118 = vmatpush.bf16.msra.mxu2 %v9461_v48  ;;  %v11951_v48 = vld [vmem:[#allocation21 + $0x2a4] sm:$0xf0]  ;;  %v11005_v49 = vor.u32 %v12271_v61, %v11004_v60  ;;  %v12368_v60 = vld [vmem:[#allocation21 + $0xfac] sm:$0xf0]  ;;  %v11968_v61 = vld [vmem:[#allocation21 + $0x334] sm:$0xf] }
 0x489   :  { %7127 = vmatpush.bf16.msra.mxu3 %v10997_v12  ;;  %7144 = vmatpush.bf16.msrb.mxu0 %v9465_v24  ;;  %v12335_v12 = vld [vmem:[#allocation21 + $0xea4] sm:$0xf0]  ;;  %v11935_v24 = vld [vmem:[#allocation21 + $0x22c] sm:$0xf]  ;;  %v9725_v39 = vor.u32 %v11951_v48, %v9724_v16  ;;  %v10118_v16 = vld [vmem:[#allocation21 + $0x5b0] sm:$0xf0] }
 0x48a   :  { %7153 = vmatpush.bf16.msrb.mxu1 %v11001_v63  ;;  %v9726_v63 = vld [vmem:[#allocation21 + $0x2a8] sm:$0xf0]  ;;  %v11261_v11 = vor.u32 %v12335_v12, %v11260_v62  ;;  %v11920_v38 = vld [vmem:[#allocation21 + $0x1ac] sm:$0xf0] }
 0x48b   :  { %7119 = vmatmul.bf16.vlgmr.msra.gmra.mxu2 %v13191_v21 }
 0x48c   :  { %7163 = vmatpush.bf16.msrb.mxu2 %v10365_v41  ;;  %7145 = vmatmul.bf16.vlgmr.msrb.gmra.mxu0 %v13191_v21  ;;  %v12319_v41 = vld [vmem:[#allocation21 + $0xe2c] sm:$0xf] }
 0x48d   :  { %7189 = vmatpush.bf16.msra.mxu0 %v10369_v35  ;;  %7128 = vmatpush.bf16.msra.mxu3 %v10869_v45  ;;  %v9729_v35 = vor.u32 %v11935_v24, %v9726_v63  ;;  %v11265_v10 = vor.u32 %v12319_v41, %v11262_v36  ;;  %v11903_v45 = vld [vmem:[#allocation21 + $0x12c] sm:$0xf]  ;;  %v10620_v24 = vld [vmem:[#allocation21 + $0x928] sm:$0xf] }
 0x48e   :  { %7154 = vmatpush.bf16.msrb.mxu1 %v10873_v46  ;;  %v9598_v46 = vld [vmem:[#allocation21 + $0x1a8] sm:$0xf0]  ;;  %v12175_v63 = vld [vmem:[#allocation21 + $0x9a4] sm:$0xf0] }
 0x48f   :  { %v9601_v56 = vor.u32 %v11903_v45, %v9598_v46  ;;  %v12159_v41 = vld [vmem:[#allocation21 + $0x92c] sm:$0xf]  ;;  %v12143_v46 = vld [vmem:[#allocation21 + $0x8a4] sm:$0xf0] }
 0x490   :  { %7164 = vmatpush.bf16.msrb.mxu2 %v10237_v52  ;;  %v12287_v52 = vld [vmem:[#allocation21 + $0xd2c] sm:$0xf] }
 0x491   :  { %7190 = vmatpush.bf16.msra.mxu0 %v10241_v22  ;;  %7129 = vmatpush.bf16.msra.mxu3 %v10741_v20  ;;  %v11133_v22 = vor.u32 %v12303_v44, %v11132_v43  ;;  %v11137_v25 = vor.u32 %v12287_v52, %v11134_v28  ;;  %v11871_v20 = vld [vmem:[#allocation21 + $0x2c] sm:$0xf]  ;;  %v10621_v43 = vor.u32 %v12175_v63, %v10620_v24  ;;  %v11012_v24 = vld [vmem:[#allocation21 + $0xc30] sm:$0xf] }
 0x492   :  { %7155 = vmatpush.bf16.msrb.mxu1 %v10745_v59  ;;  %v9470_v59 = vld [vmem:[#allocation21 + $0xa8] sm:$0xf0]  ;;  %v12272_v63 = vld [vmem:[#allocation21 + $0xcac] sm:$0xf0] }
 0x493   :  { %v9473_v6 = vor.u32 %v11871_v20, %v9470_v59  ;;  %v12127_v52 = vld [vmem:[#allocation21 + $0x82c] sm:$0xf]  ;;  %v12352_v59 = vld [vmem:[#allocation21 + $0xf34] sm:$0xf] }
 0x494   :  { %7165 = vmatpush.bf16.msrb.mxu2 %v10109_v32  ;;  %v12255_v32 = vld [vmem:[#allocation21 + $0xc2c] sm:$0xf] }
 0x495   :  { %7191 = vmatpush.bf16.msra.mxu0 %v10113_v7  ;;  %7130 = vmatpush.bf16.msra.mxu3 %v10613_v50  ;;  %v9469_v7 = vor.u32 %v11887_v57, %v9468_v51  ;;  %v11009_v58 = vor.u32 %v12255_v32, %v11006_v0  ;;  %v10373_v50 = vor.u32 %v12112_v23, %v10372_v2  ;;  %v10494_v28 = vld [vmem:[#allocation21 + $0x8a8] sm:$0xf0]  ;;  %v9860_v51 = vld [vmem:[#allocation21 + $0x330] sm:$0xf]  ;;  %v11398_v32 = vld [vmem:[#allocation21 + $0xfb0] sm:$0xf0] }
 0x496   :  { %7156 = vmatpush.bf16.msrb.mxu1 %v10617_v13  ;;  %v12239_v13 = vld [vmem:[#allocation21 + $0xba4] sm:$0xf0]  ;;  %v10497_v0 = vor.u32 %v12127_v52, %v10494_v28 }
 0x497   :  { %v10877_v27 = vor.u32 %v12239_v13, %v10876_v37  ;;  %v11936_v37 = vld [vmem:[#allocation21 + $0x234] sm:$0xf] }
 0x498   :  { %7166 = vmatpush.bf16.msrb.mxu2 %v9981_v14  ;;  %v12223_v14 = vld [vmem:[#allocation21 + $0xb2c] sm:$0xf]  ;;  %v9734_v13 = vld [vmem:[#allocation21 + $0x2b0] sm:$0xf0] }
 0x499   :  { %7192 = vmatpush.bf16.msra.mxu0 %v9985_v17  ;;  %7131 = vmatpush.bf16.msra.mxu3 %v10485_v53  ;;  %v12080_v17 = vld [vmem:[#allocation21 + $0x6ac] sm:$0xf0]  ;;  %v10881_v29 = vor.u32 %v12223_v14, %v10878_v3  ;;  %v12207_v53 = vld [vmem:[#allocation21 + $0xaa4] sm:$0xf0]  ;;  %v12320_v14 = vld [vmem:[#allocation21 + $0xe34] sm:$0xf] }
 0x49a   :  { %7157 = vmatpush.bf16.msrb.mxu1 %v10489_v19  ;;  %v10245_v30 = vor.u32 %v12080_v17, %v10244_v5  ;;  %v10750_v19 = vld [vmem:[#allocation21 + $0xaa8] sm:$0xf0]  ;;  %v10749_v48 = vor.u32 %v12207_v53, %v10748_v31  ;;  %v9737_v17 = vor.u32 %v11936_v37, %v9734_v13  ;;  %v12304_v31 = vld [vmem:[#allocation21 + $0xdac] sm:$0xf0]  ;;  %v11904_v53 = vld [vmem:[#allocation21 + $0x134] sm:$0xf] }
 0x49b   :  { %v10753_v62 = vor.u32 %v12191_v15, %v10750_v19  ;;  %v9606_v15 = vld [vmem:[#allocation21 + $0x1b0] sm:$0xf0] }
 0x49c   :  { %7167 = vmatpush.bf16.msrb.mxu2 %v9853_v33  ;;  %7132 = vmatmul.bf16.vlgmr.msra.gmra.mxu3 %v13197_v18  ;;  %v10116_v33 = vld [vmem:[#allocation21 + $0x530] sm:$0xf]  ;;  %v11142_v19 = vld [vmem:[#allocation21 + $0xdb0] sm:$0xf0] }
 0x49d   :  { %7176 = vmatpush.bf16.msrb.mxu3 %v11389_v1  ;;  %7193 = vmatpush.bf16.msra.mxu0 %v9857_v34  ;;  %v12048_v1 = vld [vmem:[#allocation21 + $0x5ac] sm:$0xf0]  ;;  %v12032_v34 = vld [vmem:[#allocation21 + $0x534] sm:$0xf] }
 0x49e   :  { %7202 = vmatpush.bf16.msra.mxu1 %v11393_v55  ;;  %v10117_v55 = vor.u32 %v12048_v1, %v10116_v33  ;;  %v10121_v36 = vor.u32 %v12032_v34, %v10118_v16  ;;  %v9605_v33 = vor.u32 %v11920_v38, %v9604_v47  ;;  %v9476_v34 = vld [vmem:[#allocation21 + $0x30] sm:$0xf]  ;;  %v10758_v13 = vld [vmem:[#allocation21 + $0xab0] sm:$0xf0] }
 0x49f   :  { %7158 = vmatmul.bf16.vlgmr.msrb.gmra.mxu1 %v13197_v18 }
 0x4a0   :  { %7168 = vmatpush.bf16.msrb.mxu2 %v9725_v39  ;;  %v10622_v39 = vld [vmem:[#allocation21 + $0x9a8] sm:$0xf0] }
 0x4a1   :  { %7177 = vmatpush.bf16.msrb.mxu3 %v11261_v11  ;;  %7194 = vmatpush.bf16.msra.mxu0 %v9729_v35  ;;  %v9988_v11 = vld [vmem:[#allocation21 + $0x430] sm:$0xf]  ;;  %v10625_v44 = vor.u32 %v12159_v41, %v10622_v39  ;;  %v9478_v39 = vld [vmem:[#allocation21 + $0xb0] sm:$0xf0] }
 0x4a2   :  { %7203 = vmatpush.bf16.msra.mxu1 %v11265_v10  ;;  %v12016_v35 = vld [vmem:[#allocation21 + $0x4ac] sm:$0xf0]  ;;  %v10492_v10 = vld [vmem:[#allocation21 + $0x828] sm:$0xf] }
 0x4a3   :  { %v9989_v45 = vor.u32 %v12016_v35, %v9988_v11  ;;  %v10493_v20 = vor.u32 %v12143_v46, %v10492_v10  ;;  %v12256_v11 = vld [vmem:[#allocation21 + $0xc34] sm:$0xf]  ;;  %v12097_v10 = vld [vmem:[#allocation21 + $0x73c] sm:$0xf] }
 0x4a4   :  { %7169 = vmatpush.bf16.msrb.mxu2 %v9597_v54  ;;  %v9993_v54 = vor.u32 %v12000_v26, %v9990_v40  ;;  %v11014_v35 = vld [vmem:[#allocation21 + $0xcb0] sm:$0xf0]  ;;  %v10380_v26 = vld [vmem:[#allocation21 + $0x738] sm:$0xf] }
 0x4a5   :  { %7178 = vmatpush.bf16.msrb.mxu3 %v11133_v22  ;;  %7195 = vmatpush.bf16.msra.mxu0 %v9601_v56  ;;  %v11984_v22 = vld [vmem:[#allocation21 + $0x3ac] sm:$0xf0]  ;;  %v12113_v40 = vld [vmem:[#allocation21 + $0x7b4] sm:$0xf0]  ;;  %v11017_v52 = vor.u32 %v12256_v11, %v11014_v35  ;;  %v12128_v35 = vld [vmem:[#allocation21 + $0x834] sm:$0xf] }
 0x4a6   :  { %7204 = vmatpush.bf16.msra.mxu1 %v11137_v25  ;;  %v11396_v56 = vld [vmem:[#allocation21 + $0xf30] sm:$0xf]  ;;  %v9862_v25 = vld [vmem:[#allocation21 + $0x3b0] sm:$0xf0]  ;;  %v9861_v2 = vor.u32 %v11984_v22, %v9860_v51  ;;  %v10381_v28 = vor.u32 %v12113_v40, %v10380_v26 }
 0x4a7   :  { %v13219_v12 = vpop.f32.mrf.mxu0  ;;  %v9865_v9 = vor.u32 %v11968_v61, %v9862_v25  ;;  %v10884_v51 = vld [vmem:[#allocation21 + $0xb30] sm:$0xf]  ;;  %v10886_v25 = vld [vmem:[#allocation21 + $0xbb0] sm:$0xf0] }
 0x4a8   :  { %7170 = vmatpush.bf16.msrb.mxu2 %v9469_v7  ;;  %v11397_v7 = vor.u32 %v12368_v60, %v11396_v56  ;;  %v12240_v22 = vld [vmem:[#allocation21 + $0xbac] sm:$0xf0]  ;;  %v12224_v56 = vld [vmem:[#allocation21 + $0xb34] sm:$0xf] }
 0x4a9   :  { %7179 = vmatpush.bf16.msrb.mxu3 %v11005_v49  ;;  %7196 = vmatpush.bf16.msra.mxu0 %v9473_v6  ;;  %v11952_v49 = vld [vmem:[#allocation21 + $0x2ac] sm:$0xf0] }
 0x4aa   :  { %7205 = vmatpush.bf16.msra.mxu1 %v11009_v58  ;;  %v11268_v6 = vld [vmem:[#allocation21 + $0xe30] sm:$0xf]  ;;  %v11401_v58 = vor.u32 %v12352_v59, %v11398_v32  ;;  %v9733_v3 = vor.u32 %v11952_v49, %v9732_v42  ;;  %v12081_v59 = vld [vmem:[#allocation21 + $0x6b4] sm:$0xf0]  ;;  %v10889_v42 = vor.u32 %v12224_v56, %v10886_v25  ;;  %v11969_v56 = vld [vmem:[#allocation21 + $0x33c] sm:$0xf] }
 0x4ab   :  { %7171 = vmatmul.bf16.vlgmr.msrb.gmra.mxu2 %v13191_v21  ;;  %v12144_v11 = vld [vmem:[#allocation21 + $0x8ac] sm:$0xf0] }
 0x4ac   :  { %7215 = vmatpush.bf16.msra.mxu2 %v10373_v50  ;;  %7197 = vmatmul.bf16.vlgmr.msra.gmra.mxu0 %v13191_v21  ;;  %v12336_v50 = vld [vmem:[#allocation21 + $0xeac] sm:$0xf0] }
 0x4ad   :  { %7241 = vmatpush.bf16.msrb.mxu0 %v10377_v4  ;;  %7180 = vmatpush.bf16.msrb.mxu3 %v10877_v27  ;;  %v13221_v57 = vpop.f32.mrf.mxu2  ;;  %v11270_v4 = vld [vmem:[#allocation21 + $0xeb0] sm:$0xf0]  ;;  %v11269_v5 = vor.u32 %v12336_v50, %v11268_v6  ;;  %v11140_v27 = vld [vmem:[#allocation21 + $0xd30] sm:$0xf] }
 0x4ae   :  { %7206 = vmatpush.bf16.msra.mxu1 %v10881_v29  ;;  %v11273_v29 = vor.u32 %v12320_v14, %v11270_v4  ;;  %v11141_v16 = vor.u32 %v12304_v31, %v11140_v27  ;;  %v10756_v6 = vld [vmem:[#allocation21 + $0xa30] sm:$0xf]  ;;  %v12192_v50 = vld [vmem:[#allocation21 + $0xa34] sm:$0xf]  ;;  %v10124_v14 = vld [vmem:[#allocation21 + $0x538] sm:$0xf] }
 0x4af   :  { %v6940_v23 = vpop.f32.mrf.mxu0  ;;  %v12049_v4 = vld [vmem:[#allocation21 + $0x5b4] sm:$0xf0]  ;;  %v10761_v27 = vor.u32 %v12192_v50, %v10758_v13  ;;  %v10628_v31 = vld [vmem:[#allocation21 + $0x930] sm:$0xf] }
 0x4b0   :  { %7216 = vmatpush.bf16.msra.mxu2 %v10245_v30  ;;  %v13233_v23 = vld [vmem:[#allocation23] sm:$0xff] }
 0x4b1   :  { %7242 = vmatpush.bf16.msrb.mxu0 %v10249_v8  ;;  %7181 = vmatpush.bf16.msrb.mxu3 %v10749_v48  ;;  %v12288_v8 = vld [vmem:[#allocation21 + $0xd34] sm:$0xf]  ;;  %v9609_v48 = vor.u32 %v11904_v53, %v9606_v15  ;;  %v4279_v47 = vperm.slane %v13233_v23, 0  ;;  %v12176_v53 = vld [vmem:[#allocation21 + $0x9ac] sm:$0xf0] }
 0x4b2   :  { %7207 = vmatpush.bf16.msra.mxu1 %v10753_v62  ;;  %v11145_v41 = vor.u32 %v12288_v8, %v11142_v19  ;;  %v12160_v15 = vld [vmem:[#allocation21 + $0x934] sm:$0xf] }
 0x4b3   :  { %v6913_v25 = vadd.f32 %v13221_v57, %v4279_v47  ;;  %v11276_v57 = vld [vmem:[#allocation21 + $0xe38] sm:$0xf] }
 0x4b4   :  { %7217 = vmatpush.bf16.msra.mxu2 %v10117_v55  ;;  %v11888_v55 = vld [vmem:[#allocation21 + $0xac] sm:$0xf0] }
 0x4b5   :  { %7243 = vmatpush.bf16.msrb.mxu0 %v10121_v36  ;;  %7182 = vmatpush.bf16.msrb.mxu3 %v10621_v43  ;;  %v6914_v30 = vpop.f32.mrf.mxu2  ;;  %v11872_v36 = vld [vmem:[#allocation21 + $0x34] sm:$0xf]  ;;  %v9477_v43 = vor.u32 %v11888_v55, %v9476_v34  ;;  %v9996_v34 = vld [vmem:[#allocation21 + $0x438] sm:$0xf]  ;;  %v4281_v55 = vperm.slane %v13233_v23, 2 }
 0x4b6   :  { %7208 = vmatpush.bf16.msra.mxu1 %v10625_v44  ;;  %v10382_v44 = vld [vmem:[#allocation21 + $0x7b8] sm:$0xf0]  ;;  %v9481_v46 = vor.u32 %v11872_v36, %v9478_v39  ;;  %v10500_v39 = vld [vmem:[#allocation21 + $0x830] sm:$0xf] }
 0x4b7   :  { %v13225_v1 = vpop.f32.mrf.mxu1  ;;  %v10385_v60 = vor.u32 %v12097_v10, %v10382_v44  ;;  %v9868_v10 = vld [vmem:[#allocation21 + $0x338] sm:$0xf] }
 0x4b8   :  { %7218 = vmatpush.bf16.msra.mxu2 %v9989_v45  ;;  %v13227_v62 = vpop.f32.mrf.mxu0  ;;  %v11013_v45 = vor.u32 %v12272_v63, %v11012_v24  ;;  %v12001_v24 = vld [vmem:[#allocation21 + $0x43c] sm:$0xf]  ;;  %v11985_v44 = vld [vmem:[#allocation21 + $0x3b4] sm:$0xf0] }
 0x4b9   :  { %7244 = vmatpush.bf16.msrb.mxu0 %v9993_v54  ;;  %7183 = vmatpush.bf16.msrb.mxu3 %v10493_v20  ;;  %v10252_v20 = vld [vmem:[#allocation21 + $0x638] sm:$0xf]  ;;  %v9998_v63 = vld [vmem:[#allocation21 + $0x4b8] sm:$0xf0] }
 0x4ba   :  { %7209 = vmatpush.bf16.msra.mxu1 %v10497_v0  ;;  %v12065_v0 = vld [vmem:[#allocation21 + $0x63c] sm:$0xf]  ;;  %v10253_v49 = vor.u32 %v12081_v59, %v10252_v20  ;;  %v10501_v20 = vor.u32 %v12144_v11, %v10500_v39  ;;  %v9484_v39 = vld [vmem:[#allocation21 + $0x38] sm:$0xf] }
 0x4bc   :  { %7219 = vmatpush.bf16.msra.mxu2 %v9861_v2  ;;  %7184 = vmatmul.bf16.vlgmr.msrb.gmra.mxu3 %v13197_v18  ;;  %v10254_v2 = vld [vmem:[#allocation21 + $0x6b8] sm:$0xf0] }
 0x4bd   :  { %7228 = vmatpush.bf16.msra.mxu3 %v11397_v7  ;;  %7245 = vmatpush.bf16.msrb.mxu0 %v9865_v9  ;;  %v13229_v54 = vpop.f32.mrf.mxu3  ;;  %v10885_v7 = vor.u32 %v12240_v22, %v10884_v51  ;;  %v10257_v37 = vor.u32 %v12065_v0, %v10254_v2  ;;  %v12369_v22 = vld [vmem:[#allocation21 + $0xfb4] sm:$0xf0]  ;;  %v12353_v0 = vld [vmem:[#allocation21 + $0xf3c] sm:$0xf] }
 0x4be   :  { %7254 = vmatpush.bf16.msrb.mxu1 %v11401_v58  ;;  %v13231_v61 = vpop.f32.mrf.mxu2  ;;  %v12208_v58 = vld [vmem:[#allocation21 + $0xaac] sm:$0xf0]  ;;  %v11406_v2 = vld [vmem:[#allocation21 + $0xfb8] sm:$0xf0]  ;;  %v6926_v50 = vadd.f32 %v13229_v54, %v6913_v25 }
 0x4bf   :  { %7210 = vmatmul.bf16.vlgmr.msra.gmra.mxu1 %v13197_v18  ;;  %v6953_v32 = vpop.f32.mrf.mxu1  ;;  %v10757_v38 = vor.u32 %v12208_v58, %v10756_v6  ;;  %v9740_v6 = vld [vmem:[#allocation21 + $0x238] sm:$0xf] }
 0x4c0   :  { %7220 = vmatpush.bf16.msra.mxu2 %v9733_v3  ;;  %v6992_v9 = vpop.f32.mrf.mxu0  ;;  %v12033_v3 = vld [vmem:[#allocation21 + $0x53c] sm:$0xf]  ;;  %v9869_v32 = vor.u32 %v11985_v44, %v9868_v10  ;;  %v11953_v58 = vld [vmem:[#allocation21 + $0x2b4] sm:$0xf0] }
 0x4c1   :  { %7229 = vmatpush.bf16.msra.mxu3 %v11269_v5  ;;  %7246 = vmatpush.bf16.msrb.mxu0 %v9737_v17  ;;  %v10126_v5 = vld [vmem:[#allocation21 + $0x5b8] sm:$0xf0]  ;;  %v4280_v17 = vperm.slane %v13233_v23, 1  ;;  %v6965_v9 = vadd.f32 %v13231_v61, %v4281_v55  ;;  %v12273_v10 = vld [vmem:[#allocation21 + $0xcb4] sm:$0xf0] }
 0x4c2   :  { %7255 = vmatpush.bf16.msrb.mxu1 %v11273_v29  ;;  %v10125_v29 = vor.u32 %v12049_v4, %v10124_v14  ;;  %v10129_v8 = vor.u32 %v12033_v3, %v10126_v5  ;;  %v12337_v4 = vld [vmem:[#allocation21 + $0xeb4] sm:$0xf0]  ;;  %v9742_v3 = vld [vmem:[#allocation21 + $0x2b8] sm:$0xf0] }
 0x4c3   :  { %v12321_v5 = vld [vmem:[#allocation21 + $0xe3c] sm:$0xf] }
 0x4c4   :  { %7221 = vmatpush.bf16.msra.mxu2 %v9605_v33  ;;  %v10630_v33 = vld [vmem:[#allocation21 + $0x9b0] sm:$0xf0]  ;;  %v9614_v55 = vld [vmem:[#allocation21 + $0x1b8] sm:$0xf0] }
 0x4c5   :  { %7230 = vmatpush.bf16.msra.mxu3 %v11141_v16  ;;  %7247 = vmatpush.bf16.msrb.mxu0 %v9609_v48  ;;  %v6927_v30 = vpop.f32.mrf.mxu3  ;;  %v12017_v16 = vld [vmem:[#allocation21 + $0x4b4] sm:$0xf0]  ;;  %v4282_v48 = vperm.slane %v13233_v23, 3  ;;  %v10633_v26 = vor.u32 %v12160_v15, %v10630_v33 }
 0x4c6   :  { %7256 = vmatpush.bf16.msrb.mxu1 %v11145_v41  ;;  %v6966_v19 = vpop.f32.mrf.mxu2  ;;  %v10629_v41 = vor.u32 %v12176_v53, %v10628_v31  ;;  %v9997_v40 = vor.u32 %v12017_v16, %v9996_v34  ;;  %v11277_v30 = vor.u32 %v12337_v4, %v11276_v57  ;;  %v9612_v53 = vld [vmem:[#allocation21 + $0x138] sm:$0xf]  ;;  %v12082_v57 = vld [vmem:[#allocation21 + $0x6bc] sm:$0xf0] }
 0x4c7   :  { %v7003_v36 = vpop.f32.mrf.mxu1  ;;  %v6991_v51 = vadd.f32 %v13227_v62, %v4282_v48  ;;  %v11921_v15 = vld [vmem:[#allocation21 + $0x1b4] sm:$0xf0]  ;;  %v11905_v48 = vld [vmem:[#allocation21 + $0x13c] sm:$0xf] }
 0x4c8   :  { %7222 = vmatpush.bf16.msra.mxu2 %v9477_v43  ;;  %v10502_v43 = vld [vmem:[#allocation21 + $0x8b0] sm:$0xf0]  ;;  %v12305_v16 = vld [vmem:[#allocation21 + $0xdb4] sm:$0xf0] }
 0x4c9   :  { %7231 = vmatpush.bf16.msra.mxu3 %v11013_v45  ;;  %7248 = vmatpush.bf16.msrb.mxu0 %v9481_v46  ;;  %v10001_v46 = vor.u32 %v12001_v24, %v9998_v63  ;;  %v10505_v59 = vor.u32 %v12128_v35, %v10502_v43  ;;  %v12289_v63 = vld [vmem:[#allocation21 + $0xd3c] sm:$0xf]  ;;  %v9617_v35 = vor.u32 %v11905_v48, %v9614_v55  ;;  %v11020_v43 = vld [vmem:[#allocation21 + $0xc38] sm:$0xf]  ;;  %v10004_v55 = vld [vmem:[#allocation21 + $0x440] sm:$0xf] }
 0x4ca   :  { %7257 = vmatpush.bf16.msrb.mxu1 %v11017_v52  ;;  %v11404_v52 = vld [vmem:[#allocation21 + $0xf38] sm:$0xf]  ;;  %v10638_v48 = vld [vmem:[#allocation21 + $0x9b8] sm:$0xf0] }
 0x4cb   :  { %7223 = vmatmul.bf16.vlgmr.msra.gmra.mxu2 %v13191_v21  ;;  %v13241_v45 = vpop.f32.mrf.mxu0 }
 0x4cc   :  { %7267 = vmatpush.bf16.msrb.mxu2 %v10381_v28  ;;  %7249 = vmatmul.bf16.vlgmr.msrb.gmra.mxu0 %v13191_v21  ;;  %v6939_v28 = vadd.f32 %v13219_v12, %v4280_v17  ;;  %v11405_v12 = vor.u32 %v12369_v22, %v11404_v52  ;;  %v11278_v17 = vld [vmem:[#allocation21 + $0xeb8] sm:$0xf0] }
 0x4cd   :  { %7293 = vmatpush.bf16.msra.mxu0 %v10385_v60  ;;  %7232 = vmatpush.bf16.msra.mxu3 %v10885_v7  ;;  %v9870_v60 = vld [vmem:[#allocation21 + $0x3b8] sm:$0xf0]  ;;  %v11281_v34 = vor.u32 %v12321_v5, %v11278_v17  ;;  %v12209_v5 = vld [vmem:[#allocation21 + $0xab4] sm:$0xf0] }
 0x4ce   :  { %7258 = vmatpush.bf16.msrb.mxu1 %v10889_v42  ;;  %v6952_v7 = vadd.f32 %v13225_v1, %v6939_v28  ;;  %v7004_v42 = vadd.f32 %v7003_v36, %v6991_v51  ;;  %v9873_v62 = vor.u32 %v11969_v56, %v9870_v60  ;;  %v13249_v14 = vpop.f32.mrf.mxu2  ;;  %v11937_v1 = vld [vmem:[#allocation21 + $0x23c] sm:$0xf]  ;;  %v9613_v36 = vor.u32 %v11921_v15, %v9612_v53  ;;  %v10388_v56 = vld [vmem:[#allocation21 + $0x740] sm:$0xf] }
 0x4cf   :  { %v7005_v61 = vpop.f32.mrf.mxu1  ;;  %v9745_v31 = vor.u32 %v11937_v1, %v9742_v3  ;;  %v11873_v52 = vld [vmem:[#allocation21 + $0x3c] sm:$0xf]  ;;  %v12114_v60 = vld [vmem:[#allocation21 + $0x7bc] sm:$0xf0] }
 0x4d0   :  { %7268 = vmatpush.bf16.msrb.mxu2 %v10253_v49  ;;  %v6977_v49 = vpop.f32.mrf.mxu3  ;;  %v7767_v47 = vrot.slane %v6952_v7, 6  ;;  %v9486_v28 = vld [vmem:[#allocation21 + $0xb8] sm:$0xf0]  ;;  %v10764_v61 = vld [vmem:[#allocation21 + $0xa38] sm:$0xf] }
 0x4d1   :  { %7294 = vmatpush.bf16.msra.mxu0 %v10257_v37  ;;  %7233 = vmatpush.bf16.msra.mxu3 %v10757_v38  ;;  %v11409_v37 = vor.u32 %v12353_v0, %v11406_v2  ;;  %v6978_v13 = vadd.f32 %v6977_v49, %v6965_v9  ;;  %v7769_v38 = vrot.slane %v7004_v42, 2  ;;  %v12257_v51 = vld [vmem:[#allocation21 + $0xc3c] sm:$0xf]  ;;  %v11021_v0 = vor.u32 %v12273_v10, %v11020_v43  ;;  %v10892_v42 = vld [vmem:[#allocation21 + $0xb38] sm:$0xf] }
 0x4d2   :  { %7259 = vmatpush.bf16.msrb.mxu1 %v10761_v27  ;;  %v7791_v19 = vsel %vm1137_vm3, %v6926_v50, %v7767_v47  ;;  %v11022_v22 = vld [vmem:[#allocation21 + $0xcb8] sm:$0xf0]  ;;  %v9489_v2 = vor.u32 %v11873_v52, %v9486_v28  ;;  %v10389_v9 = vor.u32 %v12114_v60, %v10388_v56  ;;  %v12066_v50 = vld [vmem:[#allocation21 + $0x644] sm:$0xf]  ;;  %v10765_v53 = vor.u32 %v12209_v5, %v10764_v61  ;;  %v12145_v43 = vld [vmem:[#allocation21 + $0x8b4] sm:$0xf0] }
 0x4d3   :  { %v7768_v27 = vrot.slane %v6978_v13, 4  ;;  %v7044_v54 = vpop.f32.mrf.mxu0  ;;  %v11025_v7 = vor.u32 %v12257_v51, %v11022_v22  ;;  %v12193_v17 = vld [vmem:[#allocation21 + $0xa3c] sm:$0xf]  ;;  %v9876_v52 = vld [vmem:[#allocation21 + $0x340] sm:$0xf] }
 0x4d4   :  { %7269 = vmatpush.bf16.msrb.mxu2 %v10125_v29  ;;  %v9741_v29 = vor.u32 %v11953_v58, %v9740_v6  ;;  %v10894_v6 = vld [vmem:[#allocation21 + $0xbb8] sm:$0xf0]  ;;  %v10260_v58 = vld [vmem:[#allocation21 + $0x640] sm:$0xf]  ;;  %v11970_v56 = vld [vmem:[#allocation21 + $0x344] sm:$0xf] }
 0x4d5   :  { %7295 = vmatpush.bf16.msra.mxu0 %v10129_v8  ;;  %7234 = vmatpush.bf16.msra.mxu3 %v10629_v41  ;;  %v11148_v8 = vld [vmem:[#allocation21 + $0xd38] sm:$0xf]  ;;  %v7792_v33 = vsel %vm1143_vm6, %v7768_v27, %v7769_v38  ;;  %v11150_v41 = vld [vmem:[#allocation21 + $0xdb8] sm:$0xf0]  ;;  %v10261_v3 = vor.u32 %v12082_v57, %v10260_v58  ;;  %v10132_v27 = vld [vmem:[#allocation21 + $0x540] sm:$0xf] }
 0x4d6   :  { %7260 = vmatpush.bf16.msrb.mxu1 %v10633_v26  ;;  %v7793_v24 = vsel %vm1145_vm7, %v7791_v19, %v7792_v33  ;;  %v11149_v11 = vor.u32 %v12305_v16, %v11148_v8  ;;  %v11153_v44 = vor.u32 %v12289_v63, %v11150_v41  ;;  %v10766_v38 = vld [vmem:[#allocation21 + $0xab8] sm:$0xf0]  ;;  %v10636_v19 = vld [vmem:[#allocation21 + $0x938] sm:$0xf]  ;;  %v12002_v63 = vld [vmem:[#allocation21 + $0x444] sm:$0xf] }
 0x4d7   :  { %7823 = vst [vmem:[#allocation24] sm:$0xff] %v7793_v24  ;;  %v10769_v15 = vor.u32 %v12193_v17, %v10766_v38  ;;  %v12177_v33 = vld [vmem:[#allocation21 + $0x9b4] sm:$0xf0]  ;;  %v12018_v24 = vld [vmem:[#allocation21 + $0x4bc] sm:$0xf0] }
 0x4d8   :  { %7270 = vmatpush.bf16.msrb.mxu2 %v9997_v40  ;;  %v6979_v26 = vpop.f32.mrf.mxu3  ;;  %v11889_v40 = vld [vmem:[#allocation21 + $0xb4] sm:$0xf0]  ;;  %v10006_v41 = vld [vmem:[#allocation21 + $0x4c0] sm:$0xf0]  ;;  %v12129_v10 = vld [vmem:[#allocation21 + $0x83c] sm:$0xf] }
 0x4d9   :  { %7296 = vmatpush.bf16.msra.mxu0 %v10001_v46  ;;  %7235 = vmatpush.bf16.msra.mxu3 %v10501_v20  ;;  %v7018_v46 = vpop.f32.mrf.mxu2  ;;  %v9485_v20 = vor.u32 %v11889_v40, %v9484_v39  ;;  %v10637_v39 = vor.u32 %v12177_v33, %v10636_v19  ;;  %v10005_v40 = vor.u32 %v12018_v24, %v10004_v55  ;;  %v11986_v28 = vld [vmem:[#allocation21 + $0x3bc] sm:$0xf0]  ;;  %v9878_v60 = vld [vmem:[#allocation21 + $0x3c0] sm:$0xf0]  ;;  %v4286_v19 = vperm.slane %v13233_v23, 7 }
 0x4da   :  { %7261 = vmatpush.bf16.msrb.mxu1 %v10505_v59  ;;  %v12098_v59 = vld [vmem:[#allocation21 + $0x744] sm:$0xf]  ;;  %v10009_v46 = vor.u32 %v12002_v63, %v10006_v41  ;;  %v11412_v51 = vld [vmem:[#allocation21 + $0xf40] sm:$0xf] }
 0x4db   :  { %v13256_v25 = vpop.f32.mrf.mxu1  ;;  %v12370_v22 = vld [vmem:[#allocation21 + $0xfbc] sm:$0xf0]  ;;  %v11938_v57 = vld [vmem:[#allocation21 + $0x244] sm:$0xf] }
 0x4dc   :  { %7271 = vmatpush.bf16.msrb.mxu2 %v9869_v32  ;;  %7236 = vmatmul.bf16.vlgmr.msra.gmra.mxu3 %v13197_v18  ;;  %v10390_v32 = vld [vmem:[#allocation21 + $0x7c0] sm:$0xf0]  ;;  %v12338_v58 = vld [vmem:[#allocation21 + $0xebc] sm:$0xf0] }
 0x4dd   :  { %7280 = vmatpush.bf16.msrb.mxu3 %v11405_v12  ;;  %7297 = vmatpush.bf16.msra.mxu0 %v9873_v62  ;;  %v12241_v12 = vld [vmem:[#allocation21 + $0xbb4] sm:$0xf0]  ;;  %v12225_v62 = vld [vmem:[#allocation21 + $0xb3c] sm:$0xf]  ;;  %v10393_v49 = vor.u32 %v12098_v59, %v10390_v32  ;;  %v12354_v59 = vld [vmem:[#allocation21 + $0xf44] sm:$0xf] }
 0x4de   :  { %7306 = vmatpush.bf16.msra.mxu1 %v11409_v37  ;;  %v10262_v37 = vld [vmem:[#allocation21 + $0x6c0] sm:$0xf0]  ;;  %v10893_v13 = vor.u32 %v12241_v12, %v10892_v42  ;;  %v10897_v1 = vor.u32 %v12225_v62, %v10894_v6  ;;  %v9748_v12 = vld [vmem:[#allocation21 + $0x240] sm:$0xf] }
 0x4df   :  { %7262 = vmatmul.bf16.vlgmr.msrb.gmra.mxu1 %v13197_v18  ;;  %v10265_v47 = vor.u32 %v12066_v50, %v10262_v37  ;;  %v11414_v32 = vld [vmem:[#allocation21 + $0xfc0] sm:$0xf0]  ;;  %v11954_v62 = vld [vmem:[#allocation21 + $0x2bc] sm:$0xf0] }
 0x4e0   :  { %7272 = vmatpush.bf16.msrb.mxu2 %v9741_v29  ;;  %v13258_v4 = vpop.f32.mrf.mxu3  ;;  %v12050_v29 = vld [vmem:[#allocation21 + $0x5bc] sm:$0xf0]  ;;  %v11417_v6 = vor.u32 %v12354_v59, %v11414_v32  ;;  %v9750_v50 = vld [vmem:[#allocation21 + $0x2c0] sm:$0xf0] }
 0x4e1   :  { %7281 = vmatpush.bf16.msrb.mxu3 %v11277_v30  ;;  %7298 = vmatpush.bf16.msra.mxu0 %v9745_v31  ;;  %v12034_v30 = vld [vmem:[#allocation21 + $0x544] sm:$0xf]  ;;  %v10133_v8 = vor.u32 %v12050_v29, %v10132_v27  ;;  %v9753_v5 = vor.u32 %v11938_v57, %v9750_v50  ;;  %v9620_v17 = vld [vmem:[#allocation21 + $0x140] sm:$0xf]  ;;  %v10270_v57 = vld [vmem:[#allocation21 + $0x6c8] sm:$0xf0] }
 0x4e2   :  { %7307 = vmatpush.bf16.msra.mxu1 %v11281_v34  ;;  %v10134_v31 = vld [vmem:[#allocation21 + $0x5c0] sm:$0xf0]  ;;  %v12161_v34 = vld [vmem:[#allocation21 + $0x93c] sm:$0xf]  ;;  %v11156_v38 = vld [vmem:[#allocation21 + $0xd40] sm:$0xf] }
 0x4e3   :  { %v7057_v54 = vpop.f32.mrf.mxu1  ;;  %v10137_v16 = vor.u32 %v12034_v30, %v10134_v31  ;;  %v10641_v26 = vor.u32 %v12161_v34, %v10638_v48  ;;  %v12306_v29 = vld [vmem:[#allocation21 + $0xdbc] sm:$0xf0]  ;;  %v9622_v30 = vld [vmem:[#allocation21 + $0x1c0] sm:$0xf0]  ;;  %v4284_v31 = vperm.slane %v13233_v23, 5 }
 0x4e4   :  { %7273 = vmatpush.bf16.msrb.mxu2 %v9613_v36  ;;  %v11906_v54 = vld [vmem:[#allocation21 + $0x144] sm:$0xf]  ;;  %v9492_v34 = vld [vmem:[#allocation21 + $0x40] sm:$0xf] }
 0x4e5   :  { %7282 = vmatpush.bf16.msrb.mxu3 %v11149_v11  ;;  %7299 = vmatpush.bf16.msra.mxu0 %v9617_v35  ;;  %v10508_v35 = vld [vmem:[#allocation21 + $0x838] sm:$0xf]  ;;  %v9625_v48 = vor.u32 %v11906_v54, %v9622_v30  ;;  %v11890_v24 = vld [vmem:[#allocation21 + $0xbc] sm:$0xf0]  ;;  %v12035_v30 = vld [vmem:[#allocation21 + $0x54c] sm:$0xf] }
 0x4e6   :  { %7308 = vmatpush.bf16.msra.mxu1 %v11153_v44  ;;  %v10510_v44 = vld [vmem:[#allocation21 + $0x8b8] sm:$0xf0]  ;;  %v11028_v63 = vld [vmem:[#allocation21 + $0xc40] sm:$0xf] }
 0x4e7   :  { %v12274_v41 = vld [vmem:[#allocation21 + $0xcbc] sm:$0xf0] }
 0x4e8   :  { %7274 = vmatpush.bf16.msrb.mxu2 %v9485_v20  ;;  %v7031_v11 = vpop.f32.mrf.mxu3  ;;  %v10509_v20 = vor.u32 %v12145_v43, %v10508_v35  ;;  %v9494_v35 = vld [vmem:[#allocation21 + $0xc0] sm:$0xf0] }
 0x4e9   :  { %7283 = vmatpush.bf16.msrb.mxu3 %v11021_v0  ;;  %7300 = vmatpush.bf16.msra.mxu0 %v9489_v2  ;;  %v13262_v36 = vpop.f32.mrf.mxu0  ;;  %v10513_v0 = vor.u32 %v12129_v10, %v10510_v44  ;;  %v9877_v2 = vor.u32 %v11986_v28, %v9876_v52  ;;  %v11874_v11 = vld [vmem:[#allocation21 + $0x44] sm:$0xf]  ;;  %v10396_v10 = vld [vmem:[#allocation21 + $0x748] sm:$0xf]  ;;  %v9493_v28 = vor.u32 %v11890_v24, %v9492_v34  ;;  %v10644_v34 = vld [vmem:[#allocation21 + $0x940] sm:$0xf] }
 0x4ea   :  { %7309 = vmatpush.bf16.msra.mxu1 %v11025_v7  ;;  %v11413_v7 = vor.u32 %v12370_v22, %v11412_v51  ;;  %v11030_v43 = vld [vmem:[#allocation21 + $0xcc0] sm:$0xf0]  ;;  %v12115_v44 = vld [vmem:[#allocation21 + $0x7c4] sm:$0xf0]  ;;  %v12099_v51 = vld [vmem:[#allocation21 + $0x74c] sm:$0xf]  ;;  %v7095_v59 = vadd.f32 %v13262_v36, %v4286_v19 }
 0x4eb   :  { %7275 = vmatmul.bf16.vlgmr.msrb.gmra.mxu2 %v13191_v21  ;;  %v10398_v22 = vld [vmem:[#allocation21 + $0x7c8] sm:$0xf0]  ;;  %v10397_v32 = vor.u32 %v12115_v44, %v10396_v10  ;;  %v10516_v10 = vld [vmem:[#allocation21 + $0x840] sm:$0xf] }
 0x4ec   :  { %7319 = vmatpush.bf16.msra.mxu2 %v10389_v9  ;;  %7301 = vmatmul.bf16.vlgmr.msra.gmra.mxu0 %v13191_v21  ;;  %v9881_v9 = vor.u32 %v11970_v56, %v9878_v60  ;;  %v11029_v60 = vor.u32 %v12274_v41, %v11028_v63  ;;  %v10646_v63 = vld [vmem:[#allocation21 + $0x9c0] sm:$0xf0]  ;;  %v10012_v41 = vld [vmem:[#allocation21 + $0x448] sm:$0xf] }
 0x4ed   :  { %7345 = vmatpush.bf16.msrb.mxu0 %v10393_v49  ;;  %7284 = vmatpush.bf16.msrb.mxu3 %v10893_v13  ;;  %v11284_v49 = vld [vmem:[#allocation21 + $0xe40] sm:$0xf]  ;;  %v12322_v13 = vld [vmem:[#allocation21 + $0xe44] sm:$0xf] }
 0x4ee   :  { %7310 = vmatpush.bf16.msra.mxu1 %v10897_v1  ;;  %v13264_v42 = vpop.f32.mrf.mxu2  ;;  %v11286_v1 = vld [vmem:[#allocation21 + $0xec0] sm:$0xf0]  ;;  %v11285_v61 = vor.u32 %v12338_v58, %v11284_v49  ;;  %v12083_v49 = vld [vmem:[#allocation21 + $0x6c4] sm:$0xf0]  ;;  %v12067_v58 = vld [vmem:[#allocation21 + $0x64c] sm:$0xf] }
 0x4ef   :  { %v11289_v27 = vor.u32 %v12322_v13, %v11286_v1 }
 0x4f0   :  { %7320 = vmatpush.bf16.msra.mxu2 %v10261_v3  ;;  %v9749_v3 = vor.u32 %v11954_v62, %v9748_v12  ;;  %v10902_v12 = vld [vmem:[#allocation21 + $0xbc0] sm:$0xf0]  ;;  %v10268_v62 = vld [vmem:[#allocation21 + $0x648] sm:$0xf] }
 0x4f1   :  { %7346 = vmatpush.bf16.msrb.mxu0 %v10265_v47  ;;  %7285 = vmatpush.bf16.msrb.mxu3 %v10765_v53  ;;  %v7096_v37 = vpop.f32.mrf.mxu0  ;;  %v11922_v47 = vld [vmem:[#allocation21 + $0x1bc] sm:$0xf0]  ;;  %v12290_v53 = vld [vmem:[#allocation21 + $0xd44] sm:$0xf] }
 0x4f2   :  { %7311 = vmatpush.bf16.msra.mxu1 %v10769_v15  ;;  %v11158_v15 = vld [vmem:[#allocation21 + $0xdc0] sm:$0xf0]  ;;  %v9621_v33 = vor.u32 %v11922_v47, %v9620_v17 }
 0x4f3   :  { %v12194_v17 = vld [vmem:[#allocation21 + $0xa44] sm:$0xf] }
 0x4f4   :  { %7321 = vmatpush.bf16.msra.mxu2 %v10133_v8  ;;  %v4283_v8 = vperm.slane %v13233_v23, 4  ;;  %v10774_v47 = vld [vmem:[#allocation21 + $0xac0] sm:$0xf0] }
 0x4f5   :  { %7347 = vmatpush.bf16.msrb.mxu0 %v10137_v16  ;;  %7286 = vmatpush.bf16.msrb.mxu3 %v10637_v39  ;;  %v11157_v16 = vor.u32 %v12306_v29, %v11156_v38  ;;  %v11161_v39 = vor.u32 %v12290_v53, %v11158_v15  ;;  %v10140_v38 = vld [vmem:[#allocation21 + $0x548] sm:$0xf]  ;;  %v10777_v19 = vor.u32 %v12194_v17, %v10774_v47 }
 0x4f6   :  { %7312 = vmatpush.bf16.msra.mxu1 %v10641_v26  ;;  %v7070_v55 = vpop.f32.mrf.mxu2  ;;  %v12258_v26 = vld [vmem:[#allocation21 + $0xc44] sm:$0xf]  ;;  %v9628_v17 = vld [vmem:[#allocation21 + $0x148] sm:$0xf] }
 0x4f7   :  { %v11164_v47 = vld [vmem:[#allocation21 + $0xd48] sm:$0xf] }
 0x4f8   :  { %7322 = vmatpush.bf16.msra.mxu2 %v10005_v40  ;;  %v7043_v40 = vadd.f32 %v13241_v45, %v4284_v31  ;;  %v11033_v45 = vor.u32 %v12258_v26, %v11030_v43  ;;  %v10142_v31 = vld [vmem:[#allocation21 + $0x5c8] sm:$0xf0] }
 0x4f9   :  { %7348 = vmatpush.bf16.msrb.mxu0 %v10009_v46  ;;  %7287 = vmatpush.bf16.msrb.mxu3 %v10509_v20  ;;  %v4285_v46 = vperm.slane %v13233_v23, 6  ;;  %v9497_v20 = vor.u32 %v11874_v11, %v9494_v35  ;;  %v7017_v23 = vadd.f32 %v13249_v14, %v4283_v8  ;;  %v10145_v24 = vor.u32 %v12035_v30, %v10142_v31  ;;  %v12003_v11 = vld [vmem:[#allocation21 + $0x44c] sm:$0xf] }
 0x4fa   :  { %7313 = vmatpush.bf16.msra.mxu1 %v10513_v0  ;;  %v7056_v56 = vadd.f32 %v13256_v25, %v7043_v40  ;;  %v10900_v0 = vld [vmem:[#allocation21 + $0xb40] sm:$0xf]  ;;  %v10014_v35 = vld [vmem:[#allocation21 + $0x4c8] sm:$0xf0] }
 0x4fb   :  { %v7069_v25 = vadd.f32 %v13264_v42, %v4285_v46  ;;  %v7030_v36 = vadd.f32 %v13258_v4, %v7017_v23  ;;  %v10273_v42 = vor.u32 %v12067_v58, %v10270_v57  ;;  %v11292_v58 = vld [vmem:[#allocation21 + $0xe48] sm:$0xf]  ;;  %v11166_v30 = vld [vmem:[#allocation21 + $0xdc8] sm:$0xf0] }
 0x4fc   :  { %7323 = vmatpush.bf16.msra.mxu2 %v9877_v2  ;;  %7288 = vmatmul.bf16.vlgmr.msrb.gmra.mxu3 %v13197_v18  ;;  %v7107_v52 = vpop.f32.mrf.mxu1  ;;  %v12242_v2 = vld [vmem:[#allocation21 + $0xbbc] sm:$0xf0]  ;;  %v7770_v50 = vrot.slane %v7056_v56, 6  ;;  %v9884_v56 = vld [vmem:[#allocation21 + $0x348] sm:$0xf] }
 0x4fd   :  { %7332 = vmatpush.bf16.msra.mxu3 %v11413_v7  ;;  %7349 = vmatpush.bf16.msrb.mxu0 %v9881_v9  ;;  %v12226_v7 = vld [vmem:[#allocation21 + $0xb44] sm:$0xf]  ;;  %v10401_v9 = vor.u32 %v12099_v51, %v10398_v22  ;;  %v10901_v37 = vor.u32 %v12242_v2, %v10900_v0  ;;  %v10017_v22 = vor.u32 %v12003_v11, %v10014_v35  ;;  %v12355_v2 = vld [vmem:[#allocation21 + $0xf4c] sm:$0xf]  ;;  %v12116_v11 = vld [vmem:[#allocation21 + $0x7cc] sm:$0xf0] }
 0x4fe   :  { %7358 = vmatpush.bf16.msrb.mxu1 %v11417_v6  ;;  %v7108_v6 = vadd.f32 %v7107_v52, %v7095_v59  ;;  %v10905_v14 = vor.u32 %v12226_v7, %v10902_v12  ;;  %v7794_v53 = vsel %vm1137_vm3, %v7030_v36, %v7770_v50  ;;  %v12146_v52 = vld [vmem:[#allocation21 + $0x8bc] sm:$0xf0]  ;;  %v10518_v51 = vld [vmem:[#allocation21 + $0x8c0] sm:$0xf0]  ;;  %v12371_v59 = vld [vmem:[#allocation21 + $0xfc4] sm:$0xf0] }
 0x4ff   :  { %7314 = vmatmul.bf16.vlgmr.msra.gmra.mxu1 %v13197_v18  ;;  %v7081_v13 = vpop.f32.mrf.mxu3  ;;  %v10517_v0 = vor.u32 %v12146_v52, %v10516_v10  ;;  %v11422_v7 = vld [vmem:[#allocation21 + $0xfc8] sm:$0xf0]  ;;  %v12339_v50 = vld [vmem:[#allocation21 + $0xec4] sm:$0xf0]  ;;  %v10406_v10 = vld [vmem:[#allocation21 + $0x7d0] sm:$0xf0] }
 0x500   :  { %7324 = vmatpush.bf16.msra.mxu2 %v9749_v3  ;;  %v7082_v1 = vadd.f32 %v7081_v13, %v7069_v25  ;;  %v10269_v3 = vor.u32 %v12083_v49, %v10268_v62  ;;  %v7772_v4 = vrot.slane %v7108_v6, 2  ;;  %v9756_v25 = vld [vmem:[#allocation21 + $0x248] sm:$0xf]  ;;  %v11425_v57 = vor.u32 %v12355_v2, %v11422_v7  ;;  %v11939_v36 = vld [vmem:[#allocation21 + $0x24c] sm:$0xf] }
 0x501   :  { %7333 = vmatpush.bf16.msra.mxu3 %v11285_v61  ;;  %7350 = vmatpush.bf16.msrb.mxu0 %v9753_v5  ;;  %v10772_v61 = vld [vmem:[#allocation21 + $0xa40] sm:$0xf]  ;;  %v11955_v6 = vld [vmem:[#allocation21 + $0x2c4] sm:$0xf0] }
 0x502   :  { %7359 = vmatpush.bf16.msrb.mxu1 %v11289_v27  ;;  %v12210_v5 = vld [vmem:[#allocation21 + $0xabc] sm:$0xf0]  ;;  %v12051_v27 = vld [vmem:[#allocation21 + $0x5c4] sm:$0xf0]  ;;  %v7771_v29 = vrot.slane %v7082_v1, 4 }
 0x503   :  { %v10773_v15 = vor.u32 %v12210_v5, %v10772_v61  ;;  %v11294_v1 = vld [vmem:[#allocation21 + $0xec8] sm:$0xf0]  ;;  %v11293_v61 = vor.u32 %v12339_v50, %v11292_v58  ;;  %v12052_v50 = vld [vmem:[#allocation21 + $0x5cc] sm:$0xf0] }
 0x504   :  { %7325 = vmatpush.bf16.msra.mxu2 %v9621_v33  ;;  %v7109_v54 = vpop.f32.mrf.mxu1  ;;  %v7795_v8 = vsel %vm1143_vm6, %v7771_v29, %v7772_v4  ;;  %v10141_v33 = vor.u32 %v12051_v27, %v10140_v38  ;;  %v12307_v27 = vld [vmem:[#allocation21 + $0xdc4] sm:$0xf0]  ;;  %v11907_v4 = vld [vmem:[#allocation21 + $0x14c] sm:$0xf] }
 0x505   :  { %7334 = vmatpush.bf16.msra.mxu3 %v11157_v16  ;;  %7351 = vmatpush.bf16.msrb.mxu0 %v9625_v48  ;;  %v12178_v16 = vld [vmem:[#allocation21 + $0x9bc] sm:$0xf0]  ;;  %v12162_v48 = vld [vmem:[#allocation21 + $0x944] sm:$0xf]  ;;  %v7796_v55 = vsel %vm1145_vm7, %v7794_v53, %v7795_v8  ;;  %v9630_v29 = vld [vmem:[#allocation21 + $0x1c8] sm:$0xf0]  ;;  %v11165_v8 = vor.u32 %v12307_v27, %v11164_v47 }
 0x506   :  { %7360 = vmatpush.bf16.msrb.mxu1 %v11161_v39  ;;  %v12019_v39 = vld [vmem:[#allocation21 + $0x4c4] sm:$0xf0]  ;;  %7824 = vst [vmem:[#allocation24 + $0x8] sm:$0xff] %v7796_v55  ;;  %v10645_v40 = vor.u32 %v12178_v16, %v10644_v34  ;;  %v10649_v44 = vor.u32 %v12162_v48, %v10646_v63  ;;  %v12291_v54 = vld [vmem:[#allocation21 + $0xd4c] sm:$0xf] }
 0x507   :  { %v7083_v43 = vpop.f32.mrf.mxu3  ;;  %v10013_v46 = vor.u32 %v12019_v39, %v10012_v41  ;;  %v11036_v34 = vld [vmem:[#allocation21 + $0xc48] sm:$0xf]  ;;  %v11169_v48 = vor.u32 %v12291_v54, %v11166_v30  ;;  %v11875_v55 = vld [vmem:[#allocation21 + $0x4c] sm:$0xf]  ;;  %v10404_v39 = vld [vmem:[#allocation21 + $0x750] sm:$0xf] }
 0x508   :  { %7326 = vmatpush.bf16.msra.mxu2 %v9493_v28  ;;  %v12130_v28 = vld [vmem:[#allocation21 + $0x844] sm:$0xf]  ;;  %v12275_v16 = vld [vmem:[#allocation21 + $0xcc4] sm:$0xf0]  ;;  %v12259_v63 = vld [vmem:[#allocation21 + $0xc4c] sm:$0xf] }
 0x509   :  { %7335 = vmatpush.bf16.msra.mxu3 %v11029_v60  ;;  %7352 = vmatpush.bf16.msrb.mxu0 %v9497_v20  ;;  %v13283_v26 = vpop.f32.mrf.mxu0  ;;  %v11987_v60 = vld [vmem:[#allocation21 + $0x3c4] sm:$0xf0]  ;;  %v10521_v23 = vor.u32 %v12130_v28, %v10518_v51  ;;  %v11038_v41 = vld [vmem:[#allocation21 + $0xcc8] sm:$0xf0]  ;;  %v12100_v43 = vld [vmem:[#allocation21 + $0x754] sm:$0xf]  ;;  %v10405_v28 = vor.u32 %v12116_v11, %v10404_v39 }
 0x50a   :  { %7361 = vmatpush.bf16.msrb.mxu1 %v11033_v45  ;;  %v11420_v20 = vld [vmem:[#allocation21 + $0xf48] sm:$0xf]  ;;  %v11971_v45 = vld [vmem:[#allocation21 + $0x34c] sm:$0xf]  ;;  %v11041_v52 = vor.u32 %v12259_v63, %v11038_v41  ;;  %v12020_v27 = vld [vmem:[#allocation21 + $0x4cc] sm:$0xf0] }
 0x50b   :  { %7327 = vmatmul.bf16.vlgmr.msra.gmra.mxu2 %v13191_v21  ;;  %v11421_v62 = vor.u32 %v12371_v59, %v11420_v20  ;;  %v10908_v51 = vld [vmem:[#allocation21 + $0xb48] sm:$0xf]  ;;  %v10910_v20 = vld [vmem:[#allocation21 + $0xbc8] sm:$0xf0]  ;;  %v10276_v59 = vld [vmem:[#allocation21 + $0x650] sm:$0xf] }
 0x50c   :  { %7371 = vmatpush.bf16.msrb.mxu2 %v10397_v32  ;;  %7353 = vmatmul.bf16.vlgmr.msrb.gmra.mxu0 %v13191_v21  ;;  %v9886_v32 = vld [vmem:[#allocation21 + $0x3c8] sm:$0xf0]  ;;  %v12372_v63 = vld [vmem:[#allocation21 + $0xfcc] sm:$0xf0]  ;;  %v11972_v41 = vld [vmem:[#allocation21 + $0x354] sm:$0xf] }
 0x50d   :  { %7397 = vmatpush.bf16.msra.mxu0 %v10401_v9  ;;  %7336 = vmatpush.bf16.msra.mxu3 %v10901_v37  ;;  %v9885_v9 = vor.u32 %v11987_v60, %v9884_v56  ;;  %v9889_v49 = vor.u32 %v11971_v45, %v9886_v32  ;;  %v9758_v37 = vld [vmem:[#allocation21 + $0x2c8] sm:$0xf0]  ;;  %v10409_v60 = vor.u32 %v12100_v43, %v10406_v10  ;;  %v12084_v45 = vld [vmem:[#allocation21 + $0x6cc] sm:$0xf0]  ;;  %v12068_v32 = vld [vmem:[#allocation21 + $0x654] sm:$0xf] }
 0x50e   :  { %7362 = vmatpush.bf16.msrb.mxu1 %v10905_v14  ;;  %v13285_v12 = vpop.f32.mrf.mxu2  ;;  %v12323_v14 = vld [vmem:[#allocation21 + $0xe4c] sm:$0xf]  ;;  %v9761_v5 = vor.u32 %v11939_v36, %v9758_v37  ;;  %v12036_v37 = vld [vmem:[#allocation21 + $0x554] sm:$0xf] }
 0x50f   :  { %v11297_v38 = vor.u32 %v12323_v14, %v11294_v1  ;;  %v12227_v56 = vld [vmem:[#allocation21 + $0xb4c] sm:$0xf]  ;;  %v9894_v39 = vld [vmem:[#allocation21 + $0x3d0] sm:$0xf0] }
 0x510   :  { %7372 = vmatpush.bf16.msrb.mxu2 %v10269_v3  ;;  %v9757_v3 = vor.u32 %v11955_v6, %v9756_v25  ;;  %v12195_v25 = vld [vmem:[#allocation21 + $0xa4c] sm:$0xf]  ;;  %v11430_v43 = vld [vmem:[#allocation21 + $0xfd0] sm:$0xf0] }
 0x511   :  { %7398 = vmatpush.bf16.msra.mxu0 %v10273_v42  ;;  %7337 = vmatpush.bf16.msra.mxu3 %v10773_v15  ;;  %v7148_v13 = vpop.f32.mrf.mxu0  ;;  %v11923_v42 = vld [vmem:[#allocation21 + $0x1c4] sm:$0xf0]  ;;  %v10782_v58 = vld [vmem:[#allocation21 + $0xac8] sm:$0xf0] }
 0x512   :  { %7363 = vmatpush.bf16.msrb.mxu1 %v10777_v19  ;;  %v9629_v31 = vor.u32 %v11923_v42, %v9628_v17  ;;  %v9500_v15 = vld [vmem:[#allocation21 + $0x48] sm:$0xf]  ;;  %v9633_v19 = vor.u32 %v11907_v4, %v9630_v29  ;;  %v10150_v13 = vld [vmem:[#allocation21 + $0x5d0] sm:$0xf0]  ;;  %v10785_v1 = vor.u32 %v12195_v25, %v10782_v58  ;;  %v12163_v17 = vld [vmem:[#allocation21 + $0x94c] sm:$0xf] }
 0x513   :  { %v10153_v42 = vor.u32 %v12036_v37, %v10150_v13  ;;  %v10654_v47 = vld [vmem:[#allocation21 + $0x9c8] sm:$0xf0]  ;;  %v12004_v4 = vld [vmem:[#allocation21 + $0x454] sm:$0xf]  ;;  %v9636_v25 = vld [vmem:[#allocation21 + $0x150] sm:$0xf] }
 0x514   :  { %7373 = vmatpush.bf16.msrb.mxu2 %v10141_v33  ;;  %v11891_v33 = vld [vmem:[#allocation21 + $0xc4] sm:$0xf0]  ;;  %v10022_v29 = vld [vmem:[#allocation21 + $0x4d0] sm:$0xf0]  ;;  %v11172_v58 = vld [vmem:[#allocation21 + $0xd50] sm:$0xf] }
 0x515   :  { %7399 = vmatpush.bf16.msra.mxu0 %v10145_v24  ;;  %7338 = vmatpush.bf16.msra.mxu3 %v10645_v40  ;;  %v9502_v24 = vld [vmem:[#allocation21 + $0xc8] sm:$0xf0]  ;;  %v9501_v40 = vor.u32 %v11891_v33, %v9500_v15  ;;  %v10657_v15 = vor.u32 %v12163_v17, %v10654_v47  ;;  %v9638_v37 = vld [vmem:[#allocation21 + $0x1d0] sm:$0xf0] }
 0x516   :  { %7364 = vmatpush.bf16.msrb.mxu1 %v10649_v44  ;;  %v7122_v53 = vpop.f32.mrf.mxu2  ;;  %v11037_v44 = vor.u32 %v12275_v16, %v11036_v34  ;;  %v12131_v33 = vld [vmem:[#allocation21 + $0x84c] sm:$0xf]  ;;  %v10025_v16 = vor.u32 %v12004_v4, %v10022_v29  ;;  %v11044_v4 = vld [vmem:[#allocation21 + $0xc50] sm:$0xf] }
 0x517   :  { %v10524_v53 = vld [vmem:[#allocation21 + $0x848] sm:$0xf]  ;;  %v10526_v34 = vld [vmem:[#allocation21 + $0x8c8] sm:$0xf0]  ;;  %v12276_v29 = vld [vmem:[#allocation21 + $0xccc] sm:$0xf0] }
 0x518   :  { %7374 = vmatpush.bf16.msrb.mxu2 %v10013_v46  ;;  %v9505_v46 = vor.u32 %v11875_v55, %v9502_v24  ;;  %v11988_v55 = vld [vmem:[#allocation21 + $0x3cc] sm:$0xf0]  ;;  %v10529_v10 = vor.u32 %v12131_v33, %v10526_v34  ;;  %v10412_v33 = vld [vmem:[#allocation21 + $0x758] sm:$0xf] }
 0x519   :  { %7400 = vmatpush.bf16.msra.mxu0 %v10017_v22  ;;  %7339 = vmatpush.bf16.msra.mxu3 %v10517_v0  ;;  %v12243_v22 = vld [vmem:[#allocation21 + $0xbc4] sm:$0xf0]  ;;  %v10278_v0 = vld [vmem:[#allocation21 + $0x6d0] sm:$0xf0]  ;;  %v11428_v24 = vld [vmem:[#allocation21 + $0xf50] sm:$0xf] }
 0x51a   :  { %7365 = vmatpush.bf16.msrb.mxu1 %v10521_v23  ;;  %v10909_v2 = vor.u32 %v12243_v22, %v10908_v51  ;;  %v10913_v23 = vor.u32 %v12227_v56, %v10910_v20  ;;  %v10281_v6 = vor.u32 %v12068_v32, %v10278_v0  ;;  %v9764_v51 = vld [vmem:[#allocation21 + $0x250] sm:$0xf]  ;;  %v12324_v0 = vld [vmem:[#allocation21 + $0xe54] sm:$0xf]  ;;  %v12117_v34 = vld [vmem:[#allocation21 + $0x7d4] sm:$0xf0] }
 0x51b   :  { %v11956_v22 = vld [vmem:[#allocation21 + $0x2cc] sm:$0xf0] }
 0x51c   :  { %7375 = vmatpush.bf16.msrb.mxu2 %v9885_v9  ;;  %7340 = vmatmul.bf16.vlgmr.msra.gmra.mxu3 %v13197_v18  ;;  %v13289_v35 = vpop.f32.mrf.mxu1  ;;  %v10277_v9 = vor.u32 %v12084_v45, %v10276_v59  ;;  %v11300_v56 = vld [vmem:[#allocation21 + $0xe50] sm:$0xf]  ;;  %v11940_v59 = vld [vmem:[#allocation21 + $0x254] sm:$0xf] }
 0x51d   :  { %7384 = vmatpush.bf16.msrb.mxu3 %v11421_v62  ;;  %7401 = vmatpush.bf16.msra.mxu0 %v9889_v49  ;;  %v10780_v62 = vld [vmem:[#allocation21 + $0xa48] sm:$0xf]  ;;  %v12340_v20 = vld [vmem:[#allocation21 + $0xecc] sm:$0xf0]  ;;  %v9766_v45 = vld [vmem:[#allocation21 + $0x2d0] sm:$0xf0] }
 0x51e   :  { %7410 = vmatpush.bf16.msra.mxu1 %v11425_v57  ;;  %v12211_v49 = vld [vmem:[#allocation21 + $0xac4] sm:$0xf0]  ;;  %v10148_v57 = vld [vmem:[#allocation21 + $0x550] sm:$0xf] }
 0x51f   :  { %7366 = vmatmul.bf16.vlgmr.msrb.gmra.mxu1 %v13197_v18  ;;  %v13291_v7 = vpop.f32.mrf.mxu3  ;;  %v10781_v14 = vor.u32 %v12211_v49, %v10780_v62  ;;  %v11301_v62 = vor.u32 %v12340_v20, %v11300_v56  ;;  %v9769_v49 = vor.u32 %v11940_v59, %v9766_v45  ;;  %v10284_v56 = vld [vmem:[#allocation21 + $0x658] sm:$0xf]  ;;  %v12069_v59 = vld [vmem:[#allocation21 + $0x65c] sm:$0xf] }
 0x520   :  { %7376 = vmatpush.bf16.msrb.mxu2 %v9757_v3  ;;  %v10149_v3 = vor.u32 %v12052_v50, %v10148_v57  ;;  %v12308_v50 = vld [vmem:[#allocation21 + $0xdcc] sm:$0xf0]  ;;  %v10286_v45 = vld [vmem:[#allocation21 + $0x6d8] sm:$0xf0] }
 0x521   :  { %7385 = vmatpush.bf16.msrb.mxu3 %v11293_v61  ;;  %7402 = vmatpush.bf16.msra.mxu0 %v9761_v5  ;;  %v10652_v61 = vld [vmem:[#allocation21 + $0x948] sm:$0xf]  ;;  %v11173_v47 = vor.u32 %v12308_v50, %v11172_v58  ;;  %v10790_v58 = vld [vmem:[#allocation21 + $0xad0] sm:$0xf0]  ;;  %v12053_v50 = vld [vmem:[#allocation21 + $0x5d4] sm:$0xf0] }
 0x522   :  { %7411 = vmatpush.bf16.msra.mxu1 %v11297_v38  ;;  %v12179_v5 = vld [vmem:[#allocation21 + $0x9c4] sm:$0xf0]  ;;  %v10020_v38 = vld [vmem:[#allocation21 + $0x450] sm:$0xf] }
 0x523   :  { %v10653_v30 = vor.u32 %v12179_v5, %v10652_v61 }
 0x524   :  { %7377 = vmatpush.bf16.msrb.mxu2 %v9629_v31  ;;  %v7161_v36 = vpop.f32.mrf.mxu1 }
 0x525   :  { %7386 = vmatpush.bf16.msrb.mxu3 %v11165_v8  ;;  %7403 = vmatpush.bf16.msra.mxu0 %v9633_v19  ;;  %v10021_v8 = vor.u32 %v12020_v27, %v10020_v38  ;;  %v12147_v19 = vld [vmem:[#allocation21 + $0x8c4] sm:$0xf0]  ;;  %v11908_v36 = vld [vmem:[#allocation21 + $0x154] sm:$0xf]  ;;  %v11892_v27 = vld [vmem:[#allocation21 + $0xcc] sm:$0xf0] }
 0x526   :  { %7412 = vmatpush.bf16.msra.mxu1 %v11169_v48  ;;  %v9892_v48 = vld [vmem:[#allocation21 + $0x350] sm:$0xf]  ;;  %v10525_v11 = vor.u32 %v12147_v19, %v10524_v53  ;;  %v9641_v38 = vor.u32 %v11908_v36, %v9638_v37  ;;  %v9510_v53 = vld [vmem:[#allocation21 + $0xd0] sm:$0xf0] }
 0x527   :  { %v7135_v31 = vpop.f32.mrf.mxu3  ;;  %v11046_v19 = vld [vmem:[#allocation21 + $0xcd0] sm:$0xf0] }
 0x528   :  { %7378 = vmatpush.bf16.msrb.mxu2 %v9501_v40  ;;  %v12356_v40 = vld [vmem:[#allocation21 + $0xf54] sm:$0xf] }
 0x529   :  { %7387 = vmatpush.bf16.msrb.mxu3 %v11037_v44  ;;  %7404 = vmatpush.bf16.msra.mxu0 %v9505_v46  ;;  %v13295_v54 = vpop.f32.mrf.mxu0  ;;  %v9893_v44 = vor.u32 %v11988_v55, %v9892_v48  ;;  %v11876_v31 = vld [vmem:[#allocation21 + $0x54] sm:$0xf] }
 0x52a   :  { %7413 = vmatpush.bf16.msra.mxu1 %v11041_v52  ;;  %v11429_v52 = vor.u32 %v12372_v63, %v11428_v24  ;;  %v12101_v24 = vld [vmem:[#allocation21 + $0x75c] sm:$0xf] }
 0x52b   :  { %7379 = vmatmul.bf16.vlgmr.msrb.gmra.mxu2 %v13191_v21  ;;  %v10414_v63 = vld [vmem:[#allocation21 + $0x7d8] sm:$0xf0] }
 0x52c   :  { %7423 = vmatpush.bf16.msra.mxu2 %v10405_v28  ;;  %7405 = vmatmul.bf16.vlgmr.msra.gmra.mxu0 %v13191_v21  ;;  %v9897_v28 = vor.u32 %v11972_v41, %v9894_v39  ;;  %v11045_v39 = vor.u32 %v12276_v29, %v11044_v4  ;;  %v10662_v29 = vld [vmem:[#allocation21 + $0x9d0] sm:$0xf0] }
 0x52d   :  { %7449 = vmatpush.bf16.msrb.mxu0 %v10409_v60  ;;  %7388 = vmatpush.bf16.msrb.mxu3 %v10909_v2  ;;  %v11433_v60 = vor.u32 %v12356_v40, %v11430_v43  ;;  %v11302_v2 = vld [vmem:[#allocation21 + $0xed0] sm:$0xf0]  ;;  %v10413_v43 = vor.u32 %v12117_v34, %v10412_v33  ;;  %v10532_v34 = vld [vmem:[#allocation21 + $0x850] sm:$0xf] }
 0x52e   :  { %7414 = vmatpush.bf16.msra.mxu1 %v10913_v23  ;;  %v13297_v46 = vpop.f32.mrf.mxu2  ;;  %v13299_v23 = vld [vmem:[#allocation23 + $0x8] sm:$0xff]  ;;  %v11305_v57 = vor.u32 %v12324_v0, %v11302_v2 }
 0x52f   :  { %v4288_v13 = vperm.slane %v13299_v23, 1  ;;  %v4290_v61 = vperm.slane %v13299_v23, 3 }
 0x530   :  { %7424 = vmatpush.bf16.msra.mxu2 %v10277_v9  ;;  %v9765_v9 = vor.u32 %v11956_v22, %v9764_v51  ;;  %v10417_v51 = vor.u32 %v12101_v24, %v10414_v63  ;;  %v10918_v22 = vld [vmem:[#allocation21 + $0xbd0] sm:$0xf0] }
 0x531   :  { %7450 = vmatpush.bf16.msrb.mxu0 %v10281_v6  ;;  %7389 = vmatpush.bf16.msrb.mxu3 %v10781_v14  ;;  %v7200_v32 = vpop.f32.mrf.mxu0  ;;  %v11924_v6 = vld [vmem:[#allocation21 + $0x1cc] sm:$0xf0]  ;;  %v12292_v14 = vld [vmem:[#allocation21 + $0xd54] sm:$0xf]  ;;  %v7199_v40 = vadd.f32 %v13295_v54, %v4290_v61 }
 0x532   :  { %7415 = vmatpush.bf16.msra.mxu1 %v10785_v1  ;;  %v11174_v1 = vld [vmem:[#allocation21 + $0xdd0] sm:$0xf0]  ;;  %v9637_v5 = vor.u32 %v11924_v6, %v9636_v25  ;;  %v12212_v25 = vld [vmem:[#allocation21 + $0xacc] sm:$0xf0] }
 0x533   :  { %v12196_v6 = vld [vmem:[#allocation21 + $0xa54] sm:$0xf] }
 0x534   :  { %7425 = vmatpush.bf16.msra.mxu2 %v10149_v3  ;;  %v4287_v3 = vperm.slane %v13299_v23, 0  ;;  %v12132_v24 = vld [vmem:[#allocation21 + $0x854] sm:$0xf] }
 0x535   :  { %7451 = vmatpush.bf16.msrb.mxu0 %v10153_v42  ;;  %7390 = vmatpush.bf16.msrb.mxu3 %v10653_v30  ;;  %v9508_v42 = vld [vmem:[#allocation21 + $0x50] sm:$0xf]  ;;  %v11177_v30 = vor.u32 %v12292_v14, %v11174_v1  ;;  %v10158_v14 = vld [vmem:[#allocation21 + $0x5d8] sm:$0xf0]  ;;  %v10534_v63 = vld [vmem:[#allocation21 + $0x8d0] sm:$0xf0] }
 0x536   :  { %7416 = vmatpush.bf16.msra.mxu1 %v10657_v15  ;;  %v7174_v17 = vpop.f32.mrf.mxu2  ;;  %v12260_v15 = vld [vmem:[#allocation21 + $0xc54] sm:$0xf]  ;;  %v9509_v55 = vor.u32 %v11892_v27, %v9508_v42  ;;  %v10660_v42 = vld [vmem:[#allocation21 + $0x950] sm:$0xf] }
 0x538   :  { %7426 = vmatpush.bf16.msra.mxu2 %v10021_v8  ;;  %v7147_v8 = vadd.f32 %v13283_v26, %v4288_v13  ;;  %v11049_v26 = vor.u32 %v12260_v15, %v11046_v19  ;;  %v12037_v13 = vld [vmem:[#allocation21 + $0x55c] sm:$0xf] }
 0x539   :  { %7452 = vmatpush.bf16.msrb.mxu0 %v10025_v16  ;;  %7391 = vmatpush.bf16.msrb.mxu3 %v10525_v11  ;;  %v4289_v16 = vperm.slane %v13299_v23, 2  ;;  %v9513_v11 = vor.u32 %v11876_v31, %v9510_v53  ;;  %v10161_v4 = vor.u32 %v12037_v13, %v10158_v14  ;;  %v12021_v31 = vld [vmem:[#allocation21 + $0x4d4] sm:$0xf0]  ;;  %v12005_v53 = vld [vmem:[#allocation21 + $0x45c] sm:$0xf] }
 0x53a   :  { %7417 = vmatpush.bf16.msra.mxu1 %v10529_v10  ;;  %v7160_v41 = vadd.f32 %v13289_v35, %v7147_v8  ;;  %v10916_v10 = vld [vmem:[#allocation21 + $0xb50] sm:$0xf]  ;;  %v10030_v15 = vld [vmem:[#allocation21 + $0x4d8] sm:$0xf0] }
 0x53b   :  { %v7173_v35 = vadd.f32 %v13297_v46, %v4289_v16  ;;  %v10289_v46 = vor.u32 %v12069_v59, %v10286_v45  ;;  %v11957_v59 = vld [vmem:[#allocation21 + $0x2d4] sm:$0xf0]  ;;  %v12293_v13 = vld [vmem:[#allocation21 + $0xd5c] sm:$0xf] }
 0x53c   :  { %7427 = vmatpush.bf16.msra.mxu2 %v9893_v44  ;;  %7392 = vmatmul.bf16.vlgmr.msrb.gmra.mxu3 %v13197_v18  ;;  %v7211_v48 = vpop.f32.mrf.mxu1  ;;  %v12244_v44 = vld [vmem:[#allocation21 + $0xbcc] sm:$0xf0]  ;;  %v7773_v32 = vrot.slane %v7160_v41, 6  ;;  %v10033_v41 = vor.u32 %v12005_v53, %v10030_v15  ;;  %v11308_v45 = vld [vmem:[#allocation21 + $0xe58] sm:$0xf] }
 0x53d   :  { %7436 = vmatpush.bf16.msra.mxu3 %v11429_v52  ;;  %7453 = vmatpush.bf16.msrb.mxu0 %v9897_v28  ;;  %v12228_v52 = vld [vmem:[#allocation21 + $0xb54] sm:$0xf]  ;;  %v7121_v28 = vadd.f32 %v13285_v12, %v4287_v3  ;;  %v7212_v20 = vadd.f32 %v7211_v48, %v7199_v40  ;;  %v10917_v0 = vor.u32 %v12244_v44, %v10916_v10  ;;  %v11436_v40 = vld [vmem:[#allocation21 + $0xf58] sm:$0xf]  ;;  %v9902_v10 = vld [vmem:[#allocation21 + $0x3d8] sm:$0xf0] }
 0x53e   :  { %7462 = vmatpush.bf16.msrb.mxu1 %v11433_v60  ;;  %v12085_v60 = vld [vmem:[#allocation21 + $0x6d4] sm:$0xf0]  ;;  %v10921_v12 = vor.u32 %v12228_v52, %v10918_v22  ;;  %v12357_v52 = vld [vmem:[#allocation21 + $0xf5c] sm:$0xf]  ;;  %v10420_v53 = vld [vmem:[#allocation21 + $0x760] sm:$0xf] }
 0x53f   :  { %7418 = vmatmul.bf16.vlgmr.msra.gmra.mxu1 %v13197_v18  ;;  %v7134_v54 = vadd.f32 %v13291_v7, %v7121_v28  ;;  %v7185_v2 = vpop.f32.mrf.mxu3  ;;  %v7775_v7 = vrot.slane %v7212_v20, 2  ;;  %v11438_v28 = vld [vmem:[#allocation21 + $0xfd8] sm:$0xf0]  ;;  %v9772_v20 = vld [vmem:[#allocation21 + $0x258] sm:$0xf] }
 0x540   :  { %7428 = vmatpush.bf16.msra.mxu2 %v9765_v9  ;;  %v7186_v9 = vadd.f32 %v7185_v2, %v7173_v35  ;;  %v9774_v2 = vld [vmem:[#allocation21 + $0x2d8] sm:$0xf0]  ;;  %v12118_v15 = vld [vmem:[#allocation21 + $0x7dc] sm:$0xf0] }
 0x541   :  { %7437 = vmatpush.bf16.msra.mxu3 %v11301_v62  ;;  %7454 = vmatpush.bf16.msrb.mxu0 %v9769_v49  ;;  %v10285_v62 = vor.u32 %v12085_v60, %v10284_v56  ;;  %v10788_v49 = vld [vmem:[#allocation21 + $0xa50] sm:$0xf]  ;;  %v7797_v1 = vsel %vm1137_vm3, %v7134_v54, %v7773_v32  ;;  %v11441_v32 = vor.u32 %v12357_v52, %v11438_v28  ;;  %v12341_v54 = vld [vmem:[#allocation21 + $0xed4] sm:$0xf0]  ;;  %v11182_v14 = vld [vmem:[#allocation21 + $0xdd8] sm:$0xf0] }
 0x542   :  { %7463 = vmatpush.bf16.msrb.mxu1 %v11305_v57  ;;  %v10156_v57 = vld [vmem:[#allocation21 + $0x558] sm:$0xf]  ;;  %v7774_v36 = vrot.slane %v7186_v9, 4  ;;  %v10789_v3 = vor.u32 %v12212_v25, %v10788_v49  ;;  %v12325_v9 = vld [vmem:[#allocation21 + $0xe5c] sm:$0xf]  ;;  %v9773_v49 = vor.u32 %v11957_v59, %v9772_v20  ;;  %v11309_v25 = vor.u32 %v12341_v54, %v11308_v45 }
 0x543   :  { %v10157_v17 = vor.u32 %v12053_v50, %v10156_v57  ;;  %v11180_v57 = vld [vmem:[#allocation21 + $0xd58] sm:$0xf]  ;;  %v10294_v52 = vld [vmem:[#allocation21 + $0x6e0] sm:$0xf0]  ;;  %v12197_v59 = vld [vmem:[#allocation21 + $0xa5c] sm:$0xf] }
 0x544   :  { %7429 = vmatpush.bf16.msra.mxu2 %v9637_v5  ;;  %v7213_v37 = vpop.f32.mrf.mxu1  ;;  %v7798_v61 = vsel %vm1143_vm6, %v7774_v36, %v7775_v7  ;;  %v10793_v5 = vor.u32 %v12196_v6, %v10790_v58  ;;  %v11925_v58 = vld [vmem:[#allocation21 + $0x1d4] sm:$0xf0]  ;;  %v11909_v36 = vld [vmem:[#allocation21 + $0x15c] sm:$0xf]  ;;  %v10164_v54 = vld [vmem:[#allocation21 + $0x560] sm:$0xf] }
 0x545   :  { %7438 = vmatpush.bf16.msra.mxu3 %v11173_v47  ;;  %7455 = vmatpush.bf16.msrb.mxu0 %v9641_v38  ;;  %v12180_v47 = vld [vmem:[#allocation21 + $0x9cc] sm:$0xf0]  ;;  %v12164_v38 = vld [vmem:[#allocation21 + $0x954] sm:$0xf]  ;;  %v7799_v27 = vsel %vm1145_vm7, %v7797_v1, %v7798_v61  ;;  %v12309_v7 = vld [vmem:[#allocation21 + $0xdd4] sm:$0xf0] }
 0x546   :  { %7464 = vmatpush.bf16.msrb.mxu1 %v11177_v30  ;;  %v10028_v30 = vld [vmem:[#allocation21 + $0x458] sm:$0xf]  ;;  %7825 = vst [vmem:[#allocation24 + $0x10] sm:$0xff] %v7799_v27  ;;  %v10661_v19 = vor.u32 %v12180_v47, %v10660_v42  ;;  %v10665_v16 = vor.u32 %v12164_v38, %v10662_v29  ;;  %v9646_v37 = vld [vmem:[#allocation21 + $0x1d8] sm:$0xf0]  ;;  %v11185_v27 = vor.u32 %v12293_v13, %v11182_v14 }
 0x547   :  { %v7187_v33 = vpop.f32.mrf.mxu3  ;;  %v10029_v48 = vor.u32 %v12021_v31, %v10028_v30  ;;  %v9516_v61 = vld [vmem:[#allocation21 + $0x58] sm:$0xf]  ;;  %v9518_v29 = vld [vmem:[#allocation21 + $0xd8] sm:$0xf0]  ;;  %v10038_v13 = vld [vmem:[#allocation21 + $0x4e0] sm:$0xf0] }
 0x548   :  { %7430 = vmatpush.bf16.msra.mxu2 %v9509_v55  ;;  %v12148_v55 = vld [vmem:[#allocation21 + $0x8cc] sm:$0xf0]  ;;  %v11893_v42 = vld [vmem:[#allocation21 + $0xd4] sm:$0xf0]  ;;  %v12261_v30 = vld [vmem:[#allocation21 + $0xc5c] sm:$0xf] }
 0x549   :  { %7439 = vmatpush.bf16.msra.mxu3 %v11045_v39  ;;  %7456 = vmatpush.bf16.msrb.mxu0 %v9513_v11  ;;  %v13318_v8 = vpop.f32.mrf.mxu0  ;;  %v9900_v39 = vld [vmem:[#allocation21 + $0x358] sm:$0xf]  ;;  %v10533_v44 = vor.u32 %v12148_v55, %v10532_v34  ;;  %v11054_v31 = vld [vmem:[#allocation21 + $0xcd8] sm:$0xf0]  ;;  %v9517_v33 = vor.u32 %v11893_v42, %v9516_v61  ;;  %v12102_v34 = vld [vmem:[#allocation21 + $0x764] sm:$0xf] }
 0x54a   :  { %7465 = vmatpush.bf16.msrb.mxu1 %v11049_v26  ;;  %v11989_v11 = vld [vmem:[#allocation21 + $0x3d4] sm:$0xf0] }
 0x54b   :  { %7431 = vmatmul.bf16.vlgmr.msra.gmra.mxu2 %v13191_v21  ;;  %v12373_v26 = vld [vmem:[#allocation21 + $0xfd4] sm:$0xf0]  ;;  %v9901_v22 = vor.u32 %v11989_v11, %v9900_v39  ;;  %v12229_v11 = vld [vmem:[#allocation21 + $0xb5c] sm:$0xf] }
 0x54c   :  { %7475 = vmatpush.bf16.msrb.mxu2 %v10413_v43  ;;  %7457 = vmatmul.bf16.vlgmr.msrb.gmra.mxu0 %v13191_v21  ;;  %v11973_v43 = vld [vmem:[#allocation21 + $0x35c] sm:$0xf]  ;;  %v11437_v60 = vor.u32 %v12373_v26, %v11436_v40  ;;  %v11052_v47 = vld [vmem:[#allocation21 + $0xc58] sm:$0xf] }
 0x54d   :  { %7501 = vmatpush.bf16.msra.mxu0 %v10417_v51  ;;  %7440 = vmatpush.bf16.msra.mxu3 %v10917_v0  ;;  %v10537_v51 = vor.u32 %v12132_v24, %v10534_v63  ;;  %v9905_v35 = vor.u32 %v11973_v43, %v9902_v10  ;;  %v11941_v0 = vld [vmem:[#allocation21 + $0x25c] sm:$0xf]  ;;  %v12277_v38 = vld [vmem:[#allocation21 + $0xcd4] sm:$0xf0]  ;;  %v11057_v24 = vor.u32 %v12261_v30, %v11054_v31  ;;  %v10292_v43 = vld [vmem:[#allocation21 + $0x660] sm:$0xf] }
 0x54e   :  { %7466 = vmatpush.bf16.msrb.mxu1 %v10921_v12  ;;  %v13320_v56 = vpop.f32.mrf.mxu2  ;;  %v9777_v6 = vor.u32 %v11941_v0, %v9774_v2  ;;  %v10421_v63 = vor.u32 %v12118_v15, %v10420_v53  ;;  %v12245_v39 = vld [vmem:[#allocation21 + $0xbd4] sm:$0xf0]  ;;  %v10926_v26 = vld [vmem:[#allocation21 + $0xbd8] sm:$0xf0]  ;;  %v12086_v10 = vld [vmem:[#allocation21 + $0x6dc] sm:$0xf0] }
 0x54f   :  { %v12213_v20 = vld [vmem:[#allocation21 + $0xad4] sm:$0xf0]  ;;  %v12054_v0 = vld [vmem:[#allocation21 + $0x5dc] sm:$0xf0]  ;;  %v11974_v53 = vld [vmem:[#allocation21 + $0x364] sm:$0xf] }
 0x550   :  { %7476 = vmatpush.bf16.msrb.mxu2 %v10285_v62  ;;  %v11310_v62 = vld [vmem:[#allocation21 + $0xed8] sm:$0xf0]  ;;  %v10540_v61 = vld [vmem:[#allocation21 + $0x858] sm:$0xf]  ;;  %v11444_v30 = vld [vmem:[#allocation21 + $0xf60] sm:$0xf] }
 0x551   :  { %7502 = vmatpush.bf16.msra.mxu0 %v10289_v46  ;;  %7441 = vmatpush.bf16.msra.mxu3 %v10789_v3  ;;  %v7252_v12 = vpop.f32.mrf.mxu0  ;;  %v9644_v46 = vld [vmem:[#allocation21 + $0x158] sm:$0xf]  ;;  %v11313_v50 = vor.u32 %v12325_v9, %v11310_v62  ;;  %v10166_v9 = vld [vmem:[#allocation21 + $0x5e0] sm:$0xf0]  ;;  %v12374_v31 = vld [vmem:[#allocation21 + $0xfdc] sm:$0xf0] }
 0x552   :  { %7467 = vmatpush.bf16.msrb.mxu1 %v10793_v5  ;;  %v9645_v1 = vor.u32 %v11925_v58, %v9644_v46  ;;  %v11181_v5 = vor.u32 %v12309_v7, %v11180_v57  ;;  %v12038_v12 = vld [vmem:[#allocation21 + $0x564] sm:$0xf]  ;;  %v12181_v46 = vld [vmem:[#allocation21 + $0x9d4] sm:$0xf0]  ;;  %v12165_v58 = vld [vmem:[#allocation21 + $0x95c] sm:$0xf] }
 0x553   :  { %v10169_v57 = vor.u32 %v12038_v12, %v10166_v9  ;;  %v10036_v7 = vld [vmem:[#allocation21 + $0x460] sm:$0xf]  ;;  %v12149_v42 = vld [vmem:[#allocation21 + $0x8d4] sm:$0xf0]  ;;  %v9910_v15 = vld [vmem:[#allocation21 + $0x3e0] sm:$0xf0] }
 0x554   :  { %7477 = vmatpush.bf16.msrb.mxu2 %v10157_v17  ;;  %v9649_v17 = vor.u32 %v11909_v36, %v9646_v37  ;;  %v12022_v36 = vld [vmem:[#allocation21 + $0x4dc] sm:$0xf0]  ;;  %v12006_v37 = vld [vmem:[#allocation21 + $0x464] sm:$0xf]  ;;  %v4292_v9 = vperm.slane %v13299_v23, 5 }
 0x555   :  { %7503 = vmatpush.bf16.msra.mxu0 %v10161_v4  ;;  %7442 = vmatpush.bf16.msra.mxu3 %v10661_v19  ;;  %v11877_v4 = vld [vmem:[#allocation21 + $0x5c] sm:$0xf]  ;;  %v9654_v12 = vld [vmem:[#allocation21 + $0x1e0] sm:$0xf0] }
 0x556   :  { %7468 = vmatpush.bf16.msrb.mxu1 %v10665_v16  ;;  %v7226_v3 = vpop.f32.mrf.mxu2  ;;  %v10422_v16 = vld [vmem:[#allocation21 + $0x7e0] sm:$0xf0]  ;;  %v9521_v55 = vor.u32 %v11877_v4, %v9518_v29  ;;  %v9908_v4 = vld [vmem:[#allocation21 + $0x360] sm:$0xf] }
 0x557   :  { %v10425_v40 = vor.u32 %v12102_v34, %v10422_v16  ;;  %v11990_v29 = vld [vmem:[#allocation21 + $0x3dc] sm:$0xf0]  ;;  %v12358_v34 = vld [vmem:[#allocation21 + $0xf64] sm:$0xf] }
 0x558   :  { %7478 = vmatpush.bf16.msrb.mxu2 %v10029_v48  ;;  %v11053_v48 = vor.u32 %v12277_v38, %v11052_v47  ;;  %v12133_v47 = vld [vmem:[#allocation21 + $0x85c] sm:$0xf]  ;;  %v11446_v16 = vld [vmem:[#allocation21 + $0xfe0] sm:$0xf0] }
 0x559   :  { %7504 = vmatpush.bf16.msra.mxu0 %v10033_v41  ;;  %7443 = vmatpush.bf16.msra.mxu3 %v10533_v44  ;;  %v10924_v41 = vld [vmem:[#allocation21 + $0xb58] sm:$0xf]  ;;  %v12070_v44 = vld [vmem:[#allocation21 + $0x664] sm:$0xf]  ;;  %v10542_v38 = vld [vmem:[#allocation21 + $0x8d8] sm:$0xf0] }
 0x55a   :  { %7469 = vmatpush.bf16.msrb.mxu1 %v10537_v51  ;;  %v10925_v28 = vor.u32 %v12245_v39, %v10924_v41  ;;  %v10297_v45 = vor.u32 %v12070_v44, %v10294_v52  ;;  %v9913_v41 = vor.u32 %v11974_v53, %v9910_v15  ;;  %v9780_v39 = vld [vmem:[#allocation21 + $0x260] sm:$0xf]  ;;  %v9782_v44 = vld [vmem:[#allocation21 + $0x2e0] sm:$0xf0] }
 0x55c   :  { %7479 = vmatpush.bf16.msrb.mxu2 %v9901_v22  ;;  %7444 = vmatmul.bf16.vlgmr.msra.gmra.mxu3 %v13197_v18  ;;  %v13324_v19 = vpop.f32.mrf.mxu1  ;;  %v10929_v22 = vor.u32 %v12229_v11, %v10926_v26  ;;  %v11958_v11 = vld [vmem:[#allocation21 + $0x2dc] sm:$0xf0]  ;;  %v11449_v26 = vor.u32 %v12358_v34, %v11446_v16 }
 0x55d   :  { %7488 = vmatpush.bf16.msrb.mxu3 %v11437_v60  ;;  %7505 = vmatpush.bf16.msra.mxu0 %v9905_v35  ;;  %v10293_v60 = vor.u32 %v12086_v10, %v10292_v43  ;;  %v10796_v35 = vld [vmem:[#allocation21 + $0xa58] sm:$0xf]  ;;  %v12342_v43 = vld [vmem:[#allocation21 + $0xedc] sm:$0xf0]  ;;  %v11942_v10 = vld [vmem:[#allocation21 + $0x264] sm:$0xf] }
 0x55e   :  { %7514 = vmatpush.bf16.msra.mxu1 %v11441_v32  ;;  %v10798_v32 = vld [vmem:[#allocation21 + $0xad8] sm:$0xf0]  ;;  %v10797_v62 = vor.u32 %v12213_v20, %v10796_v35  ;;  %v9785_v20 = vor.u32 %v11942_v10, %v9782_v44  ;;  %v10302_v10 = vld [vmem:[#allocation21 + $0x6e8] sm:$0xf0] }
 0x55f   :  { %7470 = vmatmul.bf16.vlgmr.msrb.gmra.mxu1 %v13197_v18  ;;  %v13326_v51 = vpop.f32.mrf.mxu3 }
 0x560   :  { %7480 = vmatpush.bf16.msrb.mxu2 %v9773_v49  ;;  %v10801_v49 = vor.u32 %v12197_v59, %v10798_v32  ;;  %v9652_v59 = vld [vmem:[#allocation21 + $0x160] sm:$0xf] }
 0x561   :  { %7489 = vmatpush.bf16.msrb.mxu3 %v11309_v25  ;;  %7506 = vmatpush.bf16.msra.mxu0 %v9777_v6  ;;  %v10165_v25 = vor.u32 %v12054_v0, %v10164_v54  ;;  %v10668_v6 = vld [vmem:[#allocation21 + $0x958] sm:$0xf]  ;;  %v11188_v32 = vld [vmem:[#allocation21 + $0xd60] sm:$0xf] }
 0x562   :  { %7515 = vmatpush.bf16.msra.mxu1 %v11313_v50  ;;  %v10670_v50 = vld [vmem:[#allocation21 + $0x9d8] sm:$0xf0]  ;;  %v12310_v0 = vld [vmem:[#allocation21 + $0xddc] sm:$0xf0] }
 0x564   :  { %7481 = vmatpush.bf16.msrb.mxu2 %v9645_v1  ;;  %v7265_v2 = vpop.f32.mrf.mxu1  ;;  %v10669_v1 = vor.u32 %v12181_v46, %v10668_v6  ;;  %v4294_v6 = vperm.slane %v13299_v23, 7 }
 0x565   :  { %7490 = vmatpush.bf16.msrb.mxu3 %v11181_v5  ;;  %7507 = vmatpush.bf16.msra.mxu0 %v9649_v17  ;;  %v10673_v5 = vor.u32 %v12165_v58, %v10670_v50  ;;  %v10037_v17 = vor.u32 %v12022_v36, %v10036_v7  ;;  %v11910_v2 = vld [vmem:[#allocation21 + $0x164] sm:$0xf]  ;;  %v11189_v50 = vor.u32 %v12310_v0, %v11188_v32  ;;  %v11894_v36 = vld [vmem:[#allocation21 + $0xdc] sm:$0xf0]  ;;  %v10172_v32 = vld [vmem:[#allocation21 + $0x568] sm:$0xf] }
 0x566   :  { %7516 = vmatpush.bf16.msra.mxu1 %v11185_v27  ;;  %v10041_v27 = vor.u32 %v12006_v37, %v10038_v13  ;;  %v9657_v7 = vor.u32 %v11910_v2, %v9654_v12  ;;  %v11060_v37 = vld [vmem:[#allocation21 + $0xc60] sm:$0xf]  ;;  %v12039_v12 = vld [vmem:[#allocation21 + $0x56c] sm:$0xf] }
 0x567   :  { %v7239_v3 = vpop.f32.mrf.mxu3  ;;  %v12278_v13 = vld [vmem:[#allocation21 + $0xcdc] sm:$0xf0] }
 0x568   :  { %7482 = vmatpush.bf16.msrb.mxu2 %v9517_v33  ;;  %v10541_v33 = vor.u32 %v12149_v42, %v10540_v61  ;;  %v11878_v3 = vld [vmem:[#allocation21 + $0x64] sm:$0xf]  ;;  %v11061_v15 = vor.u32 %v12278_v13, %v11060_v37  ;;  %v10044_v13 = vld [vmem:[#allocation21 + $0x468] sm:$0xf] }
 0x569   :  { %7491 = vmatpush.bf16.msrb.mxu3 %v11053_v48  ;;  %7508 = vmatpush.bf16.msra.mxu0 %v9521_v55  ;;  %v13330_v14 = vpop.f32.mrf.mxu0  ;;  %v10545_v48 = vor.u32 %v12133_v47, %v10542_v38  ;;  %v9909_v55 = vor.u32 %v11990_v29, %v9908_v4  ;;  %v9526_v61 = vld [vmem:[#allocation21 + $0xe0] sm:$0xf0]  ;;  %v10428_v47 = vld [vmem:[#allocation21 + $0x768] sm:$0xf] }
 0x56a   :  { %7517 = vmatpush.bf16.msra.mxu1 %v11057_v24  ;;  %v11062_v42 = vld [vmem:[#allocation21 + $0xce0] sm:$0xf0]  ;;  %v12119_v38 = vld [vmem:[#allocation21 + $0x7e4] sm:$0xf0]  ;;  %v7303_v34 = vadd.f32 %v13330_v14, %v4294_v6 }
 0x56b   :  { %7483 = vmatmul.bf16.vlgmr.msrb.gmra.mxu2 %v13191_v21  ;;  %v10429_v16 = vor.u32 %v12119_v38, %v10428_v47  ;;  %v10678_v37 = vld [vmem:[#allocation21 + $0x9e0] sm:$0xf0]  ;;  %v10548_v47 = vld [vmem:[#allocation21 + $0x860] sm:$0xf] }
 0x56c   :  { %7527 = vmatpush.bf16.msra.mxu2 %v10421_v63  ;;  %7509 = vmatmul.bf16.vlgmr.msra.gmra.mxu0 %v13191_v21  ;;  %v11445_v63 = vor.u32 %v12374_v31, %v11444_v30  ;;  %v12103_v30 = vld [vmem:[#allocation21 + $0x76c] sm:$0xf] }
 0x56d   :  { %7553 = vmatpush.bf16.msrb.mxu0 %v10425_v40  ;;  %7492 = vmatpush.bf16.msrb.mxu3 %v10925_v28  ;;  %v11316_v40 = vld [vmem:[#allocation21 + $0xe60] sm:$0xf]  ;;  %v12326_v28 = vld [vmem:[#allocation21 + $0xe64] sm:$0xf]  ;;  %v10430_v31 = vld [vmem:[#allocation21 + $0x7e8] sm:$0xf0] }
 0x56e   :  { %7518 = vmatpush.bf16.msra.mxu1 %v10929_v22  ;;  %v13332_v24 = vpop.f32.mrf.mxu2  ;;  %v11318_v22 = vld [vmem:[#allocation21 + $0xee0] sm:$0xf0]  ;;  %v11317_v35 = vor.u32 %v12342_v43, %v11316_v40  ;;  %v12087_v40 = vld [vmem:[#allocation21 + $0x6e4] sm:$0xf0]  ;;  %v12071_v43 = vld [vmem:[#allocation21 + $0x66c] sm:$0xf] }
 0x56f   :  { %v11321_v54 = vor.u32 %v12326_v28, %v11318_v22 }
 0x570   :  { %7528 = vmatpush.bf16.msra.mxu2 %v10293_v60  ;;  %v9781_v60 = vor.u32 %v11958_v11, %v9780_v39  ;;  %v10934_v39 = vld [vmem:[#allocation21 + $0xbe0] sm:$0xf0]  ;;  %v10300_v11 = vld [vmem:[#allocation21 + $0x668] sm:$0xf] }
 0x571   :  { %7554 = vmatpush.bf16.msrb.mxu0 %v10297_v45  ;;  %7493 = vmatpush.bf16.msrb.mxu3 %v10797_v62  ;;  %v7304_v52 = vpop.f32.mrf.mxu0  ;;  %v11926_v45 = vld [vmem:[#allocation21 + $0x1dc] sm:$0xf0]  ;;  %v12294_v62 = vld [vmem:[#allocation21 + $0xd64] sm:$0xf] }
 0x572   :  { %7519 = vmatpush.bf16.msra.mxu1 %v10801_v49  ;;  %v11190_v49 = vld [vmem:[#allocation21 + $0xde0] sm:$0xf0]  ;;  %v9653_v46 = vor.u32 %v11926_v45, %v9652_v59 }
 0x573   :  { %v12198_v59 = vld [vmem:[#allocation21 + $0xa64] sm:$0xf] }
 0x574   :  { %7529 = vmatpush.bf16.msra.mxu2 %v10165_v25  ;;  %v4291_v25 = vperm.slane %v13299_v23, 4  ;;  %v10806_v45 = vld [vmem:[#allocation21 + $0xae0] sm:$0xf0] }
 0x575   :  { %7555 = vmatpush.bf16.msrb.mxu0 %v10169_v57  ;;  %7494 = vmatpush.bf16.msrb.mxu3 %v10669_v1  ;;  %v9524_v57 = vld [vmem:[#allocation21 + $0x60] sm:$0xf]  ;;  %v11193_v1 = vor.u32 %v12294_v62, %v11190_v49  ;;  %v10809_v6 = vor.u32 %v12198_v59, %v10806_v45  ;;  %v9660_v59 = vld [vmem:[#allocation21 + $0x168] sm:$0xf] }
 0x576   :  { %7520 = vmatpush.bf16.msra.mxu1 %v10673_v5  ;;  %v7278_v58 = vpop.f32.mrf.mxu2  ;;  %v12262_v5 = vld [vmem:[#allocation21 + $0xc64] sm:$0xf]  ;;  %v9525_v29 = vor.u32 %v11894_v36, %v9524_v57  ;;  %v12182_v57 = vld [vmem:[#allocation21 + $0x9dc] sm:$0xf0]  ;;  %v11196_v45 = vld [vmem:[#allocation21 + $0xd68] sm:$0xf] }
 0x577   :  { %v10676_v58 = vld [vmem:[#allocation21 + $0x960] sm:$0xf] }
 0x578   :  { %7530 = vmatpush.bf16.msra.mxu2 %v10037_v17  ;;  %v7251_v17 = vadd.f32 %v13318_v8, %v4292_v9  ;;  %v11065_v8 = vor.u32 %v12262_v5, %v11062_v42  ;;  %v10174_v9 = vld [vmem:[#allocation21 + $0x5e8] sm:$0xf0] }
 0x579   :  { %7556 = vmatpush.bf16.msrb.mxu0 %v10041_v27  ;;  %7495 = vmatpush.bf16.msrb.mxu3 %v10541_v33  ;;  %v4293_v27 = vperm.slane %v13299_v23, 6  ;;  %v9529_v33 = vor.u32 %v11878_v3, %v9526_v61  ;;  %v7225_v23 = vadd.f32 %v13320_v56, %v4291_v25  ;;  %v10177_v36 = vor.u32 %v12039_v12, %v10174_v9  ;;  %v12007_v3 = vld [vmem:[#allocation21 + $0x46c] sm:$0xf] }
 0x57a   :  { %7521 = vmatpush.bf16.msra.mxu1 %v10545_v48  ;;  %v7264_v53 = vadd.f32 %v13324_v19, %v7251_v17  ;;  %v10932_v48 = vld [vmem:[#allocation21 + $0xb60] sm:$0xf]  ;;  %v10046_v61 = vld [vmem:[#allocation21 + $0x4e8] sm:$0xf0]  ;;  %v10677_v17 = vor.u32 %v12182_v57, %v10676_v58  ;;  %v11068_v58 = vld [vmem:[#allocation21 + $0xc68] sm:$0xf] }
 0x57b   :  { %v7277_v19 = vadd.f32 %v13332_v24, %v4293_v27  ;;  %v7238_v14 = vadd.f32 %v13326_v51, %v7225_v23  ;;  %v10305_v24 = vor.u32 %v12071_v43, %v10302_v10  ;;  %v11324_v43 = vld [vmem:[#allocation21 + $0xe68] sm:$0xf]  ;;  %v11198_v12 = vld [vmem:[#allocation21 + $0xde8] sm:$0xf0] }
 0x57c   :  { %7531 = vmatpush.bf16.msra.mxu2 %v9909_v55  ;;  %7496 = vmatmul.bf16.vlgmr.msrb.gmra.mxu3 %v13197_v18  ;;  %v7315_v4 = vpop.f32.mrf.mxu1  ;;  %v12246_v55 = vld [vmem:[#allocation21 + $0xbdc] sm:$0xf0]  ;;  %v7776_v44 = vrot.slane %v7264_v53, 6  ;;  %v9916_v53 = vld [vmem:[#allocation21 + $0x368] sm:$0xf] }
 0x57d   :  { %7540 = vmatpush.bf16.msra.mxu3 %v11445_v63  ;;  %7557 = vmatpush.bf16.msrb.mxu0 %v9913_v41  ;;  %v12230_v63 = vld [vmem:[#allocation21 + $0xb64] sm:$0xf]  ;;  %v10433_v41 = vor.u32 %v12103_v30, %v10430_v31  ;;  %v10933_v52 = vor.u32 %v12246_v55, %v10932_v48  ;;  %v10049_v31 = vor.u32 %v12007_v3, %v10046_v61  ;;  %v12359_v55 = vld [vmem:[#allocation21 + $0xf6c] sm:$0xf]  ;;  %v12279_v57 = vld [vmem:[#allocation21 + $0xce4] sm:$0xf0] }
 0x57e   :  { %7566 = vmatpush.bf16.msrb.mxu1 %v11449_v26  ;;  %v7316_v26 = vadd.f32 %v7315_v4, %v7303_v34  ;;  %v10937_v56 = vor.u32 %v12230_v63, %v10934_v39  ;;  %v7800_v62 = vsel %vm1137_vm3, %v7238_v14, %v7776_v44  ;;  %v12150_v4 = vld [vmem:[#allocation21 + $0x8dc] sm:$0xf0]  ;;  %v10550_v30 = vld [vmem:[#allocation21 + $0x8e0] sm:$0xf0]  ;;  %v12375_v34 = vld [vmem:[#allocation21 + $0xfe4] sm:$0xf0] }
 0x57f   :  { %7522 = vmatmul.bf16.vlgmr.msra.gmra.mxu1 %v13197_v18  ;;  %v7289_v28 = vpop.f32.mrf.mxu3  ;;  %v10549_v48 = vor.u32 %v12150_v4, %v10548_v47  ;;  %v11454_v63 = vld [vmem:[#allocation21 + $0xfe8] sm:$0xf0]  ;;  %v12343_v44 = vld [vmem:[#allocation21 + $0xee4] sm:$0xf0]  ;;  %v12120_v3 = vld [vmem:[#allocation21 + $0x7ec] sm:$0xf0] }
 0x580   :  { %7532 = vmatpush.bf16.msra.mxu2 %v9781_v60  ;;  %v7290_v22 = vadd.f32 %v7289_v28, %v7277_v19  ;;  %v10301_v60 = vor.u32 %v12087_v40, %v10300_v11  ;;  %v7778_v51 = vrot.slane %v7316_v26, 2  ;;  %v9788_v19 = vld [vmem:[#allocation21 + $0x268] sm:$0xf]  ;;  %v11457_v10 = vor.u32 %v12359_v55, %v11454_v63  ;;  %v11943_v14 = vld [vmem:[#allocation21 + $0x26c] sm:$0xf] }
 0x581   :  { %7541 = vmatpush.bf16.msra.mxu3 %v11317_v35  ;;  %7558 = vmatpush.bf16.msrb.mxu0 %v9785_v20  ;;  %v10804_v35 = vld [vmem:[#allocation21 + $0xa60] sm:$0xf]  ;;  %v11959_v26 = vld [vmem:[#allocation21 + $0x2e4] sm:$0xf0]  ;;  %v10438_v47 = vld [vmem:[#allocation21 + $0x7f0] sm:$0xf0] }
 0x582   :  { %7567 = vmatpush.bf16.msrb.mxu1 %v11321_v54  ;;  %v12214_v20 = vld [vmem:[#allocation21 + $0xadc] sm:$0xf0]  ;;  %v12055_v54 = vld [vmem:[#allocation21 + $0x5e4] sm:$0xf0]  ;;  %v7777_v0 = vrot.slane %v7290_v22, 4 }
 0x583   :  { %v10805_v49 = vor.u32 %v12214_v20, %v10804_v35  ;;  %v11326_v22 = vld [vmem:[#allocation21 + $0xee8] sm:$0xf0]  ;;  %v11325_v35 = vor.u32 %v12343_v44, %v11324_v43  ;;  %v12056_v44 = vld [vmem:[#allocation21 + $0x5ec] sm:$0xf0] }
 0x584   :  { %7533 = vmatpush.bf16.msra.mxu2 %v9653_v46  ;;  %v7317_v2 = vpop.f32.mrf.mxu1  ;;  %v7801_v25 = vsel %vm1143_vm6, %v7777_v0, %v7778_v51  ;;  %v10173_v46 = vor.u32 %v12055_v54, %v10172_v32  ;;  %v12311_v54 = vld [vmem:[#allocation21 + $0xde4] sm:$0xf0]  ;;  %v11911_v51 = vld [vmem:[#allocation21 + $0x16c] sm:$0xf] }
 0x585   :  { %7542 = vmatpush.bf16.msra.mxu3 %v11189_v50  ;;  %7559 = vmatpush.bf16.msrb.mxu0 %v9657_v7  ;;  %v12166_v50 = vld [vmem:[#allocation21 + $0x964] sm:$0xf]  ;;  %v7802_v7 = vsel %vm1145_vm7, %v7800_v62, %v7801_v25  ;;  %v9662_v0 = vld [vmem:[#allocation21 + $0x1e8] sm:$0xf0]  ;;  %v11197_v25 = vor.u32 %v12311_v54, %v11196_v45  ;;  %v12024_v54 = vld [vmem:[#allocation21 + $0x4ec] sm:$0xf0] }
 0x586   :  { %7568 = vmatpush.bf16.msrb.mxu1 %v11193_v1  ;;  %v12023_v1 = vld [vmem:[#allocation21 + $0x4e4] sm:$0xf0]  ;;  %7826 = vst [vmem:[#allocation24 + $0x18] sm:$0xff] %v7802_v7  ;;  %v10681_v38 = vor.u32 %v12166_v50, %v10678_v37  ;;  %v12295_v2 = vld [vmem:[#allocation21 + $0xd6c] sm:$0xf] }
 0x587   :  { %v7291_v42 = vpop.f32.mrf.mxu3  ;;  %v10045_v27 = vor.u32 %v12023_v1, %v10044_v13  ;;  %v11201_v50 = vor.u32 %v12295_v2, %v11198_v12  ;;  %v11879_v7 = vld [vmem:[#allocation21 + $0x6c] sm:$0xf]  ;;  %v10436_v1 = vld [vmem:[#allocation21 + $0x770] sm:$0xf] }
 0x588   :  { %7534 = vmatpush.bf16.msra.mxu2 %v9525_v29  ;;  %v12134_v29 = vld [vmem:[#allocation21 + $0x864] sm:$0xf]  ;;  %v12263_v37 = vld [vmem:[#allocation21 + $0xc6c] sm:$0xf]  ;;  %v12104_v42 = vld [vmem:[#allocation21 + $0x774] sm:$0xf] }
 0x589   :  { %7543 = vmatpush.bf16.msra.mxu3 %v11061_v15  ;;  %7560 = vmatpush.bf16.msrb.mxu0 %v9529_v33  ;;  %v13351_v5 = vpop.f32.mrf.mxu0  ;;  %v11991_v15 = vld [vmem:[#allocation21 + $0x3e4] sm:$0xf0]  ;;  %v10553_v23 = vor.u32 %v12134_v29, %v10550_v30  ;;  %v11070_v13 = vld [vmem:[#allocation21 + $0xce8] sm:$0xf0]  ;;  %v10437_v29 = vor.u32 %v12120_v3, %v10436_v1  ;;  %v9926_v1 = vld [vmem:[#allocation21 + $0x3f0] sm:$0xf0] }
 0x58a   :  { %7569 = vmatpush.bf16.msrb.mxu1 %v11065_v8  ;;  %v11452_v33 = vld [vmem:[#allocation21 + $0xf68] sm:$0xf]  ;;  %v11975_v8 = vld [vmem:[#allocation21 + $0x36c] sm:$0xf]  ;;  %v11073_v4 = vor.u32 %v12263_v37, %v11070_v13  ;;  %v12376_v37 = vld [vmem:[#allocation21 + $0xfec] sm:$0xf0] }
 0x58b   :  { %7535 = vmatmul.bf16.vlgmr.msra.gmra.mxu2 %v13191_v21  ;;  %v11453_v11 = vor.u32 %v12375_v34, %v11452_v33  ;;  %v10940_v30 = vld [vmem:[#allocation21 + $0xb68] sm:$0xf]  ;;  %v10942_v33 = vld [vmem:[#allocation21 + $0xbe8] sm:$0xf0]  ;;  %v10308_v34 = vld [vmem:[#allocation21 + $0x670] sm:$0xf] }
 0x58c   :  { %7579 = vmatpush.bf16.msrb.mxu2 %v10429_v16  ;;  %7561 = vmatmul.bf16.vlgmr.msrb.gmra.mxu0 %v13191_v21  ;;  %v9918_v16 = vld [vmem:[#allocation21 + $0x3e8] sm:$0xf0]  ;;  %v11976_v13 = vld [vmem:[#allocation21 + $0x374] sm:$0xf] }
 0x58d   :  { %7605 = vmatpush.bf16.msra.mxu0 %v10433_v41  ;;  %7544 = vmatpush.bf16.msra.mxu3 %v10933_v52  ;;  %v9917_v41 = vor.u32 %v11991_v15, %v9916_v53  ;;  %v9921_v40 = vor.u32 %v11975_v8, %v9918_v16  ;;  %v9790_v52 = vld [vmem:[#allocation21 + $0x2e8] sm:$0xf0]  ;;  %v10441_v15 = vor.u32 %v12104_v42, %v10438_v47  ;;  %v12088_v8 = vld [vmem:[#allocation21 + $0x6ec] sm:$0xf0]  ;;  %v12072_v16 = vld [vmem:[#allocation21 + $0x674] sm:$0xf] }
 0x58e   :  { %7570 = vmatpush.bf16.msrb.mxu1 %v10937_v56  ;;  %v13353_v39 = vpop.f32.mrf.mxu2  ;;  %v12327_v56 = vld [vmem:[#allocation21 + $0xe6c] sm:$0xf]  ;;  %v9793_v20 = vor.u32 %v11943_v14, %v9790_v52  ;;  %v12040_v52 = vld [vmem:[#allocation21 + $0x574] sm:$0xf] }
 0x58f   :  { %v11329_v32 = vor.u32 %v12327_v56, %v11326_v22  ;;  %v12231_v53 = vld [vmem:[#allocation21 + $0xb6c] sm:$0xf]  ;;  %v11462_v42 = vld [vmem:[#allocation21 + $0xff0] sm:$0xf0] }
 0x590   :  { %7580 = vmatpush.bf16.msrb.mxu2 %v10301_v60  ;;  %v9789_v60 = vor.u32 %v11959_v26, %v9788_v19  ;;  %v12199_v19 = vld [vmem:[#allocation21 + $0xa6c] sm:$0xf] }
 0x591   :  { %7606 = vmatpush.bf16.msra.mxu0 %v10305_v24  ;;  %7545 = vmatpush.bf16.msra.mxu3 %v10805_v49  ;;  %v7356_v28 = vpop.f32.mrf.mxu0  ;;  %v11927_v24 = vld [vmem:[#allocation21 + $0x1e4] sm:$0xf0]  ;;  %v10814_v43 = vld [vmem:[#allocation21 + $0xae8] sm:$0xf0] }
 0x592   :  { %7571 = vmatpush.bf16.msrb.mxu1 %v10809_v6  ;;  %v9661_v9 = vor.u32 %v11927_v24, %v9660_v59  ;;  %v9532_v49 = vld [vmem:[#allocation21 + $0x68] sm:$0xf]  ;;  %v9665_v6 = vor.u32 %v11911_v51, %v9662_v0  ;;  %v10182_v28 = vld [vmem:[#allocation21 + $0x5f0] sm:$0xf0]  ;;  %v10817_v22 = vor.u32 %v12199_v19, %v10814_v43  ;;  %v12167_v59 = vld [vmem:[#allocation21 + $0x96c] sm:$0xf] }
 0x593   :  { %v10185_v24 = vor.u32 %v12040_v52, %v10182_v28  ;;  %v10686_v45 = vld [vmem:[#allocation21 + $0x9e8] sm:$0xf0]  ;;  %v12008_v51 = vld [vmem:[#allocation21 + $0x474] sm:$0xf]  ;;  %v9668_v19 = vld [vmem:[#allocation21 + $0x170] sm:$0xf] }
 0x594   :  { %7581 = vmatpush.bf16.msrb.mxu2 %v10173_v46  ;;  %v11895_v46 = vld [vmem:[#allocation21 + $0xe4] sm:$0xf0]  ;;  %v10054_v0 = vld [vmem:[#allocation21 + $0x4f0] sm:$0xf0]  ;;  %v11204_v43 = vld [vmem:[#allocation21 + $0xd70] sm:$0xf] }
 0x595   :  { %7607 = vmatpush.bf16.msra.mxu0 %v10177_v36  ;;  %7546 = vmatpush.bf16.msra.mxu3 %v10677_v17  ;;  %v9534_v36 = vld [vmem:[#allocation21 + $0xe8] sm:$0xf0]  ;;  %v9533_v17 = vor.u32 %v11895_v46, %v9532_v49  ;;  %v10689_v49 = vor.u32 %v12167_v59, %v10686_v45  ;;  %v9670_v52 = vld [vmem:[#allocation21 + $0x1f0] sm:$0xf0] }
 0x596   :  { %7572 = vmatpush.bf16.msrb.mxu1 %v10681_v38  ;;  %v7330_v62 = vpop.f32.mrf.mxu2  ;;  %v11069_v38 = vor.u32 %v12279_v57, %v11068_v58  ;;  %v12135_v46 = vld [vmem:[#allocation21 + $0x86c] sm:$0xf]  ;;  %v10057_v57 = vor.u32 %v12008_v51, %v10054_v0  ;;  %v11076_v51 = vld [vmem:[#allocation21 + $0xc70] sm:$0xf] }
 0x597   :  { %v10556_v62 = vld [vmem:[#allocation21 + $0x868] sm:$0xf]  ;;  %v10558_v58 = vld [vmem:[#allocation21 + $0x8e8] sm:$0xf0]  ;;  %v12280_v0 = vld [vmem:[#allocation21 + $0xcec] sm:$0xf0] }
 0x598   :  { %7582 = vmatpush.bf16.msrb.mxu2 %v10045_v27  ;;  %v9537_v27 = vor.u32 %v11879_v7, %v9534_v36  ;;  %v11992_v7 = vld [vmem:[#allocation21 + $0x3ec] sm:$0xf0]  ;;  %v10561_v47 = vor.u32 %v12135_v46, %v10558_v58  ;;  %v10444_v46 = vld [vmem:[#allocation21 + $0x778] sm:$0xf] }
 0x599   :  { %7608 = vmatpush.bf16.msra.mxu0 %v10049_v31  ;;  %7547 = vmatpush.bf16.msra.mxu3 %v10549_v48  ;;  %v12247_v31 = vld [vmem:[#allocation21 + $0xbe4] sm:$0xf0]  ;;  %v10310_v48 = vld [vmem:[#allocation21 + $0x6f0] sm:$0xf0]  ;;  %v11460_v36 = vld [vmem:[#allocation21 + $0xf70] sm:$0xf] }
 0x59a   :  { %7573 = vmatpush.bf16.msrb.mxu1 %v10553_v23  ;;  %v10941_v55 = vor.u32 %v12247_v31, %v10940_v30  ;;  %v10945_v23 = vor.u32 %v12231_v53, %v10942_v33  ;;  %v10313_v26 = vor.u32 %v12072_v16, %v10310_v48  ;;  %v9796_v30 = vld [vmem:[#allocation21 + $0x270] sm:$0xf]  ;;  %v12328_v48 = vld [vmem:[#allocation21 + $0xe74] sm:$0xf]  ;;  %v12121_v58 = vld [vmem:[#allocation21 + $0x7f4] sm:$0xf0] }
 0x59b   :  { %v11960_v31 = vld [vmem:[#allocation21 + $0x2ec] sm:$0xf0] }
 0x59c   :  { %7583 = vmatpush.bf16.msrb.mxu2 %v9917_v41  ;;  %7548 = vmatmul.bf16.vlgmr.msra.gmra.mxu3 %v13197_v18  ;;  %v13357_v61 = vpop.f32.mrf.mxu1  ;;  %v10309_v41 = vor.u32 %v12088_v8, %v10308_v34  ;;  %v11332_v53 = vld [vmem:[#allocation21 + $0xe70] sm:$0xf]  ;;  %v11944_v34 = vld [vmem:[#allocation21 + $0x274] sm:$0xf] }
 0x59d   :  { %7592 = vmatpush.bf16.msrb.mxu3 %v11453_v11  ;;  %7609 = vmatpush.bf16.msra.mxu0 %v9921_v40  ;;  %v10812_v11 = vld [vmem:[#allocation21 + $0xa68] sm:$0xf]  ;;  %v12344_v33 = vld [vmem:[#allocation21 + $0xeec] sm:$0xf0]  ;;  %v9798_v8 = vld [vmem:[#allocation21 + $0x2f0] sm:$0xf0] }
 0x59e   :  { %7618 = vmatpush.bf16.msra.mxu1 %v11457_v10  ;;  %v12215_v40 = vld [vmem:[#allocation21 + $0xae4] sm:$0xf0]  ;;  %v10180_v10 = vld [vmem:[#allocation21 + $0x570] sm:$0xf] }
 0x59f   :  { %7574 = vmatmul.bf16.vlgmr.msrb.gmra.mxu1 %v13197_v18  ;;  %v13359_v63 = vpop.f32.mrf.mxu3  ;;  %v10813_v56 = vor.u32 %v12215_v40, %v10812_v11  ;;  %v11333_v11 = vor.u32 %v12344_v33, %v11332_v53  ;;  %v9801_v40 = vor.u32 %v11944_v34, %v9798_v8  ;;  %v10316_v53 = vld [vmem:[#allocation21 + $0x678] sm:$0xf]  ;;  %v12073_v34 = vld [vmem:[#allocation21 + $0x67c] sm:$0xf] }
 0x5a0   :  { %7584 = vmatpush.bf16.msrb.mxu2 %v9789_v60  ;;  %v10181_v60 = vor.u32 %v12056_v44, %v10180_v10  ;;  %v12312_v44 = vld [vmem:[#allocation21 + $0xdec] sm:$0xf0]  ;;  %v10318_v8 = vld [vmem:[#allocation21 + $0x6f8] sm:$0xf0] }
 0x5a1   :  { %7593 = vmatpush.bf16.msrb.mxu3 %v11325_v35  ;;  %7610 = vmatpush.bf16.msra.mxu0 %v9793_v20  ;;  %v10684_v35 = vld [vmem:[#allocation21 + $0x968] sm:$0xf]  ;;  %v11205_v45 = vor.u32 %v12312_v44, %v11204_v43  ;;  %v10822_v43 = vld [vmem:[#allocation21 + $0xaf0] sm:$0xf0]  ;;  %v12057_v44 = vld [vmem:[#allocation21 + $0x5f4] sm:$0xf0] }
 0x5a2   :  { %7619 = vmatpush.bf16.msra.mxu1 %v11329_v32  ;;  %v12183_v20 = vld [vmem:[#allocation21 + $0x9e4] sm:$0xf0]  ;;  %v10052_v32 = vld [vmem:[#allocation21 + $0x470] sm:$0xf] }
 0x5a3   :  { %v10685_v12 = vor.u32 %v12183_v20, %v10684_v35 }
 0x5a4   :  { %7585 = vmatpush.bf16.msrb.mxu2 %v9661_v9  ;;  %v7369_v14 = vpop.f32.mrf.mxu1 }
 0x5a5   :  { %7594 = vmatpush.bf16.msrb.mxu3 %v11197_v25  ;;  %7611 = vmatpush.bf16.msra.mxu0 %v9665_v6  ;;  %v10053_v25 = vor.u32 %v12024_v54, %v10052_v32  ;;  %v12151_v6 = vld [vmem:[#allocation21 + $0x8e4] sm:$0xf0]  ;;  %v11912_v14 = vld [vmem:[#allocation21 + $0x174] sm:$0xf]  ;;  %v11896_v54 = vld [vmem:[#allocation21 + $0xec] sm:$0xf0] }
 0x5a6   :  { %7620 = vmatpush.bf16.msra.mxu1 %v11201_v50  ;;  %v9924_v50 = vld [vmem:[#allocation21 + $0x370] sm:$0xf]  ;;  %v10557_v3 = vor.u32 %v12151_v6, %v10556_v62  ;;  %v9673_v32 = vor.u32 %v11912_v14, %v9670_v52  ;;  %v9542_v62 = vld [vmem:[#allocation21 + $0xf0] sm:$0xf0] }
 0x5a7   :  { %v7343_v9 = vpop.f32.mrf.mxu3  ;;  %v11078_v6 = vld [vmem:[#allocation21 + $0xcf0] sm:$0xf0] }
 0x5a8   :  { %7586 = vmatpush.bf16.msrb.mxu2 %v9533_v17  ;;  %v12360_v17 = vld [vmem:[#allocation21 + $0xf74] sm:$0xf] }
 0x5a9   :  { %7595 = vmatpush.bf16.msrb.mxu3 %v11069_v38  ;;  %7612 = vmatpush.bf16.msra.mxu0 %v9537_v27  ;;  %v13363_v2 = vpop.f32.mrf.mxu0  ;;  %v9925_v38 = vor.u32 %v11992_v7, %v9924_v50  ;;  %v11880_v9 = vld [vmem:[#allocation21 + $0x74] sm:$0xf] }
 0x5aa   :  { %7621 = vmatpush.bf16.msra.mxu1 %v11073_v4  ;;  %v11461_v4 = vor.u32 %v12376_v37, %v11460_v36  ;;  %v12105_v36 = vld [vmem:[#allocation21 + $0x77c] sm:$0xf] }
 0x5ab   :  { %7587 = vmatmul.bf16.vlgmr.msrb.gmra.mxu2 %v13191_v21  ;;  %v10446_v37 = vld [vmem:[#allocation21 + $0x7f8] sm:$0xf0] }
 0x5ac   :  { %7631 = vmatpush.bf16.msra.mxu2 %v10437_v29  ;;  %7613 = vmatmul.bf16.vlgmr.msra.gmra.mxu0 %v13191_v21  ;;  %v9929_v29 = vor.u32 %v11976_v13, %v9926_v1  ;;  %v11077_v1 = vor.u32 %v12280_v0, %v11076_v51  ;;  %v10694_v0 = vld [vmem:[#allocation21 + $0x9f0] sm:$0xf0] }
 0x5ad   :  { %7657 = vmatpush.bf16.msrb.mxu0 %v10441_v15  ;;  %7596 = vmatpush.bf16.msrb.mxu3 %v10941_v55  ;;  %v11465_v15 = vor.u32 %v12360_v17, %v11462_v42  ;;  %v11334_v55 = vld [vmem:[#allocation21 + $0xef0] sm:$0xf0]  ;;  %v10445_v42 = vor.u32 %v12121_v58, %v10444_v46  ;;  %v10564_v58 = vld [vmem:[#allocation21 + $0x870] sm:$0xf] }
 0x5ae   :  { %7622 = vmatpush.bf16.msra.mxu1 %v10945_v23  ;;  %v13365_v27 = vpop.f32.mrf.mxu2  ;;  %v13367_v23 = vld [vmem:[#allocation23 + $0x10] sm:$0xff]  ;;  %v11337_v10 = vor.u32 %v12328_v48, %v11334_v55 }
 0x5af   :  { %v4296_v28 = vperm.slane %v13367_v23, 1  ;;  %v4298_v35 = vperm.slane %v13367_v23, 3 }
 0x5b0   :  { %7632 = vmatpush.bf16.msra.mxu2 %v10309_v41  ;;  %v9797_v41 = vor.u32 %v11960_v31, %v9796_v30  ;;  %v10449_v30 = vor.u32 %v12105_v36, %v10446_v37  ;;  %v10950_v31 = vld [vmem:[#allocation21 + $0xbf0] sm:$0xf0] }
 0x5b1   :  { %7658 = vmatpush.bf16.msrb.mxu0 %v10313_v26  ;;  %7597 = vmatpush.bf16.msrb.mxu3 %v10813_v56  ;;  %v7408_v16 = vpop.f32.mrf.mxu0  ;;  %v11928_v26 = vld [vmem:[#allocation21 + $0x1ec] sm:$0xf0]  ;;  %v12296_v56 = vld [vmem:[#allocation21 + $0xd74] sm:$0xf]  ;;  %v7407_v17 = vadd.f32 %v13363_v2, %v4298_v35 }
 0x5b2   :  { %7623 = vmatpush.bf16.msra.mxu1 %v10817_v22  ;;  %v11206_v22 = vld [vmem:[#allocation21 + $0xdf0] sm:$0xf0]  ;;  %v9669_v20 = vor.u32 %v11928_v26, %v9668_v19  ;;  %v12216_v19 = vld [vmem:[#allocation21 + $0xaec] sm:$0xf0] }
 0x5b3   :  { %v12200_v26 = vld [vmem:[#allocation21 + $0xa74] sm:$0xf] }
 0x5b4   :  { %7633 = vmatpush.bf16.msra.mxu2 %v10181_v60  ;;  %v4295_v60 = vperm.slane %v13367_v23, 0  ;;  %v12136_v36 = vld [vmem:[#allocation21 + $0x874] sm:$0xf] }
 0x5b5   :  { %7659 = vmatpush.bf16.msrb.mxu0 %v10185_v24  ;;  %7598 = vmatpush.bf16.msrb.mxu3 %v10685_v12  ;;  %v9540_v24 = vld [vmem:[#allocation21 + $0x70] sm:$0xf]  ;;  %v11209_v12 = vor.u32 %v12296_v56, %v11206_v22  ;;  %v10190_v56 = vld [vmem:[#allocation21 + $0x5f8] sm:$0xf0]  ;;  %v10566_v37 = vld [vmem:[#allocation21 + $0x8f0] sm:$0xf0] }
 0x5b6   :  { %7624 = vmatpush.bf16.msra.mxu1 %v10689_v49  ;;  %v7382_v59 = vpop.f32.mrf.mxu2  ;;  %v12264_v49 = vld [vmem:[#allocation21 + $0xc74] sm:$0xf]  ;;  %v9541_v7 = vor.u32 %v11896_v54, %v9540_v24  ;;  %v10692_v24 = vld [vmem:[#allocation21 + $0x970] sm:$0xf] }
 0x5b8   :  { %7634 = vmatpush.bf16.msra.mxu2 %v10053_v25  ;;  %v7355_v25 = vadd.f32 %v13351_v5, %v4296_v28  ;;  %v11081_v5 = vor.u32 %v12264_v49, %v11078_v6  ;;  %v12041_v28 = vld [vmem:[#allocation21 + $0x57c] sm:$0xf] }
 0x5b9   :  { %7660 = vmatpush.bf16.msrb.mxu0 %v10057_v57  ;;  %7599 = vmatpush.bf16.msrb.mxu3 %v10557_v3  ;;  %v4297_v57 = vperm.slane %v13367_v23, 2  ;;  %v9545_v3 = vor.u32 %v11880_v9, %v9542_v62  ;;  %v10193_v51 = vor.u32 %v12041_v28, %v10190_v56  ;;  %v12025_v9 = vld [vmem:[#allocation21 + $0x4f4] sm:$0xf0]  ;;  %v12009_v62 = vld [vmem:[#allocation21 + $0x47c] sm:$0xf] }
 0x5ba   :  { %7625 = vmatpush.bf16.msra.mxu1 %v10561_v47  ;;  %v7368_v13 = vadd.f32 %v13357_v61, %v7355_v25  ;;  %v10948_v47 = vld [vmem:[#allocation21 + $0xb70] sm:$0xf]  ;;  %v10062_v49 = vld [vmem:[#allocation21 + $0x4f8] sm:$0xf0] }
 0x5bb   :  { %v7381_v61 = vadd.f32 %v13365_v27, %v4297_v57  ;;  %v10321_v27 = vor.u32 %v12073_v34, %v10318_v8  ;;  %v11961_v34 = vld [vmem:[#allocation21 + $0x2f4] sm:$0xf0]  ;;  %v12297_v28 = vld [vmem:[#allocation21 + $0xd7c] sm:$0xf] }
 0x5bc   :  { %7635 = vmatpush.bf16.msra.mxu2 %v9925_v38  ;;  %7600 = vmatmul.bf16.vlgmr.msrb.gmra.mxu3 %v13197_v18  ;;  %v7419_v50 = vpop.f32.mrf.mxu1  ;;  %v12248_v38 = vld [vmem:[#allocation21 + $0xbec] sm:$0xf0]  ;;  %v7779_v16 = vrot.slane %v7368_v13, 6  ;;  %v10065_v13 = vor.u32 %v12009_v62, %v10062_v49  ;;  %v11340_v8 = vld [vmem:[#allocation21 + $0xe78] sm:$0xf] }
 0x5bd   :  { %7644 = vmatpush.bf16.msra.mxu3 %v11461_v4  ;;  %7661 = vmatpush.bf16.msrb.mxu0 %v9929_v29  ;;  %v12232_v4 = vld [vmem:[#allocation21 + $0xb74] sm:$0xf]  ;;  %v7329_v29 = vadd.f32 %v13353_v39, %v4295_v60  ;;  %v7420_v33 = vadd.f32 %v7419_v50, %v7407_v17  ;;  %v10949_v48 = vor.u32 %v12248_v38, %v10948_v47  ;;  %v11468_v17 = vld [vmem:[#allocation21 + $0xf78] sm:$0xf]  ;;  %v9934_v47 = vld [vmem:[#allocation21 + $0x3f8] sm:$0xf0] }
 0x5be   :  { %7670 = vmatpush.bf16.msrb.mxu1 %v11465_v15  ;;  %v12089_v15 = vld [vmem:[#allocation21 + $0x6f4] sm:$0xf0]  ;;  %v10953_v39 = vor.u32 %v12232_v4, %v10950_v31  ;;  %v12361_v4 = vld [vmem:[#allocation21 + $0xf7c] sm:$0xf] }
 0x5bf   :  { %7626 = vmatmul.bf16.vlgmr.msra.gmra.mxu1 %v13197_v18  ;;  %v7342_v2 = vadd.f32 %v13359_v63, %v7329_v29  ;;  %v7393_v55 = vpop.f32.mrf.mxu3  ;;  %v7781_v63 = vrot.slane %v7420_v33, 2  ;;  %v11470_v29 = vld [vmem:[#allocation21 + $0xff8] sm:$0xf0]  ;;  %v9804_v33 = vld [vmem:[#allocation21 + $0x278] sm:$0xf] }
 0x5c0   :  { %7636 = vmatpush.bf16.msra.mxu2 %v9797_v41  ;;  %v7394_v41 = vadd.f32 %v7393_v55, %v7381_v61  ;;  %v9806_v55 = vld [vmem:[#allocation21 + $0x2f8] sm:$0xf0] }
 0x5c1   :  { %7645 = vmatpush.bf16.msra.mxu3 %v11333_v11  ;;  %7662 = vmatpush.bf16.msrb.mxu0 %v9801_v40  ;;  %v10317_v11 = vor.u32 %v12089_v15, %v10316_v53  ;;  %v10820_v40 = vld [vmem:[#allocation21 + $0xa70] sm:$0xf]  ;;  %v7803_v22 = vsel %vm1137_vm3, %v7342_v2, %v7779_v16  ;;  %v11473_v16 = vor.u32 %v12361_v4, %v11470_v29  ;;  %v12345_v2 = vld [vmem:[#allocation21 + $0xef4] sm:$0xf0]  ;;  %v11214_v56 = vld [vmem:[#allocation21 + $0xdf8] sm:$0xf0] }
 0x5c2   :  { %7671 = vmatpush.bf16.msrb.mxu1 %v11337_v10  ;;  %v10188_v10 = vld [vmem:[#allocation21 + $0x578] sm:$0xf]  ;;  %v7780_v14 = vrot.slane %v7394_v41, 4  ;;  %v10821_v60 = vor.u32 %v12216_v19, %v10820_v40  ;;  %v12329_v41 = vld [vmem:[#allocation21 + $0xe7c] sm:$0xf]  ;;  %v9805_v40 = vor.u32 %v11961_v34, %v9804_v33  ;;  %v11341_v19 = vor.u32 %v12345_v2, %v11340_v8 }
 0x5c3   :  { %v10189_v59 = vor.u32 %v12057_v44, %v10188_v10  ;;  %v11212_v10 = vld [vmem:[#allocation21 + $0xd78] sm:$0xf] }
 0x5c4   :  { %7637 = vmatpush.bf16.msra.mxu2 %v9669_v20  ;;  %v7421_v52 = vpop.f32.mrf.mxu1  ;;  %v7804_v35 = vsel %vm1143_vm6, %v7780_v14, %v7781_v63  ;;  %v10825_v20 = vor.u32 %v12200_v26, %v10822_v43  ;;  %v11929_v43 = vld [vmem:[#allocation21 + $0x1f4] sm:$0xf0]  ;;  %v11913_v14 = vld [vmem:[#allocation21 + $0x17c] sm:$0xf] }
 0x5c5   :  { %7646 = vmatpush.bf16.msra.mxu3 %v11205_v45  ;;  %7663 = vmatpush.bf16.msrb.mxu0 %v9673_v32  ;;  %v12184_v45 = vld [vmem:[#allocation21 + $0x9ec] sm:$0xf0]  ;;  %v12168_v32 = vld [vmem:[#allocation21 + $0x974] sm:$0xf]  ;;  %v7805_v54 = vsel %vm1145_vm7, %v7803_v22, %v7804_v35  ;;  %v12313_v63 = vld [vmem:[#allocation21 + $0xdf4] sm:$0xf0] }
 0x5c6   :  { %7672 = vmatpush.bf16.msrb.mxu1 %v11209_v12  ;;  %v10060_v12 = vld [vmem:[#allocation21 + $0x478] sm:$0xf]  ;;  %7827 = vst [vmem:[#allocation24 + $0x20] sm:$0xff] %v7805_v54  ;;  %v10693_v6 = vor.u32 %v12184_v45, %v10692_v24  ;;  %v10697_v57 = vor.u32 %v12168_v32, %v10694_v0  ;;  %v9678_v52 = vld [vmem:[#allocation21 + $0x1f8] sm:$0xf0]  ;;  %v11213_v35 = vor.u32 %v12313_v63, %v11212_v10 }
 0x5c7   :  { %v7395_v46 = vpop.f32.mrf.mxu3  ;;  %v10061_v50 = vor.u32 %v12025_v9, %v10060_v12  ;;  %v11897_v24 = vld [vmem:[#allocation21 + $0xf4] sm:$0xf0]  ;;  %v11217_v32 = vor.u32 %v12297_v28, %v11214_v56  ;;  %v9550_v0 = vld [vmem:[#allocation21 + $0xf8] sm:$0xf0] }
 0x5c8   :  { %7638 = vmatpush.bf16.msra.mxu2 %v9541_v7  ;;  %v12152_v7 = vld [vmem:[#allocation21 + $0x8ec] sm:$0xf0]  ;;  %v11084_v45 = vld [vmem:[#allocation21 + $0xc78] sm:$0xf]  ;;  %v12265_v12 = vld [vmem:[#allocation21 + $0xc7c] sm:$0xf] }
 0x5c9   :  { %7647 = vmatpush.bf16.msra.mxu3 %v11077_v1  ;;  %7664 = vmatpush.bf16.msrb.mxu0 %v9545_v3  ;;  %v13386_v25 = vpop.f32.mrf.mxu0  ;;  %v9932_v1 = vld [vmem:[#allocation21 + $0x378] sm:$0xf]  ;;  %v10565_v38 = vor.u32 %v12152_v7, %v10564_v58  ;;  %v11086_v9 = vld [vmem:[#allocation21 + $0xcf8] sm:$0xf0] }
 0x5ca   :  { %7673 = vmatpush.bf16.msrb.mxu1 %v11081_v5  ;;  %v11993_v3 = vld [vmem:[#allocation21 + $0x3f4] sm:$0xf0]  ;;  %v11089_v58 = vor.u32 %v12265_v12, %v11086_v9  ;;  %v12233_v7 = vld [vmem:[#allocation21 + $0xb7c] sm:$0xf] }
 0x5cb   :  { %7639 = vmatmul.bf16.vlgmr.msra.gmra.mxu2 %v13191_v21  ;;  %v12377_v5 = vld [vmem:[#allocation21 + $0xff4] sm:$0xf0]  ;;  %v9933_v31 = vor.u32 %v11993_v3, %v9932_v1 }
 0x5cc   :  { %7683 = vmatpush.bf16.msrb.mxu2 %v10445_v42  ;;  %7665 = vmatmul.bf16.vlgmr.msrb.gmra.mxu0 %v13191_v21  ;;  %v11977_v42 = vld [vmem:[#allocation21 + $0x37c] sm:$0xf]  ;;  %v11469_v15 = vor.u32 %v12377_v5, %v11468_v17  ;;  %v12281_v54 = vld [vmem:[#allocation21 + $0xcf4] sm:$0xf0] }
 0x5cd   :  { %7709 = vmatpush.bf16.msra.mxu0 %v10449_v30  ;;  %7648 = vmatpush.bf16.msra.mxu3 %v10949_v48  ;;  %v10569_v30 = vor.u32 %v12136_v36, %v10566_v37  ;;  %v9937_v61 = vor.u32 %v11977_v42, %v9934_v47  ;;  %v11945_v48 = vld [vmem:[#allocation21 + $0x27c] sm:$0xf]  ;;  %v10828_v3 = vld [vmem:[#allocation21 + $0xa78] sm:$0xf] }
 0x5ce   :  { %7674 = vmatpush.bf16.msrb.mxu1 %v10953_v39  ;;  %v13388_v53 = vpop.f32.mrf.mxu2  ;;  %v9809_v26 = vor.u32 %v11945_v48, %v9806_v55  ;;  %v10958_v36 = vld [vmem:[#allocation21 + $0xbf8] sm:$0xf0]  ;;  %v12217_v17 = vld [vmem:[#allocation21 + $0xaf4] sm:$0xf0] }
 0x5cf   :  { %v10961_v1 = vor.u32 %v12233_v7, %v10958_v36  ;;  %v12201_v5 = vld [vmem:[#allocation21 + $0xa7c] sm:$0xf]  ;;  %v10700_v29 = vld [vmem:[#allocation21 + $0x978] sm:$0xf] }
 0x5d0   :  { %7684 = vmatpush.bf16.msrb.mxu2 %v10317_v11  ;;  %v11342_v11 = vld [vmem:[#allocation21 + $0xef8] sm:$0xf0]  ;;  %v12153_v2 = vld [vmem:[#allocation21 + $0x8f4] sm:$0xf0] }
 0x5d1   :  { %7710 = vmatpush.bf16.msra.mxu0 %v10321_v27  ;;  %7649 = vmatpush.bf16.msra.mxu3 %v10821_v60  ;;  %v7460_v39 = vpop.f32.mrf.mxu0  ;;  %v9676_v27 = vld [vmem:[#allocation21 + $0x178] sm:$0xf]  ;;  %v11345_v44 = vor.u32 %v12329_v41, %v11342_v11  ;;  %v10830_v42 = vld [vmem:[#allocation21 + $0xaf8] sm:$0xf0] }
 0x5d2   :  { %7675 = vmatpush.bf16.msrb.mxu1 %v10825_v20  ;;  %v9677_v22 = vor.u32 %v11929_v43, %v9676_v27  ;;  %v9681_v20 = vor.u32 %v11913_v14, %v9678_v52  ;;  %v10833_v4 = vor.u32 %v12201_v5, %v10830_v42  ;;  %v12137_v48 = vld [vmem:[#allocation21 + $0x87c] sm:$0xf]  ;;  %v4299_v27 = vperm.slane %v13367_v23, 4 }
 0x5d3   :  { %v10574_v55 = vld [vmem:[#allocation21 + $0x8f8] sm:$0xf0]  ;;  %v4301_v43 = vperm.slane %v13367_v23, 6 }
 0x5d4   :  { %7685 = vmatpush.bf16.msrb.mxu2 %v10189_v59  ;;  %v9548_v59 = vld [vmem:[#allocation21 + $0x78] sm:$0xf]  ;;  %v10577_v39 = vor.u32 %v12137_v48, %v10574_v55  ;;  %v7433_v14 = vadd.f32 %v13388_v53, %v4299_v27 }
 0x5d5   :  { %7711 = vmatpush.bf16.msra.mxu0 %v10193_v51  ;;  %7650 = vmatpush.bf16.msra.mxu3 %v10693_v6  ;;  %v11881_v51 = vld [vmem:[#allocation21 + $0x7c] sm:$0xf]  ;;  %v9549_v49 = vor.u32 %v11897_v24, %v9548_v59  ;;  %v11085_v6 = vor.u32 %v12281_v54, %v11084_v45 }
 0x5d6   :  { %7676 = vmatpush.bf16.msrb.mxu1 %v10697_v57  ;;  %v7434_v60 = vpop.f32.mrf.mxu2  ;;  %v9553_v46 = vor.u32 %v11881_v51, %v9550_v0  ;;  %v10956_v57 = vld [vmem:[#allocation21 + $0xb78] sm:$0xf] }
 0x5d8   :  { %7686 = vmatpush.bf16.msrb.mxu2 %v10061_v50  ;;  %v12249_v50 = vld [vmem:[#allocation21 + $0xbf4] sm:$0xf0] }
 0x5d9   :  { %7712 = vmatpush.bf16.msra.mxu0 %v10065_v13  ;;  %7651 = vmatpush.bf16.msra.mxu3 %v10565_v38  ;;  %v10957_v37 = vor.u32 %v12249_v50, %v10956_v57  ;;  %v10829_v38 = vor.u32 %v12217_v17, %v10828_v3  ;;  %v4274_v57 = vld [vmem:[#allocation23 + $0x18] sm:$0xff] }
 0x5da   :  { %7677 = vmatpush.bf16.msrb.mxu1 %v10569_v30  ;;  %v12185_v30 = vld [vmem:[#allocation21 + $0x9f4] sm:$0xf0]  ;;  %v4304_v7 = vperm.slane %v4274_v57, 1  ;;  %v4306_v36 = vperm.slane %v4274_v57, 3 }
 0x5db   :  { %v10701_v33 = vor.u32 %v12185_v30, %v10700_v29 }
 0x5dc   :  { %7687 = vmatpush.bf16.msrb.mxu2 %v9933_v31  ;;  %7652 = vmatmul.bf16.vlgmr.msra.gmra.mxu3 %v13197_v18  ;;  %v13392_v62 = vpop.f32.mrf.mxu1  ;;  %v12169_v31 = vld [vmem:[#allocation21 + $0x97c] sm:$0xf] }
 0x5dd   :  { %7696 = vmatpush.bf16.msrb.mxu3 %v11469_v15  ;;  %7713 = vmatpush.bf16.msra.mxu0 %v9937_v61  ;;  %v10702_v15 = vld [vmem:[#allocation21 + $0x9f8] sm:$0xf0] }
 0x5de   :  { %7722 = vmatpush.bf16.msra.mxu1 %v11473_v16  ;;  %v10705_v8 = vor.u32 %v12169_v31, %v10702_v15  ;;  %v10572_v16 = vld [vmem:[#allocation21 + $0x878] sm:$0xf] }
 0x5df   :  { %7678 = vmatmul.bf16.vlgmr.msrb.gmra.mxu1 %v13197_v18  ;;  %v7445_v13 = vpop.f32.mrf.mxu3 }
 0x5e0   :  { %7688 = vmatpush.bf16.msrb.mxu2 %v9805_v40 }
 0x5e1   :  { %7697 = vmatpush.bf16.msrb.mxu3 %v11341_v19  ;;  %7714 = vmatpush.bf16.msra.mxu0 %v9809_v26  ;;  %v4300_v19 = vperm.slane %v13367_v23, 5  ;;  %v4302_v26 = vperm.slane %v13367_v23, 7 }
 0x5e2   :  { %7723 = vmatpush.bf16.msra.mxu1 %v11345_v44 }
 0x5e3   :  { %v7459_v44 = vadd.f32 %v13386_v25, %v4300_v19 }
 0x5e4   :  { %7689 = vmatpush.bf16.msrb.mxu2 %v9677_v22  ;;  %v7473_v47 = vpop.f32.mrf.mxu1  ;;  %v7446_v22 = vadd.f32 %v7445_v13, %v7433_v14  ;;  %v4305_v13 = vperm.slane %v4274_v57, 2  ;;  %v4307_v14 = vperm.slane %v4274_v57, 4 }
 0x5e5   :  { %7698 = vmatpush.bf16.msrb.mxu3 %v11213_v35  ;;  %7715 = vmatpush.bf16.msra.mxu0 %v9681_v20  ;;  %v7472_v52 = vadd.f32 %v13392_v62, %v7459_v44  ;;  %v4308_v44 = vperm.slane %v4274_v57, 5 }
 0x5e6   :  { %7724 = vmatpush.bf16.msra.mxu1 %v11217_v32 }
 0x5e7   :  { %v7447_v34 = vpop.f32.mrf.mxu3  ;;  %v7782_v35 = vrot.slane %v7472_v52, 6  ;;  %v4309_v52 = vperm.slane %v4274_v57, 6 }
 0x5e8   :  { %7690 = vmatpush.bf16.msrb.mxu2 %v9549_v49 }
 0x5e9   :  { %7699 = vmatpush.bf16.msrb.mxu3 %v11085_v6  ;;  %7716 = vmatpush.bf16.msra.mxu0 %v9553_v46  ;;  %v7510_v61 = vpop.f32.mrf.mxu0  ;;  %v7806_v45 = vsel %vm1137_vm3, %v7446_v22, %v7782_v35 }
 0x5ea   :  { %7725 = vmatpush.bf16.msra.mxu1 %v11089_v58  ;;  %v7511_v63 = vadd.f32 %v7510_v61, %v4302_v26 }
 0x5eb   :  { %7691 = vmatmul.bf16.vlgmr.msrb.gmra.mxu2 %v13191_v21 }
 0x5ec   :  { %7717 = vmatmul.bf16.vlgmr.msra.gmra.mxu0 %v13191_v21  ;;  %v10573_v21 = vor.u32 %v12153_v2, %v10572_v16 }
 0x5ed   :  { %7700 = vmatpush.bf16.msrb.mxu3 %v10957_v37  ;;  %v4303_v37 = vperm.slane %v4274_v57, 0 }
 0x5ee   :  { %7726 = vmatpush.bf16.msra.mxu1 %v10961_v1  ;;  %v7484_v41 = vpop.f32.mrf.mxu2 }
 0x5ef   :  { %v7485_v28 = vadd.f32 %v7484_v41, %v4301_v43 }
 0x5f1   :  { %7701 = vmatpush.bf16.msrb.mxu3 %v10829_v38  ;;  %v7512_v11 = vpop.f32.mrf.mxu0 }
 0x5f2   :  { %7727 = vmatpush.bf16.msra.mxu1 %v10833_v4 }
 0x5f5   :  { %7702 = vmatpush.bf16.msrb.mxu3 %v10701_v33 }
 0x5f6   :  { %7728 = vmatpush.bf16.msra.mxu1 %v10705_v8  ;;  %v7486_v40 = vpop.f32.mrf.mxu2 }
 0x5f9   :  { %7703 = vmatpush.bf16.msrb.mxu3 %v10573_v21 }
 0x5fa   :  { %7729 = vmatpush.bf16.msra.mxu1 %v10577_v39 }
 0x5fc   :  { %7704 = vmatmul.bf16.vlgmr.msrb.gmra.mxu3 %v13197_v18  ;;  %v7523_v10 = vpop.f32.mrf.mxu1 }
 0x5fd   :  { %7730 = vmatmul.bf16.vlgmr.msra.gmra.mxu1 %v13197_v18  ;;  %v7524_v56 = vadd.f32 %v7523_v10, %v7511_v63  ;;  %v4310_v63 = vperm.slane %v4274_v57, 7 }
 0x5ff   :  { %v7497_v18 = vpop.f32.mrf.mxu3  ;;  %v7784_v20 = vrot.slane %v7524_v56, 2 }
 0x600   :  { %v7498_v60 = vadd.f32 %v7497_v18, %v7485_v28 }
 0x602   :  { %v7783_v59 = vrot.slane %v7498_v60, 4 }
 0x604   :  { %v7525_v24 = vpop.f32.mrf.mxu1  ;;  %v7807_v23 = vsel %vm1143_vm6, %v7783_v59, %v7784_v20 }
 0x605   :  { %v7808_v25 = vsel %vm1145_vm7, %v7806_v45, %v7807_v23 }
 0x606   :  { %7828 = vst [vmem:[#allocation24 + $0x28] sm:$0xff] %v7808_v25 }
 0x607   :  { %v7499_v53 = vpop.f32.mrf.mxu3 }
 0x609   :  { %v7562_v32 = vpop.f32.mrf.mxu0 }
 0x60a   :  { %v7563_v3 = vadd.f32 %v7562_v32, %v4304_v7 }
 0x60e   :  { %v7536_v54 = vpop.f32.mrf.mxu2 }
 0x60f   :  { %v7537_v5 = vadd.f32 %v7536_v54, %v4303_v37 }
 0x611   :  { %v7564_v51 = vpop.f32.mrf.mxu0 }
 0x616   :  { %v7538_v0 = vpop.f32.mrf.mxu2 }
 0x61c   :  { %v7575_v12 = vpop.f32.mrf.mxu1 }
 0x61d   :  { %v7576_v42 = vadd.f32 %v7575_v12, %v7563_v3 }
 0x61f   :  { %v7549_v9 = vpop.f32.mrf.mxu3  ;;  %v7785_v31 = vrot.slane %v7576_v42, 6 }
 0x620   :  { %v7550_v29 = vadd.f32 %v7549_v9, %v7537_v5 }
 0x622   :  { %v7809_v34 = vsel %vm1137_vm3, %v7550_v29, %v7785_v31 }
 0x624   :  { %v7577_v62 = vpop.f32.mrf.mxu1 }
 0x627   :  { %v7551_v6 = vpop.f32.mrf.mxu3 }
 0x629   :  { %v7614_v49 = vpop.f32.mrf.mxu0 }
 0x62a   :  { %v7615_v17 = vadd.f32 %v7614_v49, %v4306_v36 }
 0x62e   :  { %v7588_v46 = vpop.f32.mrf.mxu2 }
 0x62f   :  { %v7589_v47 = vadd.f32 %v7588_v46, %v4305_v13 }
 0x631   :  { %v7616_v58 = vpop.f32.mrf.mxu0 }
 0x636   :  { %v7590_v50 = vpop.f32.mrf.mxu2 }
 0x63c   :  { %v7627_v1 = vpop.f32.mrf.mxu1 }
 0x63d   :  { %v7628_v38 = vadd.f32 %v7627_v1, %v7615_v17 }
 0x63f   :  { %v7601_v4 = vpop.f32.mrf.mxu3  ;;  %v7787_v15 = vrot.slane %v7628_v38, 2 }
 0x640   :  { %v7602_v30 = vadd.f32 %v7601_v4, %v7589_v47 }
 0x642   :  { %v7786_v61 = vrot.slane %v7602_v30, 4 }
 0x644   :  { %v7629_v33 = vpop.f32.mrf.mxu1  ;;  %v7810_v8 = vsel %vm1143_vm6, %v7786_v61, %v7787_v15 }
 0x645   :  { %v7811_v16 = vsel %vm1145_vm7, %v7809_v34, %v7810_v8 }
 0x646   :  { %7829 = vst [vmem:[#allocation24 + $0x30] sm:$0xff] %v7811_v16 }
 0x647   :  { %v7603_v48 = vpop.f32.mrf.mxu3 }
 0x649   :  { %v7666_v2 = vpop.f32.mrf.mxu0 }
 0x64a   :  { %v7667_v56 = vadd.f32 %v7666_v2, %v4308_v44 }
 0x64e   :  { %v7640_v55 = vpop.f32.mrf.mxu2 }
 0x64f   :  { %v7641_v22 = vadd.f32 %v7640_v55, %v4307_v14 }
 0x651   :  { %v7668_v21 = vpop.f32.mrf.mxu0 }
 0x656   :  { %v7642_v39 = vpop.f32.mrf.mxu2 }
 0x65c   :  { %v7679_v41 = vpop.f32.mrf.mxu1 }
 0x65d   :  { %v7680_v60 = vadd.f32 %v7679_v41, %v7667_v56 }
 0x65f   :  { %v7653_v11 = vpop.f32.mrf.mxu3  ;;  %v7788_v23 = vrot.slane %v7680_v60, 6 }
 0x660   :  { %v7654_v24 = vadd.f32 %v7653_v11, %v7641_v22 }
 0x662   :  { %v7812_v54 = vsel %vm1137_vm3, %v7654_v24, %v7788_v23 }
 0x664   :  { %v7681_v40 = vpop.f32.mrf.mxu1 }
 0x667   :  { %v7655_v26 = vpop.f32.mrf.mxu3 }
 0x669   :  { %v7718_v19 = vpop.f32.mrf.mxu0 }
 0x66a   :  { %v7719_v18 = vadd.f32 %v7718_v19, %v4310_v63 }
 0x66e   :  { %v7692_v27 = vpop.f32.mrf.mxu2 }
 0x66f   :  { %v7693_v35 = vadd.f32 %v7692_v27, %v4309_v52 }
 0x671   :  { %v7720_v43 = vpop.f32.mrf.mxu0 }
 0x676   :  { %v7694_v10 = vpop.f32.mrf.mxu2 }
 0x67a   :  { %v7731_v28 = vpop.f32.mrf.mxu1 }
 0x67b   :  { %v7732_v20 = vadd.f32 %v7731_v28, %v7719_v18 }
 0x67d   :  { %v7790_v25 = vrot.slane %v7732_v20, 2 }
 0x67f   :  { %v7705_v59 = vpop.f32.mrf.mxu3 }
 0x680   :  { %v7706_v45 = vadd.f32 %v7705_v59, %v7693_v35 }
 0x682   :  { %v7789_v32 = vrot.slane %v7706_v45, 4  ;;  %v7733_v53 = vpop.f32.mrf.mxu1 }
 0x684   :  { %v7813_v51 = vsel %vm1143_vm6, %v7789_v32, %v7790_v25 }
 0x685   :  { %v7814_v0 = vsel %vm1145_vm7, %v7812_v54, %v7813_v51 }
 0x686   :  { %7830 = vst [vmem:[#allocation24 + $0x38] sm:$0xff] %v7814_v0 }
 0x687   :  { %v7707_v12 = vpop.f32.mrf.mxu3  ;;  %7841 = dma.vmem_to_hbm [thread:$0]  %s7837_s12, 1024, %s7839_s14, [#allocation5]  }
 0x688   :  { %12755 = dma.done.wait [#allocation5], 1024  }
 0x689   :  { %12756 = vsyncadd [#allocation5], 4294966272 }
 0x68a   :  { %7846 = vsyncpa [#allocation4], 1 }
 0x68b   :  { %7847 = vsyncpa [#allocation7], 1 }
 0x68c   :  { %7848 = vsyncpa [#allocation10], 1 }
 0x68d   :  { %7849 = vsyncpa [#allocation13], 1 }
 0x68e   :  { %7850 = vsyncpa [#allocation16], 1 }
 0x68f   :  { %7851 = vsyncpa [#allocation19], 1 }
 0x690   :  { %7852 = vsyncpa [#allocation22], 1 }
 0x691   :  { %7853 = vsyncpa [#allocation5], 1 }

</bundles_post_ra>
